<compile_context>
chip_gen: v6e
topology: v6e:2x2x1
jax: 0.10.0
libtpu: 0.0.40
codegen_flags: <defaults>
</compile_context>

<pallas_src>
import math

import jax
import jax.numpy as jnp
from jax.experimental import pallas as pl
from jax.experimental.pallas import tpu as pltpu

BN_EPS = 1e-5
CP = 128  # padded channel width: one full TPU lane group


def fused_block_kernel(x_ref, w1_ref, g1_ref, b1_ref, w2_ref, g2_ref, b2_ref,
                       o_ref, xp_ref):
    """Fully fused Block forward (both conv-BN-ReLU stages).

    x_ref:           (N, H, W, CP)       channel-padded NHWC input, f32
    w1_ref, w2_ref:  (9, CP, CP)         conv weights, tap-major (dy*3+dx)
    g*_ref, b*_ref:  (1, CP)             BN gamma / beta (zero in padded lanes)
    o_ref:           (N*H*W, CP)         lane-dense output slab
    xp_ref:          (N, H+2, W+2, CP)   single halo scratch shared by stages
    """
    N, H, W, _ = x_ref.shape
    M = N * H * W

    def conv_bn_relu(src_ref, w_ref, g_ref, b_ref):
        # 3x3 conv as 9 per-tap MXU matmuls accumulated in f32: each tap is a
        # lane-dense (M,128)x(128,128) contraction, no im2col patch in VMEM.
        acc = jnp.zeros((M, CP), jnp.float32)
        for dy in range(3):
            for dx in range(3):
                tap = src_ref[:, dy:dy + H, dx:dx + W, :].reshape(M, CP)
                acc = acc + jnp.dot(tap, w_ref[dy * 3 + dx],
                                    preferred_element_type=jnp.float32)
        # BatchNorm with batch statistics in ONE reduction pass.  The conv bias
        # is omitted: it cancels exactly under the mean subtraction.  Fold
        # gamma * inv_std into a single per-channel scale (EUP rsqrt).
        inv_m = 1.0 / M
        mean = jnp.sum(acc, axis=0, keepdims=True) * inv_m
        ex2 = jnp.sum(acc * acc, axis=0, keepdims=True) * inv_m
        var = ex2 - mean * mean
        scale = g_ref[...] * jax.lax.rsqrt(var + BN_EPS)
        return jnp.maximum((acc - mean) * scale + b_ref[...], 0.0)

    # Zero ONLY the 1-px halo border strips, once; both stages overwrite the
    # interior and share this scratch buffer (borders stay zero throughout).
    xp_ref[:, 0:1, :, :] = jnp.zeros((N, 1, W + 2, CP), jnp.float32)
    xp_ref[:, H + 1:H + 2, :, :] = jnp.zeros((N, 1, W + 2, CP), jnp.float32)
    xp_ref[:, :, 0:1, :] = jnp.zeros((N, H + 2, 1, CP), jnp.float32)
    xp_ref[:, :, W + 1:W + 2, :] = jnp.zeros((N, H + 2, 1, CP), jnp.float32)

    # ---- stage 1 ----
    xp_ref[:, 1:H + 1, 1:W + 1, :] = x_ref[...]
    h = conv_bn_relu(xp_ref, w1_ref, g1_ref, b1_ref)

    # ---- stage 2: intermediate stays in VMEM; reuse the same halo scratch ----
    xp_ref[:, 1:H + 1, 1:W + 1, :] = h.reshape(N, H, W, CP)
    o_ref[...] = conv_bn_relu(xp_ref, w2_ref, g2_ref, b2_ref)


def _vmem_limit_bytes(N, H, W):
    """Size the scoped VMEM limit from the actual buffer footprint."""
    f32 = 4
    act = N * H * W * CP * f32                    # one (M, CP) activation slab
    halo = N * (H + 2) * (W + 2) * CP * f32       # shared halo scratch
    weights = 2 * 9 * CP * CP * f32               # both packed conv weights
    vecs = 4 * CP * f32                           # gammas / betas
    # input + output + scratch + a handful of live activation-sized temporaries
    # (tap copy, accumulator, normalized result), with ~25% headroom.
    need = act + weights + vecs + act + halo + 6 * act
    limit = int(need * 1.25)
    return min(max(limit, 32 * 1024 * 1024), 56 * 1024 * 1024)


def fused_block(x_nhwc_padded, w1p, g1p, b1p, w2p, g2p, b2p):
    N, H, W, cp = x_nhwc_padded.shape
    assert cp == CP
    return pl.pallas_call(
        fused_block_kernel,
        out_shape=jax.ShapeDtypeStruct((N * H * W, CP), jnp.float32),
        in_specs=[pl.BlockSpec(memory_space=pltpu.MemorySpace.VMEM)] * 7,
        out_specs=pl.BlockSpec(memory_space=pltpu.MemorySpace.VMEM),
        scratch_shapes=[
            pltpu.VMEM((N, H + 2, W + 2, CP), jnp.float32),
        ],
        compiler_params=pltpu.CompilerParams(
            vmem_limit_bytes=_vmem_limit_bytes(N, H, W)),
    )(x_nhwc_padded, w1p, g1p, b1p, w2p, g2p, b2p)


# ---------------------------- wrapper-side packing ----------------------------

def _pack_conv_weight(w_hwio):
    """(3, 3, cin, cout) -> (9, CP, CP), tap-major rows (dy*3+dx)."""
    cin, cout = w_hwio.shape[2], w_hwio.shape[3]
    wp = jnp.zeros((3, 3, CP, CP), jnp.float32)
    wp = wp.at[:, :, :cin, :cout].set(w_hwio.astype(jnp.float32))
    return wp.reshape(9, CP, CP)


def _pack_channel_vec(v):
    """(1, cout) -> (1, CP), zero padded (padded BN channels stay exactly 0)."""
    cout = v.shape[-1]
    return jnp.zeros((1, CP), jnp.float32).at[:, :cout].set(v.astype(jnp.float32))


def init_block_params(key, in_channel, out_channel):
    """Deterministic init mirroring nn.Conv2d (kaiming-uniform style bounds)
    and nn.BatchNorm2d (gamma=1, beta=0)."""
    k1, k2, k3, k4 = jax.random.split(key, 4)

    def conv_init(kw, kb, cin, cout):
        bound = 1.0 / math.sqrt(cin * 9)
        w = jax.random.uniform(kw, (3, 3, cin, cout), jnp.float32, -bound, bound)
        b = jax.random.uniform(kb, (1, cout), jnp.float32, -bound, bound)
        return w, b

    w1, b1 = conv_init(k1, k2, in_channel, out_channel)
    w2, b2 = conv_init(k3, k4, out_channel, out_channel)
    return {
        "w1": w1, "b1": b1,
        "g1": jnp.ones((1, out_channel), jnp.float32),
        "be1": jnp.zeros((1, out_channel), jnp.float32),
        "w2": w2, "b2": b2,
        "g2": jnp.ones((1, out_channel), jnp.float32),
        "be2": jnp.zeros((1, out_channel), jnp.float32),
    }


@jax.jit
def block_forward(x_nchw, params):
    # NCHW (PyTorch) -> NHWC for the kernel.
    x = jnp.transpose(x_nchw, (0, 2, 3, 1)).astype(jnp.float32)
    N, H, W, cin = x.shape
    cout = params["w1"].shape[-1]
    # Lane-dense channel packing (zero pad to 128 lanes) at the wrapper boundary.
    xp = jnp.pad(x, ((0, 0), (0, 0), (0, 0), (0, CP - cin)))
    # Conv biases b1/b2 are intentionally NOT passed to the kernel —
    # they cancel exactly under batch-statistic BatchNorm.
    out = fused_block(
        xp,
        _pack_conv_weight(params["w1"]), _pack_channel_vec(params["g1"]),
        _pack_channel_vec(params["be1"]),
        _pack_conv_weight(params["w2"]), _pack_channel_vec(params["g2"]),
        _pack_channel_vec(params["be2"]),
    )
    y = out.reshape(N, H, W, CP)[..., :cout]
    return jnp.transpose(y, (0, 3, 1, 2))   # back to NCHW


def block_forward_ref(x_nchw, params):
    """Pure-JAX reference (lax conv + bias + batch-stat BN + relu)."""
    x = jnp.transpose(x_nchw, (0, 2, 3, 1)).astype(jnp.float32)

    def step(x, w, b, g, be):
        cout = w.shape[-1]
        y = jax.lax.conv_general_dilated(
            x, w, window_strides=(1, 1), padding="SAME",
            dimension_numbers=("NHWC", "HWIO", "NHWC")) + b.reshape(1, 1, 1, cout)
        mean = jnp.mean(y, axis=(0, 1, 2), keepdims=True)
        var = jnp.mean((y - mean) ** 2, axis=(0, 1, 2), keepdims=True)
        y = (y - mean) * jax.lax.rsqrt(var + BN_EPS)
        y = y * g.reshape(1, 1, 1, cout) + be.reshape(1, 1, 1, cout)
        return jnp.maximum(y, 0.0)

    h = step(x, params["w1"], params["b1"], params["g1"], params["be1"])
    y = step(h, params["w2"], params["b2"], params["g2"], params["be2"])
    return jnp.transpose(y, (0, 3, 1, 2))


if __name__ == "__main__":
    key = jax.random.PRNGKey(0)
    k_x, k_p = jax.random.split(key)

    N, Cin, Cout, HW = 2, 4, 8, 16
    x = jax.random.normal(k_x, (N, Cin, HW, HW), jnp.float32)  # NCHW like PyTorch
    params = init_block_params(k_p, Cin, Cout)

    out = jax.block_until_ready(block_forward(x, params))
    assert out.shape == (N, Cout, HW, HW), out.shape

    ref = block_forward_ref(x, params)
    max_err = float(jnp.max(jnp.abs(out - ref)))
    assert jnp.allclose(out, ref, atol=1e-4, rtol=1e-4), max_err

    print("KERNEL_OK")
</pallas_src>

<mosaic_0001>
module attributes {stable_mosaic.version = 11 : i64} {
  func.func @fused_block_kernel(%arg0: memref<2x16x16x128xf32, #tpu.memory_space<vmem>>, %arg1: memref<9x128x128xf32, #tpu.memory_space<vmem>>, %arg2: memref<1x128xf32, #tpu.memory_space<vmem>>, %arg3: memref<1x128xf32, #tpu.memory_space<vmem>>, %arg4: memref<9x128x128xf32, #tpu.memory_space<vmem>>, %arg5: memref<1x128xf32, #tpu.memory_space<vmem>>, %arg6: memref<1x128xf32, #tpu.memory_space<vmem>>, %arg7: memref<512x128xf32, #tpu.memory_space<vmem>>, %arg8: memref<2x18x18x128xf32, #tpu.memory_space<vmem>>) attributes {dimension_semantics = [], scalar_prefetch = 0 : i64, scratch_operands = 1 : i64, tpu.core_type = #tpu.core_type<tc>} {
    %cst = arith.constant 0.000000e+00 : f32
    %0 = vector.broadcast %cst : f32 to vector<2x1x18x128xf32>
    %c0 = arith.constant 0 : index
    %c0_0 = arith.constant 0 : index
    %c0_1 = arith.constant 0 : index
    %c0_2 = arith.constant 0 : index
    %1 = vector.load %arg8[%c0, %c0_0, %c0_1, %c0_2] : memref<2x18x18x128xf32, #tpu.memory_space<vmem>>, vector<2x1x18x128xf32>
    tpu.vector_store %arg8[%c0, %c0_0, %c0_1, %c0_2], %0 {strides = array<i32>} : memref<2x18x18x128xf32, #tpu.memory_space<vmem>>, vector<2x1x18x128xf32>,
    %cst_3 = arith.constant 0.000000e+00 : f32
    %2 = vector.broadcast %cst_3 : f32 to vector<2x1x18x128xf32>
    %c0_4 = arith.constant 0 : index
    %c17 = arith.constant 17 : index
    %c0_5 = arith.constant 0 : index
    %c0_6 = arith.constant 0 : index
    %3 = vector.load %arg8[%c0_4, %c17, %c0_5, %c0_6] : memref<2x18x18x128xf32, #tpu.memory_space<vmem>>, vector<2x1x18x128xf32>
    tpu.vector_store %arg8[%c0_4, %c17, %c0_5, %c0_6], %2 {strides = array<i32>} : memref<2x18x18x128xf32, #tpu.memory_space<vmem>>, vector<2x1x18x128xf32>,
    %cst_7 = arith.constant 0.000000e+00 : f32
    %4 = vector.broadcast %cst_7 : f32 to vector<2x18x1x128xf32>
    %c0_8 = arith.constant 0 : index
    %c0_9 = arith.constant 0 : index
    %c0_10 = arith.constant 0 : index
    %c0_11 = arith.constant 0 : index
    %5 = vector.load %arg8[%c0_8, %c0_9, %c0_10, %c0_11] : memref<2x18x18x128xf32, #tpu.memory_space<vmem>>, vector<2x18x1x128xf32>
    tpu.vector_store %arg8[%c0_8, %c0_9, %c0_10, %c0_11], %4 {strides = array<i32>} : memref<2x18x18x128xf32, #tpu.memory_space<vmem>>, vector<2x18x1x128xf32>,
    %cst_12 = arith.constant 0.000000e+00 : f32
    %6 = vector.broadcast %cst_12 : f32 to vector<2x18x1x128xf32>
    %c0_13 = arith.constant 0 : index
    %c0_14 = arith.constant 0 : index
    %c17_15 = arith.constant 17 : index
    %c0_16 = arith.constant 0 : index
    %7 = vector.load %arg8[%c0_13, %c0_14, %c17_15, %c0_16] : memref<2x18x18x128xf32, #tpu.memory_space<vmem>>, vector<2x18x1x128xf32>
    tpu.vector_store %arg8[%c0_13, %c0_14, %c17_15, %c0_16], %6 {strides = array<i32>} : memref<2x18x18x128xf32, #tpu.memory_space<vmem>>, vector<2x18x1x128xf32>,
    %c0_17 = arith.constant 0 : index
    %c0_18 = arith.constant 0 : index
    %c0_19 = arith.constant 0 : index
    %c0_20 = arith.constant 0 : index
    %8 = vector.load %arg0[%c0_17, %c0_18, %c0_19, %c0_20] : memref<2x16x16x128xf32, #tpu.memory_space<vmem>>, vector<2x16x16x128xf32>
    %c0_21 = arith.constant 0 : index
    %c1 = arith.constant 1 : index
    %c1_22 = arith.constant 1 : index
    %c0_23 = arith.constant 0 : index
    %9 = vector.load %arg8[%c0_21, %c1, %c1_22, %c0_23] : memref<2x18x18x128xf32, #tpu.memory_space<vmem>>, vector<2x16x16x128xf32>
    tpu.vector_store %arg8[%c0_21, %c1, %c1_22, %c0_23], %8 {strides = array<i32>} : memref<2x18x18x128xf32, #tpu.memory_space<vmem>>, vector<2x16x16x128xf32>,
    %cst_24 = arith.constant 0.000000e+00 : f32
    %10 = vector.broadcast %cst_24 : f32 to vector<512x128xf32>
    %c0_25 = arith.constant 0 : index
    %c0_26 = arith.constant 0 : index
    %c0_27 = arith.constant 0 : index
    %c0_28 = arith.constant 0 : index
    %11 = vector.load %arg8[%c0_25, %c0_26, %c0_27, %c0_28] : memref<2x18x18x128xf32, #tpu.memory_space<vmem>>, vector<2x16x16x128xf32>
    %12 = vector.shape_cast %11 : vector<2x16x16x128xf32> to vector<512x128xf32>
    %c0_29 = arith.constant 0 : index
    %c0_30 = arith.constant 0 : index
    %c0_31 = arith.constant 0 : index
    %13 = vector.load %arg1[%c0_29, %c0_30, %c0_31] : memref<9x128x128xf32, #tpu.memory_space<vmem>>, vector<1x128x128xf32>
    %14 = vector.shape_cast %13 : vector<1x128x128xf32> to vector<128x128xf32>
    %cst_32 = arith.constant dense<0.000000e+00> : vector<512x128xf32>
    %15 = tpu.matmul %12, %14, %cst_32 {dimension_numbers = #tpu.dot_dimension_numbers<[1], [0], [0], [1], [0, 0, 1, 1], [], []>} : vector<512x128xf32>, vector<128x128xf32>, vector<512x128xf32> -> vector<512x128xf32>
    %16 = arith.addf %10, %15 : vector<512x128xf32>
    %c0_33 = arith.constant 0 : index
    %c0_34 = arith.constant 0 : index
    %c1_35 = arith.constant 1 : index
    %c0_36 = arith.constant 0 : index
    %17 = vector.load %arg8[%c0_33, %c0_34, %c1_35, %c0_36] : memref<2x18x18x128xf32, #tpu.memory_space<vmem>>, vector<2x16x16x128xf32>
    %18 = vector.shape_cast %17 : vector<2x16x16x128xf32> to vector<512x128xf32>
    %c1_37 = arith.constant 1 : index
    %c0_38 = arith.constant 0 : index
    %c0_39 = arith.constant 0 : index
    %19 = vector.load %arg1[%c1_37, %c0_38, %c0_39] : memref<9x128x128xf32, #tpu.memory_space<vmem>>, vector<1x128x128xf32>
    %20 = vector.shape_cast %19 : vector<1x128x128xf32> to vector<128x128xf32>
    %cst_40 = arith.constant dense<0.000000e+00> : vector<512x128xf32>
    %21 = tpu.matmul %18, %20, %cst_40 {dimension_numbers = #tpu.dot_dimension_numbers<[1], [0], [0], [1], [0, 0, 1, 1], [], []>} : vector<512x128xf32>, vector<128x128xf32>, vector<512x128xf32> -> vector<512x128xf32>
    %22 = arith.addf %16, %21 : vector<512x128xf32>
    %c0_41 = arith.constant 0 : index
    %c0_42 = arith.constant 0 : index
    %c2 = arith.constant 2 : index
    %c0_43 = arith.constant 0 : index
    %23 = vector.load %arg8[%c0_41, %c0_42, %c2, %c0_43] : memref<2x18x18x128xf32, #tpu.memory_space<vmem>>, vector<2x16x16x128xf32>
    %24 = vector.shape_cast %23 : vector<2x16x16x128xf32> to vector<512x128xf32>
    %c2_44 = arith.constant 2 : index
    %c0_45 = arith.constant 0 : index
    %c0_46 = arith.constant 0 : index
    %25 = vector.load %arg1[%c2_44, %c0_45, %c0_46] : memref<9x128x128xf32, #tpu.memory_space<vmem>>, vector<1x128x128xf32>
    %26 = vector.shape_cast %25 : vector<1x128x128xf32> to vector<128x128xf32>
    %cst_47 = arith.constant dense<0.000000e+00> : vector<512x128xf32>
    %27 = tpu.matmul %24, %26, %cst_47 {dimension_numbers = #tpu.dot_dimension_numbers<[1], [0], [0], [1], [0, 0, 1, 1], [], []>} : vector<512x128xf32>, vector<128x128xf32>, vector<512x128xf32> -> vector<512x128xf32>
    %28 = arith.addf %22, %27 : vector<512x128xf32>
    %c0_48 = arith.constant 0 : index
    %c1_49 = arith.constant 1 : index
    %c0_50 = arith.constant 0 : index
    %c0_51 = arith.constant 0 : index
    %29 = vector.load %arg8[%c0_48, %c1_49, %c0_50, %c0_51] : memref<2x18x18x128xf32, #tpu.memory_space<vmem>>, vector<2x16x16x128xf32>
    %30 = vector.shape_cast %29 : vector<2x16x16x128xf32> to vector<512x128xf32>
    %c3 = arith.constant 3 : index
    %c0_52 = arith.constant 0 : index
    %c0_53 = arith.constant 0 : index
    %31 = vector.load %arg1[%c3, %c0_52, %c0_53] : memref<9x128x128xf32, #tpu.memory_space<vmem>>, vector<1x128x128xf32>
    %32 = vector.shape_cast %31 : vector<1x128x128xf32> to vector<128x128xf32>
    %cst_54 = arith.constant dense<0.000000e+00> : vector<512x128xf32>
    %33 = tpu.matmul %30, %32, %cst_54 {dimension_numbers = #tpu.dot_dimension_numbers<[1], [0], [0], [1], [0, 0, 1, 1], [], []>} : vector<512x128xf32>, vector<128x128xf32>, vector<512x128xf32> -> vector<512x128xf32>
    %34 = arith.addf %28, %33 : vector<512x128xf32>
    %c0_55 = arith.constant 0 : index
    %c1_56 = arith.constant 1 : index
    %c1_57 = arith.constant 1 : index
    %c0_58 = arith.constant 0 : index
    %35 = vector.load %arg8[%c0_55, %c1_56, %c1_57, %c0_58] : memref<2x18x18x128xf32, #tpu.memory_space<vmem>>, vector<2x16x16x128xf32>
    %36 = vector.shape_cast %35 : vector<2x16x16x128xf32> to vector<512x128xf32>
    %c4 = arith.constant 4 : index
    %c0_59 = arith.constant 0 : index
    %c0_60 = arith.constant 0 : index
    %37 = vector.load %arg1[%c4, %c0_59, %c0_60] : memref<9x128x128xf32, #tpu.memory_space<vmem>>, vector<1x128x128xf32>
    %38 = vector.shape_cast %37 : vector<1x128x128xf32> to vector<128x128xf32>
    %cst_61 = arith.constant dense<0.000000e+00> : vector<512x128xf32>
    %39 = tpu.matmul %36, %38, %cst_61 {dimension_numbers = #tpu.dot_dimension_numbers<[1], [0], [0], [1], [0, 0, 1, 1], [], []>} : vector<512x128xf32>, vector<128x128xf32>, vector<512x128xf32> -> vector<512x128xf32>
    %40 = arith.addf %34, %39 : vector<512x128xf32>
    %c0_62 = arith.constant 0 : index
    %c1_63 = arith.constant 1 : index
    %c2_64 = arith.constant 2 : index
    %c0_65 = arith.constant 0 : index
    %41 = vector.load %arg8[%c0_62, %c1_63, %c2_64, %c0_65] : memref<2x18x18x128xf32, #tpu.memory_space<vmem>>, vector<2x16x16x128xf32>
    %42 = vector.shape_cast %41 : vector<2x16x16x128xf32> to vector<512x128xf32>
    %c5 = arith.constant 5 : index
    %c0_66 = arith.constant 0 : index
    %c0_67 = arith.constant 0 : index
    %43 = vector.load %arg1[%c5, %c0_66, %c0_67] : memref<9x128x128xf32, #tpu.memory_space<vmem>>, vector<1x128x128xf32>
    %44 = vector.shape_cast %43 : vector<1x128x128xf32> to vector<128x128xf32>
    %cst_68 = arith.constant dense<0.000000e+00> : vector<512x128xf32>
    %45 = tpu.matmul %42, %44, %cst_68 {dimension_numbers = #tpu.dot_dimension_numbers<[1], [0], [0], [1], [0, 0, 1, 1], [], []>} : vector<512x128xf32>, vector<128x128xf32>, vector<512x128xf32> -> vector<512x128xf32>
    %46 = arith.addf %40, %45 : vector<512x128xf32>
    %c0_69 = arith.constant 0 : index
    %c2_70 = arith.constant 2 : index
    %c0_71 = arith.constant 0 : index
    %c0_72 = arith.constant 0 : index
    %47 = vector.load %arg8[%c0_69, %c2_70, %c0_71, %c0_72] : memref<2x18x18x128xf32, #tpu.memory_space<vmem>>, vector<2x16x16x128xf32>
    %48 = vector.shape_cast %47 : vector<2x16x16x128xf32> to vector<512x128xf32>
    %c6 = arith.constant 6 : index
    %c0_73 = arith.constant 0 : index
    %c0_74 = arith.constant 0 : index
    %49 = vector.load %arg1[%c6, %c0_73, %c0_74] : memref<9x128x128xf32, #tpu.memory_space<vmem>>, vector<1x128x128xf32>
    %50 = vector.shape_cast %49 : vector<1x128x128xf32> to vector<128x128xf32>
    %cst_75 = arith.constant dense<0.000000e+00> : vector<512x128xf32>
    %51 = tpu.matmul %48, %50, %cst_75 {dimension_numbers = #tpu.dot_dimension_numbers<[1], [0], [0], [1], [0, 0, 1, 1], [], []>} : vector<512x128xf32>, vector<128x128xf32>, vector<512x128xf32> -> vector<512x128xf32>
    %52 = arith.addf %46, %51 : vector<512x128xf32>
    %c0_76 = arith.constant 0 : index
    %c2_77 = arith.constant 2 : index
    %c1_78 = arith.constant 1 : index
    %c0_79 = arith.constant 0 : index
    %53 = vector.load %arg8[%c0_76, %c2_77, %c1_78, %c0_79] : memref<2x18x18x128xf32, #tpu.memory_space<vmem>>, vector<2x16x16x128xf32>
    %54 = vector.shape_cast %53 : vector<2x16x16x128xf32> to vector<512x128xf32>
    %c7 = arith.constant 7 : index
    %c0_80 = arith.constant 0 : index
    %c0_81 = arith.constant 0 : index
    %55 = vector.load %arg1[%c7, %c0_80, %c0_81] : memref<9x128x128xf32, #tpu.memory_space<vmem>>, vector<1x128x128xf32>
    %56 = vector.shape_cast %55 : vector<1x128x128xf32> to vector<128x128xf32>
    %cst_82 = arith.constant dense<0.000000e+00> : vector<512x128xf32>
    %57 = tpu.matmul %54, %56, %cst_82 {dimension_numbers = #tpu.dot_dimension_numbers<[1], [0], [0], [1], [0, 0, 1, 1], [], []>} : vector<512x128xf32>, vector<128x128xf32>, vector<512x128xf32> -> vector<512x128xf32>
    %58 = arith.addf %52, %57 : vector<512x128xf32>
    %c0_83 = arith.constant 0 : index
    %c2_84 = arith.constant 2 : index
    %c2_85 = arith.constant 2 : index
    %c0_86 = arith.constant 0 : index
    %59 = vector.load %arg8[%c0_83, %c2_84, %c2_85, %c0_86] : memref<2x18x18x128xf32, #tpu.memory_space<vmem>>, vector<2x16x16x128xf32>
    %60 = vector.shape_cast %59 : vector<2x16x16x128xf32> to vector<512x128xf32>
    %c8 = arith.constant 8 : index
    %c0_87 = arith.constant 0 : index
    %c0_88 = arith.constant 0 : index
    %61 = vector.load %arg1[%c8, %c0_87, %c0_88] : memref<9x128x128xf32, #tpu.memory_space<vmem>>, vector<1x128x128xf32>
    %62 = vector.shape_cast %61 : vector<1x128x128xf32> to vector<128x128xf32>
    %cst_89 = arith.constant dense<0.000000e+00> : vector<512x128xf32>
    %63 = tpu.matmul %60, %62, %cst_89 {dimension_numbers = #tpu.dot_dimension_numbers<[1], [0], [0], [1], [0, 0, 1, 1], [], []>} : vector<512x128xf32>, vector<128x128xf32>, vector<512x128xf32> -> vector<512x128xf32>
    %64 = arith.addf %58, %63 : vector<512x128xf32>
    %cst_90 = arith.constant dense<0.000000e+00> : vector<128xf32>
    %65 = vector.multi_reduction <add>, %64, %cst_90 [0] : vector<512x128xf32> to vector<128xf32>
    %66 = vector.shape_cast %65 : vector<128xf32> to vector<1x128xf32>
    %cst_91 = arith.constant 0.001953125 : f32
    %67 = vector.broadcast %cst_91 : f32 to vector<1x128xf32>
    %68 = arith.mulf %66, %67 : vector<1x128xf32>
    %69 = arith.mulf %64, %64 : vector<512x128xf32>
    %cst_92 = arith.constant dense<0.000000e+00> : vector<128xf32>
    %70 = vector.multi_reduction <add>, %69, %cst_92 [0] : vector<512x128xf32> to vector<128xf32>
    %71 = vector.shape_cast %70 : vector<128xf32> to vector<1x128xf32>
    %cst_93 = arith.constant 0.001953125 : f32
    %72 = vector.broadcast %cst_93 : f32 to vector<1x128xf32>
    %73 = arith.mulf %71, %72 : vector<1x128xf32>
    %74 = arith.mulf %68, %68 : vector<1x128xf32>
    %75 = arith.subf %73, %74 : vector<1x128xf32>
    %c0_94 = arith.constant 0 : index
    %c0_95 = arith.constant 0 : index
    %76 = vector.load %arg2[%c0_94, %c0_95] : memref<1x128xf32, #tpu.memory_space<vmem>>, vector<1x128xf32>
    %cst_96 = arith.constant 9.99999974E-6 : f32
    %77 = vector.broadcast %cst_96 : f32 to vector<1x128xf32>
    %78 = arith.addf %75, %77 : vector<1x128xf32>
    %79 = math.rsqrt %78 : vector<1x128xf32>
    %80 = arith.mulf %76, %79 : vector<1x128xf32>
    %81 = vector.broadcast %68 : vector<1x128xf32> to vector<512x128xf32>
    %82 = arith.subf %64, %81 : vector<512x128xf32>
    %83 = vector.broadcast %80 : vector<1x128xf32> to vector<512x128xf32>
    %84 = arith.mulf %82, %83 : vector<512x128xf32>
    %c0_97 = arith.constant 0 : index
    %c0_98 = arith.constant 0 : index
    %85 = vector.load %arg3[%c0_97, %c0_98] : memref<1x128xf32, #tpu.memory_space<vmem>>, vector<1x128xf32>
    %86 = vector.broadcast %85 : vector<1x128xf32> to vector<512x128xf32>
    %87 = arith.addf %84, %86 : vector<512x128xf32>
    %cst_99 = arith.constant 0.000000e+00 : f32
    %88 = vector.broadcast %cst_99 : f32 to vector<512x128xf32>
    %89 = arith.maximumf %87, %88 : vector<512x128xf32>
    %90 = vector.shape_cast %89 : vector<512x128xf32> to vector<2x16x16x128xf32>
    %c0_100 = arith.constant 0 : index
    %c1_101 = arith.constant 1 : index
    %c1_102 = arith.constant 1 : index
    %c0_103 = arith.constant 0 : index
    %91 = vector.load %arg8[%c0_100, %c1_101, %c1_102, %c0_103] : memref<2x18x18x128xf32, #tpu.memory_space<vmem>>, vector<2x16x16x128xf32>
    tpu.vector_store %arg8[%c0_100, %c1_101, %c1_102, %c0_103], %90 {strides = array<i32>} : memref<2x18x18x128xf32, #tpu.memory_space<vmem>>, vector<2x16x16x128xf32>,
    %cst_104 = arith.constant 0.000000e+00 : f32
    %92 = vector.broadcast %cst_104 : f32 to vector<512x128xf32>
    %c0_105 = arith.constant 0 : index
    %c0_106 = arith.constant 0 : index
    %c0_107 = arith.constant 0 : index
    %c0_108 = arith.constant 0 : index
    %93 = vector.load %arg8[%c0_105, %c0_106, %c0_107, %c0_108] : memref<2x18x18x128xf32, #tpu.memory_space<vmem>>, vector<2x16x16x128xf32>
    %94 = vector.shape_cast %93 : vector<2x16x16x128xf32> to vector<512x128xf32>
    %c0_109 = arith.constant 0 : index
    %c0_110 = arith.constant 0 : index
    %c0_111 = arith.constant 0 : index
    %95 = vector.load %arg4[%c0_109, %c0_110, %c0_111] : memref<9x128x128xf32, #tpu.memory_space<vmem>>, vector<1x128x128xf32>
    %96 = vector.shape_cast %95 : vector<1x128x128xf32> to vector<128x128xf32>
    %cst_112 = arith.constant dense<0.000000e+00> : vector<512x128xf32>
    %97 = tpu.matmul %94, %96, %cst_112 {dimension_numbers = #tpu.dot_dimension_numbers<[1], [0], [0], [1], [0, 0, 1, 1], [], []>} : vector<512x128xf32>, vector<128x128xf32>, vector<512x128xf32> -> vector<512x128xf32>
    %98 = arith.addf %92, %97 : vector<512x128xf32>
    %c0_113 = arith.constant 0 : index
    %c0_114 = arith.constant 0 : index
    %c1_115 = arith.constant 1 : index
    %c0_116 = arith.constant 0 : index
    %99 = vector.load %arg8[%c0_113, %c0_114, %c1_115, %c0_116] : memref<2x18x18x128xf32, #tpu.memory_space<vmem>>, vector<2x16x16x128xf32>
    %100 = vector.shape_cast %99 : vector<2x16x16x128xf32> to vector<512x128xf32>
    %c1_117 = arith.constant 1 : index
    %c0_118 = arith.constant 0 : index
    %c0_119 = arith.constant 0 : index
    %101 = vector.load %arg4[%c1_117, %c0_118, %c0_119] : memref<9x128x128xf32, #tpu.memory_space<vmem>>, vector<1x128x128xf32>
    %102 = vector.shape_cast %101 : vector<1x128x128xf32> to vector<128x128xf32>
    %cst_120 = arith.constant dense<0.000000e+00> : vector<512x128xf32>
    %103 = tpu.matmul %100, %102, %cst_120 {dimension_numbers = #tpu.dot_dimension_numbers<[1], [0], [0], [1], [0, 0, 1, 1], [], []>} : vector<512x128xf32>, vector<128x128xf32>, vector<512x128xf32> -> vector<512x128xf32>
    %104 = arith.addf %98, %103 : vector<512x128xf32>
    %c0_121 = arith.constant 0 : index
    %c0_122 = arith.constant 0 : index
    %c2_123 = arith.constant 2 : index
    %c0_124 = arith.constant 0 : index
    %105 = vector.load %arg8[%c0_121, %c0_122, %c2_123, %c0_124] : memref<2x18x18x128xf32, #tpu.memory_space<vmem>>, vector<2x16x16x128xf32>
    %106 = vector.shape_cast %105 : vector<2x16x16x128xf32> to vector<512x128xf32>
    %c2_125 = arith.constant 2 : index
    %c0_126 = arith.constant 0 : index
    %c0_127 = arith.constant 0 : index
    %107 = vector.load %arg4[%c2_125, %c0_126, %c0_127] : memref<9x128x128xf32, #tpu.memory_space<vmem>>, vector<1x128x128xf32>
    %108 = vector.shape_cast %107 : vector<1x128x128xf32> to vector<128x128xf32>
    %cst_128 = arith.constant dense<0.000000e+00> : vector<512x128xf32>
    %109 = tpu.matmul %106, %108, %cst_128 {dimension_numbers = #tpu.dot_dimension_numbers<[1], [0], [0], [1], [0, 0, 1, 1], [], []>} : vector<512x128xf32>, vector<128x128xf32>, vector<512x128xf32> -> vector<512x128xf32>
    %110 = arith.addf %104, %109 : vector<512x128xf32>
    %c0_129 = arith.constant 0 : index
    %c1_130 = arith.constant 1 : index
    %c0_131 = arith.constant 0 : index
    %c0_132 = arith.constant 0 : index
    %111 = vector.load %arg8[%c0_129, %c1_130, %c0_131, %c0_132] : memref<2x18x18x128xf32, #tpu.memory_space<vmem>>, vector<2x16x16x128xf32>
    %112 = vector.shape_cast %111 : vector<2x16x16x128xf32> to vector<512x128xf32>
    %c3_133 = arith.constant 3 : index
    %c0_134 = arith.constant 0 : index
    %c0_135 = arith.constant 0 : index
    %113 = vector.load %arg4[%c3_133, %c0_134, %c0_135] : memref<9x128x128xf32, #tpu.memory_space<vmem>>, vector<1x128x128xf32>
    %114 = vector.shape_cast %113 : vector<1x128x128xf32> to vector<128x128xf32>
    %cst_136 = arith.constant dense<0.000000e+00> : vector<512x128xf32>
    %115 = tpu.matmul %112, %114, %cst_136 {dimension_numbers = #tpu.dot_dimension_numbers<[1], [0], [0], [1], [0, 0, 1, 1], [], []>} : vector<512x128xf32>, vector<128x128xf32>, vector<512x128xf32> -> vector<512x128xf32>
    %116 = arith.addf %110, %115 : vector<512x128xf32>
    %c0_137 = arith.constant 0 : index
    %c1_138 = arith.constant 1 : index
    %c1_139 = arith.constant 1 : index
    %c0_140 = arith.constant 0 : index
    %117 = vector.load %arg8[%c0_137, %c1_138, %c1_139, %c0_140] : memref<2x18x18x128xf32, #tpu.memory_space<vmem>>, vector<2x16x16x128xf32>
    %118 = vector.shape_cast %117 : vector<2x16x16x128xf32> to vector<512x128xf32>
    %c4_141 = arith.constant 4 : index
    %c0_142 = arith.constant 0 : index
    %c0_143 = arith.constant 0 : index
    %119 = vector.load %arg4[%c4_141, %c0_142, %c0_143] : memref<9x128x128xf32, #tpu.memory_space<vmem>>, vector<1x128x128xf32>
    %120 = vector.shape_cast %119 : vector<1x128x128xf32> to vector<128x128xf32>
    %cst_144 = arith.constant dense<0.000000e+00> : vector<512x128xf32>
    %121 = tpu.matmul %118, %120, %cst_144 {dimension_numbers = #tpu.dot_dimension_numbers<[1], [0], [0], [1], [0, 0, 1, 1], [], []>} : vector<512x128xf32>, vector<128x128xf32>, vector<512x128xf32> -> vector<512x128xf32>
    %122 = arith.addf %116, %121 : vector<512x128xf32>
    %c0_145 = arith.constant 0 : index
    %c1_146 = arith.constant 1 : index
    %c2_147 = arith.constant 2 : index
    %c0_148 = arith.constant 0 : index
    %123 = vector.load %arg8[%c0_145, %c1_146, %c2_147, %c0_148] : memref<2x18x18x128xf32, #tpu.memory_space<vmem>>, vector<2x16x16x128xf32>
    %124 = vector.shape_cast %123 : vector<2x16x16x128xf32> to vector<512x128xf32>
    %c5_149 = arith.constant 5 : index
    %c0_150 = arith.constant 0 : index
    %c0_151 = arith.constant 0 : index
    %125 = vector.load %arg4[%c5_149, %c0_150, %c0_151] : memref<9x128x128xf32, #tpu.memory_space<vmem>>, vector<1x128x128xf32>
    %126 = vector.shape_cast %125 : vector<1x128x128xf32> to vector<128x128xf32>
    %cst_152 = arith.constant dense<0.000000e+00> : vector<512x128xf32>
    %127 = tpu.matmul %124, %126, %cst_152 {dimension_numbers = #tpu.dot_dimension_numbers<[1], [0], [0], [1], [0, 0, 1, 1], [], []>} : vector<512x128xf32>, vector<128x128xf32>, vector<512x128xf32> -> vector<512x128xf32>
    %128 = arith.addf %122, %127 : vector<512x128xf32>
    %c0_153 = arith.constant 0 : index
    %c2_154 = arith.constant 2 : index
    %c0_155 = arith.constant 0 : index
    %c0_156 = arith.constant 0 : index
    %129 = vector.load %arg8[%c0_153, %c2_154, %c0_155, %c0_156] : memref<2x18x18x128xf32, #tpu.memory_space<vmem>>, vector<2x16x16x128xf32>
    %130 = vector.shape_cast %129 : vector<2x16x16x128xf32> to vector<512x128xf32>
    %c6_157 = arith.constant 6 : index
    %c0_158 = arith.constant 0 : index
    %c0_159 = arith.constant 0 : index
    %131 = vector.load %arg4[%c6_157, %c0_158, %c0_159] : memref<9x128x128xf32, #tpu.memory_space<vmem>>, vector<1x128x128xf32>
    %132 = vector.shape_cast %131 : vector<1x128x128xf32> to vector<128x128xf32>
    %cst_160 = arith.constant dense<0.000000e+00> : vector<512x128xf32>
    %133 = tpu.matmul %130, %132, %cst_160 {dimension_numbers = #tpu.dot_dimension_numbers<[1], [0], [0], [1], [0, 0, 1, 1], [], []>} : vector<512x128xf32>, vector<128x128xf32>, vector<512x128xf32> -> vector<512x128xf32>
    %134 = arith.addf %128, %133 : vector<512x128xf32>
    %c0_161 = arith.constant 0 : index
    %c2_162 = arith.constant 2 : index
    %c1_163 = arith.constant 1 : index
    %c0_164 = arith.constant 0 : index
    %135 = vector.load %arg8[%c0_161, %c2_162, %c1_163, %c0_164] : memref<2x18x18x128xf32, #tpu.memory_space<vmem>>, vector<2x16x16x128xf32>
    %136 = vector.shape_cast %135 : vector<2x16x16x128xf32> to vector<512x128xf32>
    %c7_165 = arith.constant 7 : index
    %c0_166 = arith.constant 0 : index
    %c0_167 = arith.constant 0 : index
    %137 = vector.load %arg4[%c7_165, %c0_166, %c0_167] : memref<9x128x128xf32, #tpu.memory_space<vmem>>, vector<1x128x128xf32>
    %138 = vector.shape_cast %137 : vector<1x128x128xf32> to vector<128x128xf32>
    %cst_168 = arith.constant dense<0.000000e+00> : vector<512x128xf32>
    %139 = tpu.matmul %136, %138, %cst_168 {dimension_numbers = #tpu.dot_dimension_numbers<[1], [0], [0], [1], [0, 0, 1, 1], [], []>} : vector<512x128xf32>, vector<128x128xf32>, vector<512x128xf32> -> vector<512x128xf32>
    %140 = arith.addf %134, %139 : vector<512x128xf32>
    %c0_169 = arith.constant 0 : index
    %c2_170 = arith.constant 2 : index
    %c2_171 = arith.constant 2 : index
    %c0_172 = arith.constant 0 : index
    %141 = vector.load %arg8[%c0_169, %c2_170, %c2_171, %c0_172] : memref<2x18x18x128xf32, #tpu.memory_space<vmem>>, vector<2x16x16x128xf32>
    %142 = vector.shape_cast %141 : vector<2x16x16x128xf32> to vector<512x128xf32>
    %c8_173 = arith.constant 8 : index
    %c0_174 = arith.constant 0 : index
    %c0_175 = arith.constant 0 : index
    %143 = vector.load %arg4[%c8_173, %c0_174, %c0_175] : memref<9x128x128xf32, #tpu.memory_space<vmem>>, vector<1x128x128xf32>
    %144 = vector.shape_cast %143 : vector<1x128x128xf32> to vector<128x128xf32>
    %cst_176 = arith.constant dense<0.000000e+00> : vector<512x128xf32>
    %145 = tpu.matmul %142, %144, %cst_176 {dimension_numbers = #tpu.dot_dimension_numbers<[1], [0], [0], [1], [0, 0, 1, 1], [], []>} : vector<512x128xf32>, vector<128x128xf32>, vector<512x128xf32> -> vector<512x128xf32>
    %146 = arith.addf %140, %145 : vector<512x128xf32>
    %cst_177 = arith.constant dense<0.000000e+00> : vector<128xf32>
    %147 = vector.multi_reduction <add>, %146, %cst_177 [0] : vector<512x128xf32> to vector<128xf32>
    %148 = vector.shape_cast %147 : vector<128xf32> to vector<1x128xf32>
    %cst_178 = arith.constant 0.001953125 : f32
    %149 = vector.broadcast %cst_178 : f32 to vector<1x128xf32>
    %150 = arith.mulf %148, %149 : vector<1x128xf32>
    %151 = arith.mulf %146, %146 : vector<512x128xf32>
    %cst_179 = arith.constant dense<0.000000e+00> : vector<128xf32>
    %152 = vector.multi_reduction <add>, %151, %cst_179 [0] : vector<512x128xf32> to vector<128xf32>
    %153 = vector.shape_cast %152 : vector<128xf32> to vector<1x128xf32>
    %cst_180 = arith.constant 0.001953125 : f32
    %154 = vector.broadcast %cst_180 : f32 to vector<1x128xf32>
    %155 = arith.mulf %153, %154 : vector<1x128xf32>
    %156 = arith.mulf %150, %150 : vector<1x128xf32>
    %157 = arith.subf %155, %156 : vector<1x128xf32>
    %c0_181 = arith.constant 0 : index
    %c0_182 = arith.constant 0 : index
    %158 = vector.load %arg5[%c0_181, %c0_182] : memref<1x128xf32, #tpu.memory_space<vmem>>, vector<1x128xf32>
    %cst_183 = arith.constant 9.99999974E-6 : f32
    %159 = vector.broadcast %cst_183 : f32 to vector<1x128xf32>
    %160 = arith.addf %157, %159 : vector<1x128xf32>
    %161 = math.rsqrt %160 : vector<1x128xf32>
    %162 = arith.mulf %158, %161 : vector<1x128xf32>
    %163 = vector.broadcast %150 : vector<1x128xf32> to vector<512x128xf32>
    %164 = arith.subf %146, %163 : vector<512x128xf32>
    %165 = vector.broadcast %162 : vector<1x128xf32> to vector<512x128xf32>
    %166 = arith.mulf %164, %165 : vector<512x128xf32>
    %c0_184 = arith.constant 0 : index
    %c0_185 = arith.constant 0 : index
    %167 = vector.load %arg6[%c0_184, %c0_185] : memref<1x128xf32, #tpu.memory_space<vmem>>, vector<1x128xf32>
    %168 = vector.broadcast %167 : vector<1x128xf32> to vector<512x128xf32>
    %169 = arith.addf %166, %168 : vector<512x128xf32>
    %cst_186 = arith.constant 0.000000e+00 : f32
    %170 = vector.broadcast %cst_186 : f32 to vector<512x128xf32>
    %171 = arith.maximumf %169, %170 : vector<512x128xf32>
    %c0_187 = arith.constant 0 : index
    %c0_188 = arith.constant 0 : index
    %172 = vector.load %arg7[%c0_187, %c0_188] : memref<512x128xf32, #tpu.memory_space<vmem>>, vector<512x128xf32>
    tpu.vector_store %arg7[%c0_187, %c0_188], %171 {strides = array<i32>} : memref<512x128xf32, #tpu.memory_space<vmem>>, vector<512x128xf32>,
    return
  }
}

</mosaic_0001>

<bundles_post_ra>
// kernel: block_forward.1
= control target key start
LH: loop header
LB: loop body
LE: loop exit
PB: predicated region body
PF: predicated region fallthrough
CT: control target
= control target key end

     0   :  { %v21324_v3 = vmov 0.0   ;;  %s21316_s1 = inlined_call_operand.vmem [shape: f32[9,128,128], index: 1, kind: input, shape index: {}]   ;;  %s21317_s0 = inlined_call_operand.vmem [shape: f32[2,16,16,128], index: 0, kind: input, shape index: {}]   ;;  %s21318_s4 = inlined_call_operand.vmem [shape: f32[9,128,128], index: 4, kind: input, shape index: {}]   ;;  %s21319_s2 = inlined_call_operand.vmem [shape: f32[1,128], index: 2, kind: input, shape index: {}]   ;;  %s21320_s3 = inlined_call_operand.vmem [shape: f32[1,128], index: 3, kind: input, shape index: {}]   ;;  %s21321_s5 = inlined_call_operand.vmem [shape: f32[1,128], index: 5, kind: input, shape index: {}]   ;;  %s21322_s6 = inlined_call_operand.vmem [shape: f32[1,128], index: 6, kind: input, shape index: {}]   ;;  %s21323_s7 = inlined_call_operand.vmem [shape: f32[512,128], index: 7, kind: output, shape index: {}]  }
   0x1   :  { %v14668_v0 = vld [vmem:[%s21316_s1 + $0xf8] sm:$0xff]  ;;  %v14678_v2 = vld [vmem:[%s21316_s1 + $0xf0] sm:$0xff]  ;;  %26 = vst [vmem:[#allocation2] sm:$0xff] %v21324_v3  ;;  %27 = vst [vmem:[#allocation2 + $0x8] sm:$0xff] %v21324_v3 }
   0x2   :  { %v14673_v1 = vld [vmem:[%s21316_s1 + $0x78] sm:$0xff]  ;;  %28 = vst [vmem:[#allocation2 + $0x10] sm:$0x3] %v21324_v3  ;;  %29 = vst [vmem:[#allocation2 + $0x1b0] sm:$0xff] %v21324_v3  ;;  %12311 = vmatprep.subr.mxu0 %v14668_v0  ;;  %v318_v4 = vld [vmem:[%s21316_s1 + $0x70] sm:$0xff] }
   0x3   :  { %30 = vst [vmem:[#allocation2 + $0x1b8] sm:$0xff] %v21324_v3  ;;  %31 = vst [vmem:[#allocation2 + $0x1c0] sm:$0x3] %v21324_v3  ;;  %12439 = vmatprep.subr.mxu1 %v14673_v1  ;;  %12312 = vmatpush3.msra.mxu0 %v14668_v0  ;;  %v10626_v5 = vld [vmem:[%s21316_s1 + $0xe8] sm:$0xff]  ;;  %v10625_v7 = vld [vmem:[%s21316_s1 + $0xe0] sm:$0xff] }
   0x4   :  { %33 = vst [vmem:[#allocation2 + $0x198] sm:$0xff] %v21324_v3  ;;  %34 = vst [vmem:[#allocation2 + $0x1a0] sm:$0xff] %v21324_v3  ;;  %12440 = vmatpush3.msra.mxu1 %v14673_v1  ;;  %v317_v6 = vld [vmem:[%s21316_s1 + $0x68] sm:$0xff]  ;;  %12313 = vmatprep.subr.mxu0 %v14678_v2  ;;  %v316_v8 = vld [vmem:[%s21316_s1 + $0x60] sm:$0xff] }
   0x5   :  { %35 = vst [vmem:[#allocation2 + $0x1a8] sm:$0x3] %v21324_v3  ;;  %36 = vst [vmem:[#allocation2 + $0x348] sm:$0xff] %v21324_v3  ;;  %12441 = vmatprep.subr.mxu1 %v318_v4  ;;  %12314 = vmatpush3.msra.mxu0 %v14678_v2  ;;  %v10624_v9 = vld [vmem:[%s21316_s1 + $0xd8] sm:$0xff]  ;;  %v10623_v11 = vld [vmem:[%s21316_s1 + $0xd0] sm:$0xff] }
   0x6   :  { %37 = vst [vmem:[#allocation2 + $0x350] sm:$0xff] %v21324_v3  ;;  %38 = vst [vmem:[#allocation2 + $0x358] sm:$0x3] %v21324_v3  ;;  %12442 = vmatpush3.msra.mxu1 %v318_v4  ;;  %12315 = vmatprep.subr.mxu0 %v10626_v5  ;;  %v315_v10 = vld [vmem:[%s21316_s1 + $0x58] sm:$0xff]  ;;  %v314_v12 = vld [vmem:[%s21316_s1 + $0x50] sm:$0xff] }
   0x7   :  { %40 = vst [vmem:[#allocation2 + $0x18] sm:$0x1] %v21324_v3  ;;  %41 = vst [vmem:[#allocation2 + $0x30] sm:$0x1] %v21324_v3  ;;  %12443 = vmatprep.subr.mxu1 %v317_v6  ;;  %12316 = vmatpush3.msra.mxu0 %v10626_v5  ;;  %v10622_v13 = vld [vmem:[%s21316_s1 + $0xc8] sm:$0xff]  ;;  %v10621_v15 = vld [vmem:[%s21316_s1 + $0xc0] sm:$0xff] }
   0x8   :  { %42 = vst [vmem:[#allocation2 + $0x48] sm:$0x1] %v21324_v3  ;;  %43 = vst [vmem:[#allocation2 + $0x60] sm:$0x1] %v21324_v3  ;;  %12444 = vmatpush3.msra.mxu1 %v317_v6  ;;  %12317 = vmatprep.subr.mxu0 %v10625_v7  ;;  %v313_v14 = vld [vmem:[%s21316_s1 + $0x48] sm:$0xff]  ;;  %v312_v16 = vld [vmem:[%s21316_s1 + $0x40] sm:$0xff] }
   0x9   :  { %44 = vst [vmem:[#allocation2 + $0x78] sm:$0x1] %v21324_v3  ;;  %45 = vst [vmem:[#allocation2 + $0x90] sm:$0x1] %v21324_v3  ;;  %12445 = vmatprep.subr.mxu1 %v316_v8  ;;  %12318 = vmatpush3.msra.mxu0 %v10625_v7  ;;  %v10620_v17 = vld [vmem:[%s21316_s1 + $0xb8] sm:$0xff]  ;;  %v14815_v18 = vld [vmem:[%s21317_s0] sm:$0xff] }
   0xa   :  { %46 = vst [vmem:[#allocation2 + $0xa8] sm:$0x1] %v21324_v3  ;;  %47 = vst [vmem:[#allocation2 + $0xc0] sm:$0x1] %v21324_v3  ;;  %12446 = vmatpush3.msra.mxu1 %v316_v8  ;;  %12319 = vmatprep.subr.mxu0 %v10624_v9  ;;  %v14820_v19 = vld [vmem:[%s21317_s0 + $0x8] sm:$0xff]  ;;  %v14825_v20 = vld [vmem:[%s21317_s0 + $0x10] sm:$0xff] }
   0xb   :  { %48 = vst [vmem:[#allocation2 + $0xd8] sm:$0x1] %v21324_v3  ;;  %49 = vst [vmem:[#allocation2 + $0xf0] sm:$0x1] %v21324_v3  ;;  %12447 = vmatprep.subr.mxu1 %v315_v10  ;;  %12320 = vmatpush3.msra.mxu0 %v10624_v9  ;;  %v311_v21 = vld [vmem:[%s21316_s1 + $0x38] sm:$0xff]  ;;  %v14841_v23 = vld [vmem:[%s21317_s0 + $0x20] sm:$0xff] }
   0xc   :  { %50 = vst [vmem:[#allocation2 + $0x108] sm:$0x1] %v21324_v3  ;;  %51 = vst [vmem:[#allocation2 + $0x120] sm:$0x1] %v21324_v3  ;;  %12448 = vmatpush3.msra.mxu1 %v315_v10  ;;  %12321 = vmatprep.subr.mxu0 %v10623_v11  ;;  %v14836_v22 = vld [vmem:[%s21317_s0 + $0x18] sm:$0xff]  ;;  %v10619_v24 = vld [vmem:[%s21316_s1 + $0xb0] sm:$0xff] }
   0xd   :  { %52 = vst [vmem:[#allocation2 + $0x138] sm:$0x1] %v21324_v3  ;;  %53 = vst [vmem:[#allocation2 + $0x150] sm:$0x1] %v21324_v3  ;;  %12449 = vmatprep.subr.mxu1 %v314_v12  ;;  %12322 = vmatpush3.msra.mxu0 %v10623_v11  ;;  %v14851_v25 = vld [vmem:[%s21317_s0 + $0x28] sm:$0xff]  ;;  %v14856_v26 = vld [vmem:[%s21317_s0 + $0x30] sm:$0xff] }
   0xe   :  { %54 = vst [vmem:[#allocation2 + $0x168] sm:$0x1] %v21324_v3  ;;  %55 = vst [vmem:[#allocation2 + $0x180] sm:$0x1] %v21324_v3  ;;  %12450 = vmatpush3.msra.mxu1 %v314_v12  ;;  %12323 = vmatprep.subr.mxu0 %v10622_v13  ;;  %v14861_v27 = vld [vmem:[%s21317_s0 + $0x38] sm:$0xff]  ;;  %v310_v28 = vld [vmem:[%s21316_s1 + $0x30] sm:$0xff] }
   0xf   :  { %58 = vst [vmem:[#allocation2 + $0x1c8] sm:$0x1] %v21324_v3  ;;  %59 = vst [vmem:[#allocation2 + $0x1e0] sm:$0x1] %v21324_v3  ;;  %12451 = vmatprep.subr.mxu1 %v313_v14  ;;  %12324 = vmatpush3.msra.mxu0 %v10622_v13  ;;  %v14872_v29 = vld [vmem:[%s21317_s0 + $0x40] sm:$0xff]  ;;  %v14877_v30 = vld [vmem:[%s21317_s0 + $0x48] sm:$0xff] }
  0x10   :  { %60 = vst [vmem:[#allocation2 + $0x1f8] sm:$0x1] %v21324_v3  ;;  %61 = vst [vmem:[#allocation2 + $0x210] sm:$0x1] %v21324_v3  ;;  %12452 = vmatpush3.msra.mxu1 %v313_v14  ;;  %12325 = vmatprep.subr.mxu0 %v10621_v15  ;;  %v10618_v31 = vld [vmem:[%s21316_s1 + $0xa8] sm:$0xff]  ;;  %v14887_v32 = vld [vmem:[%s21317_s0 + $0x50] sm:$0xff] }
  0x11   :  { %62 = vst [vmem:[#allocation2 + $0x228] sm:$0x1] %v21324_v3  ;;  %63 = vst [vmem:[#allocation2 + $0x240] sm:$0x1] %v21324_v3  ;;  %12453 = vmatprep.subr.mxu1 %v312_v16  ;;  %12326 = vmatpush3.msra.mxu0 %v10621_v15  ;;  %v14892_v33 = vld [vmem:[%s21317_s0 + $0x58] sm:$0xff]  ;;  %v14899_v34 = vld [vmem:[%s21317_s0 + $0x60] sm:$0xff] }
  0x12   :  { %64 = vst [vmem:[#allocation2 + $0x258] sm:$0x1] %v21324_v3  ;;  %65 = vst [vmem:[#allocation2 + $0x270] sm:$0x1] %v21324_v3  ;;  %12454 = vmatpush3.msra.mxu1 %v312_v16  ;;  %12327 = vmatprep.subr.mxu0 %v10620_v17  ;;  %v14904_v35 = vld [vmem:[%s21317_s0 + $0x68] sm:$0xff]  ;;  %v14909_v36 = vld [vmem:[%s21317_s0 + $0x70] sm:$0xff] }
  0x13   :  { %66 = vst [vmem:[#allocation2 + $0x288] sm:$0x1] %v21324_v3  ;;  %67 = vst [vmem:[#allocation2 + $0x2a0] sm:$0x1] %v21324_v3  ;;  %12455 = vmatprep.subr.mxu1 %v311_v21  ;;  %12328 = vmatpush3.msra.mxu0 %v10620_v17  ;;  %v309_v37 = vld [vmem:[%s21316_s1 + $0x28] sm:$0xff]  ;;  %v14920_v38 = vld [vmem:[%s21317_s0 + $0x78] sm:$0xff] }
  0x14   :  { %68 = vst [vmem:[#allocation2 + $0x2b8] sm:$0x1] %v21324_v3  ;;  %69 = vst [vmem:[#allocation2 + $0x2d0] sm:$0x1] %v21324_v3  ;;  %12456 = vmatpush3.msra.mxu1 %v311_v21  ;;  %v14925_v39 = vld [vmem:[%s21317_s0 + $0x80] sm:$0xff]  ;;  %12329 = vmatprep.subr.mxu0 %v10619_v24  ;;  %v14932_v40 = vld [vmem:[%s21317_s0 + $0x88] sm:$0xff] }
  0x15   :  { %70 = vst [vmem:[#allocation2 + $0x2e8] sm:$0x1] %v21324_v3  ;;  %71 = vst [vmem:[#allocation2 + $0x300] sm:$0x1] %v21324_v3  ;;  %12457 = vmatprep.subr.mxu1 %v310_v28  ;;  %v14937_v41 = vld [vmem:[%s21317_s0 + $0x90] sm:$0xff]  ;;  %v14942_v42 = vld [vmem:[%s21317_s0 + $0x98] sm:$0xff]  ;;  %12330 = vmatpush3.msra.mxu0 %v10619_v24 }
  0x16   :  { %72 = vst [vmem:[#allocation2 + $0x318] sm:$0x1] %v21324_v3  ;;  %73 = vst [vmem:[#allocation2 + $0x330] sm:$0x1] %v21324_v3  ;;  %12458 = vmatpush3.msra.mxu1 %v310_v28  ;;  %v10617_v43 = vld [vmem:[%s21316_s1 + $0xa0] sm:$0xff]  ;;  %12331 = vmatprep.subr.mxu0 %v10618_v31  ;;  %v10616_v45 = vld [vmem:[%s21316_s1 + $0x98] sm:$0xff] }
  0x17   :  { %76 = vst [vmem:[#allocation2 + $0x29] sm:$0x1] %v21324_v3  ;;  %77 = vst [vmem:[#allocation2 + $0x41] sm:$0x1] %v21324_v3  ;;  %v308_v44 = vld [vmem:[%s21316_s1 + $0x20] sm:$0xff]  ;;  %12459 = vmatprep.subr.mxu1 %v309_v37  ;;  %12332 = vmatpush3.msra.mxu0 %v10618_v31  ;;  %v307_v46 = vld [vmem:[%s21316_s1 + $0x18] sm:$0xff] }
  0x18   :  { %78 = vst [vmem:[#allocation2 + $0x59] sm:$0x1] %v21324_v3  ;;  %79 = vst [vmem:[#allocation2 + $0x71] sm:$0x1] %v21324_v3  ;;  %12460 = vmatpush3.msra.mxu1 %v309_v37  ;;  %12333 = vmatprep.subr.mxu0 %v10617_v43  ;;  %v14962_v47 = vld [vmem:[%s21317_s0 + $0xa0] sm:$0xff]  ;;  %v10615_v48 = vld [vmem:[%s21316_s1 + $0x90] sm:$0xff] }
  0x19   :  { %80 = vst [vmem:[#allocation2 + $0x89] sm:$0x1] %v21324_v3  ;;  %81 = vst [vmem:[#allocation2 + $0xa1] sm:$0x1] %v21324_v3  ;;  %12461 = vmatprep.subr.mxu1 %v308_v44  ;;  %12334 = vmatpush3.msra.mxu0 %v10617_v43  ;;  %v306_v49 = vld [vmem:[%s21316_s1 + $0x10] sm:$0xff]  ;;  %v14974_v50 = vld [vmem:[%s21317_s0 + $0xa8] sm:$0xff] }
  0x1a   :  { %82 = vst [vmem:[#allocation2 + $0xb9] sm:$0x1] %v21324_v3  ;;  %83 = vst [vmem:[#allocation2 + $0xd1] sm:$0x1] %v21324_v3  ;;  %12462 = vmatpush3.msra.mxu1 %v308_v44  ;;  %12335 = vmatprep.subr.mxu0 %v10616_v45  ;;  %v10614_v51 = vld [vmem:[%s21316_s1 + $0x88] sm:$0xff]  ;;  %v14986_v53 = vld [vmem:[%s21317_s0 + $0xb0] sm:$0xff] }
  0x1b   :  { %84 = vst [vmem:[#allocation2 + $0xe9] sm:$0x1] %v21324_v3  ;;  %85 = vst [vmem:[#allocation2 + $0x101] sm:$0x1] %v21324_v3  ;;  %12463 = vmatprep.subr.mxu1 %v307_v46  ;;  %12336 = vmatpush3.msra.mxu0 %v10616_v45  ;;  %v305_v52 = vld [vmem:[%s21316_s1 + $0x8] sm:$0xff]  ;;  %v10613_v54 = vld [vmem:[%s21316_s1 + $0x80] sm:$0xff] }
  0x1c   :  { %86 = vst [vmem:[#allocation2 + $0x119] sm:$0x1] %v21324_v3  ;;  %87 = vst [vmem:[#allocation2 + $0x131] sm:$0x1] %v21324_v3  ;;  %12464 = vmatpush3.msra.mxu1 %v307_v46  ;;  %12337 = vmatprep.subr.mxu0 %v10615_v48  ;;  %v304_v55 = vld [vmem:[%s21316_s1] sm:$0xff]  ;;  %v14998_v57 = vld [vmem:[%s21317_s0 + $0xb8] sm:$0xff] }
  0x1d   :  { %88 = vst [vmem:[#allocation2 + $0x149] sm:$0x1] %v21324_v3  ;;  %89 = vst [vmem:[#allocation2 + $0x161] sm:$0x1] %v21324_v3  ;;  %12465 = vmatprep.subr.mxu1 %v306_v49  ;;  %12338 = vmatpush3.msra.mxu0 %v10615_v48  ;;  %v320_v56 = vld [vmem:[#allocation2 + $0x1] sm:$0xff]  ;;  %v15015_v60 = vld [vmem:[%s21317_s0 + $0xd0] sm:$0xff] }
  0x1e   :  { %90 = vst [vmem:[#allocation2 + $0x179] sm:$0x1] %v21324_v3  ;;  %91 = vst [vmem:[#allocation2 + $0x191] sm:$0x1] %v21324_v3  ;;  %12466 = vmatpush3.msra.mxu1 %v306_v49  ;;  %v15003_v58 = vld [vmem:[%s21317_s0 + $0xc0] sm:$0xff]  ;;  %12339 = vmatprep.subr.mxu0 %v10614_v51  ;;  %v15010_v59 = vld [vmem:[%s21317_s0 + $0xc8] sm:$0xff] }
  0x1f   :  { %94 = vst [vmem:[#allocation2 + $0x1d9] sm:$0x1] %v21324_v3  ;;  %95 = vst [vmem:[#allocation2 + $0x1f1] sm:$0x1] %v21324_v3  ;;  %12467 = vmatprep.subr.mxu1 %v305_v52  ;;  %v15020_v61 = vld [vmem:[%s21317_s0 + $0xd8] sm:$0xff]  ;;  %12340 = vmatpush3.msra.mxu0 %v10614_v51  ;;  %v15028_v63 = vld [vmem:[%s21317_s0 + $0xe0] sm:$0xff] }
  0x20   :  { %96 = vst [vmem:[#allocation2 + $0x209] sm:$0x1] %v21324_v3  ;;  %97 = vst [vmem:[#allocation2 + $0x221] sm:$0x1] %v21324_v3  ;;  %12468 = vmatpush3.msra.mxu1 %v305_v52  ;;  %v15033_v0 = vld [vmem:[%s21317_s0 + $0xe8] sm:$0xff]  ;;  %12341 = vmatprep.subr.mxu0 %v10613_v54  ;;  %v10644_v2 = vld [vmem:[%s21316_s1 + $0x178] sm:$0xff] }
  0x21   :  { %98 = vst [vmem:[#allocation2 + $0x239] sm:$0x1] %v21324_v3  ;;  %99 = vst [vmem:[#allocation2 + $0x251] sm:$0x1] %v21324_v3  ;;  %12469 = vmatprep.subr.mxu1 %v304_v55  ;;  %v321_v1 = vld [vmem:[#allocation2 + $0x9] sm:$0xff]  ;;  %12342 = vmatpush3.msra.mxu0 %v10613_v54  ;;  %v15045_v5 = vld [vmem:[%s21317_s0 + $0x100] sm:$0xff] }
  0x22   :  { %100 = vst [vmem:[#allocation2 + $0x269] sm:$0x1] %v21324_v3  ;;  %101 = vst [vmem:[#allocation2 + $0x281] sm:$0x1] %v21324_v3  ;;  %12343 = vmatprep.mubr.f32.mxu0 %v320_v56  ;;  %12470 = vmatpush3.msra.mxu1 %v304_v55  ;;  %v15050_v6 = vld [vmem:[%s21317_s0 + $0x108] sm:$0xff]  ;;  %v15055_v7 = vld [vmem:[%s21317_s0 + $0x110] sm:$0xff] }
  0x23   :  { %102 = vst [vmem:[#allocation2 + $0x299] sm:$0x1] %v21324_v3  ;;  %103 = vst [vmem:[#allocation2 + $0x2b1] sm:$0x1] %v21324_v3  ;;  %12344 = vmatmul.mubr.f32.vlgmr.msra.gmra.mxu0 %v321_v1  ;;  %v10643_v9 = vld [vmem:[%s21316_s1 + $0x170] sm:$0xff]  ;;  %v15069_v10 = vld [vmem:[%s21317_s0 + $0x118] sm:$0xff]  ;;  %12567 = vmatprep.subr.mxu0 %v10644_v2 }
  0x24   :  { %104 = vst [vmem:[#allocation2 + $0x2c9] sm:$0x1] %v21324_v3  ;;  %105 = vst [vmem:[#allocation2 + $0x2e1] sm:$0x1] %v21324_v3  ;;  %12346 = vmatprep.mubr.f32.mxu0 %v14815_v18  ;;  %v15076_v11 = vld [vmem:[%s21317_s0 + $0x120] sm:$0xff]  ;;  %v15081_v12 = vld [vmem:[%s21317_s0 + $0x128] sm:$0xff]  ;;  %12568 = vmatpush3.msra.mxu0 %v10644_v2 }
  0x25   :  { %106 = vst [vmem:[#allocation2 + $0x2f9] sm:$0x1] %v21324_v3  ;;  %107 = vst [vmem:[#allocation2 + $0x311] sm:$0x1] %v21324_v3  ;;  %v15086_v13 = vld [vmem:[%s21317_s0 + $0x130] sm:$0xff]  ;;  %v15097_v15 = vld [vmem:[%s21317_s0 + $0x138] sm:$0xff]  ;;  %12569 = vmatprep.subr.mxu0 %v10643_v9 }
  0x26   :  { %108 = vst [vmem:[#allocation2 + $0x329] sm:$0x1] %v21324_v3  ;;  %109 = vst [vmem:[#allocation2 + $0x341] sm:$0x1] %v21324_v3  ;;  %v10642_v17 = vld [vmem:[%s21316_s1 + $0x168] sm:$0xff]  ;;  %v15122_v21 = vld [vmem:[%s21317_s0 + $0x150] sm:$0xff]  ;;  %12570 = vmatpush3.msra.mxu0 %v10643_v9 }
  0x27   :  { %39 = vst [vmem:[#allocation2] sm:$0x1] %v21324_v3  ;;  %56 = vst [vmem:[#allocation2 + $0x198] sm:$0x1] %v21324_v3  ;;  %12347 = vmatmul.mubr.f32.gmra.mxu0 %v14820_v19  ;;  %v15137_v28 = vld [vmem:[%s21317_s0 + $0x160] sm:$0xff]  ;;  %12571 = vmatprep.subr.mxu0 %v10642_v17  ;;  %v15149_v37 = vld [vmem:[%s21317_s0 + $0x168] sm:$0xff] }
  0x28   :  { %57 = vst [vmem:[#allocation2 + $0x1b0] sm:$0x1] %v21324_v3  ;;  %74 = vst [vmem:[#allocation2 + $0x348] sm:$0x1] %v21324_v3  ;;  %12349 = vmatprep.mubr.f32.mxu0 %v14825_v20  ;;  %v10641_v31 = vld [vmem:[%s21316_s1 + $0x160] sm:$0xff]  ;;  %v15154_v43 = vld [vmem:[%s21317_s0 + $0x170] sm:$0xff]  ;;  %12572 = vmatpush3.msra.mxu0 %v10642_v17 }
  0x29   :  { %75 = vst [vmem:[#allocation2 + $0x11] sm:$0x1] %v21324_v3  ;;  %92 = vst [vmem:[#allocation2 + $0x1a9] sm:$0x1] %v21324_v3  ;;  %v15167_v45 = vld [vmem:[%s21317_s0 + $0x178] sm:$0xff]  ;;  %12573 = vmatprep.subr.mxu0 %v10641_v31  ;;  %v15176_v46 = vld [vmem:[%s21317_s0 + $0x180] sm:$0xff] }
  0x2a   :  { %93 = vst [vmem:[#allocation2 + $0x1c1] sm:$0x1] %v21324_v3  ;;  %110 = vst [vmem:[#allocation2 + $0x359] sm:$0x1] %v21324_v3  ;;  %v15181_v48 = vld [vmem:[%s21317_s0 + $0x188] sm:$0xff]  ;;  %v10640_v49 = vld [vmem:[%s21316_s1 + $0x158] sm:$0xff]  ;;  %12574 = vmatpush3.msra.mxu0 %v10641_v31 }
  0x2b   :  { %176 = vst [vmem:[#allocation2 + $0x19] sm:$0xff] %v14815_v18  ;;  %177 = vst [vmem:[#allocation2 + $0x21] sm:$0xff] %v14820_v19  ;;  %v15112_v18 = vld [vmem:[%s21317_s0 + $0x140] sm:$0xff]  ;;  %v15117_v19 = vld [vmem:[%s21317_s0 + $0x148] sm:$0xff]  ;;  %12350 = vmatmul.mubr.f32.gmra.mxu0 %v14836_v22  ;;  %12575 = vmatprep.subr.mxu0 %v10640_v49 }
  0x2c   :  { %178 = vst [vmem:[#allocation2 + $0x31] sm:$0xff] %v14825_v20  ;;  %179 = vst [vmem:[#allocation2 + $0x39] sm:$0xff] %v14836_v22  ;;  %v15132_v20 = vld [vmem:[%s21317_s0 + $0x158] sm:$0xff]  ;;  %12352 = vmatprep.mubr.f32.mxu0 %v14841_v23  ;;  %v15193_v51 = vld [vmem:[%s21317_s0 + $0x190] sm:$0xff]  ;;  %12576 = vmatpush3.msra.mxu0 %v10640_v49 }
  0x2d   :  { %180 = vst [vmem:[#allocation2 + $0x49] sm:$0xff] %v14841_v23  ;;  %181 = vst [vmem:[#allocation2 + $0x51] sm:$0xff] %v14851_v25  ;;  %v10660_v23 = vld [vmem:[%s21316_s1 + $0x1f8] sm:$0xff]  ;;  %v10639_v55 = vld [vmem:[%s21316_s1 + $0x150] sm:$0xff] }
  0x2e   :  { %182 = vst [vmem:[#allocation2 + $0x61] sm:$0xff] %v14856_v26  ;;  %183 = vst [vmem:[#allocation2 + $0x69] sm:$0xff] %v14861_v27  ;;  %v240_v62 = vld [vmem:[#allocation2] sm:$0xff]  ;;  %12695 = vmatprep.subr.mxu1 %v10660_v23  ;;  %v15205_v54 = vld [vmem:[%s21317_s0 + $0x198] sm:$0xff]  ;;  %12577 = vmatprep.subr.mxu0 %v10639_v55 }
  0x2f   :  { %184 = vst [vmem:[#allocation2 + $0x79] sm:$0xff] %v14872_v29  ;;  %185 = vst [vmem:[#allocation2 + $0x81] sm:$0xff] %v14877_v30  ;;  %12471 = vmatprep.mubr.f32.mxu1 %v240_v62  ;;  %12353 = vmatmul.mubr.f32.gmra.mxu0 %v14851_v25  ;;  %v15219_v56 = vld [vmem:[%s21317_s0 + $0x1a0] sm:$0xff]  ;;  %v15242_v2 = vld [vmem:[%s21317_s0 + $0x1b8] sm:$0xff] }
  0x30   :  { %186 = vst [vmem:[#allocation2 + $0x91] sm:$0xff] %v14887_v32  ;;  %187 = vst [vmem:[#allocation2 + $0x99] sm:$0xff] %v14892_v33  ;;  %12472 = vmatmul.mubr.f32.vlgmr.msra.gmra.mxu1 %v21324_v3  ;;  %12355 = vmatprep.mubr.f32.mxu0 %v14856_v26  ;;  %v10659_v26 = vld [vmem:[%s21316_s1 + $0x1f0] sm:$0xff]  ;;  %v10658_v9 = vld [vmem:[%s21316_s1 + $0x1e8] sm:$0xff] }
  0x31   :  { %188 = vst [vmem:[#allocation2 + $0xa9] sm:$0xff] %v14899_v34  ;;  %189 = vst [vmem:[#allocation2 + $0xb1] sm:$0xff] %v14904_v35  ;;  %12696 = vmatpush3.msra.mxu1 %v10660_v23  ;;  %v10638_v17 = vld [vmem:[%s21316_s1 + $0x148] sm:$0xff]  ;;  %v15261_v23 = vld [vmem:[%s21317_s0 + $0x1c0] sm:$0xff]  ;;  %12578 = vmatpush3.msra.mxu0 %v10639_v55 }
  0x32   :  { %190 = vst [vmem:[#allocation2 + $0xc1] sm:$0xff] %v14909_v36  ;;  %191 = vst [vmem:[#allocation2 + $0xc9] sm:$0xff] %v14920_v38  ;;  %v15040_v4 = vld [vmem:[#allocation2 + $0x18] sm:$0xff]  ;;  %v15058_v8 = vld [vmem:[#allocation2 + $0x20] sm:$0xff]  ;;  %12697 = vmatprep.subr.mxu1 %v10659_v26  ;;  %12579 = vmatprep.subr.mxu0 %v10638_v17 }
  0x33   :  { %192 = vst [vmem:[#allocation2 + $0xd9] sm:$0xff] %v14925_v39  ;;  %193 = vst [vmem:[#allocation2 + $0xe1] sm:$0xff] %v14932_v40  ;;  %12474 = vmatprep.mubr.f32.mxu1 %v15040_v4  ;;  %v15089_v14 = vld [vmem:[#allocation2 + $0x30] sm:$0xff]  ;;  %v15102_v16 = vld [vmem:[#allocation2 + $0x38] sm:$0xff]  ;;  %12356 = vmatmul.mubr.f32.gmra.mxu0 %v14861_v27 }
  0x34   :  { %194 = vst [vmem:[#allocation2 + $0xf1] sm:$0xff] %v14937_v41  ;;  %195 = vst [vmem:[#allocation2 + $0xf9] sm:$0xff] %v14942_v42  ;;  %12475 = vmatmul.mubr.f32.gmra.mxu1 %v15058_v8  ;;  %v15124_v24 = vld [vmem:[#allocation2 + $0x48] sm:$0xff]  ;;  %v15158_v22 = vld [vmem:[#allocation2 + $0x50] sm:$0xff]  ;;  %12358 = vmatprep.mubr.f32.mxu0 %v14872_v29 }
  0x35   :  { %196 = vst [vmem:[#allocation2 + $0x109] sm:$0xff] %v14962_v47  ;;  %197 = vst [vmem:[#allocation2 + $0x111] sm:$0xff] %v14974_v50  ;;  %12477 = vmatprep.mubr.f32.mxu1 %v15089_v14  ;;  %v15162_v44 = vld [vmem:[#allocation2 + $0x60] sm:$0xff]  ;;  %v15197_v25 = vld [vmem:[#allocation2 + $0x68] sm:$0xff]  ;;  %12698 = vmatpush3.msra.mxu1 %v10659_v26 }
  0x36   :  { %198 = vst [vmem:[#allocation2 + $0x121] sm:$0xff] %v14986_v53  ;;  %199 = vst [vmem:[#allocation2 + $0x129] sm:$0xff] %v14998_v57  ;;  %v15200_v52 = vld [vmem:[#allocation2 + $0x78] sm:$0xff]  ;;  %v15223_v62 = vld [vmem:[#allocation2 + $0x80] sm:$0xff]  ;;  %12699 = vmatprep.subr.mxu1 %v10658_v9  ;;  %12580 = vmatpush3.msra.mxu0 %v10638_v17 }
  0x37   :  { %200 = vst [vmem:[#allocation2 + $0x139] sm:$0xff] %v15003_v58  ;;  %201 = vst [vmem:[#allocation2 + $0x141] sm:$0xff] %v15010_v59  ;;  %v15229_v27 = vld [vmem:[%s21317_s0 + $0x1a8] sm:$0xff]  ;;  %v15231_v1 = vld [vmem:[#allocation2 + $0x90] sm:$0xff]  ;;  %12359 = vmatmul.mubr.f32.gmra.mxu0 %v14877_v30  ;;  %12700 = vmatpush3.msra.mxu1 %v10658_v9 }
  0x38   :  { %202 = vst [vmem:[#allocation2 + $0x151] sm:$0xff] %v15015_v60  ;;  %203 = vst [vmem:[#allocation2 + $0x159] sm:$0xff] %v15020_v61  ;;  %12478 = vmatmul.mubr.f32.gmra.mxu1 %v15102_v16  ;;  %v15237_v29 = vld [vmem:[%s21317_s0 + $0x1b0] sm:$0xff]  ;;  %12361 = vmatprep.mubr.f32.mxu0 %v14887_v32  ;;  %v15256_v31 = vld [vmem:[#allocation2 + $0x98] sm:$0xff] }
  0x39   :  { %204 = vst [vmem:[#allocation2 + $0x169] sm:$0xff] %v15028_v63  ;;  %205 = vst [vmem:[#allocation2 + $0x171] sm:$0xff] %v15033_v0  ;;  %12480 = vmatprep.mubr.f32.mxu1 %v15124_v24  ;;  %v15266_v30 = vld [vmem:[%s21317_s0 + $0x1c8] sm:$0xff]  ;;  %v15275_v32 = vld [vmem:[%s21317_s0 + $0x1d0] sm:$0xff] }
  0x3a   :  { %208 = vst [vmem:[#allocation2 + $0x1c9] sm:$0xff] %v15045_v5  ;;  %209 = vst [vmem:[#allocation2 + $0x1d1] sm:$0xff] %v15050_v6  ;;  %v15268_v49 = vld [vmem:[#allocation2 + $0xa8] sm:$0xff]  ;;  %v10657_v26 = vld [vmem:[%s21316_s1 + $0x1e0] sm:$0xff] }
  0x3b   :  { %210 = vst [vmem:[#allocation2 + $0x1e1] sm:$0xff] %v15055_v7  ;;  %211 = vst [vmem:[#allocation2 + $0x1e9] sm:$0xff] %v15069_v10  ;;  %v15284_v55 = vld [vmem:[%s21317_s0 + $0x1d8] sm:$0xff]  ;;  %12362 = vmatmul.mubr.f32.gmra.mxu0 %v14892_v33  ;;  %v10637_v3 = vld [vmem:[%s21316_s1 + $0x140] sm:$0xff]  ;;  %12701 = vmatprep.subr.mxu1 %v10657_v26 }
  0x3c   :  { %212 = vst [vmem:[#allocation2 + $0x1f9] sm:$0xff] %v15076_v11  ;;  %213 = vst [vmem:[#allocation2 + $0x201] sm:$0xff] %v15081_v12  ;;  %12481 = vmatmul.mubr.f32.gmra.mxu1 %v15158_v22  ;;  %v15295_v9 = vld [vmem:[%s21317_s0 + $0x1e0] sm:$0xff]  ;;  %12364 = vmatprep.mubr.f32.mxu0 %v14899_v34  ;;  %v15305_v33 = vld [vmem:[%s21317_s0 + $0x1e8] sm:$0xff] }
  0x3d   :  { %214 = vst [vmem:[#allocation2 + $0x211] sm:$0xff] %v15086_v13  ;;  %215 = vst [vmem:[#allocation2 + $0x219] sm:$0xff] %v15097_v15  ;;  %12483 = vmatprep.mubr.f32.mxu1 %v15162_v44  ;;  %12581 = vmatprep.subr.mxu0 %v10637_v3  ;;  %v10656_v34 = vld [vmem:[%s21316_s1 + $0x1d8] sm:$0xff]  ;;  %v15320_v17 = vld [vmem:[#allocation2 + $0xc8] sm:$0xff] }
  0x3e   :  { %216 = vst [vmem:[#allocation2 + $0x229] sm:$0xff] %v15112_v18  ;;  %217 = vst [vmem:[#allocation2 + $0x231] sm:$0xff] %v15117_v19  ;;  %12702 = vmatpush3.msra.mxu1 %v10657_v26  ;;  %12582 = vmatpush3.msra.mxu0 %v10637_v3  ;;  %v15334_v3 = vld [vmem:[#allocation2 + $0xe0] sm:$0xff]  ;;  %v15336_v26 = vld [vmem:[#allocation2 + $0xf0] sm:$0xff] }
  0x3f   :  { %218 = vst [vmem:[#allocation2 + $0x241] sm:$0xff] %v15122_v21  ;;  %219 = vst [vmem:[#allocation2 + $0x249] sm:$0xff] %v15132_v20  ;;  %12365 = vmatmul.mubr.f32.gmra.mxu0 %v14904_v35  ;;  %12703 = vmatprep.subr.mxu1 %v10656_v34  ;;  %v10655_v35 = vld [vmem:[%s21316_s1 + $0x1d0] sm:$0xff] }
  0x40   :  { %220 = vst [vmem:[#allocation2 + $0x259] sm:$0xff] %v15137_v28  ;;  %221 = vst [vmem:[#allocation2 + $0x261] sm:$0xff] %v15149_v37  ;;  %12484 = vmatmul.mubr.f32.gmra.mxu1 %v15197_v25  ;;  %12367 = vmatprep.mubr.f32.mxu0 %v14909_v36  ;;  %v10635_v36 = vld [vmem:[%s21316_s1 + $0x130] sm:$0xff] }
  0x41   :  { %222 = vst [vmem:[#allocation2 + $0x271] sm:$0xff] %v15154_v43  ;;  %223 = vst [vmem:[#allocation2 + $0x279] sm:$0xff] %v15167_v45  ;;  %12486 = vmatprep.mubr.f32.mxu1 %v15200_v52  ;;  %12704 = vmatpush3.msra.mxu1 %v10656_v34  ;;  %v15350_v34 = vld [vmem:[#allocation2 + $0x108] sm:$0xff] }
  0x42   :  { %224 = vst [vmem:[#allocation2 + $0x289] sm:$0xff] %v15176_v46  ;;  %225 = vst [vmem:[#allocation2 + $0x291] sm:$0xff] %v15181_v48  ;;  %12705 = vmatprep.subr.mxu1 %v10655_v35 }
  0x43   :  { %226 = vst [vmem:[#allocation2 + $0x2a1] sm:$0xff] %v15193_v51  ;;  %227 = vst [vmem:[#allocation2 + $0x2a9] sm:$0xff] %v15205_v54  ;;  %12368 = vmatmul.mubr.f32.gmra.mxu0 %v14920_v38  ;;  %12706 = vmatpush3.msra.mxu1 %v10655_v35  ;;  %v10654_v38 = vld [vmem:[%s21316_s1 + $0x1c8] sm:$0xff]  ;;  %v15362_v35 = vld [vmem:[#allocation2 + $0x110] sm:$0xff] }
  0x44   :  { %21455 = vst [vmem:[#allocation3_spill] sm:$0xff] %v15223_v62  ;;  %228 = vst [vmem:[#allocation2 + $0x2b9] sm:$0xff] %v15219_v56  ;;  %12487 = vmatmul.mubr.f32.gmra.mxu1 %v15223_v62  ;;  %v15322_v62 = vld [vmem:[#allocation2 + $0xd8] sm:$0xff]  ;;  %12370 = vmatprep.mubr.f32.mxu0 %v14925_v39  ;;  %v10634_v39 = vld [vmem:[%s21316_s1 + $0x128] sm:$0xff] }
  0x45   :  { %21456 = vst [vmem:[#allocation4_spill] sm:$0xff] %v15231_v1  ;;  %229 = vst [vmem:[#allocation2 + $0x2c1] sm:$0xff] %v15229_v27  ;;  %12489 = vmatprep.mubr.f32.mxu1 %v15231_v1  ;;  %v15299_v1 = vld [vmem:[#allocation2 + $0xb0] sm:$0xff]  ;;  %12707 = vmatprep.subr.mxu1 %v10654_v38 }
  0x46   :  { %230 = vst [vmem:[#allocation2 + $0x2d1] sm:$0xff] %v15237_v29  ;;  %231 = vst [vmem:[#allocation2 + $0x2d9] sm:$0xff] %v15242_v2  ;;  %12708 = vmatpush3.msra.mxu1 %v10654_v38  ;;  %v15376_v38 = vld [vmem:[#allocation2 + $0x128] sm:$0xff] }
  0x47   :  { %21457 = vst [vmem:[#allocation5_spill] sm:$0xff] %v15256_v31  ;;  %21458 = vst [vmem:[#allocation6_spill] sm:$0xff] %v15268_v49  ;;  %12371 = vmatmul.mubr.f32.gmra.mxu0 %v14932_v40  ;;  %v10653_v40 = vld [vmem:[%s21316_s1 + $0x1c0] sm:$0xff] }
  0x48   :  { %232 = vst [vmem:[#allocation2 + $0x2e9] sm:$0xff] %v15261_v23  ;;  %233 = vst [vmem:[#allocation2 + $0x2f1] sm:$0xff] %v15266_v30  ;;  %12490 = vmatmul.mubr.f32.gmra.mxu1 %v15256_v31  ;;  %v15307_v31 = vld [vmem:[#allocation2 + $0xc0] sm:$0xff]  ;;  %12373 = vmatprep.mubr.f32.mxu0 %v14937_v41 }
  0x49   :  { %234 = vst [vmem:[#allocation2 + $0x301] sm:$0xff] %v15275_v32  ;;  %235 = vst [vmem:[#allocation2 + $0x309] sm:$0xff] %v15284_v55  ;;  %12492 = vmatprep.mubr.f32.mxu1 %v15268_v49  ;;  %v10636_v49 = vld [vmem:[%s21316_s1 + $0x138] sm:$0xff]  ;;  %v10633_v41 = vld [vmem:[%s21316_s1 + $0x120] sm:$0xff]  ;;  %12709 = vmatprep.subr.mxu1 %v10653_v40 }
  0x4a   :  { %236 = vst [vmem:[#allocation2 + $0x319] sm:$0xff] %v15295_v9  ;;  %237 = vst [vmem:[#allocation2 + $0x321] sm:$0xff] %v15305_v33  ;;  %12583 = vmatprep.subr.mxu0 %v10636_v49  ;;  %12710 = vmatpush3.msra.mxu1 %v10653_v40  ;;  %v15390_v40 = vld [vmem:[#allocation2 + $0x140] sm:$0xff] }
  0x4b   :  { %12584 = vmatpush3.msra.mxu0 %v10636_v49  ;;  %v15348_v49 = vld [vmem:[#allocation2 + $0xf8] sm:$0xff] }
  0x4c   :  { %12493 = vmatmul.mubr.f32.gmra.mxu1 %v15299_v1  ;;  %12585 = vmatprep.subr.mxu0 %v10635_v36 }
  0x4d   :  { %12495 = vmatprep.mubr.f32.mxu1 %v15307_v31  ;;  %12586 = vmatpush3.msra.mxu0 %v10635_v36  ;;  %v15364_v36 = vld [vmem:[#allocation2 + $0x120] sm:$0xff] }
  0x4e   :  { %12587 = vmatprep.subr.mxu0 %v10634_v39  ;;  %12374 = vmatmul.mubr.f32.gmra.mxu0 %v14942_v42  ;;  %v10652_v42 = vld [vmem:[%s21316_s1 + $0x1b8] sm:$0xff] }
  0x4f   :  { %12376 = vmatprep.mubr.f32.mxu0 %v14962_v47  ;;  %12588 = vmatpush3.msra.mxu0 %v10634_v39  ;;  %v10632_v47 = vld [vmem:[%s21316_s1 + $0x118] sm:$0xff] }
  0x50   :  { %12496 = vmatmul.mubr.f32.gmra.mxu1 %v15320_v17  ;;  %12589 = vmatprep.subr.mxu0 %v10633_v41  ;;  %v15378_v39 = vld [vmem:[#allocation2 + $0x138] sm:$0xff] }
  0x51   :  { %12498 = vmatprep.mubr.f32.mxu1 %v15322_v62  ;;  %12590 = vmatpush3.msra.mxu0 %v10633_v41  ;;  %v15392_v41 = vld [vmem:[#allocation2 + $0x150] sm:$0xff] }
  0x52   :  { %12377 = vmatmul.mubr.f32.gmra.mxu0 %v14974_v50  ;;  %12711 = vmatprep.subr.mxu1 %v10652_v42  ;;  %v10651_v50 = vld [vmem:[%s21316_s1 + $0x1b0] sm:$0xff] }
  0x53   :  { %12379 = vmatprep.mubr.f32.mxu0 %v14986_v53  ;;  %12591 = vmatprep.subr.mxu0 %v10632_v47  ;;  %v10631_v53 = vld [vmem:[%s21316_s1 + $0x110] sm:$0xff] }
  0x54   :  { %12499 = vmatmul.mubr.f32.gmra.mxu1 %v15334_v3  ;;  %12592 = vmatpush3.msra.mxu0 %v10632_v47  ;;  %v15407_v47 = vld [vmem:[#allocation2 + $0x158] sm:$0xff] }
  0x55   :  { %12501 = vmatprep.mubr.f32.mxu1 %v15336_v26  ;;  %12712 = vmatpush3.msra.mxu1 %v10652_v42  ;;  %v141_v42 = vld [vmem:[%s21317_s0 + $0xf0] sm:$0xff] }
  0x56   :  { %12380 = vmatmul.mubr.f32.gmra.mxu0 %v14998_v57  ;;  %12713 = vmatprep.subr.mxu1 %v10651_v50  ;;  %v10650_v57 = vld [vmem:[%s21316_s1 + $0x1a8] sm:$0xff]  ;;  %206 = vst [vmem:[#allocation2 + $0x181] sm:$0xff] %v141_v42  ;;  %v10629_v42 = vld [vmem:[%s21316_s1 + $0x100] sm:$0xff] }
  0x57   :  { %12382 = vmatprep.mubr.f32.mxu0 %v15003_v58  ;;  %12593 = vmatprep.subr.mxu0 %v10631_v53  ;;  %v10630_v58 = vld [vmem:[%s21316_s1 + $0x108] sm:$0xff] }
  0x58   :  { %12502 = vmatmul.mubr.f32.gmra.mxu1 %v15348_v49  ;;  %12594 = vmatpush3.msra.mxu0 %v10631_v53  ;;  %v15424_v53 = vld [vmem:[#allocation2 + $0x170] sm:$0xff] }
  0x59   :  { %12504 = vmatprep.mubr.f32.mxu1 %v15350_v34  ;;  %12714 = vmatpush3.msra.mxu1 %v10651_v50  ;;  %v15412_v50 = vld [vmem:[#allocation2 + $0x168] sm:$0xff] }
  0x5a   :  { %12383 = vmatmul.mubr.f32.gmra.mxu0 %v15010_v59  ;;  %v142_v59 = vld [vmem:[%s21317_s0 + $0xf8] sm:$0xff]  ;;  %21459 = vst [vmem:[#allocation7_spill] sm:$0xff] %v15412_v50  ;;  %12715 = vmatprep.subr.mxu1 %v10650_v57 }
  0x5b   :  { %12385 = vmatprep.mubr.f32.mxu0 %v15015_v60  ;;  %207 = vst [vmem:[#allocation2 + $0x189] sm:$0xff] %v142_v59  ;;  %12595 = vmatprep.subr.mxu0 %v10630_v58  ;;  %v10649_v60 = vld [vmem:[%s21316_s1 + $0x1a0] sm:$0xff]  ;;  %v352_v59 = vld [vmem:[#allocation2 + $0x1b1] sm:$0xff] }
  0x5c   :  { %12505 = vmatmul.mubr.f32.gmra.mxu1 %v15362_v35  ;;  %12596 = vmatpush3.msra.mxu0 %v10630_v58  ;;  %v15436_v58 = vld [vmem:[#allocation2 + $0x1c8] sm:$0xff] }
  0x5d   :  { %12507 = vmatprep.mubr.f32.mxu1 %v15364_v36  ;;  %12716 = vmatpush3.msra.mxu1 %v10650_v57  ;;  %v272_v57 = vld [vmem:[#allocation2 + $0x1b0] sm:$0xff] }
  0x5e   :  { %12386 = vmatmul.mubr.f32.gmra.mxu0 %v15020_v61  ;;  %12717 = vmatprep.subr.mxu1 %v10649_v60  ;;  %v10648_v61 = vld [vmem:[%s21316_s1 + $0x198] sm:$0xff] }
  0x5f   :  { %12388 = vmatprep.mubr.f32.mxu0 %v15028_v63  ;;  %12597 = vmatprep.subr.mxu0 %v10629_v42  ;;  %v15434_v63 = vld [vmem:[%s21316_s1 + $0x278] sm:$0xff] }
  0x60   :  { %12508 = vmatmul.mubr.f32.gmra.mxu1 %v15376_v38  ;;  %12598 = vmatpush3.msra.mxu0 %v10629_v42  ;;  %v10646_v42 = vld [vmem:[%s21316_s1 + $0x188] sm:$0xff] }
  0x61   :  { %12510 = vmatprep.mubr.f32.mxu1 %v15378_v39  ;;  %12718 = vmatpush3.msra.mxu1 %v10649_v60  ;;  %v10647_v60 = vld [vmem:[%s21316_s1 + $0x190] sm:$0xff] }
  0x62   :  { %12389 = vmatmul.mubr.f32.gmra.mxu0 %v15033_v0  ;;  %12719 = vmatprep.subr.mxu1 %v10648_v61  ;;  %v21460_v0 = vmov 0.0  }
  0x63   :  { %12391 = vmatprep.mubr.f32.mxu0 %v352_v59  ;;  %12720 = vmatpush3.msra.mxu1 %v10648_v61  ;;  %v15445_v59 = vld [vmem:[#allocation2 + $0x1d0] sm:$0xff]  ;;  %v10645_v61 = vld [vmem:[%s21316_s1 + $0x180] sm:$0xff] }
  0x64   :  { %12511 = vmatmul.mubr.f32.gmra.mxu1 %v15390_v40  ;;  %12823 = vmatprep.subr.mxu0 %v15434_v63 }
  0x65   :  { %12513 = vmatprep.mubr.f32.mxu1 %v15392_v41  ;;  %12721 = vmatprep.subr.mxu1 %v10647_v60 }
  0x66   :  { %12722 = vmatpush3.msra.mxu1 %v10647_v60  ;;  %v15477_v60 = vld [vmem:[#allocation2 + $0x228] sm:$0xff] }
  0x67   :  { %12723 = vmatprep.subr.mxu1 %v10646_v42 }
  0x68   :  { %12514 = vmatmul.mubr.f32.gmra.mxu1 %v15407_v47 }
  0x69   :  { %12516 = vmatprep.mubr.f32.mxu1 %v15412_v50  ;;  %v353_v50 = vld [vmem:[#allocation2 + $0x1b9] sm:$0xff]  ;;  %12724 = vmatpush3.msra.mxu1 %v10646_v42 }
  0x6a   :  { %12392 = vmatmul.mubr.f32.gmra.mxu0 %v353_v50  ;;  %v15458_v50 = vld [vmem:[#allocation2 + $0x1f8] sm:$0xff]  ;;  %12725 = vmatprep.subr.mxu1 %v10645_v61 }
  0x6b   :  { %12394 = vmatprep.mubr.f32.mxu0 %v15045_v5  ;;  %v15456_v5 = vld [vmem:[#allocation2 + $0x1e8] sm:$0xff]  ;;  %12726 = vmatpush3.msra.mxu1 %v10645_v61  ;;  %v15566_v42 = vld [vmem:[#allocation2 + $0x318] sm:$0xff] }
  0x6c   :  { %12517 = vmatmul.mubr.f32.gmra.mxu1 %v15424_v53  ;;  %v1172_v61 = vld [vmem:[#allocation2 + $0xa] sm:$0xff] }
  0x6d   :  { %12519 = vmatprep.mubr.f32.mxu1 %v272_v57  ;;  %v15447_v57 = vld [vmem:[#allocation2 + $0x1e0] sm:$0xff] }
  0x6e   :  { %12395 = vmatmul.mubr.f32.gmra.mxu0 %v15050_v6  ;;  %v15467_v6 = vld [vmem:[#allocation2 + $0x200] sm:$0xff] }
  0x6f   :  { %12397 = vmatprep.mubr.f32.mxu0 %v15055_v7  ;;  %v15469_v7 = vld [vmem:[#allocation2 + $0x210] sm:$0xff] }
  0x70   :  { %12520 = vmatmul.mubr.f32.gmra.mxu1 %v21460_v0  ;;  %v15534_v0 = vld [vmem:[#allocation2 + $0x2c0] sm:$0xff] }
  0x71   :  { %12522 = vmatprep.mubr.f32.mxu1 %v15436_v58 }
  0x72   :  { %12398 = vmatmul.mubr.f32.gmra.mxu0 %v15069_v10  ;;  %v15475_v10 = vld [vmem:[#allocation2 + $0x218] sm:$0xff] }
  0x73   :  { %12400 = vmatprep.mubr.f32.mxu0 %v15076_v11  ;;  %v15483_v11 = vld [vmem:[#allocation2 + $0x230] sm:$0xff] }
  0x74   :  { %12523 = vmatmul.mubr.f32.gmra.mxu1 %v15445_v59 }
  0x75   :  { %12525 = vmatprep.mubr.f32.mxu1 %v15447_v57 }
  0x76   :  { %12401 = vmatmul.mubr.f32.gmra.mxu0 %v15081_v12  ;;  %v15485_v12 = vld [vmem:[#allocation2 + $0x240] sm:$0xff] }
  0x77   :  { %12403 = vmatprep.mubr.f32.mxu0 %v15086_v13  ;;  %v15491_v13 = vld [vmem:[#allocation2 + $0x248] sm:$0xff] }
  0x78   :  { %12526 = vmatmul.mubr.f32.gmra.mxu1 %v15456_v5 }
  0x79   :  { %12528 = vmatprep.mubr.f32.mxu1 %v15458_v50 }
  0x7a   :  { %12404 = vmatmul.mubr.f32.gmra.mxu0 %v15097_v15  ;;  %v15493_v15 = vld [vmem:[#allocation2 + $0x258] sm:$0xff] }
  0x7b   :  { %12406 = vmatprep.mubr.f32.mxu0 %v15112_v18  ;;  %v15499_v18 = vld [vmem:[#allocation2 + $0x260] sm:$0xff] }
  0x7c   :  { %12529 = vmatmul.mubr.f32.gmra.mxu1 %v15467_v6 }
  0x7d   :  { %12531 = vmatprep.mubr.f32.mxu1 %v15469_v7 }
  0x7e   :  { %12407 = vmatmul.mubr.f32.gmra.mxu0 %v15117_v19  ;;  %v15501_v19 = vld [vmem:[#allocation2 + $0x270] sm:$0xff] }
  0x7f   :  { %12409 = vmatprep.mubr.f32.mxu0 %v15122_v21  ;;  %v15507_v21 = vld [vmem:[#allocation2 + $0x278] sm:$0xff] }
  0x80   :  { %12532 = vmatmul.mubr.f32.gmra.mxu1 %v15475_v10 }
  0x81   :  { %12534 = vmatprep.mubr.f32.mxu1 %v15477_v60 }
  0x82   :  { %12410 = vmatmul.mubr.f32.gmra.mxu0 %v15132_v20  ;;  %v15509_v20 = vld [vmem:[#allocation2 + $0x288] sm:$0xff] }
  0x83   :  { %12412 = vmatprep.mubr.f32.mxu0 %v15137_v28  ;;  %v15515_v28 = vld [vmem:[#allocation2 + $0x290] sm:$0xff] }
  0x84   :  { %12535 = vmatmul.mubr.f32.gmra.mxu1 %v15483_v11 }
  0x85   :  { %12537 = vmatprep.mubr.f32.mxu1 %v15485_v12 }
  0x86   :  { %12413 = vmatmul.mubr.f32.gmra.mxu0 %v15149_v37  ;;  %v10692_v37 = vld [vmem:[%s21316_s1 + $0x2f8] sm:$0xff] }
  0x87   :  { %12415 = vmatprep.mubr.f32.mxu0 %v15154_v43  ;;  %v15520_v43 = vld [vmem:[#allocation2 + $0x2a0] sm:$0xff]  ;;  %12951 = vmatprep.subr.mxu1 %v10692_v37 }
  0x88   :  { %12538 = vmatmul.mubr.f32.gmra.mxu1 %v15491_v13 }
  0x89   :  { %12540 = vmatprep.mubr.f32.mxu1 %v15493_v15 }
  0x8a   :  { %12416 = vmatmul.mubr.f32.gmra.mxu0 %v15167_v45  ;;  %v15526_v45 = vld [vmem:[#allocation2 + $0x2a8] sm:$0xff] }
  0x8b   :  { %12418 = vmatprep.mubr.f32.mxu0 %v15176_v46  ;;  %v15528_v46 = vld [vmem:[#allocation2 + $0x2b8] sm:$0xff] }
  0x8c   :  { %12541 = vmatmul.mubr.f32.gmra.mxu1 %v15499_v18 }
  0x8d   :  { %12543 = vmatprep.mubr.f32.mxu1 %v15501_v19 }
  0x8e   :  { %12419 = vmatmul.mubr.f32.gmra.mxu0 %v15181_v48  ;;  %v15536_v48 = vld [vmem:[#allocation2 + $0x2d0] sm:$0xff] }
  0x8f   :  { %12421 = vmatprep.mubr.f32.mxu0 %v15193_v51  ;;  %v15542_v51 = vld [vmem:[#allocation2 + $0x2d8] sm:$0xff] }
  0x90   :  { %12544 = vmatmul.mubr.f32.gmra.mxu1 %v15507_v21 }
  0x91   :  { %12546 = vmatprep.mubr.f32.mxu1 %v15509_v20 }
  0x92   :  { %12422 = vmatmul.mubr.f32.gmra.mxu0 %v15205_v54  ;;  %v15544_v54 = vld [vmem:[#allocation2 + $0x2e8] sm:$0xff] }
  0x93   :  { %12424 = vmatprep.mubr.f32.mxu0 %v15219_v56  ;;  %v15550_v56 = vld [vmem:[#allocation2 + $0x2f0] sm:$0xff] }
  0x94   :  { %12547 = vmatmul.mubr.f32.gmra.mxu1 %v15515_v28 }
  0x95   :  { %12549 = vmatprep.mubr.f32.mxu1 %v15520_v43 }
  0x96   :  { %12425 = vmatmul.mubr.f32.gmra.mxu0 %v15229_v27  ;;  %v15552_v27 = vld [vmem:[#allocation2 + $0x300] sm:$0xff] }
  0x97   :  { %12427 = vmatprep.mubr.f32.mxu0 %v15237_v29  ;;  %v173_v29 = vld [vmem:[%s21317_s0 + $0x1f0] sm:$0xff] }
  0x98   :  { %12550 = vmatmul.mubr.f32.gmra.mxu1 %v15526_v45  ;;  %238 = vst [vmem:[#allocation2 + $0x331] sm:$0xff] %v173_v29  ;;  %v15577_v29 = vld [vmem:[#allocation2 + $0x1a] sm:$0xff] }
  0x99   :  { %12552 = vmatprep.mubr.f32.mxu1 %v15528_v46 }
  0x9a   :  { %12428 = vmatmul.mubr.f32.gmra.mxu0 %v15242_v2  ;;  %v15561_v2 = vld [vmem:[#allocation2 + $0x308] sm:$0xff] }
  0x9b   :  { %12430 = vmatprep.mubr.f32.mxu0 %v15261_v23  ;;  %v174_v23 = vld [vmem:[%s21317_s0 + $0x1f8] sm:$0xff] }
  0x9c   :  { %12553 = vmatmul.mubr.f32.gmra.mxu1 %v15534_v0  ;;  %239 = vst [vmem:[#allocation2 + $0x339] sm:$0xff] %v174_v23  ;;  %v15616_v23 = vld [vmem:[#allocation2 + $0x62] sm:$0xff] }
  0x9d   :  { %12555 = vmatprep.mubr.f32.mxu1 %v15536_v48 }
  0x9e   :  { %12431 = vmatmul.mubr.f32.gmra.mxu0 %v15266_v30  ;;  %v15572_v30 = vld [vmem:[#allocation2 + $0x320] sm:$0xff] }
  0x9f   :  { %12433 = vmatprep.mubr.f32.mxu0 %v15275_v32  ;;  %v1171_v32 = vld [vmem:[#allocation2 + $0x2] sm:$0xff] }
  0xa0   :  { %12556 = vmatmul.mubr.f32.gmra.mxu1 %v15542_v51 }
  0xa1   :  { %12558 = vmatprep.mubr.f32.mxu1 %v15544_v54 }
  0xa2   :  { %12434 = vmatmul.mubr.f32.gmra.mxu0 %v15284_v55  ;;  %v10675_v55 = vld [vmem:[%s21316_s1 + $0x270] sm:$0xff] }
  0xa3   :  { %12436 = vmatprep.mubr.f32.mxu0 %v15295_v9  ;;  %v15585_v9 = vld [vmem:[#allocation2 + $0x22] sm:$0xff] }
  0xa4   :  { %12559 = vmatmul.mubr.f32.gmra.mxu1 %v15550_v56 }
  0xa5   :  { %12561 = vmatprep.mubr.f32.mxu1 %v15552_v27 }
  0xa6   :  { %12437 = vmatmul.mubr.f32.gmra.mxu0 %v15305_v33  ;;  %v15588_v33 = vld [vmem:[#allocation2 + $0x32] sm:$0xff] }
  0xa7   :  { %12599 = vmatprep.mubr.f32.mxu0 %v1171_v32  ;;  %v10672_v32 = vld [vmem:[%s21316_s1 + $0x258] sm:$0xff] }
  0xa8   :  { %12562 = vmatmul.mubr.f32.gmra.mxu1 %v15561_v2 }
  0xa9   :  { %12564 = vmatprep.mubr.f32.mxu1 %v15566_v42 }
  0xaa   :  { %12600 = vmatmul.mubr.f32.vlgmr.msra.gmra.mxu0 %v1172_v61  ;;  %v15630_v61 = vld [vmem:[#allocation2 + $0x7a] sm:$0xff] }
  0xab   :  { %12824 = vmatpush3.msra.mxu0 %v15434_v63  ;;  %12602 = vmatprep.mubr.f32.mxu0 %v15577_v29  ;;  %v15602_v63 = vld [vmem:[#allocation2 + $0x4a] sm:$0xff] }
  0xac   :  { %12565 = vmatmul.mubr.f32.gmra.mxu1 %v15572_v30  ;;  %12825 = vmatprep.subr.mxu0 %v10675_v55 }
  0xad   :  { %12727 = vmatprep.mubr.f32.mxu1 %v15040_v4  ;;  %12826 = vmatpush3.msra.mxu0 %v10675_v55  ;;  %v10674_v4 = vld [vmem:[%s21316_s1 + $0x268] sm:$0xff]  ;;  %v10671_v55 = vld [vmem:[%s21316_s1 + $0x250] sm:$0xff] }
  0xae   :  { %12603 = vmatmul.mubr.f32.gmra.mxu0 %v15585_v9  ;;  %12827 = vmatprep.subr.mxu0 %v10674_v4 }
  0xaf   :  { %12605 = vmatprep.mubr.f32.mxu0 %v15588_v33  ;;  %12828 = vmatpush3.msra.mxu0 %v10674_v4  ;;  %v21461_v4 = vld [vmem:[#allocation3_spill] sm:$0xff] }
  0xb0   :  { %12728 = vmatmul.mubr.f32.vlgmr.msra.gmra.mxu1 %v15058_v8  ;;  %v10691_v8 = vld [vmem:[%s21316_s1 + $0x2f0] sm:$0xff] }
  0xb1   :  { %12730 = vmatprep.mubr.f32.mxu1 %v15089_v14  ;;  %12952 = vmatpush3.msra.mxu1 %v10692_v37  ;;  %v15599_v14 = vld [vmem:[#allocation2 + $0x3a] sm:$0xff] }
  0xb2   :  { %12953 = vmatprep.subr.mxu1 %v10691_v8  ;;  %v10673_v37 = vld [vmem:[%s21316_s1 + $0x260] sm:$0xff]  ;;  %12606 = vmatmul.mubr.f32.gmra.mxu0 %v15599_v14 }
  0xb3   :  { %12954 = vmatpush3.msra.mxu1 %v10691_v8  ;;  %12608 = vmatprep.mubr.f32.mxu0 %v15602_v63  ;;  %v21462_v8 = vld [vmem:[#allocation4_spill] sm:$0xff] }
  0xb4   :  { %12731 = vmatmul.mubr.f32.gmra.mxu1 %v15102_v16  ;;  %v10690_v16 = vld [vmem:[%s21316_s1 + $0x2e8] sm:$0xff]  ;;  %12829 = vmatprep.subr.mxu0 %v10673_v37 }
  0xb5   :  { %12733 = vmatprep.mubr.f32.mxu1 %v15124_v24  ;;  %v15613_v24 = vld [vmem:[#allocation2 + $0x52] sm:$0xff]  ;;  %12955 = vmatprep.subr.mxu1 %v10690_v16 }
  0xb6   :  { %12830 = vmatpush3.msra.mxu0 %v10673_v37  ;;  %12956 = vmatpush3.msra.mxu1 %v10690_v16  ;;  %v15644_v37 = vld [vmem:[#allocation2 + $0x92] sm:$0xff]  ;;  %v10670_v16 = vld [vmem:[%s21316_s1 + $0x248] sm:$0xff] }
  0xb7   :  { %12609 = vmatmul.mubr.f32.gmra.mxu0 %v15613_v24  ;;  %12831 = vmatprep.subr.mxu0 %v10672_v32 }
  0xb8   :  { %12734 = vmatmul.mubr.f32.gmra.mxu1 %v15158_v22  ;;  %v10689_v22 = vld [vmem:[%s21316_s1 + $0x2e0] sm:$0xff]  ;;  %12611 = vmatprep.mubr.f32.mxu0 %v15616_v23 }
  0xb9   :  { %12736 = vmatprep.mubr.f32.mxu1 %v15162_v44  ;;  %v15627_v44 = vld [vmem:[#allocation2 + $0x6a] sm:$0xff]  ;;  %12957 = vmatprep.subr.mxu1 %v10689_v22 }
  0xba   :  { %12832 = vmatpush3.msra.mxu0 %v10672_v32  ;;  %12958 = vmatpush3.msra.mxu1 %v10689_v22  ;;  %v10687_v32 = vld [vmem:[%s21316_s1 + $0x2d0] sm:$0xff] }
  0xbb   :  { %12612 = vmatmul.mubr.f32.gmra.mxu0 %v15627_v44  ;;  %12833 = vmatprep.subr.mxu0 %v10671_v55  ;;  %v21463_v22 = vld [vmem:[#allocation5_spill] sm:$0xff] }
  0xbc   :  { %12737 = vmatmul.mubr.f32.gmra.mxu1 %v15197_v25  ;;  %v10688_v25 = vld [vmem:[%s21316_s1 + $0x2d8] sm:$0xff]  ;;  %12614 = vmatprep.mubr.f32.mxu0 %v15630_v61 }
  0xbd   :  { %12739 = vmatprep.mubr.f32.mxu1 %v15200_v52  ;;  %v15641_v52 = vld [vmem:[#allocation2 + $0x82] sm:$0xff]  ;;  %12959 = vmatprep.subr.mxu1 %v10688_v25 }
  0xbe   :  { %12834 = vmatpush3.msra.mxu0 %v10671_v55  ;;  %12960 = vmatpush3.msra.mxu1 %v10688_v25  ;;  %v15658_v55 = vld [vmem:[#allocation2 + $0xaa] sm:$0xff]  ;;  %v10669_v25 = vld [vmem:[%s21316_s1 + $0x240] sm:$0xff] }
  0xbf   :  { %12615 = vmatmul.mubr.f32.gmra.mxu0 %v15641_v52  ;;  %12835 = vmatprep.subr.mxu0 %v10670_v16 }
  0xc0   :  { %12740 = vmatmul.mubr.f32.gmra.mxu1 %v21461_v4  ;;  %12617 = vmatprep.mubr.f32.mxu0 %v15644_v37  ;;  %v15655_v4 = vld [vmem:[#allocation2 + $0x9a] sm:$0xff] }
  0xc1   :  { %12742 = vmatprep.mubr.f32.mxu1 %v21462_v8  ;;  %v21464_v8 = vld [vmem:[#allocation6_spill] sm:$0xff]  ;;  %12961 = vmatprep.subr.mxu1 %v10687_v32 }
  0xc2   :  { %12836 = vmatpush3.msra.mxu0 %v10670_v16  ;;  %12962 = vmatpush3.msra.mxu1 %v10687_v32  ;;  %v15672_v16 = vld [vmem:[#allocation2 + $0xc2] sm:$0xff]  ;;  %v10668_v32 = vld [vmem:[%s21316_s1 + $0x238] sm:$0xff] }
  0xc3   :  { %12618 = vmatmul.mubr.f32.gmra.mxu0 %v15655_v4  ;;  %12837 = vmatprep.subr.mxu0 %v10669_v25 }
  0xc4   :  { %12743 = vmatmul.mubr.f32.gmra.mxu1 %v21463_v22  ;;  %v10686_v22 = vld [vmem:[%s21316_s1 + $0x2c8] sm:$0xff]  ;;  %12620 = vmatprep.mubr.f32.mxu0 %v15658_v55 }
  0xc5   :  { %12745 = vmatprep.mubr.f32.mxu1 %v21464_v8  ;;  %v15669_v8 = vld [vmem:[#allocation2 + $0xb2] sm:$0xff]  ;;  %12963 = vmatprep.subr.mxu1 %v10686_v22 }
  0xc6   :  { %12838 = vmatpush3.msra.mxu0 %v10669_v25  ;;  %12964 = vmatpush3.msra.mxu1 %v10686_v22  ;;  %v15686_v25 = vld [vmem:[#allocation2 + $0xda] sm:$0xff]  ;;  %v10667_v22 = vld [vmem:[%s21316_s1 + $0x230] sm:$0xff] }
  0xc7   :  { %12621 = vmatmul.mubr.f32.gmra.mxu0 %v15669_v8  ;;  %12839 = vmatprep.subr.mxu0 %v10668_v32 }
  0xc8   :  { %12746 = vmatmul.mubr.f32.gmra.mxu1 %v15299_v1  ;;  %v10685_v1 = vld [vmem:[%s21316_s1 + $0x2c0] sm:$0xff]  ;;  %12623 = vmatprep.mubr.f32.mxu0 %v15672_v16 }
  0xc9   :  { %12748 = vmatprep.mubr.f32.mxu1 %v15307_v31  ;;  %v15683_v31 = vld [vmem:[#allocation2 + $0xca] sm:$0xff]  ;;  %12965 = vmatprep.subr.mxu1 %v10685_v1 }
  0xca   :  { %12840 = vmatpush3.msra.mxu0 %v10668_v32  ;;  %12966 = vmatpush3.msra.mxu1 %v10685_v1  ;;  %v15700_v32 = vld [vmem:[#allocation2 + $0xf2] sm:$0xff]  ;;  %v10666_v1 = vld [vmem:[%s21316_s1 + $0x228] sm:$0xff] }
  0xcb   :  { %12624 = vmatmul.mubr.f32.gmra.mxu0 %v15683_v31  ;;  %12841 = vmatprep.subr.mxu0 %v10667_v22 }
  0xcc   :  { %12749 = vmatmul.mubr.f32.gmra.mxu1 %v15320_v17  ;;  %v10684_v17 = vld [vmem:[%s21316_s1 + $0x2b8] sm:$0xff]  ;;  %12626 = vmatprep.mubr.f32.mxu0 %v15686_v25 }
  0xcd   :  { %12751 = vmatprep.mubr.f32.mxu1 %v15322_v62  ;;  %v15697_v62 = vld [vmem:[#allocation2 + $0xe2] sm:$0xff]  ;;  %12967 = vmatprep.subr.mxu1 %v10684_v17 }
  0xce   :  { %21465 = vst [vmem:[#allocation3_spill] sm:$0xff] %v15697_v62  ;;  %12842 = vmatpush3.msra.mxu0 %v10667_v22  ;;  %12968 = vmatpush3.msra.mxu1 %v10684_v17  ;;  %v1193_v22 = vld [vmem:[#allocation2 + $0x10a] sm:$0xff]  ;;  %v10665_v17 = vld [vmem:[%s21316_s1 + $0x220] sm:$0xff] }
  0xcf   :  { %12627 = vmatmul.mubr.f32.gmra.mxu0 %v15697_v62  ;;  %12843 = vmatprep.subr.mxu0 %v10666_v1  ;;  %v10682_v62 = vld [vmem:[%s21316_s1 + $0x2a8] sm:$0xff] }
  0xd0   :  { %12752 = vmatmul.mubr.f32.gmra.mxu1 %v15334_v3  ;;  %v10683_v3 = vld [vmem:[%s21316_s1 + $0x2b0] sm:$0xff]  ;;  %12629 = vmatprep.mubr.f32.mxu0 %v15700_v32 }
  0xd1   :  { %12754 = vmatprep.mubr.f32.mxu1 %v15336_v26  ;;  %v15711_v26 = vld [vmem:[#allocation2 + $0xfa] sm:$0xff]  ;;  %12969 = vmatprep.subr.mxu1 %v10683_v3 }
  0xd2   :  { %12844 = vmatpush3.msra.mxu0 %v10666_v1  ;;  %12970 = vmatpush3.msra.mxu1 %v10683_v3  ;;  %v10664_v1 = vld [vmem:[%s21316_s1 + $0x218] sm:$0xff]  ;;  %v10681_v3 = vld [vmem:[%s21316_s1 + $0x2a0] sm:$0xff] }
  0xd3   :  { %12630 = vmatmul.mubr.f32.gmra.mxu0 %v15711_v26  ;;  %12845 = vmatprep.subr.mxu0 %v10665_v17 }
  0xd4   :  { %12755 = vmatmul.mubr.f32.gmra.mxu1 %v15348_v49  ;;  %12632 = vmatprep.mubr.f32.mxu0 %v1193_v22  ;;  %v1194_v49 = vld [vmem:[#allocation2 + $0x112] sm:$0xff] }
  0xd5   :  { %12757 = vmatprep.mubr.f32.mxu1 %v15350_v34  ;;  %v1195_v34 = vld [vmem:[#allocation2 + $0x122] sm:$0xff]  ;;  %12971 = vmatprep.subr.mxu1 %v10682_v62  ;;  %v10663_v22 = vld [vmem:[%s21316_s1 + $0x210] sm:$0xff] }
  0xd6   :  { %12846 = vmatpush3.msra.mxu0 %v10665_v17  ;;  %12972 = vmatpush3.msra.mxu1 %v10682_v62  ;;  %v10680_v62 = vld [vmem:[%s21316_s1 + $0x298] sm:$0xff]  ;;  %v10662_v17 = vld [vmem:[%s21316_s1 + $0x208] sm:$0xff] }
  0xd7   :  { %12633 = vmatmul.mubr.f32.gmra.mxu0 %v1194_v49  ;;  %12847 = vmatprep.subr.mxu0 %v10664_v1  ;;  %v10679_v49 = vld [vmem:[%s21316_s1 + $0x290] sm:$0xff] }
  0xd8   :  { %12758 = vmatmul.mubr.f32.gmra.mxu1 %v15362_v35  ;;  %12635 = vmatprep.mubr.f32.mxu0 %v1195_v34  ;;  %v1196_v35 = vld [vmem:[#allocation2 + $0x12a] sm:$0xff]  ;;  %v21466_v34 = vld [vmem:[#allocation7_spill] sm:$0xff] }
  0xd9   :  { %12760 = vmatprep.mubr.f32.mxu1 %v15364_v36  ;;  %v1197_v36 = vld [vmem:[#allocation2 + $0x13a] sm:$0xff]  ;;  %12973 = vmatprep.subr.mxu1 %v10681_v3 }
  0xda   :  { %12848 = vmatpush3.msra.mxu0 %v10664_v1  ;;  %12974 = vmatpush3.msra.mxu1 %v10681_v3  ;;  %v1731_v1 = vld [vmem:[#allocation2 + $0x180] sm:$0xff] }
  0xdb   :  { %12636 = vmatmul.mubr.f32.gmra.mxu0 %v1196_v35  ;;  %12849 = vmatprep.subr.mxu0 %v10663_v22  ;;  %v10661_v3 = vld [vmem:[%s21316_s1 + $0x200] sm:$0xff]  ;;  %v10678_v35 = vld [vmem:[%s21316_s1 + $0x288] sm:$0xff] }
  0xdc   :  { %12761 = vmatmul.mubr.f32.gmra.mxu1 %v15376_v38  ;;  %12638 = vmatprep.mubr.f32.mxu0 %v1197_v36  ;;  %v1198_v38 = vld [vmem:[#allocation2 + $0x142] sm:$0xff] }
  0xdd   :  { %12763 = vmatprep.mubr.f32.mxu1 %v15378_v39  ;;  %v1199_v39 = vld [vmem:[#allocation2 + $0x152] sm:$0xff]  ;;  %12975 = vmatprep.subr.mxu1 %v10680_v62  ;;  %v1732_v36 = vld [vmem:[#allocation2 + $0x188] sm:$0xff] }
  0xde   :  { %12850 = vmatpush3.msra.mxu0 %v10663_v22  ;;  %12976 = vmatpush3.msra.mxu1 %v10680_v62  ;;  %v1203_v22 = vld [vmem:[#allocation2 + $0x1b2] sm:$0xff]  ;;  %v10677_v62 = vld [vmem:[%s21316_s1 + $0x280] sm:$0xff] }
  0xdf   :  { %12639 = vmatmul.mubr.f32.gmra.mxu0 %v1198_v38  ;;  %12851 = vmatprep.subr.mxu0 %v10662_v17  ;;  %v15760_v38 = vld [vmem:[%s21316_s1 + $0x378] sm:$0xff] }
  0xe0   :  { %12764 = vmatmul.mubr.f32.gmra.mxu1 %v15390_v40  ;;  %12641 = vmatprep.mubr.f32.mxu0 %v1199_v39  ;;  %v1200_v40 = vld [vmem:[#allocation2 + $0x15a] sm:$0xff]  ;;  %v1205_v39 = vld [vmem:[#allocation2 + $0x1ca] sm:$0xff] }
  0xe1   :  { %12766 = vmatprep.mubr.f32.mxu1 %v15392_v41  ;;  %v1201_v41 = vld [vmem:[#allocation2 + $0x16a] sm:$0xff]  ;;  %12977 = vmatprep.subr.mxu1 %v10679_v49 }
  0xe2   :  { %12852 = vmatpush3.msra.mxu0 %v10662_v17  ;;  %12978 = vmatpush3.msra.mxu1 %v10679_v49 }
  0xe3   :  { %12642 = vmatmul.mubr.f32.gmra.mxu0 %v1200_v40  ;;  %12853 = vmatprep.subr.mxu0 %v10661_v3  ;;  %v12345_v17 = vpop.f32.mrf.mxu0 }
  0xe4   :  { %12767 = vmatmul.mubr.f32.gmra.mxu1 %v15407_v47  ;;  %12644 = vmatprep.mubr.f32.mxu0 %v1201_v41  ;;  %v1202_v47 = vld [vmem:[#allocation2 + $0x172] sm:$0xff] }
  0xe5   :  { %12769 = vmatprep.mubr.f32.mxu1 %v21466_v34  ;;  %12979 = vmatprep.subr.mxu1 %v10678_v35  ;;  %v1206_v34 = vld [vmem:[#allocation2 + $0x1d2] sm:$0xff]  ;;  %v467_v41 = vpop.f32.mrf.mxu0 }
  0xe6   :  { %12854 = vmatpush3.msra.mxu0 %v10661_v3  ;;  %12980 = vmatpush3.msra.mxu1 %v10678_v35  ;;  %v1207_v3 = vld [vmem:[#allocation2 + $0x1e2] sm:$0xff] }
  0xe7   :  { %12645 = vmatmul.mubr.f32.gmra.mxu0 %v1202_v47  ;;  %12981 = vmatprep.subr.mxu1 %v10677_v62  ;;  %v12348_v35 = vpop.f32.mrf.mxu0 }
  0xe8   :  { %12770 = vmatmul.mubr.f32.gmra.mxu1 %v15424_v53  ;;  %12647 = vmatprep.mubr.f32.mxu0 %v1203_v22  ;;  %v1204_v53 = vld [vmem:[#allocation2 + $0x1ba] sm:$0xff] }
  0xe9   :  { %12772 = vmatprep.mubr.f32.mxu1 %v1731_v1  ;;  %13079 = vmatprep.subr.mxu0 %v15760_v38  ;;  %v477_v22 = vpop.f32.mrf.mxu0 }
  0xea   :  { %12982 = vmatpush3.msra.mxu1 %v10677_v62 }
  0xeb   :  { %12648 = vmatmul.mubr.f32.gmra.mxu0 %v1204_v53  ;;  %v1209_v53 = vld [vmem:[#allocation2 + $0x1fa] sm:$0xff] }
  0xec   :  { %12773 = vmatmul.mubr.f32.gmra.mxu1 %v1732_v36  ;;  %12650 = vmatprep.mubr.f32.mxu0 %v1205_v39  ;;  %v12351_v39 = vpop.f32.mrf.mxu0 }
  0xed   :  { %12775 = vmatprep.mubr.f32.mxu1 %v15436_v58 }
  0xef   :  { %12651 = vmatmul.mubr.f32.gmra.mxu0 %v1206_v34  ;;  %v487_v34 = vpop.f32.mrf.mxu0 }
  0xf0   :  { %v12473_v49 = vpop.f32.mrf.mxu1  ;;  %12776 = vmatmul.mubr.f32.gmra.mxu1 %v15445_v59  ;;  %12653 = vmatprep.mubr.f32.mxu0 %v1207_v3  ;;  %v1208_v59 = vld [vmem:[#allocation2 + $0x1ea] sm:$0xff] }
  0xf1   :  { %v15765_v40 = vadd.f32 %v12473_v49, %v12345_v17  ;;  %12778 = vmatprep.mubr.f32.mxu1 %v15447_v57  ;;  %v12354_v3 = vpop.f32.mrf.mxu0 }
  0xf2   :  { %v852_v1 = vpop.f32.mrf.mxu1 }
  0xf3   :  { %v15768_v58 = vadd.f32 %v852_v1, %v467_v41  ;;  %12654 = vmatmul.mubr.f32.gmra.mxu0 %v1208_v59  ;;  %v1211_v1 = vld [vmem:[#allocation2 + $0x212] sm:$0xff]  ;;  %v497_v59 = vpop.f32.mrf.mxu0 }
  0xf4   :  { %v12476_v47 = vpop.f32.mrf.mxu1  ;;  %12779 = vmatmul.mubr.f32.gmra.mxu1 %v15456_v5  ;;  %12656 = vmatprep.mubr.f32.mxu0 %v1209_v53  ;;  %v1210_v5 = vld [vmem:[#allocation2 + $0x202] sm:$0xff] }
  0xf5   :  { %v15771_v36 = vadd.f32 %v12476_v47, %v12348_v35  ;;  %12781 = vmatprep.mubr.f32.mxu1 %v15458_v50  ;;  %v12357_v53 = vpop.f32.mrf.mxu0 }
  0xf6   :  { %v862_v62 = vpop.f32.mrf.mxu1 }
  0xf7   :  { %v15774_v57 = vadd.f32 %v862_v62, %v477_v22  ;;  %12657 = vmatmul.mubr.f32.gmra.mxu0 %v1210_v5  ;;  %v1213_v62 = vld [vmem:[#allocation2 + $0x22a] sm:$0xff]  ;;  %v507_v5 = vpop.f32.mrf.mxu0 }
  0xf8   :  { %v12479_v17 = vpop.f32.mrf.mxu1  ;;  %12782 = vmatmul.mubr.f32.gmra.mxu1 %v15467_v6  ;;  %12659 = vmatprep.mubr.f32.mxu0 %v1211_v1  ;;  %v1212_v6 = vld [vmem:[#allocation2 + $0x21a] sm:$0xff] }
  0xf9   :  { %v15777_v49 = vadd.f32 %v12479_v17, %v12351_v39  ;;  %12784 = vmatprep.mubr.f32.mxu1 %v15469_v7  ;;  %v12360_v1 = vpop.f32.mrf.mxu0 }
  0xfa   :  { %v872_v41 = vpop.f32.mrf.mxu1 }
  0xfb   :  { %v15780_v50 = vadd.f32 %v872_v41, %v487_v34  ;;  %12660 = vmatmul.mubr.f32.gmra.mxu0 %v1212_v6  ;;  %v1215_v41 = vld [vmem:[#allocation2 + $0x242] sm:$0xff]  ;;  %v517_v6 = vpop.f32.mrf.mxu0 }
  0xfc   :  { %v12482_v35 = vpop.f32.mrf.mxu1  ;;  %12785 = vmatmul.mubr.f32.gmra.mxu1 %v15475_v10  ;;  %12662 = vmatprep.mubr.f32.mxu0 %v1213_v62  ;;  %v1214_v10 = vld [vmem:[#allocation2 + $0x232] sm:$0xff] }
  0xfd   :  { %v15783_v47 = vadd.f32 %v12482_v35, %v12354_v3  ;;  %12787 = vmatprep.mubr.f32.mxu1 %v15477_v60  ;;  %v12363_v62 = vpop.f32.mrf.mxu0 }
  0xfe   :  { %v882_v22 = vpop.f32.mrf.mxu1 }
  0xff   :  { %v15786_v7 = vadd.f32 %v882_v22, %v497_v59  ;;  %12663 = vmatmul.mubr.f32.gmra.mxu0 %v1214_v10  ;;  %v1217_v22 = vld [vmem:[#allocation2 + $0x25a] sm:$0xff]  ;;  %v527_v10 = vpop.f32.mrf.mxu0 }
 0x100   :  { %v12485_v39 = vpop.f32.mrf.mxu1  ;;  %12788 = vmatmul.mubr.f32.gmra.mxu1 %v15483_v11  ;;  %12665 = vmatprep.mubr.f32.mxu0 %v1215_v41  ;;  %v1216_v11 = vld [vmem:[#allocation2 + $0x24a] sm:$0xff] }
 0x101   :  { %v15789_v17 = vadd.f32 %v12485_v39, %v12357_v53  ;;  %12790 = vmatprep.mubr.f32.mxu1 %v15485_v12  ;;  %v12366_v41 = vpop.f32.mrf.mxu0 }
 0x102   :  { %v892_v34 = vpop.f32.mrf.mxu1 }
 0x103   :  { %v15792_v60 = vadd.f32 %v892_v34, %v507_v5  ;;  %12666 = vmatmul.mubr.f32.gmra.mxu0 %v1216_v11  ;;  %v1219_v34 = vld [vmem:[#allocation2 + $0x272] sm:$0xff]  ;;  %v537_v11 = vpop.f32.mrf.mxu0 }
 0x104   :  { %v12488_v3 = vpop.f32.mrf.mxu1  ;;  %12791 = vmatmul.mubr.f32.gmra.mxu1 %v15491_v13  ;;  %12668 = vmatprep.mubr.f32.mxu0 %v1217_v22  ;;  %v1218_v13 = vld [vmem:[#allocation2 + $0x262] sm:$0xff] }
 0x105   :  { %v15795_v35 = vadd.f32 %v12488_v3, %v12360_v1  ;;  %12793 = vmatprep.mubr.f32.mxu1 %v15493_v15  ;;  %v12369_v22 = vpop.f32.mrf.mxu0 }
 0x106   :  { %v902_v59 = vpop.f32.mrf.mxu1 }
 0x107   :  { %v15798_v12 = vadd.f32 %v902_v59, %v517_v6  ;;  %12669 = vmatmul.mubr.f32.gmra.mxu0 %v1218_v13  ;;  %v1221_v59 = vld [vmem:[#allocation2 + $0x28a] sm:$0xff]  ;;  %v547_v13 = vpop.f32.mrf.mxu0 }
 0x108   :  { %v12491_v53 = vpop.f32.mrf.mxu1  ;;  %12794 = vmatmul.mubr.f32.gmra.mxu1 %v15499_v18  ;;  %12671 = vmatprep.mubr.f32.mxu0 %v1219_v34  ;;  %v1220_v18 = vld [vmem:[#allocation2 + $0x27a] sm:$0xff] }
 0x109   :  { %v15801_v39 = vadd.f32 %v12491_v53, %v12363_v62  ;;  %12796 = vmatprep.mubr.f32.mxu1 %v15501_v19 }
 0x10a   :  { %v912_v5 = vpop.f32.mrf.mxu1 }
 0x10b   :  { %v15804_v15 = vadd.f32 %v912_v5, %v527_v10  ;;  %12672 = vmatmul.mubr.f32.gmra.mxu0 %v1220_v18  ;;  %v1223_v5 = vld [vmem:[#allocation2 + $0x2a2] sm:$0xff] }
 0x10c   :  { %v12494_v1 = vpop.f32.mrf.mxu1  ;;  %12797 = vmatmul.mubr.f32.gmra.mxu1 %v15507_v21  ;;  %12674 = vmatprep.mubr.f32.mxu0 %v1221_v59  ;;  %v1222_v21 = vld [vmem:[#allocation2 + $0x292] sm:$0xff] }
 0x10d   :  { %v15807_v3 = vadd.f32 %v12494_v1, %v12366_v41  ;;  %12799 = vmatprep.mubr.f32.mxu1 %v15509_v20  ;;  %v15819_v20 = vld [vmem:[%s21316_s1 + $0x3f8] sm:$0xff]  ;;  %v12372_v41 = vpop.f32.mrf.mxu0 }
 0x10e   :  { %v922_v6 = vpop.f32.mrf.mxu1  ;;  %13207 = vmatprep.subr.mxu1 %v15819_v20 }
 0x10f   :  { %v15810_v19 = vadd.f32 %v922_v6, %v537_v11  ;;  %12675 = vmatmul.mubr.f32.gmra.mxu0 %v1222_v21  ;;  %v557_v18 = vpop.f32.mrf.mxu0  ;;  %v1225_v6 = vld [vmem:[#allocation2 + $0x2ba] sm:$0xff] }
 0x110   :  { %v12497_v62 = vpop.f32.mrf.mxu1  ;;  %12800 = vmatmul.mubr.f32.gmra.mxu1 %v15515_v28  ;;  %12677 = vmatprep.mubr.f32.mxu0 %v1223_v5  ;;  %v1227_v5 = vld [vmem:[#allocation2 + $0x2d2] sm:$0xff] }
 0x111   :  { %v15813_v53 = vadd.f32 %v12497_v62, %v12369_v22  ;;  %12802 = vmatprep.mubr.f32.mxu1 %v15520_v43  ;;  %v1224_v43 = vld [vmem:[#allocation2 + $0x2aa] sm:$0xff]  ;;  %v12375_v22 = vpop.f32.mrf.mxu0 }
 0x112   :  { %v932_v10 = vpop.f32.mrf.mxu1 }
 0x113   :  { %v15822_v34 = vadd.f32 %v932_v10, %v547_v13  ;;  %12678 = vmatmul.mubr.f32.gmra.mxu0 %v1224_v43  ;;  %v567_v21 = vpop.f32.mrf.mxu0 }
 0x114   :  { %v12500_v28 = vpop.f32.mrf.mxu1  ;;  %12803 = vmatmul.mubr.f32.gmra.mxu1 %v15526_v45  ;;  %12680 = vmatprep.mubr.f32.mxu0 %v1225_v6  ;;  %v1226_v45 = vld [vmem:[#allocation2 + $0x2c2] sm:$0xff]  ;;  %v1229_v6 = vld [vmem:[#allocation2 + $0x2ea] sm:$0xff] }
 0x115   :  { %v15825_v1 = vadd.f32 %v12500_v28, %v12372_v41  ;;  %12805 = vmatprep.mubr.f32.mxu1 %v15528_v46  ;;  %v12378_v41 = vpop.f32.mrf.mxu0 }
 0x116   :  { %v942_v11 = vpop.f32.mrf.mxu1 }
 0x117   :  { %v15828_v59 = vadd.f32 %v942_v11, %v557_v18  ;;  %12681 = vmatmul.mubr.f32.gmra.mxu0 %v1226_v45  ;;  %v577_v43 = vpop.f32.mrf.mxu0 }
 0x118   :  { %v12503_v62 = vpop.f32.mrf.mxu1  ;;  %12806 = vmatmul.mubr.f32.gmra.mxu1 %v15534_v0  ;;  %12683 = vmatprep.mubr.f32.mxu0 %v1227_v5  ;;  %v1228_v0 = vld [vmem:[#allocation2 + $0x2da] sm:$0xff]  ;;  %v1231_v5 = vld [vmem:[#allocation2 + $0x302] sm:$0xff] }
 0x119   :  { %v15831_v13 = vadd.f32 %v12503_v62, %v12375_v22  ;;  %12808 = vmatprep.mubr.f32.mxu1 %v15536_v48  ;;  %v12381_v22 = vpop.f32.mrf.mxu0 }
 0x11a   :  { %v952_v10 = vpop.f32.mrf.mxu1 }
 0x11b   :  { %v15834_v46 = vadd.f32 %v952_v10, %v567_v21  ;;  %12684 = vmatmul.mubr.f32.gmra.mxu0 %v1228_v0  ;;  %v587_v45 = vpop.f32.mrf.mxu0 }
 0x11c   :  { %v12506_v28 = vpop.f32.mrf.mxu1  ;;  %12809 = vmatmul.mubr.f32.gmra.mxu1 %v15542_v51  ;;  %12686 = vmatprep.mubr.f32.mxu0 %v1229_v6  ;;  %v1230_v51 = vld [vmem:[#allocation2 + $0x2f2] sm:$0xff]  ;;  %v1233_v6 = vld [vmem:[#allocation2 + $0x31a] sm:$0xff] }
 0x11d   :  { %v15837_v18 = vadd.f32 %v12506_v28, %v12378_v41  ;;  %12811 = vmatprep.mubr.f32.mxu1 %v15544_v54  ;;  %v12384_v41 = vpop.f32.mrf.mxu0 }
 0x11e   :  { %v962_v11 = vpop.f32.mrf.mxu1 }
 0x11f   :  { %v15840_v48 = vadd.f32 %v962_v11, %v577_v43  ;;  %12687 = vmatmul.mubr.f32.gmra.mxu0 %v1230_v51  ;;  %v597_v0 = vpop.f32.mrf.mxu0 }
 0x120   :  { %v12509_v62 = vpop.f32.mrf.mxu1  ;;  %12812 = vmatmul.mubr.f32.gmra.mxu1 %v15550_v56  ;;  %12689 = vmatprep.mubr.f32.mxu0 %v1231_v5  ;;  %v1232_v56 = vld [vmem:[#allocation2 + $0x30a] sm:$0xff] }
 0x121   :  { %v15843_v21 = vadd.f32 %v12509_v62, %v12381_v22  ;;  %12814 = vmatprep.mubr.f32.mxu1 %v15552_v27  ;;  %v1763_v27 = vld [vmem:[#allocation2 + $0x330] sm:$0xff]  ;;  %v12387_v62 = vpop.f32.mrf.mxu0 }
 0x122   :  { %v972_v10 = vpop.f32.mrf.mxu1 }
 0x123   :  { %v15846_v54 = vadd.f32 %v972_v10, %v587_v45  ;;  %12690 = vmatmul.mubr.f32.gmra.mxu0 %v1232_v56  ;;  %v1764_v10 = vld [vmem:[#allocation2 + $0x338] sm:$0xff]  ;;  %v607_v5 = vpop.f32.mrf.mxu0  ;;  %v2232_v56 = vld [vmem:[#allocation2 + $0x21] sm:$0xff] }
 0x124   :  { %v12512_v28 = vpop.f32.mrf.mxu1  ;;  %12815 = vmatmul.mubr.f32.gmra.mxu1 %v15561_v2  ;;  %12692 = vmatprep.mubr.f32.mxu0 %v1233_v6  ;;  %v1234_v2 = vld [vmem:[#allocation2 + $0x322] sm:$0xff]  ;;  %v2233_v6 = vld [vmem:[#allocation2 + $0x31] sm:$0xff] }
 0x125   :  { %21467 = vst [vmem:[#allocation4_spill] sm:$0xff] %v15846_v54  ;;  %v15849_v43 = vadd.f32 %v12512_v28, %v12384_v41  ;;  %12817 = vmatprep.mubr.f32.mxu1 %v15566_v42  ;;  %v2231_v42 = vld [vmem:[#allocation2 + $0x19] sm:$0xff] }
 0x126   :  { %v982_v11 = vpop.f32.mrf.mxu1 }
 0x127   :  { %21468 = vst [vmem:[#allocation5_spill] sm:$0xff] %v15849_v43  ;;  %v15852_v22 = vadd.f32 %v982_v11, %v597_v0  ;;  %v12390_v43 = vpop.f32.mrf.mxu0  ;;  %12693 = vmatmul.mubr.f32.gmra.mxu0 %v1234_v2 }
 0x128   :  { %v12515_v45 = vpop.f32.mrf.mxu1  ;;  %12818 = vmatmul.mubr.f32.gmra.mxu1 %v15572_v30  ;;  %12855 = vmatprep.mubr.f32.mxu0 %v2231_v42  ;;  %v10706_v42 = vld [vmem:[%s21316_s1 + $0x368] sm:$0xff] }
 0x129   :  { %v15855_v51 = vadd.f32 %v12515_v45, %v12387_v62  ;;  %12820 = vmatprep.mubr.f32.mxu1 %v1763_v27  ;;  %v617_v30 = vpop.f32.mrf.mxu0  ;;  %v10707_v62 = vld [vmem:[%s21316_s1 + $0x370] sm:$0xff] }
 0x12a   :  { %v992_v41 = vpop.f32.mrf.mxu1 }
 0x12b   :  { %v15857_v28 = vadd.f32 %v992_v41, %v607_v5  ;;  %v12393_v45 = vpop.f32.mrf.mxu0  ;;  %12856 = vmatmul.mubr.f32.vlgmr.msra.gmra.mxu0 %v2232_v56 }
 0x12c   :  { %v12518_v54 = vpop.f32.mrf.mxu1  ;;  %12821 = vmatmul.mubr.f32.gmra.mxu1 %v1764_v10  ;;  %13080 = vmatpush3.msra.mxu0 %v15760_v38  ;;  %v2235_v10 = vld [vmem:[#allocation2 + $0x49] sm:$0xff] }
 0x12d   :  { %v15859_v0 = vadd.f32 %v12518_v54, %v12390_v43  ;;  %12983 = vmatprep.mubr.f32.mxu1 %v15577_v29  ;;  %12858 = vmatprep.mubr.f32.mxu0 %v2233_v6  ;;  %v2234_v29 = vld [vmem:[#allocation2 + $0x39] sm:$0xff]  ;;  %v627_v43 = vpop.f32.mrf.mxu0 }
 0x12e   :  { %v1002_v11 = vpop.f32.mrf.mxu1  ;;  %13081 = vmatprep.subr.mxu0 %v10707_v62 }
 0x12f   :  { %v15862_v27 = vadd.f32 %v1002_v11, %v617_v30  ;;  %13082 = vmatpush3.msra.mxu0 %v10707_v62  ;;  %v12396_v38 = vpop.f32.mrf.mxu0  ;;  %v2236_v30 = vld [vmem:[#allocation2 + $0x51] sm:$0xff]  ;;  %v2237_v62 = vld [vmem:[#allocation2 + $0x61] sm:$0xff] }
 0x130   :  { %v12521_v5 = vpop.f32.mrf.mxu1  ;;  %12984 = vmatmul.mubr.f32.vlgmr.msra.gmra.mxu1 %v15585_v9  ;;  %v10723_v9 = vld [vmem:[%s21316_s1 + $0x3f0] sm:$0xff]  ;;  %12859 = vmatmul.mubr.f32.gmra.mxu0 %v2234_v29 }
 0x131   :  { %v15868_v54 = vadd.f32 %v12521_v5, %v12393_v45  ;;  %12986 = vmatprep.mubr.f32.mxu1 %v15588_v33  ;;  %13208 = vmatpush3.msra.mxu1 %v15819_v20  ;;  %v637_v11 = vpop.f32.mrf.mxu0  ;;  %v10705_v45 = vld [vmem:[%s21316_s1 + $0x360] sm:$0xff] }
 0x132   :  { %v1012_v2 = vpop.f32.mrf.mxu1  ;;  %12861 = vmatprep.mubr.f32.mxu0 %v2235_v10  ;;  %13083 = vmatprep.subr.mxu0 %v10706_v42 }
 0x133   :  { %v15872_v41 = vadd.f32 %v1012_v2, %v627_v43  ;;  %13209 = vmatprep.subr.mxu1 %v10723_v9  ;;  %13084 = vmatpush3.msra.mxu0 %v10706_v42  ;;  %v12399_v5 = vpop.f32.mrf.mxu0  ;;  %v2238_v43 = vld [vmem:[#allocation2 + $0x69] sm:$0xff]  ;;  %v2239_v42 = vld [vmem:[#allocation2 + $0x79] sm:$0xff] }
 0x134   :  { %v12524_v56 = vpop.f32.mrf.mxu1  ;;  %12987 = vmatmul.mubr.f32.gmra.mxu1 %v15599_v14  ;;  %v10722_v14 = vld [vmem:[%s21316_s1 + $0x3e8] sm:$0xff]  ;;  %12862 = vmatmul.mubr.f32.gmra.mxu0 %v2236_v30 }
 0x135   :  { %v15882_v33 = vadd.f32 %v12524_v56, %v12396_v38  ;;  %12989 = vmatprep.mubr.f32.mxu1 %v15602_v63  ;;  %13210 = vmatpush3.msra.mxu1 %v10723_v9  ;;  %v647_v2 = vpop.f32.mrf.mxu0  ;;  %v10704_v38 = vld [vmem:[%s21316_s1 + $0x358] sm:$0xff] }
 0x136   :  { %v1022_v6 = vpop.f32.mrf.mxu1  ;;  %12864 = vmatprep.mubr.f32.mxu0 %v2237_v62  ;;  %13085 = vmatprep.subr.mxu0 %v10705_v45 }
 0x137   :  { %v15885_v20 = vadd.f32 %v1022_v6, %v637_v11  ;;  %13211 = vmatprep.subr.mxu1 %v10722_v14  ;;  %13086 = vmatpush3.msra.mxu0 %v10705_v45  ;;  %v12402_v56 = vpop.f32.mrf.mxu0  ;;  %v2240_v11 = vld [vmem:[#allocation2 + $0x81] sm:$0xff]  ;;  %v2241_v45 = vld [vmem:[#allocation2 + $0x91] sm:$0xff] }
 0x138   :  { %v12527_v29 = vpop.f32.mrf.mxu1  ;;  %12990 = vmatmul.mubr.f32.gmra.mxu1 %v15613_v24  ;;  %v10721_v24 = vld [vmem:[%s21316_s1 + $0x3e0] sm:$0xff]  ;;  %12865 = vmatmul.mubr.f32.gmra.mxu0 %v2238_v43 }
 0x139   :  { %v15894_v63 = vadd.f32 %v12527_v29, %v12399_v5  ;;  %12992 = vmatprep.mubr.f32.mxu1 %v15616_v23  ;;  %13212 = vmatpush3.msra.mxu1 %v10722_v14  ;;  %v657_v6 = vpop.f32.mrf.mxu0  ;;  %v10703_v5 = vld [vmem:[%s21316_s1 + $0x350] sm:$0xff] }
 0x13a   :  { %v1032_v10 = vpop.f32.mrf.mxu1  ;;  %12867 = vmatprep.mubr.f32.mxu0 %v2239_v42  ;;  %13087 = vmatprep.subr.mxu0 %v10704_v38 }
 0x13b   :  { %v15897_v9 = vadd.f32 %v1032_v10, %v647_v2  ;;  %13213 = vmatprep.subr.mxu1 %v10721_v24  ;;  %13088 = vmatpush3.msra.mxu0 %v10704_v38  ;;  %v12405_v29 = vpop.f32.mrf.mxu0  ;;  %v2242_v2 = vld [vmem:[#allocation2 + $0x99] sm:$0xff]  ;;  %v2243_v38 = vld [vmem:[#allocation2 + $0xa9] sm:$0xff] }
 0x13c   :  { %v12530_v30 = vpop.f32.mrf.mxu1  ;;  %12993 = vmatmul.mubr.f32.gmra.mxu1 %v15627_v44  ;;  %v10720_v44 = vld [vmem:[%s21316_s1 + $0x3d8] sm:$0xff]  ;;  %12868 = vmatmul.mubr.f32.gmra.mxu0 %v2240_v11 }
 0x13d   :  { %v15906_v23 = vadd.f32 %v12530_v30, %v12402_v56  ;;  %12995 = vmatprep.mubr.f32.mxu1 %v15630_v61  ;;  %13214 = vmatpush3.msra.mxu1 %v10721_v24  ;;  %v667_v10 = vpop.f32.mrf.mxu0  ;;  %v10702_v56 = vld [vmem:[%s21316_s1 + $0x348] sm:$0xff] }
 0x13e   :  { %v1042_v62 = vpop.f32.mrf.mxu1  ;;  %12870 = vmatprep.mubr.f32.mxu0 %v2241_v45  ;;  %13089 = vmatprep.subr.mxu0 %v10703_v5 }
 0x13f   :  { %v15909_v14 = vadd.f32 %v1042_v62, %v657_v6  ;;  %13215 = vmatprep.subr.mxu1 %v10720_v44  ;;  %13090 = vmatpush3.msra.mxu0 %v10703_v5  ;;  %v12408_v30 = vpop.f32.mrf.mxu0  ;;  %v2244_v6 = vld [vmem:[#allocation2 + $0xb1] sm:$0xff]  ;;  %v2245_v5 = vld [vmem:[#allocation2 + $0xc1] sm:$0xff] }
 0x140   :  { %v12533_v43 = vpop.f32.mrf.mxu1  ;;  %12996 = vmatmul.mubr.f32.gmra.mxu1 %v15641_v52  ;;  %v10719_v52 = vld [vmem:[%s21316_s1 + $0x3d0] sm:$0xff]  ;;  %12871 = vmatmul.mubr.f32.gmra.mxu0 %v2242_v2 }
 0x141   :  { %v15918_v61 = vadd.f32 %v12533_v43, %v12405_v29  ;;  %12998 = vmatprep.mubr.f32.mxu1 %v15644_v37  ;;  %13216 = vmatpush3.msra.mxu1 %v10720_v44  ;;  %v677_v62 = vpop.f32.mrf.mxu0  ;;  %v10701_v29 = vld [vmem:[%s21316_s1 + $0x340] sm:$0xff] }
 0x142   :  { %v1052_v42 = vpop.f32.mrf.mxu1  ;;  %12873 = vmatprep.mubr.f32.mxu0 %v2243_v38  ;;  %13091 = vmatprep.subr.mxu0 %v10702_v56 }
 0x143   :  { %v15921_v24 = vadd.f32 %v1052_v42, %v667_v10  ;;  %13217 = vmatprep.subr.mxu1 %v10719_v52  ;;  %13092 = vmatpush3.msra.mxu0 %v10702_v56  ;;  %v12411_v43 = vpop.f32.mrf.mxu0  ;;  %v2246_v10 = vld [vmem:[#allocation2 + $0xc9] sm:$0xff]  ;;  %v2247_v56 = vld [vmem:[#allocation2 + $0xd9] sm:$0xff] }
 0x144   :  { %v12536_v11 = vpop.f32.mrf.mxu1  ;;  %12999 = vmatmul.mubr.f32.gmra.mxu1 %v15655_v4  ;;  %v10718_v4 = vld [vmem:[%s21316_s1 + $0x3c8] sm:$0xff]  ;;  %12874 = vmatmul.mubr.f32.gmra.mxu0 %v2244_v6 }
 0x145   :  { %v15930_v37 = vadd.f32 %v12536_v11, %v12408_v30  ;;  %13001 = vmatprep.mubr.f32.mxu1 %v15658_v55  ;;  %13218 = vmatpush3.msra.mxu1 %v10719_v52  ;;  %v687_v42 = vpop.f32.mrf.mxu0  ;;  %v10700_v30 = vld [vmem:[%s21316_s1 + $0x338] sm:$0xff] }
 0x146   :  { %v1062_v45 = vpop.f32.mrf.mxu1  ;;  %12876 = vmatprep.mubr.f32.mxu0 %v2245_v5  ;;  %13093 = vmatprep.subr.mxu0 %v10701_v29 }
 0x147   :  { %v15933_v44 = vadd.f32 %v1062_v45, %v677_v62  ;;  %13219 = vmatprep.subr.mxu1 %v10718_v4  ;;  %13094 = vmatpush3.msra.mxu0 %v10701_v29  ;;  %v12414_v11 = vpop.f32.mrf.mxu0  ;;  %v2248_v62 = vld [vmem:[#allocation2 + $0xe1] sm:$0xff]  ;;  %v2249_v29 = vld [vmem:[#allocation2 + $0xf1] sm:$0xff] }
 0x148   :  { %v12539_v2 = vpop.f32.mrf.mxu1  ;;  %13002 = vmatmul.mubr.f32.gmra.mxu1 %v15669_v8  ;;  %v10717_v8 = vld [vmem:[%s21316_s1 + $0x3c0] sm:$0xff]  ;;  %12877 = vmatmul.mubr.f32.gmra.mxu0 %v2246_v10 }
 0x149   :  { %v15942_v55 = vadd.f32 %v12539_v2, %v12411_v43  ;;  %13004 = vmatprep.mubr.f32.mxu1 %v15672_v16  ;;  %13220 = vmatpush3.msra.mxu1 %v10718_v4  ;;  %v697_v45 = vpop.f32.mrf.mxu0  ;;  %v10699_v43 = vld [vmem:[%s21316_s1 + $0x330] sm:$0xff] }
 0x14a   :  { %v1072_v38 = vpop.f32.mrf.mxu1  ;;  %12879 = vmatprep.mubr.f32.mxu0 %v2247_v56  ;;  %13095 = vmatprep.subr.mxu0 %v10700_v30 }
 0x14b   :  { %v15945_v52 = vadd.f32 %v1072_v38, %v687_v42  ;;  %13221 = vmatprep.subr.mxu1 %v10717_v8  ;;  %13096 = vmatpush3.msra.mxu0 %v10700_v30  ;;  %v12417_v2 = vpop.f32.mrf.mxu0  ;;  %v2250_v38 = vld [vmem:[#allocation2 + $0xf9] sm:$0xff] }
 0x14c   :  { %v12542_v6 = vpop.f32.mrf.mxu1  ;;  %13005 = vmatmul.mubr.f32.gmra.mxu1 %v15683_v31  ;;  %v10716_v31 = vld [vmem:[%s21316_s1 + $0x3b8] sm:$0xff]  ;;  %12880 = vmatmul.mubr.f32.gmra.mxu0 %v2248_v62  ;;  %v10698_v62 = vld [vmem:[%s21316_s1 + $0x328] sm:$0xff] }
 0x14d   :  { %v15954_v16 = vadd.f32 %v12542_v6, %v12414_v11  ;;  %13007 = vmatprep.mubr.f32.mxu1 %v15686_v25  ;;  %13222 = vmatpush3.msra.mxu1 %v10717_v8  ;;  %v21471_v25 = vld [vmem:[#allocation3_spill] sm:$0xff]  ;;  %v707_v56 = vpop.f32.mrf.mxu0  ;;  %v2251_v11 = vld [vmem:[#allocation2 + $0x109] sm:$0xff] }
 0x14e   :  { %v1082_v5 = vpop.f32.mrf.mxu1  ;;  %12882 = vmatprep.mubr.f32.mxu0 %v2249_v29  ;;  %v2781_v6 = vld [vmem:[#allocation2 + $0x10a] sm:$0xff]  ;;  %13097 = vmatprep.subr.mxu0 %v10699_v43 }
 0x14f   :  { %21469 = vst [vmem:[#allocation6_spill] sm:$0xff] %v15954_v16  ;;  %v15957_v4 = vadd.f32 %v1082_v5, %v697_v45  ;;  %13223 = vmatprep.subr.mxu1 %v10716_v31  ;;  %13098 = vmatpush3.msra.mxu0 %v10699_v43  ;;  %v10715_v45 = vld [vmem:[%s21316_s1 + $0x3b0] sm:$0xff]  ;;  %v12420_v5 = vpop.f32.mrf.mxu0 }
 0x150   :  { %v12545_v10 = vpop.f32.mrf.mxu1  ;;  %13008 = vmatmul.mubr.f32.gmra.mxu1 %v21471_v25  ;;  %12883 = vmatmul.mubr.f32.gmra.mxu0 %v2250_v38  ;;  %v2782_v43 = vld [vmem:[#allocation2 + $0x112] sm:$0xff]  ;;  %v10697_v38 = vld [vmem:[%s21316_s1 + $0x320] sm:$0xff] }
 0x151   :  { %21470 = vst [vmem:[#allocation7_spill] sm:$0xff] %v15957_v4  ;;  %v15966_v42 = vadd.f32 %v12545_v10, %v12417_v2  ;;  %13010 = vmatprep.mubr.f32.mxu1 %v15700_v32  ;;  %13224 = vmatpush3.msra.mxu1 %v10716_v31  ;;  %v2252_v2 = vld [vmem:[#allocation2 + $0x111] sm:$0xff]  ;;  %v717_v10 = vpop.f32.mrf.mxu0 }
 0x152   :  { %v1092_v30 = vpop.f32.mrf.mxu1  ;;  %12885 = vmatprep.mubr.f32.mxu0 %v2251_v11  ;;  %13099 = vmatprep.subr.mxu0 %v10698_v62 }
 0x153   :  { %21472 = vst [vmem:[#allocation3_spill] sm:$0xff] %v15966_v42  ;;  %v15969_v8 = vadd.f32 %v1092_v30, %v707_v56  ;;  %v2253_v56 = vld [vmem:[#allocation2 + $0x121] sm:$0xff]  ;;  %13225 = vmatprep.subr.mxu1 %v10715_v45  ;;  %13100 = vmatpush3.msra.mxu0 %v10698_v62  ;;  %v12423_v11 = vpop.f32.mrf.mxu0 }
 0x154   :  { %v12548_v32 = vpop.f32.mrf.mxu1  ;;  %13011 = vmatmul.mubr.f32.gmra.mxu1 %v15711_v26  ;;  %v2783_v30 = vld [vmem:[#allocation2 + $0x122] sm:$0xff]  ;;  %12886 = vmatmul.mubr.f32.gmra.mxu0 %v2252_v2  ;;  %v10696_v2 = vld [vmem:[%s21316_s1 + $0x318] sm:$0xff] }
 0x155   :  { %21473 = vst [vmem:[#allocation8_spill] sm:$0xff] %v15969_v8  ;;  %v15978_v29 = vadd.f32 %v12548_v32, %v12420_v5  ;;  %13013 = vmatprep.mubr.f32.mxu1 %v2781_v6  ;;  %13226 = vmatpush3.msra.mxu1 %v10715_v45  ;;  %v10714_v26 = vld [vmem:[%s21316_s1 + $0x3a8] sm:$0xff]  ;;  %v727_v62 = vpop.f32.mrf.mxu0  ;;  %v2797_v42 = vld [vmem:[#allocation2 + $0x1fa] sm:$0xff] }
 0x156   :  { %v1102_v25 = vpop.f32.mrf.mxu1  ;;  %12888 = vmatprep.mubr.f32.mxu0 %v2253_v56  ;;  %v2254_v32 = vld [vmem:[#allocation2 + $0x129] sm:$0xff]  ;;  %13101 = vmatprep.subr.mxu0 %v10697_v38 }
 0x157   :  { %21474 = vst [vmem:[#allocation9_spill] sm:$0xff] %v15978_v29  ;;  %v15980_v31 = vadd.f32 %v1102_v25, %v717_v10  ;;  %v2784_v10 = vld [vmem:[#allocation2 + $0x12a] sm:$0xff]  ;;  %v2785_v29 = vld [vmem:[#allocation2 + $0x13a] sm:$0xff]  ;;  %13227 = vmatprep.subr.mxu1 %v10714_v26  ;;  %13102 = vmatpush3.msra.mxu0 %v10697_v38  ;;  %v12426_v56 = vpop.f32.mrf.mxu0 }
 0x158   :  { %v12551_v6 = vpop.f32.mrf.mxu1  ;;  %13014 = vmatmul.mubr.f32.gmra.mxu1 %v2782_v43  ;;  %v10713_v43 = vld [vmem:[%s21316_s1 + $0x3a0] sm:$0xff]  ;;  %12889 = vmatmul.mubr.f32.gmra.mxu0 %v2254_v32  ;;  %v10695_v32 = vld [vmem:[%s21316_s1 + $0x310] sm:$0xff] }
 0x159   :  { %21475 = vst [vmem:[#allocation10_spill] sm:$0xff] %v15980_v31  ;;  %v15988_v5 = vadd.f32 %v12551_v6, %v12423_v11  ;;  %13016 = vmatprep.mubr.f32.mxu1 %v2783_v30  ;;  %v2255_v31 = vld [vmem:[#allocation2 + $0x139] sm:$0xff]  ;;  %13228 = vmatpush3.msra.mxu1 %v10714_v26  ;;  %v2256_v6 = vld [vmem:[#allocation2 + $0x141] sm:$0xff]  ;;  %v737_v38 = vpop.f32.mrf.mxu0 }
 0x15a   :  { %v1112_v25 = vpop.f32.mrf.mxu1  ;;  %12891 = vmatprep.mubr.f32.mxu0 %v2255_v31  ;;  %13103 = vmatprep.subr.mxu0 %v10696_v2  ;;  %v10712_v31 = vld [vmem:[%s21316_s1 + $0x398] sm:$0xff] }
 0x15b   :  { %21476 = vst [vmem:[#allocation11_spill] sm:$0xff] %v15988_v5  ;;  %v15990_v45 = vadd.f32 %v1112_v25, %v727_v62  ;;  %v2786_v62 = vld [vmem:[#allocation2 + $0x142] sm:$0xff]  ;;  %v2787_v5 = vld [vmem:[#allocation2 + $0x152] sm:$0xff]  ;;  %13229 = vmatprep.subr.mxu1 %v10713_v43  ;;  %13104 = vmatpush3.msra.mxu0 %v10696_v2 }
 0x15c   :  { %v12554_v30 = vpop.f32.mrf.mxu1  ;;  %13017 = vmatmul.mubr.f32.gmra.mxu1 %v2784_v10  ;;  %12892 = vmatmul.mubr.f32.gmra.mxu0 %v2256_v6  ;;  %v10694_v6 = vld [vmem:[%s21316_s1 + $0x308] sm:$0xff] }
 0x15d   :  { %21477 = vst [vmem:[#allocation12_spill] sm:$0xff] %v15990_v45  ;;  %v15998_v11 = vadd.f32 %v12554_v30, %v12426_v56  ;;  %13019 = vmatprep.mubr.f32.mxu1 %v2785_v29  ;;  %v2257_v45 = vld [vmem:[#allocation2 + $0x151] sm:$0xff]  ;;  %13230 = vmatpush3.msra.mxu1 %v10713_v43  ;;  %v12429_v29 = vpop.f32.mrf.mxu0  ;;  %v2258_v30 = vld [vmem:[#allocation2 + $0x159] sm:$0xff] }
 0x15e   :  { %v1122_v25 = vpop.f32.mrf.mxu1  ;;  %12894 = vmatprep.mubr.f32.mxu0 %v2257_v45  ;;  %13105 = vmatprep.subr.mxu0 %v10695_v32  ;;  %v10711_v45 = vld [vmem:[%s21316_s1 + $0x390] sm:$0xff] }
 0x15f   :  { %21478 = vst [vmem:[#allocation13_spill] sm:$0xff] %v15998_v11  ;;  %v16000_v26 = vadd.f32 %v1122_v25, %v737_v38  ;;  %v2788_v38 = vld [vmem:[#allocation2 + $0x15a] sm:$0xff]  ;;  %v747_v2 = vpop.f32.mrf.mxu0  ;;  %v2789_v11 = vld [vmem:[#allocation2 + $0x16a] sm:$0xff]  ;;  %13231 = vmatprep.subr.mxu1 %v10712_v31  ;;  %13106 = vmatpush3.msra.mxu0 %v10695_v32 }
 0x160   :  { %v12557_v10 = vpop.f32.mrf.mxu1  ;;  %13020 = vmatmul.mubr.f32.gmra.mxu1 %v2786_v62  ;;  %12895 = vmatmul.mubr.f32.gmra.mxu0 %v2258_v30  ;;  %v10693_v30 = vld [vmem:[%s21316_s1 + $0x300] sm:$0xff] }
 0x161   :  { %21479 = vst [vmem:[#allocation14_spill] sm:$0xff] %v16000_v26  ;;  %v16008_v56 = vadd.f32 %v12557_v10, %v12429_v29  ;;  %13022 = vmatprep.mubr.f32.mxu1 %v2787_v5  ;;  %v2259_v26 = vld [vmem:[#allocation2 + $0x169] sm:$0xff]  ;;  %13232 = vmatpush3.msra.mxu1 %v10712_v31  ;;  %v12432_v5 = vpop.f32.mrf.mxu0  ;;  %v2260_v10 = vld [vmem:[#allocation2 + $0x171] sm:$0xff] }
 0x162   :  { %v1132_v25 = vpop.f32.mrf.mxu1  ;;  %12897 = vmatprep.mubr.f32.mxu0 %v2259_v26  ;;  %13107 = vmatprep.subr.mxu0 %v10694_v6  ;;  %v10710_v26 = vld [vmem:[%s21316_s1 + $0x388] sm:$0xff] }
 0x163   :  { %21480 = vst [vmem:[#allocation15_spill] sm:$0xff] %v16008_v56  ;;  %v16010_v43 = vadd.f32 %v1132_v25, %v747_v2  ;;  %v2790_v2 = vld [vmem:[#allocation2 + $0x172] sm:$0xff]  ;;  %v757_v32 = vpop.f32.mrf.mxu0  ;;  %v2791_v56 = vld [vmem:[#allocation2 + $0x182] sm:$0xff]  ;;  %13233 = vmatprep.subr.mxu1 %v10711_v45  ;;  %13108 = vmatpush3.msra.mxu0 %v10694_v6 }
 0x164   :  { %v12560_v62 = vpop.f32.mrf.mxu1  ;;  %13023 = vmatmul.mubr.f32.gmra.mxu1 %v2788_v38  ;;  %12898 = vmatmul.mubr.f32.gmra.mxu0 %v2260_v10  ;;  %v10709_v10 = vld [vmem:[%s21316_s1 + $0x380] sm:$0xff] }
 0x165   :  { %21481 = vst [vmem:[#allocation16_spill] sm:$0xff] %v16010_v43  ;;  %v16018_v29 = vadd.f32 %v12560_v62, %v12432_v5  ;;  %13025 = vmatprep.mubr.f32.mxu1 %v2789_v11  ;;  %v2261_v43 = vld [vmem:[#allocation2 + $0x181] sm:$0xff]  ;;  %13234 = vmatpush3.msra.mxu1 %v10711_v45  ;;  %v12435_v11 = vpop.f32.mrf.mxu0  ;;  %v2262_v62 = vld [vmem:[#allocation2 + $0x189] sm:$0xff] }
 0x166   :  { %v1142_v25 = vpop.f32.mrf.mxu1  ;;  %12900 = vmatprep.mubr.f32.mxu0 %v2261_v43  ;;  %13109 = vmatprep.subr.mxu0 %v10693_v30  ;;  %v16038_v43 = vld [vmem:[%s21316_s1 + $0x478] sm:$0xff] }
 0x167   :  { %21482 = vst [vmem:[#allocation17_spill] sm:$0xff] %v16018_v29  ;;  %v16020_v31 = vadd.f32 %v1142_v25, %v757_v32  ;;  %v2792_v32 = vld [vmem:[#allocation2 + $0x18a] sm:$0xff]  ;;  %v767_v6 = vpop.f32.mrf.mxu0  ;;  %13235 = vmatprep.subr.mxu1 %v10710_v26  ;;  %13110 = vmatpush3.msra.mxu0 %v10693_v30  ;;  %v2794_v30 = vld [vmem:[#allocation2 + $0x1d2] sm:$0xff] }
 0x168   :  { %v12563_v38 = vpop.f32.mrf.mxu1  ;;  %13026 = vmatmul.mubr.f32.gmra.mxu1 %v2790_v2  ;;  %v2793_v29 = vld [vmem:[#allocation2 + $0x1ca] sm:$0xff]  ;;  %12901 = vmatmul.mubr.f32.gmra.mxu0 %v2262_v62 }
 0x169   :  { %21483 = vst [vmem:[#allocation18_spill] sm:$0xff] %v16020_v31  ;;  %v16028_v5 = vadd.f32 %v12563_v38, %v12435_v11  ;;  %13028 = vmatprep.mubr.f32.mxu1 %v2791_v56  ;;  %v2263_v31 = vld [vmem:[#allocation2 + $0x1c9] sm:$0xff]  ;;  %13236 = vmatpush3.msra.mxu1 %v10710_v26  ;;  %v12438_v56 = vpop.f32.mrf.mxu0  ;;  %v2264_v38 = vld [vmem:[#allocation2 + $0x1d1] sm:$0xff] }
 0x16a   :  { %v1152_v25 = vpop.f32.mrf.mxu1  ;;  %12903 = vmatprep.mubr.f32.mxu0 %v2263_v31  ;;  %13237 = vmatprep.subr.mxu1 %v10709_v10  ;;  %v2266_v31 = vld [vmem:[#allocation2 + $0x1e9] sm:$0xff] }
 0x16b   :  { %21484 = vst [vmem:[#allocation19_spill] sm:$0xff] %v16028_v5  ;;  %v16030_v45 = vadd.f32 %v1152_v25, %v767_v6  ;;  %v777_v26 = vpop.f32.mrf.mxu0  ;;  %v2265_v25 = vld [vmem:[#allocation2 + $0x1e1] sm:$0xff]  ;;  %13335 = vmatprep.subr.mxu0 %v16038_v43  ;;  %13238 = vmatpush3.msra.mxu1 %v10709_v10 }
 0x16c   :  { %v12566_v2 = vpop.f32.mrf.mxu1  ;;  %13029 = vmatmul.mubr.f32.gmra.mxu1 %v2792_v32  ;;  %12904 = vmatmul.mubr.f32.gmra.mxu0 %v2264_v38 }
 0x16d   :  { %21485 = vst [vmem:[#allocation20_spill] sm:$0xff] %v16030_v45  ;;  %v16040_v11 = vadd.f32 %v12566_v2, %v12438_v56  ;;  %13031 = vmatprep.mubr.f32.mxu1 %v2793_v29  ;;  %v2795_v45 = vld [vmem:[#allocation2 + $0x1e2] sm:$0xff]  ;;  %v12601_v8 = vpop.f32.mrf.mxu0  ;;  %12906 = vmatprep.mubr.f32.mxu0 %v2265_v25  ;;  %v2796_v29 = vld [vmem:[#allocation2 + $0x1ea] sm:$0xff] }
 0x16e   :  { %v1162_v6 = vpop.f32.mrf.mxu1  ;;  %v1638_v32 = vadd.f32 %v12601_v8, %v15765_v40  ;;  %v2268_v40 = vld [vmem:[#allocation2 + $0x201] sm:$0xff]  ;;  %v2269_v25 = vld [vmem:[#allocation2 + $0x211] sm:$0xff] }
 0x16f   :  { %21486 = vst [vmem:[#allocation21_spill] sm:$0xff] %v16040_v11  ;;  %v16043_v5 = vadd.f32 %v1162_v6, %v777_v26  ;;  %v1318_v56 = vpop.f32.mrf.mxu0  ;;  %v2267_v11 = vld [vmem:[#allocation2 + $0x1f9] sm:$0xff]  ;;  %v2798_v8 = vld [vmem:[#allocation2 + $0x202] sm:$0xff] }
 0x170   :  { %v12729_v62 = vpop.f32.mrf.mxu1  ;;  %13032 = vmatmul.mubr.f32.gmra.mxu1 %v2794_v30  ;;  %v1637_v4 = vadd.f32 %v1318_v56, %v15768_v58  ;;  %12907 = vmatmul.mubr.f32.gmra.mxu0 %v2266_v31 }
 0x171   :  { %21487 = vst [vmem:[#allocation22_spill] sm:$0xff] %v16043_v5  ;;  %13034 = vmatprep.mubr.f32.mxu1 %v2795_v45  ;;  %v16047_v16 = vadd.f32 %v12729_v62, %v1638_v32  ;;  %v12604_v26 = vpop.f32.mrf.mxu0  ;;  %12909 = vmatprep.mubr.f32.mxu0 %v2267_v11  ;;  %v2799_v5 = vld [vmem:[#allocation2 + $0x212] sm:$0xff] }
 0x172   :  { %v1848_v2 = vpop.f32.mrf.mxu1  ;;  %v1640_v38 = vadd.f32 %v12604_v26, %v15771_v36  ;;  %v2270_v11 = vld [vmem:[#allocation2 + $0x219] sm:$0xff]  ;;  %v2801_v26 = vld [vmem:[#allocation2 + $0x22a] sm:$0xff] }
 0x173   :  { %v16050_v30 = vadd.f32 %v1848_v2, %v1637_v4  ;;  %v1328_v45 = vpop.f32.mrf.mxu0  ;;  %v2271_v2 = vld [vmem:[#allocation2 + $0x229] sm:$0xff] }
 0x174   :  { %v12732_v10 = vpop.f32.mrf.mxu1  ;;  %13035 = vmatmul.mubr.f32.gmra.mxu1 %v2796_v29  ;;  %v1639_v58 = vadd.f32 %v1328_v45, %v15774_v57  ;;  %12910 = vmatmul.mubr.f32.gmra.mxu0 %v2268_v40  ;;  %v2272_v45 = vld [vmem:[#allocation2 + $0x231] sm:$0xff] }
 0x175   :  { %13037 = vmatprep.mubr.f32.mxu1 %v2797_v42  ;;  %v16053_v62 = vadd.f32 %v12732_v10, %v1640_v38  ;;  %v12607_v32 = vpop.f32.mrf.mxu0  ;;  %12912 = vmatprep.mubr.f32.mxu0 %v2269_v25  ;;  %v2800_v42 = vld [vmem:[#allocation2 + $0x21a] sm:$0xff] }
 0x176   :  { %v1858_v6 = vpop.f32.mrf.mxu1  ;;  %v1642_v36 = vadd.f32 %v12607_v32, %v15777_v49  ;;  %v2803_v32 = vld [vmem:[#allocation2 + $0x242] sm:$0xff] }
 0x177   :  { %v16056_v4 = vadd.f32 %v1858_v6, %v1639_v58  ;;  %v1338_v29 = vpop.f32.mrf.mxu0  ;;  %v2273_v58 = vld [vmem:[#allocation2 + $0x241] sm:$0xff] }
 0x178   :  { %v12735_v31 = vpop.f32.mrf.mxu1  ;;  %13038 = vmatmul.mubr.f32.gmra.mxu1 %v2798_v8  ;;  %v1641_v57 = vadd.f32 %v1338_v29, %v15780_v50  ;;  %12913 = vmatmul.mubr.f32.gmra.mxu0 %v2270_v11  ;;  %v2274_v29 = vld [vmem:[#allocation2 + $0x249] sm:$0xff] }
 0x179   :  { %13040 = vmatprep.mubr.f32.mxu1 %v2799_v5  ;;  %v16059_v10 = vadd.f32 %v12735_v31, %v1642_v36  ;;  %v12610_v38 = vpop.f32.mrf.mxu0  ;;  %12915 = vmatprep.mubr.f32.mxu0 %v2271_v2  ;;  %v2802_v5 = vld [vmem:[#allocation2 + $0x232] sm:$0xff] }
 0x17a   :  { %v1868_v56 = vpop.f32.mrf.mxu1  ;;  %v1644_v49 = vadd.f32 %v12610_v38, %v15783_v47  ;;  %v2805_v38 = vld [vmem:[#allocation2 + $0x25a] sm:$0xff] }
 0x17b   :  { %v16062_v8 = vadd.f32 %v1868_v56, %v1641_v57  ;;  %v1348_v6 = vpop.f32.mrf.mxu0  ;;  %v2804_v56 = vld [vmem:[#allocation2 + $0x24a] sm:$0xff]  ;;  %v2275_v57 = vld [vmem:[#allocation2 + $0x259] sm:$0xff] }
 0x17c   :  { %v12738_v40 = vpop.f32.mrf.mxu1  ;;  %13041 = vmatmul.mubr.f32.gmra.mxu1 %v2800_v42  ;;  %v1643_v50 = vadd.f32 %v1348_v6, %v15786_v7  ;;  %12916 = vmatmul.mubr.f32.gmra.mxu0 %v2272_v45  ;;  %v2276_v6 = vld [vmem:[#allocation2 + $0x261] sm:$0xff] }
 0x17d   :  { %13043 = vmatprep.mubr.f32.mxu1 %v2801_v26  ;;  %v16065_v31 = vadd.f32 %v12738_v40, %v1644_v49  ;;  %v12613_v36 = vpop.f32.mrf.mxu0  ;;  %12918 = vmatprep.mubr.f32.mxu0 %v2273_v58 }
 0x17e   :  { %v1878_v25 = vpop.f32.mrf.mxu1  ;;  %v1646_v47 = vadd.f32 %v12613_v36, %v15789_v17  ;;  %v2807_v36 = vld [vmem:[#allocation2 + $0x272] sm:$0xff] }
 0x17f   :  { %v16068_v42 = vadd.f32 %v1878_v25, %v1643_v50  ;;  %v1358_v2 = vpop.f32.mrf.mxu0  ;;  %v2806_v25 = vld [vmem:[#allocation2 + $0x262] sm:$0xff]  ;;  %v2277_v50 = vld [vmem:[#allocation2 + $0x271] sm:$0xff] }
 0x180   :  { %v12741_v11 = vpop.f32.mrf.mxu1  ;;  %13044 = vmatmul.mubr.f32.gmra.mxu1 %v2802_v5  ;;  %v1645_v7 = vadd.f32 %v1358_v2, %v15792_v60  ;;  %12919 = vmatmul.mubr.f32.gmra.mxu0 %v2274_v29  ;;  %v2278_v2 = vld [vmem:[#allocation2 + $0x279] sm:$0xff] }
 0x181   :  { %13046 = vmatprep.mubr.f32.mxu1 %v2803_v32  ;;  %v16071_v40 = vadd.f32 %v12741_v11, %v1646_v47  ;;  %v12616_v49 = vpop.f32.mrf.mxu0  ;;  %12921 = vmatprep.mubr.f32.mxu0 %v2275_v57 }
 0x182   :  { %v1888_v26 = vpop.f32.mrf.mxu1  ;;  %v1648_v17 = vadd.f32 %v12616_v49, %v15795_v35  ;;  %v2809_v49 = vld [vmem:[#allocation2 + $0x28a] sm:$0xff] }
 0x183   :  { %v16074_v5 = vadd.f32 %v1888_v26, %v1645_v7  ;;  %v1368_v58 = vpop.f32.mrf.mxu0  ;;  %v2808_v26 = vld [vmem:[#allocation2 + $0x27a] sm:$0xff]  ;;  %v2279_v7 = vld [vmem:[#allocation2 + $0x289] sm:$0xff] }
 0x184   :  { %v12744_v45 = vpop.f32.mrf.mxu1  ;;  %13047 = vmatmul.mubr.f32.gmra.mxu1 %v2804_v56  ;;  %v1647_v60 = vadd.f32 %v1368_v58, %v15798_v12  ;;  %12922 = vmatmul.mubr.f32.gmra.mxu0 %v2276_v6  ;;  %v2280_v58 = vld [vmem:[#allocation2 + $0x291] sm:$0xff] }
 0x185   :  { %13049 = vmatprep.mubr.f32.mxu1 %v2805_v38  ;;  %v16077_v11 = vadd.f32 %v12744_v45, %v1648_v17  ;;  %v12619_v47 = vpop.f32.mrf.mxu0  ;;  %12924 = vmatprep.mubr.f32.mxu0 %v2277_v50 }
 0x186   :  { %v1898_v32 = vpop.f32.mrf.mxu1  ;;  %v1650_v35 = vadd.f32 %v12619_v47, %v15801_v39  ;;  %v2811_v47 = vld [vmem:[#allocation2 + $0x2a2] sm:$0xff] }
 0x187   :  { %v16080_v56 = vadd.f32 %v1898_v32, %v1647_v60  ;;  %v1378_v57 = vpop.f32.mrf.mxu0  ;;  %v2810_v32 = vld [vmem:[#allocation2 + $0x292] sm:$0xff]  ;;  %v2281_v60 = vld [vmem:[#allocation2 + $0x2a1] sm:$0xff] }
 0x188   :  { %v12747_v29 = vpop.f32.mrf.mxu1  ;;  %13050 = vmatmul.mubr.f32.gmra.mxu1 %v2806_v25  ;;  %v1649_v12 = vadd.f32 %v1378_v57, %v15804_v15  ;;  %12925 = vmatmul.mubr.f32.gmra.mxu0 %v2278_v2  ;;  %v2282_v57 = vld [vmem:[#allocation2 + $0x2a9] sm:$0xff] }
 0x189   :  { %13052 = vmatprep.mubr.f32.mxu1 %v2807_v36  ;;  %v16083_v45 = vadd.f32 %v12747_v29, %v1650_v35  ;;  %v12622_v17 = vpop.f32.mrf.mxu0  ;;  %12927 = vmatprep.mubr.f32.mxu0 %v2279_v7 }
 0x18a   :  { %v1908_v38 = vpop.f32.mrf.mxu1  ;;  %v1652_v39 = vadd.f32 %v12622_v17, %v15807_v3  ;;  %v2813_v17 = vld [vmem:[#allocation2 + $0x2ba] sm:$0xff] }
 0x18b   :  { %v16086_v25 = vadd.f32 %v1908_v38, %v1649_v12  ;;  %v1388_v50 = vpop.f32.mrf.mxu0  ;;  %v2812_v38 = vld [vmem:[#allocation2 + $0x2aa] sm:$0xff]  ;;  %v2283_v12 = vld [vmem:[#allocation2 + $0x2b9] sm:$0xff] }
 0x18c   :  { %v12750_v6 = vpop.f32.mrf.mxu1  ;;  %13053 = vmatmul.mubr.f32.gmra.mxu1 %v2808_v26  ;;  %v1651_v15 = vadd.f32 %v1388_v50, %v15810_v19  ;;  %12928 = vmatmul.mubr.f32.gmra.mxu0 %v2280_v58  ;;  %v2284_v50 = vld [vmem:[#allocation2 + $0x2c1] sm:$0xff] }
 0x18d   :  { %13055 = vmatprep.mubr.f32.mxu1 %v2809_v49  ;;  %v16089_v29 = vadd.f32 %v12750_v6, %v1652_v39  ;;  %v12625_v35 = vpop.f32.mrf.mxu0  ;;  %12930 = vmatprep.mubr.f32.mxu0 %v2281_v60 }
 0x18e   :  { %v1918_v36 = vpop.f32.mrf.mxu1  ;;  %v1654_v3 = vadd.f32 %v12625_v35, %v15813_v53  ;;  %v2815_v35 = vld [vmem:[#allocation2 + $0x2d2] sm:$0xff] }
 0x18f   :  { %v16092_v26 = vadd.f32 %v1918_v36, %v1651_v15  ;;  %v1398_v7 = vpop.f32.mrf.mxu0  ;;  %v2814_v36 = vld [vmem:[#allocation2 + $0x2c2] sm:$0xff]  ;;  %v2285_v15 = vld [vmem:[#allocation2 + $0x2d1] sm:$0xff] }
 0x190   :  { %v12753_v2 = vpop.f32.mrf.mxu1  ;;  %13056 = vmatmul.mubr.f32.gmra.mxu1 %v2810_v32  ;;  %v1653_v19 = vadd.f32 %v1398_v7, %v15822_v34  ;;  %12931 = vmatmul.mubr.f32.gmra.mxu0 %v2282_v57  ;;  %v2286_v7 = vld [vmem:[#allocation2 + $0x2d9] sm:$0xff] }
 0x191   :  { %13058 = vmatprep.mubr.f32.mxu1 %v2811_v47  ;;  %v16095_v6 = vadd.f32 %v12753_v2, %v1654_v3  ;;  %v12628_v39 = vpop.f32.mrf.mxu0  ;;  %12933 = vmatprep.mubr.f32.mxu0 %v2283_v12 }
 0x192   :  { %v1928_v49 = vpop.f32.mrf.mxu1  ;;  %v1656_v53 = vadd.f32 %v12628_v39, %v15825_v1  ;;  %v2817_v39 = vld [vmem:[#allocation2 + $0x2ea] sm:$0xff] }
 0x193   :  { %v16098_v32 = vadd.f32 %v1928_v49, %v1653_v19  ;;  %v1408_v60 = vpop.f32.mrf.mxu0  ;;  %v2816_v49 = vld [vmem:[#allocation2 + $0x2da] sm:$0xff]  ;;  %v2287_v19 = vld [vmem:[#allocation2 + $0x2e9] sm:$0xff] }
 0x194   :  { %v12756_v58 = vpop.f32.mrf.mxu1  ;;  %13059 = vmatmul.mubr.f32.gmra.mxu1 %v2812_v38  ;;  %v1655_v34 = vadd.f32 %v1408_v60, %v15828_v59  ;;  %12934 = vmatmul.mubr.f32.gmra.mxu0 %v2284_v50  ;;  %v2288_v60 = vld [vmem:[#allocation2 + $0x2f1] sm:$0xff] }
 0x195   :  { %13061 = vmatprep.mubr.f32.mxu1 %v2813_v17  ;;  %v16101_v2 = vadd.f32 %v12756_v58, %v1656_v53  ;;  %v12631_v3 = vpop.f32.mrf.mxu0  ;;  %12936 = vmatprep.mubr.f32.mxu0 %v2285_v15 }
 0x196   :  { %v1938_v47 = vpop.f32.mrf.mxu1  ;;  %v1658_v1 = vadd.f32 %v12631_v3, %v15831_v13  ;;  %v2819_v3 = vld [vmem:[#allocation2 + $0x302] sm:$0xff] }
 0x197   :  { %v16104_v38 = vadd.f32 %v1938_v47, %v1655_v34  ;;  %v1418_v12 = vpop.f32.mrf.mxu0  ;;  %v2818_v47 = vld [vmem:[#allocation2 + $0x2f2] sm:$0xff]  ;;  %v2289_v34 = vld [vmem:[#allocation2 + $0x301] sm:$0xff] }
 0x198   :  { %v12759_v57 = vpop.f32.mrf.mxu1  ;;  %13062 = vmatmul.mubr.f32.gmra.mxu1 %v2814_v36  ;;  %v1657_v59 = vadd.f32 %v1418_v12, %v15834_v46  ;;  %12937 = vmatmul.mubr.f32.gmra.mxu0 %v2286_v7  ;;  %v2290_v12 = vld [vmem:[#allocation2 + $0x309] sm:$0xff] }
 0x199   :  { %13064 = vmatprep.mubr.f32.mxu1 %v2815_v35  ;;  %v16107_v58 = vadd.f32 %v12759_v57, %v1658_v1  ;;  %v12634_v53 = vpop.f32.mrf.mxu0  ;;  %12939 = vmatprep.mubr.f32.mxu0 %v2287_v19 }
 0x19a   :  { %v1948_v17 = vpop.f32.mrf.mxu1  ;;  %v1660_v13 = vadd.f32 %v12634_v53, %v15837_v18  ;;  %v2821_v53 = vld [vmem:[#allocation2 + $0x31a] sm:$0xff] }
 0x19b   :  { %v16110_v36 = vadd.f32 %v1948_v17, %v1657_v59  ;;  %v1428_v15 = vpop.f32.mrf.mxu0  ;;  %v2820_v17 = vld [vmem:[#allocation2 + $0x30a] sm:$0xff]  ;;  %v2291_v59 = vld [vmem:[#allocation2 + $0x319] sm:$0xff] }
 0x19c   :  { %v12762_v50 = vpop.f32.mrf.mxu1  ;;  %13065 = vmatmul.mubr.f32.gmra.mxu1 %v2816_v49  ;;  %v1659_v46 = vadd.f32 %v1428_v15, %v15840_v48  ;;  %12940 = vmatmul.mubr.f32.gmra.mxu0 %v2288_v60 }
 0x19d   :  { %21488 = vst [vmem:[#allocation23_spill] sm:$0xff] %v16110_v36  ;;  %13067 = vmatprep.mubr.f32.mxu1 %v2817_v39  ;;  %v16113_v57 = vadd.f32 %v12762_v50, %v1660_v13  ;;  %v12637_v1 = vpop.f32.mrf.mxu0  ;;  %12942 = vmatprep.mubr.f32.mxu0 %v2289_v34  ;;  %v21490_v36 = vld [vmem:[#allocation4_spill] sm:$0xff] }
 0x19e   :  { %v1958_v35 = vpop.f32.mrf.mxu1  ;;  %v1662_v18 = vadd.f32 %v12637_v1, %v15843_v21  ;;  %v2822_v34 = vld [vmem:[#allocation2 + $0x322] sm:$0xff]  ;;  %v2293_v1 = vld [vmem:[#allocation2 + $0x331] sm:$0xff] }
 0x19f   :  { %v16116_v49 = vadd.f32 %v1958_v35, %v1659_v46  ;;  %v1438_v19 = vpop.f32.mrf.mxu0  ;;  %v2292_v35 = vld [vmem:[#allocation2 + $0x321] sm:$0xff] }
 0x1a0   :  { %v12765_v7 = vpop.f32.mrf.mxu1  ;;  %13068 = vmatmul.mubr.f32.gmra.mxu1 %v2818_v47  ;;  %v1661_v48 = vadd.f32 %v1438_v19, %v21490_v36  ;;  %12943 = vmatmul.mubr.f32.gmra.mxu0 %v2290_v12  ;;  %v21491_v47 = vld [vmem:[#allocation5_spill] sm:$0xff] }
 0x1a1   :  { %21489 = vst [vmem:[#allocation24_spill] sm:$0xff] %v16116_v49  ;;  %13070 = vmatprep.mubr.f32.mxu1 %v2819_v3  ;;  %v16119_v50 = vadd.f32 %v12765_v7, %v1662_v18  ;;  %v12640_v13 = vpop.f32.mrf.mxu0  ;;  %12945 = vmatprep.mubr.f32.mxu0 %v2291_v59  ;;  %v2823_v49 = vld [vmem:[#allocation2 + $0x332] sm:$0xff]  ;;  %v2824_v59 = vld [vmem:[#allocation2 + $0x33a] sm:$0xff] }
 0x1a2   :  { %v1968_v39 = vpop.f32.mrf.mxu1  ;;  %v1664_v21 = vadd.f32 %v12640_v13, %v21491_v47  ;;  %v3292_v13 = vld [vmem:[#allocation2 + $0x30] sm:$0xff] }
 0x1a3   :  { %v16122_v15 = vadd.f32 %v1968_v39, %v1661_v48  ;;  %v1448_v3 = vpop.f32.mrf.mxu0  ;;  %v2294_v39 = vld [vmem:[#allocation2 + $0x339] sm:$0xff]  ;;  %v3822_v47 = vld [vmem:[#allocation2 + $0x31] sm:$0xff] }
 0x1a4   :  { %v12768_v60 = vpop.f32.mrf.mxu1  ;;  %13071 = vmatmul.mubr.f32.gmra.mxu1 %v2820_v17  ;;  %v1663_v36 = vadd.f32 %v1448_v3, %v15852_v22  ;;  %12946 = vmatmul.mubr.f32.gmra.mxu0 %v2292_v35  ;;  %v3293_v3 = vld [vmem:[#allocation2 + $0x38] sm:$0xff] }
 0x1a5   :  { %13073 = vmatprep.mubr.f32.mxu1 %v2821_v53  ;;  %v16125_v7 = vadd.f32 %v12768_v60, %v1664_v21  ;;  %v12643_v18 = vpop.f32.mrf.mxu0  ;;  %12948 = vmatprep.mubr.f32.mxu0 %v2293_v1 }
 0x1a6   :  { %v1978_v46 = vpop.f32.mrf.mxu1  ;;  %v1666_v17 = vadd.f32 %v12643_v18, %v15855_v51 }
 0x1a7   :  { %v16128_v19 = vadd.f32 %v1978_v46, %v1663_v36  ;;  %v1458_v53 = vpop.f32.mrf.mxu0  ;;  %v3294_v36 = vld [vmem:[#allocation2 + $0x48] sm:$0xff] }
 0x1a8   :  { %v12771_v12 = vpop.f32.mrf.mxu1  ;;  %13074 = vmatmul.mubr.f32.gmra.mxu1 %v2822_v34  ;;  %v1665_v22 = vadd.f32 %v1458_v53, %v15857_v28  ;;  %12949 = vmatmul.mubr.f32.gmra.mxu0 %v2294_v39 }
 0x1a9   :  { %13076 = vmatprep.mubr.f32.mxu1 %v2823_v49  ;;  %v16131_v60 = vadd.f32 %v12771_v12, %v1666_v17  ;;  %v12646_v21 = vpop.f32.mrf.mxu0  ;;  %13111 = vmatprep.mubr.f32.mxu0 %v3292_v13  ;;  %v3823_v49 = vld [vmem:[#allocation2 + $0x39] sm:$0xff]  ;;  %v3824_v12 = vld [vmem:[#allocation2 + $0x49] sm:$0xff] }
 0x1aa   :  { %v1988_v48 = vpop.f32.mrf.mxu1  ;;  %v1668_v51 = vadd.f32 %v12646_v21, %v15859_v0  ;;  %v10739_v17 = vld [vmem:[%s21316_s1 + $0x470] sm:$0xff]  ;;  %v3826_v21 = vld [vmem:[#allocation2 + $0x61] sm:$0xff] }
 0x1ab   :  { %v16134_v34 = vadd.f32 %v1988_v48, %v1665_v22  ;;  %v1468_v46 = vpop.f32.mrf.mxu0  ;;  %v3295_v48 = vld [vmem:[#allocation2 + $0x50] sm:$0xff]  ;;  %v3296_v22 = vld [vmem:[#allocation2 + $0x60] sm:$0xff] }
 0x1ac   :  { %v12774_v35 = vpop.f32.mrf.mxu1  ;;  %13077 = vmatmul.mubr.f32.gmra.mxu1 %v2824_v59  ;;  %v1667_v18 = vadd.f32 %v1468_v46, %v15862_v27  ;;  %13112 = vmatmul.mubr.f32.vlgmr.msra.gmra.mxu0 %v3293_v3  ;;  %v3825_v27 = vld [vmem:[#allocation2 + $0x51] sm:$0xff] }
 0x1ad   :  { %13239 = vmatprep.mubr.f32.mxu1 %v3822_v47  ;;  %v16137_v28 = vadd.f32 %v12774_v35, %v1668_v51  ;;  %v12649_v39 = vpop.f32.mrf.mxu0  ;;  %13336 = vmatpush3.msra.mxu0 %v16038_v43 }
 0x1ae   :  { %v1998_v1 = vpop.f32.mrf.mxu1  ;;  %v1670_v59 = vadd.f32 %v12649_v39, %v15868_v54  ;;  %13114 = vmatprep.mubr.f32.mxu0 %v3294_v36  ;;  %13337 = vmatprep.subr.mxu0 %v10739_v17  ;;  %v10738_v54 = vld [vmem:[%s21316_s1 + $0x468] sm:$0xff] }
 0x1af   :  { %v16143_v53 = vadd.f32 %v1998_v1, %v1667_v18  ;;  %v1478_v13 = vpop.f32.mrf.mxu0  ;;  %13338 = vmatpush3.msra.mxu0 %v10739_v17  ;;  %v3297_v1 = vld [vmem:[#allocation2 + $0x68] sm:$0xff]  ;;  %v3828_v17 = vld [vmem:[#allocation2 + $0x79] sm:$0xff] }
 0x1b0   :  { %v12777_v0 = vpop.f32.mrf.mxu1  ;;  %13240 = vmatmul.mubr.f32.vlgmr.msra.gmra.mxu1 %v3823_v49  ;;  %v1669_v35 = vadd.f32 %v1478_v13, %v15872_v41  ;;  %13115 = vmatmul.mubr.f32.gmra.mxu0 %v3295_v48  ;;  %v3827_v36 = vld [vmem:[#allocation2 + $0x69] sm:$0xff] }
 0x1b1   :  { %13242 = vmatprep.mubr.f32.mxu1 %v3824_v12  ;;  %v16147_v51 = vadd.f32 %v12777_v0, %v1670_v59  ;;  %v12652_v3 = vpop.f32.mrf.mxu0  ;;  %13117 = vmatprep.mubr.f32.mxu0 %v3296_v22  ;;  %v3298_v12 = vld [vmem:[#allocation2 + $0x78] sm:$0xff]  ;;  %v3829_v22 = vld [vmem:[#allocation2 + $0x81] sm:$0xff] }
 0x1b2   :  { %v2008_v47 = vpop.f32.mrf.mxu1  ;;  %v1672_v49 = vadd.f32 %v12652_v3, %v15882_v33  ;;  %13339 = vmatprep.subr.mxu0 %v10738_v54  ;;  %v10737_v33 = vld [vmem:[%s21316_s1 + $0x460] sm:$0xff] }
 0x1b3   :  { %v16153_v46 = vadd.f32 %v2008_v47, %v1669_v35  ;;  %v1488_v41 = vpop.f32.mrf.mxu0  ;;  %13340 = vmatpush3.msra.mxu0 %v10738_v54  ;;  %v3299_v47 = vld [vmem:[#allocation2 + $0x80] sm:$0xff]  ;;  %v3300_v35 = vld [vmem:[#allocation2 + $0x90] sm:$0xff] }
 0x1b4   :  { %v12780_v43 = vpop.f32.mrf.mxu1  ;;  %13243 = vmatmul.mubr.f32.gmra.mxu1 %v3825_v27  ;;  %v1671_v39 = vadd.f32 %v1488_v41, %v15885_v20  ;;  %13118 = vmatmul.mubr.f32.gmra.mxu0 %v3297_v1  ;;  %v3830_v54 = vld [vmem:[#allocation2 + $0x91] sm:$0xff] }
 0x1b5   :  { %13245 = vmatprep.mubr.f32.mxu1 %v3826_v21  ;;  %v16156_v0 = vadd.f32 %v12780_v43, %v1672_v49  ;;  %v12655_v59 = vpop.f32.mrf.mxu0  ;;  %13120 = vmatprep.mubr.f32.mxu0 %v3298_v12  ;;  %v3831_v12 = vld [vmem:[#allocation2 + $0x99] sm:$0xff] }
 0x1b6   :  { %v2018_v18 = vpop.f32.mrf.mxu1  ;;  %v1674_v27 = vadd.f32 %v12655_v59, %v15894_v63  ;;  %13341 = vmatprep.subr.mxu0 %v10737_v33  ;;  %v10736_v63 = vld [vmem:[%s21316_s1 + $0x458] sm:$0xff] }
 0x1b7   :  { %v16162_v13 = vadd.f32 %v2018_v18, %v1671_v39  ;;  %v1498_v20 = vpop.f32.mrf.mxu0  ;;  %13342 = vmatpush3.msra.mxu0 %v10737_v33  ;;  %v3301_v18 = vld [vmem:[#allocation2 + $0x98] sm:$0xff]  ;;  %v3302_v39 = vld [vmem:[#allocation2 + $0xa8] sm:$0xff] }
 0x1b8   :  { %v12783_v48 = vpop.f32.mrf.mxu1  ;;  %13246 = vmatmul.mubr.f32.gmra.mxu1 %v3827_v36  ;;  %v1673_v3 = vadd.f32 %v1498_v20, %v15897_v9  ;;  %13121 = vmatmul.mubr.f32.gmra.mxu0 %v3299_v47  ;;  %v3832_v33 = vld [vmem:[#allocation2 + $0xa9] sm:$0xff] }
 0x1b9   :  { %13248 = vmatprep.mubr.f32.mxu1 %v3828_v17  ;;  %v16165_v43 = vadd.f32 %v12783_v48, %v1674_v27  ;;  %v12658_v49 = vpop.f32.mrf.mxu0  ;;  %13123 = vmatprep.mubr.f32.mxu0 %v3300_v35  ;;  %v3833_v35 = vld [vmem:[#allocation2 + $0xb1] sm:$0xff] }
 0x1ba   :  { %v2028_v21 = vpop.f32.mrf.mxu1  ;;  %v1676_v36 = vadd.f32 %v12658_v49, %v15906_v23  ;;  %13343 = vmatprep.subr.mxu0 %v10736_v63  ;;  %v10735_v23 = vld [vmem:[%s21316_s1 + $0x450] sm:$0xff] }
 0x1bb   :  { %v16171_v41 = vadd.f32 %v2028_v21, %v1673_v3  ;;  %v1508_v9 = vpop.f32.mrf.mxu0  ;;  %13344 = vmatpush3.msra.mxu0 %v10736_v63  ;;  %v3303_v21 = vld [vmem:[#allocation2 + $0xb0] sm:$0xff]  ;;  %v3304_v3 = vld [vmem:[#allocation2 + $0xc0] sm:$0xff] }
 0x1bc   :  { %v12786_v1 = vpop.f32.mrf.mxu1  ;;  %13249 = vmatmul.mubr.f32.gmra.mxu1 %v3829_v22  ;;  %v1675_v59 = vadd.f32 %v1508_v9, %v15909_v14  ;;  %13124 = vmatmul.mubr.f32.gmra.mxu0 %v3301_v18  ;;  %v3834_v63 = vld [vmem:[#allocation2 + $0xc1] sm:$0xff] }
 0x1bd   :  { %13251 = vmatprep.mubr.f32.mxu1 %v3830_v54  ;;  %v16174_v48 = vadd.f32 %v12786_v1, %v1676_v36  ;;  %v12661_v27 = vpop.f32.mrf.mxu0  ;;  %13126 = vmatprep.mubr.f32.mxu0 %v3302_v39  ;;  %v3835_v39 = vld [vmem:[#allocation2 + $0xc9] sm:$0xff] }
 0x1be   :  { %v2038_v17 = vpop.f32.mrf.mxu1  ;;  %v1678_v22 = vadd.f32 %v12661_v27, %v15918_v61  ;;  %13345 = vmatprep.subr.mxu0 %v10735_v23  ;;  %v10734_v61 = vld [vmem:[%s21316_s1 + $0x448] sm:$0xff] }
 0x1bf   :  { %v16180_v20 = vadd.f32 %v2038_v17, %v1675_v59  ;;  %v1518_v14 = vpop.f32.mrf.mxu0  ;;  %13346 = vmatpush3.msra.mxu0 %v10735_v23  ;;  %v3305_v17 = vld [vmem:[#allocation2 + $0xc8] sm:$0xff]  ;;  %v3306_v59 = vld [vmem:[#allocation2 + $0xd8] sm:$0xff] }
 0x1c0   :  { %v12789_v47 = vpop.f32.mrf.mxu1  ;;  %13252 = vmatmul.mubr.f32.gmra.mxu1 %v3831_v12  ;;  %v1677_v49 = vadd.f32 %v1518_v14, %v15921_v24  ;;  %13127 = vmatmul.mubr.f32.gmra.mxu0 %v3303_v21  ;;  %v3836_v23 = vld [vmem:[#allocation2 + $0xd9] sm:$0xff] }
 0x1c1   :  { %13254 = vmatprep.mubr.f32.mxu1 %v3832_v33  ;;  %v16183_v1 = vadd.f32 %v12789_v47, %v1678_v22  ;;  %v12664_v36 = vpop.f32.mrf.mxu0  ;;  %13129 = vmatprep.mubr.f32.mxu0 %v3304_v3  ;;  %v3837_v3 = vld [vmem:[#allocation2 + $0xe1] sm:$0xff] }
 0x1c2   :  { %v2048_v54 = vpop.f32.mrf.mxu1  ;;  %v1680_v12 = vadd.f32 %v12664_v36, %v15930_v37  ;;  %13347 = vmatprep.subr.mxu0 %v10734_v61  ;;  %v10733_v37 = vld [vmem:[%s21316_s1 + $0x440] sm:$0xff] }
 0x1c3   :  { %v16189_v9 = vadd.f32 %v2048_v54, %v1677_v49  ;;  %v1528_v24 = vpop.f32.mrf.mxu0  ;;  %13348 = vmatpush3.msra.mxu0 %v10734_v61  ;;  %v3307_v54 = vld [vmem:[#allocation2 + $0xe0] sm:$0xff]  ;;  %v3308_v49 = vld [vmem:[#allocation2 + $0xf0] sm:$0xff] }
 0x1c4   :  { %v12792_v18 = vpop.f32.mrf.mxu1  ;;  %13255 = vmatmul.mubr.f32.gmra.mxu1 %v3833_v35  ;;  %v1679_v27 = vadd.f32 %v1528_v24, %v15933_v44  ;;  %13130 = vmatmul.mubr.f32.gmra.mxu0 %v3305_v17  ;;  %v3838_v61 = vld [vmem:[#allocation2 + $0xf1] sm:$0xff] }
 0x1c5   :  { %13257 = vmatprep.mubr.f32.mxu1 %v3834_v63  ;;  %v16192_v47 = vadd.f32 %v12792_v18, %v1680_v12  ;;  %v12667_v22 = vpop.f32.mrf.mxu0  ;;  %13132 = vmatprep.mubr.f32.mxu0 %v3306_v59  ;;  %v3309_v59 = vld [vmem:[#allocation2 + $0xf8] sm:$0xff] }
 0x1c6   :  { %v2058_v33 = vpop.f32.mrf.mxu1  ;;  %v1682_v35 = vadd.f32 %v12667_v22, %v15942_v55  ;;  %13349 = vmatprep.subr.mxu0 %v10733_v37  ;;  %v10732_v55 = vld [vmem:[%s21316_s1 + $0x438] sm:$0xff]  ;;  %v3310_v22 = vld [vmem:[#allocation2 + $0x108] sm:$0xff] }
 0x1c7   :  { %v16198_v14 = vadd.f32 %v2058_v33, %v1679_v27  ;;  %v1538_v44 = vpop.f32.mrf.mxu0  ;;  %13350 = vmatpush3.msra.mxu0 %v10733_v37  ;;  %v3840_v37 = vld [vmem:[#allocation2 + $0x109] sm:$0xff] }
 0x1c8   :  { %v12795_v21 = vpop.f32.mrf.mxu1  ;;  %13258 = vmatmul.mubr.f32.gmra.mxu1 %v3835_v39  ;;  %v1681_v36 = vadd.f32 %v1538_v44, %v15945_v52  ;;  %13133 = vmatmul.mubr.f32.gmra.mxu0 %v3307_v54  ;;  %v21493_v39 = vld [vmem:[#allocation6_spill] sm:$0xff]  ;;  %v10731_v54 = vld [vmem:[%s21316_s1 + $0x430] sm:$0xff] }
 0x1c9   :  { %13260 = vmatprep.mubr.f32.mxu1 %v3836_v23  ;;  %v16201_v18 = vadd.f32 %v12795_v21, %v1682_v35  ;;  %v12670_v12 = vpop.f32.mrf.mxu0  ;;  %13135 = vmatprep.mubr.f32.mxu0 %v3308_v49  ;;  %v3839_v23 = vld [vmem:[#allocation2 + $0xf9] sm:$0xff] }
 0x1ca   :  { %v2068_v63 = vpop.f32.mrf.mxu1  ;;  %v1684_v24 = vadd.f32 %v12670_v12, %v21493_v39  ;;  %13351 = vmatprep.subr.mxu0 %v10732_v55  ;;  %v21495_v21 = vld [vmem:[#allocation7_spill] sm:$0xff]  ;;  %v3311_v12 = vld [vmem:[#allocation2 + $0x110] sm:$0xff] }
 0x1cb   :  { %21492 = vst [vmem:[#allocation4_spill] sm:$0xff] %v16201_v18  ;;  %v16207_v33 = vadd.f32 %v2068_v63, %v1681_v36  ;;  %v1548_v52 = vpop.f32.mrf.mxu0  ;;  %13352 = vmatpush3.msra.mxu0 %v10732_v55  ;;  %v21497_v49 = vld [vmem:[#allocation3_spill] sm:$0xff]  ;;  %v3841_v39 = vld [vmem:[#allocation2 + $0x111] sm:$0xff] }
 0x1cc   :  { %v12798_v17 = vpop.f32.mrf.mxu1  ;;  %13261 = vmatmul.mubr.f32.gmra.mxu1 %v3837_v3  ;;  %v1683_v35 = vadd.f32 %v1548_v52, %v21495_v21  ;;  %13136 = vmatmul.mubr.f32.gmra.mxu0 %v3309_v59  ;;  %v3842_v55 = vld [vmem:[#allocation2 + $0x121] sm:$0xff] }
 0x1cd   :  { %21494 = vst [vmem:[#allocation5_spill] sm:$0xff] %v16207_v33  ;;  %13263 = vmatprep.mubr.f32.mxu1 %v3838_v61  ;;  %v16210_v44 = vadd.f32 %v12798_v17, %v1684_v24  ;;  %v12673_v3 = vpop.f32.mrf.mxu0  ;;  %13138 = vmatprep.mubr.f32.mxu0 %v3310_v22  ;;  %v3312_v24 = vld [vmem:[#allocation2 + $0x120] sm:$0xff]  ;;  %v21499_v21 = vld [vmem:[#allocation8_spill] sm:$0xff]  ;;  %v21501_v22 = vld [vmem:[#allocation9_spill] sm:$0xff] }
 0x1ce   :  { %v2078_v27 = vpop.f32.mrf.mxu1  ;;  %v1686_v61 = vadd.f32 %v12673_v3, %v21497_v49  ;;  %13353 = vmatprep.subr.mxu0 %v10731_v54  ;;  %v10730_v59 = vld [vmem:[%s21316_s1 + $0x428] sm:$0xff] }
 0x1cf   :  { %21496 = vst [vmem:[#allocation6_spill] sm:$0xff] %v16210_v44  ;;  %v16216_v36 = vadd.f32 %v2078_v27, %v1683_v35  ;;  %v1558_v52 = vpop.f32.mrf.mxu0  ;;  %13354 = vmatpush3.msra.mxu0 %v10731_v54  ;;  %v3313_v3 = vld [vmem:[#allocation2 + $0x128] sm:$0xff]  ;;  %v3844_v54 = vld [vmem:[#allocation2 + $0x139] sm:$0xff] }
 0x1d0   :  { %v12801_v63 = vpop.f32.mrf.mxu1  ;;  %13264 = vmatmul.mubr.f32.gmra.mxu1 %v3839_v23  ;;  %v1685_v44 = vadd.f32 %v1558_v52, %v21499_v21  ;;  %13139 = vmatmul.mubr.f32.gmra.mxu0 %v3311_v12  ;;  %v3843_v49 = vld [vmem:[#allocation2 + $0x129] sm:$0xff]  ;;  %v21503_v21 = vld [vmem:[#allocation10_spill] sm:$0xff]  ;;  %v10729_v12 = vld [vmem:[%s21316_s1 + $0x420] sm:$0xff] }
 0x1d1   :  { %21498 = vst [vmem:[#allocation7_spill] sm:$0xff] %v16216_v36  ;;  %13266 = vmatprep.mubr.f32.mxu1 %v3840_v37  ;;  %v16219_v33 = vadd.f32 %v12801_v63, %v1686_v61  ;;  %v12676_v23 = vpop.f32.mrf.mxu0  ;;  %13141 = vmatprep.mubr.f32.mxu0 %v3312_v24  ;;  %v3314_v61 = vld [vmem:[#allocation2 + $0x138] sm:$0xff] }
 0x1d2   :  { %v2088_v17 = vpop.f32.mrf.mxu1  ;;  %v1688_v37 = vadd.f32 %v12676_v23, %v21501_v22  ;;  %13355 = vmatprep.subr.mxu0 %v10730_v59  ;;  %v3315_v23 = vld [vmem:[#allocation2 + $0x140] sm:$0xff] }
 0x1d3   :  { %21500 = vst [vmem:[#allocation3_spill] sm:$0xff] %v16219_v33  ;;  %v16225_v35 = vadd.f32 %v2088_v17, %v1685_v44  ;;  %v1568_v52 = vpop.f32.mrf.mxu0  ;;  %13356 = vmatpush3.msra.mxu0 %v10730_v59  ;;  %v21505_v17 = vld [vmem:[#allocation11_spill] sm:$0xff]  ;;  %v3846_v59 = vld [vmem:[#allocation2 + $0x151] sm:$0xff] }
 0x1d4   :  { %v12804_v27 = vpop.f32.mrf.mxu1  ;;  %13267 = vmatmul.mubr.f32.gmra.mxu1 %v3841_v39  ;;  %v1687_v33 = vadd.f32 %v1568_v52, %v21503_v21  ;;  %13142 = vmatmul.mubr.f32.gmra.mxu0 %v3313_v3  ;;  %v3845_v22 = vld [vmem:[#allocation2 + $0x141] sm:$0xff]  ;;  %v10728_v3 = vld [vmem:[%s21316_s1 + $0x418] sm:$0xff] }
 0x1d5   :  { %21502 = vst [vmem:[#allocation8_spill] sm:$0xff] %v16225_v35  ;;  %13269 = vmatprep.mubr.f32.mxu1 %v3842_v55  ;;  %v16228_v36 = vadd.f32 %v12804_v27, %v1688_v37  ;;  %v12679_v44 = vpop.f32.mrf.mxu0  ;;  %13144 = vmatprep.mubr.f32.mxu0 %v3314_v61  ;;  %v3316_v37 = vld [vmem:[#allocation2 + $0x150] sm:$0xff]  ;;  %v21507_v21 = vld [vmem:[#allocation12_spill] sm:$0xff] }
 0x1d6   :  { %v2098_v63 = vpop.f32.mrf.mxu1  ;;  %v1690_v24 = vadd.f32 %v12679_v44, %v21505_v17  ;;  %13357 = vmatprep.subr.mxu0 %v10729_v12  ;;  %v3317_v44 = vld [vmem:[#allocation2 + $0x158] sm:$0xff] }
 0x1d7   :  { %21504 = vst [vmem:[#allocation9_spill] sm:$0xff] %v16228_v36  ;;  %v16234_v55 = vadd.f32 %v2098_v63, %v1687_v33  ;;  %v1578_v52 = vpop.f32.mrf.mxu0  ;;  %13358 = vmatpush3.msra.mxu0 %v10729_v12  ;;  %v21509_v63 = vld [vmem:[#allocation13_spill] sm:$0xff]  ;;  %v3847_v17 = vld [vmem:[#allocation2 + $0x159] sm:$0xff] }
 0x1d8   :  { %v12807_v39 = vpop.f32.mrf.mxu1  ;;  %13270 = vmatmul.mubr.f32.gmra.mxu1 %v3843_v49  ;;  %v1689_v36 = vadd.f32 %v1578_v52, %v21507_v21  ;;  %13145 = vmatmul.mubr.f32.gmra.mxu0 %v3315_v23  ;;  %v3848_v12 = vld [vmem:[#allocation2 + $0x169] sm:$0xff]  ;;  %v21511_v21 = vld [vmem:[#allocation14_spill] sm:$0xff] }
 0x1d9   :  { %21506 = vst [vmem:[#allocation10_spill] sm:$0xff] %v16234_v55  ;;  %13272 = vmatprep.mubr.f32.mxu1 %v3844_v54  ;;  %v16237_v35 = vadd.f32 %v12807_v39, %v1690_v24  ;;  %v12682_v33 = vpop.f32.mrf.mxu0  ;;  %13147 = vmatprep.mubr.f32.mxu0 %v3316_v37  ;;  %v3318_v24 = vld [vmem:[#allocation2 + $0x168] sm:$0xff]  ;;  %v10727_v23 = vld [vmem:[%s21316_s1 + $0x410] sm:$0xff] }
 0x1da   :  { %v2108_v27 = vpop.f32.mrf.mxu1  ;;  %v1692_v61 = vadd.f32 %v12682_v33, %v21509_v63  ;;  %13359 = vmatprep.subr.mxu0 %v10728_v3  ;;  %v3319_v33 = vld [vmem:[#allocation2 + $0x170] sm:$0xff] }
 0x1db   :  { %21508 = vst [vmem:[#allocation11_spill] sm:$0xff] %v16237_v35  ;;  %v16243_v54 = vadd.f32 %v2108_v27, %v1689_v36  ;;  %v1588_v52 = vpop.f32.mrf.mxu0  ;;  %13360 = vmatpush3.msra.mxu0 %v10728_v3  ;;  %v21513_v27 = vld [vmem:[#allocation15_spill] sm:$0xff]  ;;  %v3849_v63 = vld [vmem:[#allocation2 + $0x171] sm:$0xff] }
 0x1dc   :  { %v12810_v49 = vpop.f32.mrf.mxu1  ;;  %13273 = vmatmul.mubr.f32.gmra.mxu1 %v3845_v22  ;;  %v1691_v35 = vadd.f32 %v1588_v52, %v21511_v21  ;;  %13148 = vmatmul.mubr.f32.gmra.mxu0 %v3317_v44  ;;  %v3850_v3 = vld [vmem:[#allocation2 + $0x181] sm:$0xff] }
 0x1dd   :  { %21510 = vst [vmem:[#allocation12_spill] sm:$0xff] %v16243_v54  ;;  %13275 = vmatprep.mubr.f32.mxu1 %v3846_v59  ;;  %v16246_v55 = vadd.f32 %v12810_v49, %v1692_v61  ;;  %v12685_v36 = vpop.f32.mrf.mxu0  ;;  %13150 = vmatprep.mubr.f32.mxu0 %v3318_v24  ;;  %v3320_v61 = vld [vmem:[#allocation2 + $0x180] sm:$0xff]  ;;  %v21515_v21 = vld [vmem:[#allocation16_spill] sm:$0xff] }
 0x1de   :  { %v2118_v39 = vpop.f32.mrf.mxu1  ;;  %v1694_v37 = vadd.f32 %v12685_v36, %v21513_v27  ;;  %13361 = vmatprep.subr.mxu0 %v10727_v23  ;;  %v10726_v44 = vld [vmem:[%s21316_s1 + $0x408] sm:$0xff] }
 0x1df   :  { %21512 = vst [vmem:[#allocation13_spill] sm:$0xff] %v16246_v55  ;;  %v16252_v59 = vadd.f32 %v2118_v39, %v1691_v35  ;;  %v1598_v52 = vpop.f32.mrf.mxu0  ;;  %13362 = vmatpush3.msra.mxu0 %v10727_v23  ;;  %v21517_v39 = vld [vmem:[#allocation17_spill] sm:$0xff]  ;;  %v3321_v36 = vld [vmem:[#allocation2 + $0x188] sm:$0xff]  ;;  %v3852_v23 = vld [vmem:[#allocation2 + $0x199] sm:$0xff] }
 0x1e0   :  { %v12813_v22 = vpop.f32.mrf.mxu1  ;;  %13276 = vmatmul.mubr.f32.gmra.mxu1 %v3847_v17  ;;  %v1693_v55 = vadd.f32 %v1598_v52, %v21515_v21  ;;  %13151 = vmatmul.mubr.f32.gmra.mxu0 %v3319_v33  ;;  %v3851_v27 = vld [vmem:[#allocation2 + $0x189] sm:$0xff]  ;;  %v21519_v21 = vld [vmem:[#allocation18_spill] sm:$0xff]  ;;  %v10725_v33 = vld [vmem:[%s21316_s1 + $0x400] sm:$0xff] }
 0x1e1   :  { %21514 = vst [vmem:[#allocation14_spill] sm:$0xff] %v16252_v59  ;;  %13278 = vmatprep.mubr.f32.mxu1 %v3848_v12  ;;  %v16255_v54 = vadd.f32 %v12813_v22, %v1694_v37  ;;  %v12688_v35 = vpop.f32.mrf.mxu0  ;;  %13153 = vmatprep.mubr.f32.mxu0 %v3320_v61  ;;  %v3322_v37 = vld [vmem:[#allocation2 + $0x198] sm:$0xff] }
 0x1e2   :  { %v2128_v49 = vpop.f32.mrf.mxu1  ;;  %v1696_v24 = vadd.f32 %v12688_v35, %v21517_v39  ;;  %13363 = vmatprep.subr.mxu0 %v10726_v44  ;;  %v3853_v35 = vld [vmem:[#allocation2 + $0x1a1] sm:$0xff] }
 0x1e3   :  { %21516 = vst [vmem:[#allocation15_spill] sm:$0xff] %v16255_v54  ;;  %v16261_v12 = vadd.f32 %v2128_v49, %v1693_v55  ;;  %v1608_v52 = vpop.f32.mrf.mxu0  ;;  %13364 = vmatpush3.msra.mxu0 %v10726_v44  ;;  %v21521_v49 = vld [vmem:[#allocation19_spill] sm:$0xff]  ;;  %v21523_v44 = vld [vmem:[#allocation20_spill] sm:$0xff] }
 0x1e4   :  { %v12816_v17 = vpop.f32.mrf.mxu1  ;;  %13279 = vmatmul.mubr.f32.gmra.mxu1 %v3849_v63  ;;  %v1695_v54 = vadd.f32 %v1608_v52, %v21519_v21  ;;  %13154 = vmatmul.mubr.f32.gmra.mxu0 %v3321_v36 }
 0x1e5   :  { %21518 = vst [vmem:[#allocation16_spill] sm:$0xff] %v16261_v12  ;;  %13281 = vmatprep.mubr.f32.mxu1 %v3850_v3  ;;  %v16264_v59 = vadd.f32 %v12816_v17, %v1696_v24  ;;  %v12691_v55 = vpop.f32.mrf.mxu0  ;;  %13156 = vmatprep.mubr.f32.mxu0 %v3322_v37  ;;  %v3324_v17 = vld [vmem:[#allocation2 + $0x1e0] sm:$0xff]  ;;  %v16275_v12 = vld [vmem:[#allocation2 + $0x8] sm:$0xff] }
 0x1e6   :  { %v2138_v22 = vpop.f32.mrf.mxu1  ;;  %v1698_v61 = vadd.f32 %v12691_v55, %v21521_v49  ;;  %v3854_v24 = vld [vmem:[#allocation2 + $0x1e1] sm:$0xff]  ;;  %13365 = vmatprep.subr.mxu0 %v10725_v33  ;;  %v3855_v55 = vld [vmem:[#allocation2 + $0x1e9] sm:$0xff] }
 0x1e7   :  { %21520 = vst [vmem:[#allocation17_spill] sm:$0xff] %v16264_v59  ;;  %v16270_v3 = vadd.f32 %v2138_v22, %v1695_v54  ;;  %v1618_v39 = vpop.f32.mrf.mxu0  ;;  %13366 = vmatpush3.msra.mxu0 %v10725_v33  ;;  %v21527_v33 = vld [vmem:[#allocation22_spill] sm:$0xff] }
 0x1e8   :  { %v12819_v63 = vpop.f32.mrf.mxu1  ;;  %13282 = vmatmul.mubr.f32.gmra.mxu1 %v3851_v27  ;;  %v1697_v21 = vadd.f32 %v1618_v39, %v21523_v44  ;;  %13157 = vmatmul.mubr.f32.gmra.mxu0 %v16275_v12  ;;  %v21525_v27 = vld [vmem:[#allocation21_spill] sm:$0xff] }
 0x1e9   :  { %21522 = vst [vmem:[#allocation18_spill] sm:$0xff] %v16270_v3  ;;  %13284 = vmatprep.mubr.f32.mxu1 %v3852_v23  ;;  %v16273_v59 = vadd.f32 %v12819_v63, %v1698_v61  ;;  %v12694_v36 = vpop.f32.mrf.mxu0  ;;  %13159 = vmatprep.mubr.f32.mxu0 %v3324_v17  ;;  %v3325_v23 = vld [vmem:[#allocation2 + $0x1e8] sm:$0xff]  ;;  %v3326_v63 = vld [vmem:[#allocation2 + $0x1f8] sm:$0xff]  ;;  %v3327_v17 = vld [vmem:[#allocation2 + $0x200] sm:$0xff] }
 0x1ea   :  { %v2148_v52 = vpop.f32.mrf.mxu1  ;;  %v1700_v22 = vadd.f32 %v12694_v36, %v21525_v27  ;;  %v3856_v61 = vld [vmem:[#allocation2 + $0x1f9] sm:$0xff]  ;;  %v3328_v27 = vld [vmem:[#allocation2 + $0x210] sm:$0xff] }
 0x1eb   :  { %21524 = vst [vmem:[#allocation19_spill] sm:$0xff] %v16273_v59  ;;  %v16279_v37 = vadd.f32 %v2148_v52, %v1697_v21  ;;  %v1628_v49 = vpop.f32.mrf.mxu0 }
 0x1ec   :  { %v12822_v54 = vpop.f32.mrf.mxu1  ;;  %13285 = vmatmul.mubr.f32.gmra.mxu1 %v3853_v35  ;;  %v1699_v44 = vadd.f32 %v1628_v49, %v21527_v33  ;;  %13160 = vmatmul.mubr.f32.gmra.mxu0 %v3325_v23  ;;  %v3330_v33 = vld [vmem:[#allocation2 + $0x228] sm:$0xff] }
 0x1ed   :  { %21526 = vst [vmem:[#allocation20_spill] sm:$0xff] %v16279_v37  ;;  %13287 = vmatprep.mubr.f32.mxu1 %v3854_v24  ;;  %v16282_v59 = vadd.f32 %v12822_v54, %v1700_v22  ;;  %v12857_v3 = vpop.f32.mrf.mxu0  ;;  %13162 = vmatprep.mubr.f32.mxu0 %v3326_v63  ;;  %v3857_v24 = vld [vmem:[#allocation2 + $0x201] sm:$0xff]  ;;  %v3858_v37 = vld [vmem:[#allocation2 + $0x211] sm:$0xff] }
 0x1ee   :  { %v2158_v39 = vpop.f32.mrf.mxu1  ;;  %v2698_v52 = vadd.f32 %v12857_v3, %v16047_v16  ;;  %v3329_v16 = vld [vmem:[#allocation2 + $0x218] sm:$0xff] }
 0x1ef   :  { %v16284_v35 = vadd.f32 %v2158_v39, %v1699_v44  ;;  %v2378_v21 = vpop.f32.mrf.mxu0  ;;  %v3859_v3 = vld [vmem:[#allocation2 + $0x219] sm:$0xff]  ;;  %v3860_v44 = vld [vmem:[#allocation2 + $0x229] sm:$0xff] }
 0x1f0   :  { %v12985_v18 = vpop.f32.mrf.mxu1  ;;  %13288 = vmatmul.mubr.f32.gmra.mxu1 %v3855_v55  ;;  %v2697_v49 = vadd.f32 %v2378_v21, %v16050_v30  ;;  %13163 = vmatmul.mubr.f32.gmra.mxu0 %v3327_v17  ;;  %v3331_v21 = vld [vmem:[#allocation2 + $0x230] sm:$0xff] }
 0x1f1   :  { %13290 = vmatprep.mubr.f32.mxu1 %v3856_v61  ;;  %v16288_v54 = vadd.f32 %v12985_v18, %v2698_v52  ;;  %v12860_v22 = vpop.f32.mrf.mxu0  ;;  %13165 = vmatprep.mubr.f32.mxu0 %v3328_v27 }
 0x1f2   :  { %v2908_v36 = vpop.f32.mrf.mxu1  ;;  %v2700_v55 = vadd.f32 %v12860_v22, %v16053_v62  ;;  %v3862_v22 = vld [vmem:[#allocation2 + $0x241] sm:$0xff] }
 0x1f3   :  { %v16291_v39 = vadd.f32 %v2908_v36, %v2697_v49  ;;  %v2388_v63 = vpop.f32.mrf.mxu0  ;;  %v3332_v49 = vld [vmem:[#allocation2 + $0x240] sm:$0xff] }
 0x1f4   :  { %v12988_v23 = vpop.f32.mrf.mxu1  ;;  %13291 = vmatmul.mubr.f32.gmra.mxu1 %v3857_v24  ;;  %v2699_v30 = vadd.f32 %v2388_v63, %v16056_v4  ;;  %13166 = vmatmul.mubr.f32.gmra.mxu0 %v3329_v16  ;;  %v3333_v63 = vld [vmem:[#allocation2 + $0x248] sm:$0xff] }
 0x1f5   :  { %13293 = vmatprep.mubr.f32.mxu1 %v3858_v37  ;;  %v16294_v18 = vadd.f32 %v12988_v23, %v2700_v55  ;;  %v12863_v52 = vpop.f32.mrf.mxu0  ;;  %13168 = vmatprep.mubr.f32.mxu0 %v3330_v33  ;;  %v3861_v37 = vld [vmem:[#allocation2 + $0x231] sm:$0xff] }
 0x1f6   :  { %v2918_v61 = vpop.f32.mrf.mxu1  ;;  %v2702_v62 = vadd.f32 %v12863_v52, %v16059_v10  ;;  %v3864_v52 = vld [vmem:[#allocation2 + $0x259] sm:$0xff] }
 0x1f7   :  { %v16297_v24 = vadd.f32 %v2918_v61, %v2699_v30  ;;  %v2398_v36 = vpop.f32.mrf.mxu0  ;;  %v3863_v61 = vld [vmem:[#allocation2 + $0x249] sm:$0xff]  ;;  %v3334_v30 = vld [vmem:[#allocation2 + $0x258] sm:$0xff] }
 0x1f8   :  { %v12991_v17 = vpop.f32.mrf.mxu1  ;;  %13294 = vmatmul.mubr.f32.gmra.mxu1 %v3859_v3  ;;  %v2701_v4 = vadd.f32 %v2398_v36, %v16062_v8  ;;  %13169 = vmatmul.mubr.f32.gmra.mxu0 %v3331_v21  ;;  %v3335_v36 = vld [vmem:[#allocation2 + $0x260] sm:$0xff] }
 0x1f9   :  { %13296 = vmatprep.mubr.f32.mxu1 %v3860_v44  ;;  %v16300_v23 = vadd.f32 %v12991_v17, %v2702_v62  ;;  %v12866_v55 = vpop.f32.mrf.mxu0  ;;  %13171 = vmatprep.mubr.f32.mxu0 %v3332_v49 }
 0x1fa   :  { %v2928_v27 = vpop.f32.mrf.mxu1  ;;  %v2704_v10 = vadd.f32 %v12866_v55, %v16065_v31  ;;  %v3866_v55 = vld [vmem:[#allocation2 + $0x271] sm:$0xff] }
 0x1fb   :  { %v16303_v3 = vadd.f32 %v2928_v27, %v2701_v4  ;;  %v2408_v33 = vpop.f32.mrf.mxu0  ;;  %v3865_v27 = vld [vmem:[#allocation2 + $0x261] sm:$0xff]  ;;  %v3336_v4 = vld [vmem:[#allocation2 + $0x270] sm:$0xff] }
 0x1fc   :  { %v12994_v16 = vpop.f32.mrf.mxu1  ;;  %13297 = vmatmul.mubr.f32.gmra.mxu1 %v3861_v37  ;;  %v2703_v8 = vadd.f32 %v2408_v33, %v16068_v42  ;;  %13172 = vmatmul.mubr.f32.gmra.mxu0 %v3333_v63  ;;  %v3337_v33 = vld [vmem:[#allocation2 + $0x278] sm:$0xff] }
 0x1fd   :  { %13299 = vmatprep.mubr.f32.mxu1 %v3862_v22  ;;  %v16306_v17 = vadd.f32 %v12994_v16, %v2704_v10  ;;  %v12869_v62 = vpop.f32.mrf.mxu0  ;;  %13174 = vmatprep.mubr.f32.mxu0 %v3334_v30 }
 0x1fe   :  { %v2938_v44 = vpop.f32.mrf.mxu1  ;;  %v2706_v31 = vadd.f32 %v12869_v62, %v16071_v40  ;;  %v3868_v62 = vld [vmem:[#allocation2 + $0x289] sm:$0xff] }
 0x1ff   :  { %v16309_v37 = vadd.f32 %v2938_v44, %v2703_v8  ;;  %v2418_v49 = vpop.f32.mrf.mxu0  ;;  %v3867_v44 = vld [vmem:[#allocation2 + $0x279] sm:$0xff]  ;;  %v3338_v8 = vld [vmem:[#allocation2 + $0x288] sm:$0xff] }
 0x200   :  { %v12997_v21 = vpop.f32.mrf.mxu1  ;;  %13300 = vmatmul.mubr.f32.gmra.mxu1 %v3863_v61  ;;  %v2705_v42 = vadd.f32 %v2418_v49, %v16074_v5  ;;  %13175 = vmatmul.mubr.f32.gmra.mxu0 %v3335_v36  ;;  %v3339_v49 = vld [vmem:[#allocation2 + $0x290] sm:$0xff] }
 0x201   :  { %13302 = vmatprep.mubr.f32.mxu1 %v3864_v52  ;;  %v16312_v16 = vadd.f32 %v12997_v21, %v2706_v31  ;;  %v12872_v10 = vpop.f32.mrf.mxu0  ;;  %13177 = vmatprep.mubr.f32.mxu0 %v3336_v4 }
 0x202   :  { %v2948_v22 = vpop.f32.mrf.mxu1  ;;  %v2708_v40 = vadd.f32 %v12872_v10, %v16077_v11  ;;  %v3870_v10 = vld [vmem:[#allocation2 + $0x2a1] sm:$0xff] }
 0x203   :  { %v16315_v61 = vadd.f32 %v2948_v22, %v2705_v42  ;;  %v2428_v30 = vpop.f32.mrf.mxu0  ;;  %v3869_v22 = vld [vmem:[#allocation2 + $0x291] sm:$0xff]  ;;  %v3340_v42 = vld [vmem:[#allocation2 + $0x2a0] sm:$0xff] }
 0x204   :  { %v13000_v63 = vpop.f32.mrf.mxu1  ;;  %13303 = vmatmul.mubr.f32.gmra.mxu1 %v3865_v27  ;;  %v2707_v5 = vadd.f32 %v2428_v30, %v16080_v56  ;;  %13178 = vmatmul.mubr.f32.gmra.mxu0 %v3337_v33  ;;  %v3341_v30 = vld [vmem:[#allocation2 + $0x2a8] sm:$0xff] }
 0x205   :  { %13305 = vmatprep.mubr.f32.mxu1 %v3866_v55  ;;  %v16318_v21 = vadd.f32 %v13000_v63, %v2708_v40  ;;  %v12875_v31 = vpop.f32.mrf.mxu0  ;;  %13180 = vmatprep.mubr.f32.mxu0 %v3338_v8 }
 0x206   :  { %v2958_v52 = vpop.f32.mrf.mxu1  ;;  %v2710_v11 = vadd.f32 %v12875_v31, %v16083_v45  ;;  %v3872_v31 = vld [vmem:[#allocation2 + $0x2b9] sm:$0xff] }
 0x207   :  { %v16321_v27 = vadd.f32 %v2958_v52, %v2707_v5  ;;  %v2438_v4 = vpop.f32.mrf.mxu0  ;;  %v3871_v52 = vld [vmem:[#allocation2 + $0x2a9] sm:$0xff]  ;;  %v3342_v5 = vld [vmem:[#allocation2 + $0x2b8] sm:$0xff] }
 0x208   :  { %v13003_v36 = vpop.f32.mrf.mxu1  ;;  %13306 = vmatmul.mubr.f32.gmra.mxu1 %v3867_v44  ;;  %v2709_v56 = vadd.f32 %v2438_v4, %v16086_v25  ;;  %13181 = vmatmul.mubr.f32.gmra.mxu0 %v3339_v49  ;;  %v3343_v4 = vld [vmem:[#allocation2 + $0x2c0] sm:$0xff] }
 0x209   :  { %13308 = vmatprep.mubr.f32.mxu1 %v3868_v62  ;;  %v16324_v63 = vadd.f32 %v13003_v36, %v2710_v11  ;;  %v12878_v40 = vpop.f32.mrf.mxu0  ;;  %13183 = vmatprep.mubr.f32.mxu0 %v3340_v42 }
 0x20a   :  { %v2968_v55 = vpop.f32.mrf.mxu1  ;;  %v2712_v45 = vadd.f32 %v12878_v40, %v16089_v29  ;;  %v3874_v40 = vld [vmem:[#allocation2 + $0x2d1] sm:$0xff] }
 0x20b   :  { %v16327_v44 = vadd.f32 %v2968_v55, %v2709_v56  ;;  %v2448_v8 = vpop.f32.mrf.mxu0  ;;  %v3873_v55 = vld [vmem:[#allocation2 + $0x2c1] sm:$0xff]  ;;  %v3344_v56 = vld [vmem:[#allocation2 + $0x2d0] sm:$0xff] }
 0x20c   :  { %v13006_v33 = vpop.f32.mrf.mxu1  ;;  %13309 = vmatmul.mubr.f32.gmra.mxu1 %v3869_v22  ;;  %v2711_v25 = vadd.f32 %v2448_v8, %v16092_v26  ;;  %13184 = vmatmul.mubr.f32.gmra.mxu0 %v3341_v30  ;;  %v3875_v8 = vld [vmem:[#allocation2 + $0x2d9] sm:$0xff] }
 0x20d   :  { %13311 = vmatprep.mubr.f32.mxu1 %v3870_v10  ;;  %v16330_v36 = vadd.f32 %v13006_v33, %v2712_v45  ;;  %v12881_v11 = vpop.f32.mrf.mxu0  ;;  %13186 = vmatprep.mubr.f32.mxu0 %v3342_v5 }
 0x20e   :  { %v2978_v62 = vpop.f32.mrf.mxu1  ;;  %v2714_v29 = vadd.f32 %v12881_v11, %v16095_v6 }
 0x20f   :  { %v16333_v22 = vadd.f32 %v2978_v62, %v2711_v25  ;;  %v2458_v42 = vpop.f32.mrf.mxu0  ;;  %v3876_v25 = vld [vmem:[#allocation2 + $0x2e9] sm:$0xff] }
 0x210   :  { %v13009_v49 = vpop.f32.mrf.mxu1  ;;  %13312 = vmatmul.mubr.f32.gmra.mxu1 %v3871_v52  ;;  %v16338_v26 = vadd.f32 %v2458_v42, %v16098_v32  ;;  %13187 = vmatmul.mubr.f32.gmra.mxu0 %v3343_v4  ;;  %v3345_v52 = vld [vmem:[#allocation2 + $0x2d8] sm:$0xff]  ;;  %v3347_v4 = vld [vmem:[#allocation2 + $0x2f0] sm:$0xff] }
 0x211   :  { %13314 = vmatprep.mubr.f32.mxu1 %v3872_v31  ;;  %v16340_v33 = vadd.f32 %v13009_v49, %v2714_v29  ;;  %v12884_v45 = vpop.f32.mrf.mxu0  ;;  %13189 = vmatprep.mubr.f32.mxu0 %v3344_v56  ;;  %v3346_v31 = vld [vmem:[#allocation2 + $0x2e8] sm:$0xff] }
 0x212   :  { %v16335_v10 = vpop.f32.mrf.mxu1  ;;  %v2716_v6 = vadd.f32 %v12884_v45, %v16101_v2  ;;  %v3878_v45 = vld [vmem:[#allocation2 + $0x301] sm:$0xff] }
 0x213   :  { %v2468_v62 = vpop.f32.mrf.mxu0 }
 0x214   :  { %v13012_v30 = vpop.f32.mrf.mxu1  ;;  %13315 = vmatmul.mubr.f32.gmra.mxu1 %v3873_v55  ;;  %v16346_v32 = vadd.f32 %v2468_v62, %v16104_v38  ;;  %13190 = vmatmul.mubr.f32.gmra.mxu0 %v3345_v52  ;;  %v3877_v55 = vld [vmem:[#allocation2 + $0x2f1] sm:$0xff]  ;;  %v3879_v62 = vld [vmem:[#allocation2 + $0x309] sm:$0xff] }
 0x215   :  { %13317 = vmatprep.mubr.f32.mxu1 %v3874_v40  ;;  %v16348_v11 = vadd.f32 %v13012_v30, %v2716_v6  ;;  %v12887_v49 = vpop.f32.mrf.mxu0  ;;  %13192 = vmatprep.mubr.f32.mxu0 %v3346_v31  ;;  %v3348_v40 = vld [vmem:[#allocation2 + $0x300] sm:$0xff] }
 0x216   :  { %v16343_v5 = vpop.f32.mrf.mxu1  ;;  %21529 = vst [vmem:[#allocation22_spill] sm:$0xff] %v16346_v32  ;;  %v2718_v2 = vadd.f32 %v12887_v49, %v16107_v58  ;;  %v3350_v49 = vld [vmem:[#allocation2 + $0x318] sm:$0xff]  ;;  %v21534_v32 = vld [vmem:[#allocation24_spill] sm:$0xff] }
 0x217   :  { %21528 = vst [vmem:[#allocation21_spill] sm:$0xff] %v16343_v5  ;;  %v2478_v42 = vpop.f32.mrf.mxu0  ;;  %v21531_v5 = vld [vmem:[#allocation23_spill] sm:$0xff] }
 0x218   :  { %v13015_v29 = vpop.f32.mrf.mxu1  ;;  %13318 = vmatmul.mubr.f32.gmra.mxu1 %v3875_v8  ;;  %v16354_v38 = vadd.f32 %v2478_v42, %v21531_v5  ;;  %13193 = vmatmul.mubr.f32.gmra.mxu0 %v3347_v4  ;;  %v3349_v8 = vld [vmem:[#allocation2 + $0x308] sm:$0xff] }
 0x219   :  { %13320 = vmatprep.mubr.f32.mxu1 %v3876_v25  ;;  %v16356_v30 = vadd.f32 %v13015_v29, %v2718_v2  ;;  %v12890_v6 = vpop.f32.mrf.mxu0  ;;  %13195 = vmatprep.mubr.f32.mxu0 %v3348_v40  ;;  %v3881_v42 = vld [vmem:[#allocation2 + $0x321] sm:$0xff] }
 0x21a   :  { %v16351_v56 = vpop.f32.mrf.mxu1  ;;  %21532 = vst [vmem:[#allocation23_spill] sm:$0xff] %v16354_v38  ;;  %v2720_v58 = vadd.f32 %v12890_v6, %v16113_v57  ;;  %v3352_v6 = vld [vmem:[#allocation2 + $0x330] sm:$0xff] }
 0x21b   :  { %21530 = vst [vmem:[#allocation25_spill] sm:$0xff] %v16351_v56  ;;  %v2488_v31 = vpop.f32.mrf.mxu0  ;;  %v3880_v56 = vld [vmem:[#allocation2 + $0x319] sm:$0xff] }
 0x21c   :  { %v13018_v52 = vpop.f32.mrf.mxu1  ;;  %13321 = vmatmul.mubr.f32.gmra.mxu1 %v3877_v55  ;;  %v16362_v5 = vadd.f32 %v2488_v31, %v21534_v32  ;;  %13196 = vmatmul.mubr.f32.gmra.mxu0 %v3349_v8  ;;  %v3351_v55 = vld [vmem:[#allocation2 + $0x320] sm:$0xff]  ;;  %v4407_v38 = vld [vmem:[#allocation2 + $0x2f2] sm:$0xff] }
 0x21d   :  { %13323 = vmatprep.mubr.f32.mxu1 %v3878_v45  ;;  %v16364_v29 = vadd.f32 %v13018_v52, %v2720_v58  ;;  %v12893_v2 = vpop.f32.mrf.mxu0  ;;  %13198 = vmatprep.mubr.f32.mxu0 %v3350_v49 }
 0x21e   :  { %v16359_v25 = vpop.f32.mrf.mxu1  ;;  %21535 = vst [vmem:[#allocation24_spill] sm:$0xff] %v16362_v5  ;;  %v2722_v57 = vadd.f32 %v12893_v2, %v16119_v50  ;;  %v3354_v2 = vld [vmem:[#allocation2 + $0x348] sm:$0xff] }
 0x21f   :  { %21533 = vst [vmem:[#allocation26_spill] sm:$0xff] %v16359_v25  ;;  %v2498_v40 = vpop.f32.mrf.mxu0  ;;  %v3882_v25 = vld [vmem:[#allocation2 + $0x331] sm:$0xff] }
 0x220   :  { %v13021_v4 = vpop.f32.mrf.mxu1  ;;  %13324 = vmatmul.mubr.f32.gmra.mxu1 %v3879_v62  ;;  %v16370_v32 = vadd.f32 %v2498_v40, %v16122_v15  ;;  %13199 = vmatmul.mubr.f32.gmra.mxu0 %v3351_v55  ;;  %v3353_v62 = vld [vmem:[#allocation2 + $0x338] sm:$0xff] }
 0x221   :  { %13326 = vmatprep.mubr.f32.mxu1 %v3880_v56  ;;  %v16372_v52 = vadd.f32 %v13021_v4, %v2722_v57  ;;  %v12896_v58 = vpop.f32.mrf.mxu0  ;;  %13201 = vmatprep.mubr.f32.mxu0 %v3352_v6  ;;  %v3883_v56 = vld [vmem:[#allocation2 + $0x339] sm:$0xff] }
 0x222   :  { %v16367_v45 = vpop.f32.mrf.mxu1  ;;  %21537 = vst [vmem:[#allocation28_spill] sm:$0xff] %v16370_v32  ;;  %v2724_v50 = vadd.f32 %v12896_v58, %v16125_v7  ;;  %v4352_v6 = vld [vmem:[#allocation2 + $0x32] sm:$0xff] }
 0x223   :  { %21536 = vst [vmem:[#allocation27_spill] sm:$0xff] %v16367_v45  ;;  %v2508_v31 = vpop.f32.mrf.mxu0  ;;  %v3884_v45 = vld [vmem:[#allocation2 + $0x349] sm:$0xff] }
 0x224   :  { %v13024_v8 = vpop.f32.mrf.mxu1  ;;  %13327 = vmatmul.mubr.f32.gmra.mxu1 %v3881_v42  ;;  %v16378_v15 = vadd.f32 %v2508_v31, %v16128_v19  ;;  %13202 = vmatmul.mubr.f32.gmra.mxu0 %v3353_v62  ;;  %v4354_v31 = vld [vmem:[#allocation2 + $0x4a] sm:$0xff] }
 0x225   :  { %13329 = vmatprep.mubr.f32.mxu1 %v3882_v25  ;;  %v16380_v4 = vadd.f32 %v13024_v8, %v2724_v50  ;;  %v12899_v57 = vpop.f32.mrf.mxu0  ;;  %13204 = vmatprep.mubr.f32.mxu0 %v3354_v2  ;;  %v3885_v25 = vld [vmem:[#allocation2 + $0x351] sm:$0xff] }
 0x226   :  { %v16375_v49 = vpop.f32.mrf.mxu1  ;;  %21539 = vst [vmem:[#allocation30_spill] sm:$0xff] %v16378_v15  ;;  %v2726_v7 = vadd.f32 %v12899_v57, %v16131_v60  ;;  %v4353_v60 = vld [vmem:[#allocation2 + $0x3a] sm:$0xff] }
 0x227   :  { %21538 = vst [vmem:[#allocation29_spill] sm:$0xff] %v16375_v49  ;;  %v2518_v42 = vpop.f32.mrf.mxu0 }
 0x228   :  { %v13027_v55 = vpop.f32.mrf.mxu1  ;;  %13330 = vmatmul.mubr.f32.gmra.mxu1 %v3883_v56  ;;  %v16386_v58 = vadd.f32 %v2518_v42, %v16134_v34  ;;  %13205 = vmatmul.mubr.f32.gmra.mxu0 %v16275_v12  ;;  %v4356_v42 = vld [vmem:[#allocation2 + $0x62] sm:$0xff] }
 0x229   :  { %13332 = vmatprep.mubr.f32.mxu1 %v3884_v45  ;;  %v16388_v19 = vadd.f32 %v13027_v55, %v2726_v7  ;;  %v12902_v8 = vpop.f32.mrf.mxu0  ;;  %13367 = vmatprep.mubr.f32.mxu0 %v4352_v6  ;;  %v4355_v7 = vld [vmem:[#allocation2 + $0x52] sm:$0xff] }
 0x22a   :  { %v16383_v40 = vpop.f32.mrf.mxu1  ;;  %21541 = vst [vmem:[#allocation32_spill] sm:$0xff] %v16386_v58  ;;  %v2728_v62 = vadd.f32 %v12902_v8, %v16137_v28 }
 0x22b   :  { %21540 = vst [vmem:[#allocation31_spill] sm:$0xff] %v16383_v40  ;;  %v2528_v45 = vpop.f32.mrf.mxu0 }
 0x22c   :  { %v13030_v50 = vpop.f32.mrf.mxu1  ;;  %13333 = vmatmul.mubr.f32.gmra.mxu1 %v3885_v25  ;;  %v16395_v2 = vadd.f32 %v2528_v45, %v16143_v53  ;;  %13368 = vmatmul.mubr.f32.vlgmr.msra.gmra.mxu0 %v4353_v60  ;;  %v4357_v60 = vld [vmem:[#allocation2 + $0x6a] sm:$0xff] }
 0x22d   :  { %v16397_v34 = vadd.f32 %v13030_v50, %v2728_v62  ;;  %v12905_v57 = vpop.f32.mrf.mxu0  ;;  %13370 = vmatprep.mubr.f32.mxu0 %v4354_v31  ;;  %v4358_v31 = vld [vmem:[#allocation2 + $0x7a] sm:$0xff] }
 0x22e   :  { %v16392_v56 = vpop.f32.mrf.mxu1  ;;  %21543 = vst [vmem:[#allocation34_spill] sm:$0xff] %v16395_v2  ;;  %v2730_v12 = vadd.f32 %v12905_v57, %v16147_v51 }
 0x22f   :  { %21542 = vst [vmem:[#allocation33_spill] sm:$0xff] %v16392_v56  ;;  %v2538_v25 = vpop.f32.mrf.mxu0 }
 0x230   :  { %v13033_v55 = vpop.f32.mrf.mxu1  ;;  %v16403_v6 = vadd.f32 %v2538_v25, %v16153_v46  ;;  %13371 = vmatmul.mubr.f32.gmra.mxu0 %v4355_v7  ;;  %v4359_v7 = vld [vmem:[#allocation2 + $0x82] sm:$0xff] }
 0x231   :  { %v16405_v8 = vadd.f32 %v13033_v55, %v2730_v12  ;;  %v12908_v53 = vpop.f32.mrf.mxu0  ;;  %13373 = vmatprep.mubr.f32.mxu0 %v4356_v42  ;;  %v4360_v42 = vld [vmem:[#allocation2 + $0x92] sm:$0xff] }
 0x232   :  { %v16400_v28 = vpop.f32.mrf.mxu1  ;;  %21545 = vst [vmem:[#allocation36_spill] sm:$0xff] %v16403_v6  ;;  %v2732_v62 = vadd.f32 %v12908_v53, %v16156_v0 }
 0x233   :  { %21544 = vst [vmem:[#allocation35_spill] sm:$0xff] %v16400_v28  ;;  %v2548_v45 = vpop.f32.mrf.mxu0 }
 0x234   :  { %v13036_v50 = vpop.f32.mrf.mxu1  ;;  %v16411_v57 = vadd.f32 %v2548_v45, %v16162_v13  ;;  %13374 = vmatmul.mubr.f32.gmra.mxu0 %v4357_v60  ;;  %v4361_v60 = vld [vmem:[#allocation2 + $0x9a] sm:$0xff] }
 0x235   :  { %v16413_v28 = vadd.f32 %v13036_v50, %v2732_v62  ;;  %v12911_v46 = vpop.f32.mrf.mxu0  ;;  %13376 = vmatprep.mubr.f32.mxu0 %v4358_v31  ;;  %v4362_v31 = vld [vmem:[#allocation2 + $0xaa] sm:$0xff] }
 0x236   :  { %v16408_v51 = vpop.f32.mrf.mxu1  ;;  %21547 = vst [vmem:[#allocation38_spill] sm:$0xff] %v16411_v57  ;;  %v2734_v12 = vadd.f32 %v12911_v46, %v16165_v43 }
 0x237   :  { %21546 = vst [vmem:[#allocation37_spill] sm:$0xff] %v16408_v51  ;;  %v2558_v25 = vpop.f32.mrf.mxu0 }
 0x238   :  { %v13039_v55 = vpop.f32.mrf.mxu1  ;;  %v16419_v53 = vadd.f32 %v2558_v25, %v16171_v41  ;;  %13377 = vmatmul.mubr.f32.gmra.mxu0 %v4359_v7  ;;  %v4363_v7 = vld [vmem:[#allocation2 + $0xb2] sm:$0xff] }
 0x239   :  { %v16421_v51 = vadd.f32 %v13039_v55, %v2734_v12  ;;  %v12914_v13 = vpop.f32.mrf.mxu0  ;;  %13379 = vmatprep.mubr.f32.mxu0 %v4360_v42  ;;  %v4364_v42 = vld [vmem:[#allocation2 + $0xc2] sm:$0xff] }
 0x23a   :  { %v16416_v0 = vpop.f32.mrf.mxu1  ;;  %21549 = vst [vmem:[#allocation40_spill] sm:$0xff] %v16419_v53  ;;  %v2736_v62 = vadd.f32 %v12914_v13, %v16174_v48 }
 0x23b   :  { %21548 = vst [vmem:[#allocation39_spill] sm:$0xff] %v16416_v0  ;;  %v2568_v45 = vpop.f32.mrf.mxu0 }
 0x23c   :  { %v13042_v50 = vpop.f32.mrf.mxu1  ;;  %v16427_v46 = vadd.f32 %v2568_v45, %v16180_v20  ;;  %13380 = vmatmul.mubr.f32.gmra.mxu0 %v4361_v60  ;;  %v4365_v60 = vld [vmem:[#allocation2 + $0xca] sm:$0xff] }
 0x23d   :  { %v16429_v0 = vadd.f32 %v13042_v50, %v2736_v62  ;;  %v12917_v41 = vpop.f32.mrf.mxu0  ;;  %13382 = vmatprep.mubr.f32.mxu0 %v4362_v31  ;;  %v4366_v31 = vld [vmem:[#allocation2 + $0xda] sm:$0xff] }
 0x23e   :  { %v16424_v43 = vpop.f32.mrf.mxu1  ;;  %21551 = vst [vmem:[#allocation42_spill] sm:$0xff] %v16427_v46  ;;  %v2738_v12 = vadd.f32 %v12917_v41, %v16183_v1 }
 0x23f   :  { %21550 = vst [vmem:[#allocation41_spill] sm:$0xff] %v16424_v43  ;;  %v2578_v25 = vpop.f32.mrf.mxu0 }
 0x240   :  { %v13045_v55 = vpop.f32.mrf.mxu1  ;;  %v16435_v13 = vadd.f32 %v2578_v25, %v16189_v9  ;;  %13383 = vmatmul.mubr.f32.gmra.mxu0 %v4363_v7  ;;  %v4367_v7 = vld [vmem:[#allocation2 + $0xe2] sm:$0xff] }
 0x241   :  { %v16437_v43 = vadd.f32 %v13045_v55, %v2738_v12  ;;  %v12920_v20 = vpop.f32.mrf.mxu0  ;;  %13385 = vmatprep.mubr.f32.mxu0 %v4364_v42  ;;  %v21556_v12 = vld [vmem:[#allocation4_spill] sm:$0xff]  ;;  %v4368_v42 = vld [vmem:[#allocation2 + $0xf2] sm:$0xff] }
 0x242   :  { %v16432_v48 = vpop.f32.mrf.mxu1  ;;  %21553 = vst [vmem:[#allocation44_spill] sm:$0xff] %v16435_v13  ;;  %v2740_v62 = vadd.f32 %v12920_v20, %v16192_v47  ;;  %v21558_v20 = vld [vmem:[#allocation5_spill] sm:$0xff] }
 0x243   :  { %21552 = vst [vmem:[#allocation43_spill] sm:$0xff] %v16432_v48  ;;  %v2588_v45 = vpop.f32.mrf.mxu0 }
 0x244   :  { %v13048_v50 = vpop.f32.mrf.mxu1  ;;  %v16443_v41 = vadd.f32 %v2588_v45, %v16198_v14  ;;  %13386 = vmatmul.mubr.f32.gmra.mxu0 %v4365_v60  ;;  %v4369_v60 = vld [vmem:[#allocation2 + $0xfa] sm:$0xff] }
 0x245   :  { %v16445_v48 = vadd.f32 %v13048_v50, %v2740_v62  ;;  %v12923_v9 = vpop.f32.mrf.mxu0  ;;  %13388 = vmatprep.mubr.f32.mxu0 %v4366_v31  ;;  %v21560_v62 = vld [vmem:[#allocation6_spill] sm:$0xff]  ;;  %v4370_v31 = vld [vmem:[#allocation2 + $0x10a] sm:$0xff] }
 0x246   :  { %v16440_v1 = vpop.f32.mrf.mxu1  ;;  %21555 = vst [vmem:[#allocation46_spill] sm:$0xff] %v16443_v41  ;;  %v2742_v25 = vadd.f32 %v12923_v9, %v21556_v12  ;;  %v21562_v12 = vld [vmem:[#allocation7_spill] sm:$0xff] }
 0x247   :  { %21554 = vst [vmem:[#allocation45_spill] sm:$0xff] %v16440_v1  ;;  %v2598_v13 = vpop.f32.mrf.mxu0 }
 0x248   :  { %v13051_v55 = vpop.f32.mrf.mxu1  ;;  %v16451_v46 = vadd.f32 %v2598_v13, %v21558_v20  ;;  %13389 = vmatmul.mubr.f32.gmra.mxu0 %v4367_v7  ;;  %v4371_v7 = vld [vmem:[#allocation2 + $0x112] sm:$0xff] }
 0x249   :  { %v16453_v1 = vadd.f32 %v13051_v55, %v2742_v25  ;;  %v12926_v14 = vpop.f32.mrf.mxu0  ;;  %13391 = vmatprep.mubr.f32.mxu0 %v4368_v42  ;;  %v21564_v25 = vld [vmem:[#allocation3_spill] sm:$0xff] }
 0x24a   :  { %v16448_v47 = vpop.f32.mrf.mxu1  ;;  %21559 = vst [vmem:[#allocation5_spill] sm:$0xff] %v16451_v46  ;;  %v2744_v45 = vadd.f32 %v12926_v14, %v21560_v62  ;;  %v4372_v42 = vld [vmem:[#allocation2 + $0x122] sm:$0xff] }
 0x24b   :  { %21557 = vst [vmem:[#allocation4_spill] sm:$0xff] %v16448_v47  ;;  %v2608_v41 = vpop.f32.mrf.mxu0  ;;  %v21566_v62 = vld [vmem:[#allocation8_spill] sm:$0xff] }
 0x24c   :  { %v13054_v50 = vpop.f32.mrf.mxu1  ;;  %v16459_v53 = vadd.f32 %v2608_v41, %v21562_v12  ;;  %13392 = vmatmul.mubr.f32.gmra.mxu0 %v4369_v60  ;;  %v4373_v60 = vld [vmem:[#allocation2 + $0x12a] sm:$0xff] }
 0x24d   :  { %v16461_v47 = vadd.f32 %v13054_v50, %v2744_v45  ;;  %v12929_v13 = vpop.f32.mrf.mxu0  ;;  %13394 = vmatprep.mubr.f32.mxu0 %v4370_v31  ;;  %v21568_v45 = vld [vmem:[#allocation9_spill] sm:$0xff]  ;;  %v4374_v31 = vld [vmem:[#allocation2 + $0x13a] sm:$0xff] }
 0x24e   :  { %v16456_v9 = vpop.f32.mrf.mxu1  ;;  %21563 = vst [vmem:[#allocation7_spill] sm:$0xff] %v16459_v53  ;;  %v2746_v20 = vadd.f32 %v12929_v13, %v21564_v25  ;;  %v21570_v25 = vld [vmem:[#allocation10_spill] sm:$0xff] }
 0x24f   :  { %21561 = vst [vmem:[#allocation6_spill] sm:$0xff] %v16456_v9  ;;  %v2618_v46 = vpop.f32.mrf.mxu0 }
 0x250   :  { %v13057_v55 = vpop.f32.mrf.mxu1  ;;  %v16467_v57 = vadd.f32 %v2618_v46, %v21566_v62  ;;  %13395 = vmatmul.mubr.f32.gmra.mxu0 %v4371_v7  ;;  %v4375_v7 = vld [vmem:[#allocation2 + $0x142] sm:$0xff] }
 0x251   :  { %v16469_v9 = vadd.f32 %v13057_v55, %v2746_v20  ;;  %v12932_v41 = vpop.f32.mrf.mxu0  ;;  %13397 = vmatprep.mubr.f32.mxu0 %v4372_v42  ;;  %v21572_v20 = vld [vmem:[#allocation11_spill] sm:$0xff]  ;;  %v4376_v42 = vld [vmem:[#allocation2 + $0x152] sm:$0xff] }
 0x252   :  { %v16464_v14 = vpop.f32.mrf.mxu1  ;;  %21567 = vst [vmem:[#allocation8_spill] sm:$0xff] %v16467_v57  ;;  %v2748_v12 = vadd.f32 %v12932_v41, %v21568_v45  ;;  %v21574_v45 = vld [vmem:[#allocation12_spill] sm:$0xff] }
 0x253   :  { %21565 = vst [vmem:[#allocation3_spill] sm:$0xff] %v16464_v14  ;;  %v2628_v53 = vpop.f32.mrf.mxu0 }
 0x254   :  { %v13060_v50 = vpop.f32.mrf.mxu1  ;;  %v16475_v6 = vadd.f32 %v2628_v53, %v21570_v25  ;;  %13398 = vmatmul.mubr.f32.gmra.mxu0 %v4373_v60  ;;  %v4377_v60 = vld [vmem:[#allocation2 + $0x15a] sm:$0xff] }
 0x255   :  { %v16477_v14 = vadd.f32 %v13060_v50, %v2748_v12  ;;  %v12935_v46 = vpop.f32.mrf.mxu0  ;;  %13400 = vmatprep.mubr.f32.mxu0 %v4374_v31  ;;  %v21576_v12 = vld [vmem:[#allocation13_spill] sm:$0xff] }
 0x256   :  { %v16472_v13 = vpop.f32.mrf.mxu1  ;;  %21571 = vst [vmem:[#allocation10_spill] sm:$0xff] %v16475_v6  ;;  %v2750_v62 = vadd.f32 %v12935_v46, %v21572_v20  ;;  %v4378_v31 = vld [vmem:[#allocation2 + $0x16a] sm:$0xff]  ;;  %v21578_v20 = vld [vmem:[#allocation14_spill] sm:$0xff] }
 0x257   :  { %21569 = vst [vmem:[#allocation9_spill] sm:$0xff] %v16472_v13  ;;  %v2638_v57 = vpop.f32.mrf.mxu0 }
 0x258   :  { %v13063_v55 = vpop.f32.mrf.mxu1  ;;  %v16483_v56 = vadd.f32 %v2638_v57, %v21574_v45  ;;  %13401 = vmatmul.mubr.f32.gmra.mxu0 %v4375_v7  ;;  %v4379_v7 = vld [vmem:[#allocation2 + $0x172] sm:$0xff] }
 0x259   :  { %v16485_v13 = vadd.f32 %v13063_v55, %v2750_v62  ;;  %v12938_v53 = vpop.f32.mrf.mxu0  ;;  %13403 = vmatprep.mubr.f32.mxu0 %v4376_v42  ;;  %v21580_v62 = vld [vmem:[#allocation15_spill] sm:$0xff] }
 0x25a   :  { %v16480_v41 = vpop.f32.mrf.mxu1  ;;  %21575 = vst [vmem:[#allocation12_spill] sm:$0xff] %v16483_v56  ;;  %v2752_v25 = vadd.f32 %v12938_v53, %v21576_v12  ;;  %v4380_v42 = vld [vmem:[#allocation2 + $0x182] sm:$0xff] }
 0x25b   :  { %21573 = vst [vmem:[#allocation11_spill] sm:$0xff] %v16480_v41  ;;  %v2648_v6 = vpop.f32.mrf.mxu0  ;;  %v21582_v12 = vld [vmem:[#allocation16_spill] sm:$0xff] }
 0x25c   :  { %v13066_v50 = vpop.f32.mrf.mxu1  ;;  %v16491_v2 = vadd.f32 %v2648_v6, %v21578_v20  ;;  %13404 = vmatmul.mubr.f32.gmra.mxu0 %v4377_v60  ;;  %v4381_v60 = vld [vmem:[#allocation2 + $0x18a] sm:$0xff] }
 0x25d   :  { %v16493_v41 = vadd.f32 %v13066_v50, %v2752_v25  ;;  %v12941_v57 = vpop.f32.mrf.mxu0  ;;  %13406 = vmatprep.mubr.f32.mxu0 %v4378_v31  ;;  %v21584_v25 = vld [vmem:[#allocation17_spill] sm:$0xff]  ;;  %v4382_v31 = vld [vmem:[#allocation2 + $0x19a] sm:$0xff] }
 0x25e   :  { %v16488_v46 = vpop.f32.mrf.mxu1  ;;  %21579 = vst [vmem:[#allocation14_spill] sm:$0xff] %v16491_v2  ;;  %v2754_v45 = vadd.f32 %v12941_v57, %v21580_v62  ;;  %v21586_v62 = vld [vmem:[#allocation18_spill] sm:$0xff] }
 0x25f   :  { %21577 = vst [vmem:[#allocation13_spill] sm:$0xff] %v16488_v46  ;;  %v2658_v56 = vpop.f32.mrf.mxu0 }
 0x260   :  { %v13069_v55 = vpop.f32.mrf.mxu1  ;;  %v16499_v40 = vadd.f32 %v2658_v56, %v21582_v12  ;;  %13407 = vmatmul.mubr.f32.gmra.mxu0 %v4379_v7  ;;  %v4383_v7 = vld [vmem:[#allocation2 + $0x1a2] sm:$0xff] }
 0x261   :  { %v16501_v46 = vadd.f32 %v13069_v55, %v2754_v45  ;;  %v12944_v6 = vpop.f32.mrf.mxu0  ;;  %13409 = vmatprep.mubr.f32.mxu0 %v4380_v42  ;;  %v21588_v45 = vld [vmem:[#allocation19_spill] sm:$0xff] }
 0x262   :  { %v16496_v53 = vpop.f32.mrf.mxu1  ;;  %21583 = vst [vmem:[#allocation16_spill] sm:$0xff] %v16499_v40  ;;  %v2756_v20 = vadd.f32 %v12944_v6, %v21584_v25  ;;  %v4384_v42 = vld [vmem:[#allocation2 + $0x1e2] sm:$0xff] }
 0x263   :  { %21581 = vst [vmem:[#allocation15_spill] sm:$0xff] %v16496_v53  ;;  %v2668_v2 = vpop.f32.mrf.mxu0  ;;  %v21590_v25 = vld [vmem:[#allocation20_spill] sm:$0xff] }
 0x264   :  { %v13072_v50 = vpop.f32.mrf.mxu1  ;;  %v16507_v58 = vadd.f32 %v2668_v2, %v21586_v62  ;;  %13410 = vmatmul.mubr.f32.gmra.mxu0 %v4381_v60  ;;  %v4385_v60 = vld [vmem:[#allocation2 + $0x1ea] sm:$0xff] }
 0x265   :  { %v16509_v53 = vadd.f32 %v13072_v50, %v2756_v20  ;;  %v12947_v56 = vpop.f32.mrf.mxu0  ;;  %13412 = vmatprep.mubr.f32.mxu0 %v4382_v31  ;;  %v4386_v31 = vld [vmem:[#allocation2 + $0x1fa] sm:$0xff] }
 0x266   :  { %v16504_v57 = vpop.f32.mrf.mxu1  ;;  %21587 = vst [vmem:[#allocation18_spill] sm:$0xff] %v16507_v58  ;;  %v2758_v12 = vadd.f32 %v12947_v56, %v21588_v45 }
 0x267   :  { %21585 = vst [vmem:[#allocation17_spill] sm:$0xff] %v16504_v57  ;;  %v2678_v40 = vpop.f32.mrf.mxu0 }
 0x268   :  { %v13075_v55 = vpop.f32.mrf.mxu1  ;;  %v16515_v49 = vadd.f32 %v2678_v40, %v21590_v25  ;;  %13413 = vmatmul.mubr.f32.gmra.mxu0 %v4383_v7  ;;  %v4388_v25 = vld [vmem:[#allocation2 + $0x212] sm:$0xff] }
 0x269   :  { %v16517_v57 = vadd.f32 %v13075_v55, %v2758_v12  ;;  %v12950_v2 = vpop.f32.mrf.mxu0  ;;  %13415 = vmatprep.mubr.f32.mxu0 %v4384_v42 }
 0x26a   :  { %v16512_v6 = vpop.f32.mrf.mxu1  ;;  %21591 = vst [vmem:[#allocation20_spill] sm:$0xff] %v16515_v49  ;;  %v2760_v20 = vadd.f32 %v12950_v2, %v16282_v59  ;;  %v4387_v59 = vld [vmem:[#allocation2 + $0x202] sm:$0xff] }
 0x26b   :  { %21589 = vst [vmem:[#allocation19_spill] sm:$0xff] %v16512_v6  ;;  %v2688_v62 = vpop.f32.mrf.mxu0 }
 0x26c   :  { %v13078_v50 = vpop.f32.mrf.mxu1  ;;  %v16523_v45 = vadd.f32 %v2688_v62, %v16284_v35  ;;  %13416 = vmatmul.mubr.f32.gmra.mxu0 %v4385_v60 }
 0x26d   :  { %v16525_v6 = vadd.f32 %v13078_v50, %v2760_v20  ;;  %v13113_v40 = vpop.f32.mrf.mxu0  ;;  %13418 = vmatprep.mubr.f32.mxu0 %v4386_v31  ;;  %v4389_v20 = vld [vmem:[#allocation2 + $0x21a] sm:$0xff] }
 0x26e   :  { %v16520_v56 = vpop.f32.mrf.mxu1  ;;  %21593 = vst [vmem:[#allocation48_spill] sm:$0xff] %v16523_v45  ;;  %v16530_v12 = vadd.f32 %v13113_v40, %v16288_v54  ;;  %v4390_v54 = vld [vmem:[#allocation2 + $0x22a] sm:$0xff] }
 0x26f   :  { %21592 = vst [vmem:[#allocation47_spill] sm:$0xff] %v16520_v56  ;;  %v3439_v7 = vpop.f32.mrf.mxu0 }
 0x270   :  { %v16527_v55 = vpop.f32.mrf.mxu1  ;;  %v16535_v2 = vadd.f32 %v3439_v7, %v16291_v39  ;;  %13419 = vmatmul.mubr.f32.gmra.mxu0 %v4387_v59  ;;  %v4391_v39 = vld [vmem:[#allocation2 + $0x232] sm:$0xff]  ;;  %v4392_v7 = vld [vmem:[#allocation2 + $0x242] sm:$0xff] }
 0x271   :  { %v13116_v35 = vpop.f32.mrf.mxu0  ;;  %13421 = vmatprep.mubr.f32.mxu0 %v4388_v25 }
 0x272   :  { %v16532_v42 = vpop.f32.mrf.mxu1  ;;  %v16538_v50 = vadd.f32 %v13116_v35, %v16294_v18 }
 0x273   :  { %v3449_v60 = vpop.f32.mrf.mxu0 }
 0x274   :  { %v16540_v62 = vpop.f32.mrf.mxu1  ;;  %v16543_v31 = vadd.f32 %v3449_v60, %v16297_v24  ;;  %13422 = vmatmul.mubr.f32.gmra.mxu0 %v4389_v20  ;;  %v4393_v24 = vld [vmem:[#allocation2 + $0x24a] sm:$0xff]  ;;  %v4394_v60 = vld [vmem:[#allocation2 + $0x25a] sm:$0xff] }
 0x275   :  { %v13119_v40 = vpop.f32.mrf.mxu0  ;;  %13424 = vmatprep.mubr.f32.mxu0 %v4390_v54 }
 0x276   :  { %v16546_v56 = vadd.f32 %v13119_v40, %v16300_v23  ;;  %v16548_v59 = vpop.f32.mrf.mxu1 }
 0x277   :  { %v3459_v18 = vpop.f32.mrf.mxu0 }
 0x278   :  { %v16551_v25 = vadd.f32 %v3459_v18, %v16303_v3  ;;  %13425 = vmatmul.mubr.f32.gmra.mxu0 %v4391_v39  ;;  %v16556_v20 = vpop.f32.mrf.mxu1  ;;  %v4395_v3 = vld [vmem:[#allocation2 + $0x262] sm:$0xff]  ;;  %v4396_v18 = vld [vmem:[#allocation2 + $0x272] sm:$0xff] }
 0x279   :  { %v13122_v35 = vpop.f32.mrf.mxu0  ;;  %13427 = vmatprep.mubr.f32.mxu0 %v4392_v7 }
 0x27a   :  { %v16554_v45 = vadd.f32 %v13122_v35, %v16306_v17  ;;  %v16564_v39 = vpop.f32.mrf.mxu1 }
 0x27b   :  { %v3469_v23 = vpop.f32.mrf.mxu0 }
 0x27c   :  { %v16559_v54 = vadd.f32 %v3469_v23, %v16309_v37  ;;  %13428 = vmatmul.mubr.f32.gmra.mxu0 %v4393_v24  ;;  %v4397_v37 = vld [vmem:[#allocation2 + $0x27a] sm:$0xff]  ;;  %v16572_v24 = vpop.f32.mrf.mxu1  ;;  %v4398_v23 = vld [vmem:[#allocation2 + $0x28a] sm:$0xff] }
 0x27d   :  { %v13125_v40 = vpop.f32.mrf.mxu0  ;;  %13430 = vmatprep.mubr.f32.mxu0 %v4394_v60 }
 0x27e   :  { %v16562_v49 = vadd.f32 %v13125_v40, %v16312_v16 }
 0x27f   :  { %v3479_v17 = vpop.f32.mrf.mxu0 }
 0x280   :  { %v16567_v7 = vadd.f32 %v3479_v17, %v16315_v61  ;;  %13431 = vmatmul.mubr.f32.gmra.mxu0 %v4395_v3  ;;  %v4399_v61 = vld [vmem:[#allocation2 + $0x292] sm:$0xff]  ;;  %v16580_v3 = vpop.f32.mrf.mxu1  ;;  %v4400_v17 = vld [vmem:[#allocation2 + $0x2a2] sm:$0xff] }
 0x281   :  { %v13128_v35 = vpop.f32.mrf.mxu0  ;;  %13433 = vmatprep.mubr.f32.mxu0 %v4396_v18 }
 0x282   :  { %v16570_v58 = vadd.f32 %v13128_v35, %v16318_v21 }
 0x283   :  { %v3489_v16 = vpop.f32.mrf.mxu0 }
 0x284   :  { %v16575_v60 = vadd.f32 %v3489_v16, %v16321_v27  ;;  %13434 = vmatmul.mubr.f32.gmra.mxu0 %v4397_v37  ;;  %v4401_v27 = vld [vmem:[#allocation2 + $0x2aa] sm:$0xff]  ;;  %v16588_v37 = vpop.f32.mrf.mxu1  ;;  %v4402_v16 = vld [vmem:[#allocation2 + $0x2ba] sm:$0xff] }
 0x285   :  { %v13131_v40 = vpop.f32.mrf.mxu0  ;;  %13436 = vmatprep.mubr.f32.mxu0 %v4398_v23 }
 0x286   :  { %v16578_v15 = vadd.f32 %v13131_v40, %v16324_v63 }
 0x287   :  { %v3499_v21 = vpop.f32.mrf.mxu0 }
 0x288   :  { %v16583_v18 = vadd.f32 %v3499_v21, %v16327_v44  ;;  %13437 = vmatmul.mubr.f32.gmra.mxu0 %v4399_v61  ;;  %v4403_v44 = vld [vmem:[#allocation2 + $0x2c2] sm:$0xff]  ;;  %v16596_v61 = vpop.f32.mrf.mxu1  ;;  %v4404_v21 = vld [vmem:[#allocation2 + $0x2d2] sm:$0xff] }
 0x289   :  { %v13134_v35 = vpop.f32.mrf.mxu0  ;;  %13439 = vmatprep.mubr.f32.mxu0 %v4400_v17 }
 0x28a   :  { %v16586_v32 = vadd.f32 %v13134_v35, %v16330_v36 }
 0x28b   :  { %v3509_v63 = vpop.f32.mrf.mxu0 }
 0x28c   :  { %v16591_v23 = vadd.f32 %v3509_v63, %v16333_v22  ;;  %13440 = vmatmul.mubr.f32.gmra.mxu0 %v4401_v27  ;;  %v4405_v22 = vld [vmem:[#allocation2 + $0x2da] sm:$0xff]  ;;  %v16603_v63 = vpop.f32.mrf.mxu1 }
 0x28d   :  { %v13137_v40 = vpop.f32.mrf.mxu0  ;;  %13442 = vmatprep.mubr.f32.mxu0 %v4402_v16 }
 0x28e   :  { %v16594_v5 = vadd.f32 %v13137_v40, %v16340_v33  ;;  %v4406_v33 = vld [vmem:[#allocation2 + $0x2ea] sm:$0xff] }
 0x28f   :  { %v16598_v36 = vpop.f32.mrf.mxu0 }
 0x290   :  { %21594 = vst [vmem:[#allocation49_spill] sm:$0xff] %v16594_v5  ;;  %13443 = vmatmul.mubr.f32.gmra.mxu0 %v4403_v44  ;;  %v16610_v5 = vpop.f32.mrf.mxu1 }
 0x291   :  { %v13140_v17 = vpop.f32.mrf.mxu0  ;;  %13445 = vmatprep.mubr.f32.mxu0 %v4404_v21 }
 0x292   :  { %v16601_v35 = vadd.f32 %v13140_v17, %v16348_v11  ;;  %v4408_v11 = vld [vmem:[#allocation2 + $0x302] sm:$0xff] }
 0x293   :  { %v16605_v27 = vpop.f32.mrf.mxu0 }
 0x294   :  { %21595 = vst [vmem:[#allocation50_spill] sm:$0xff] %v16601_v35  ;;  %21596 = vst [vmem:[#allocation51_spill] sm:$0xff] %v16605_v27  ;;  %13446 = vmatmul.mubr.f32.gmra.mxu0 %v4405_v22  ;;  %v4409_v35 = vld [vmem:[#allocation2 + $0x30a] sm:$0xff]  ;;  %v16617_v27 = vpop.f32.mrf.mxu1 }
 0x295   :  { %v13143_v40 = vpop.f32.mrf.mxu0  ;;  %13448 = vmatprep.mubr.f32.mxu0 %v4406_v33 }
 0x296   :  { %v16608_v16 = vadd.f32 %v13143_v40, %v16356_v30  ;;  %v4410_v30 = vld [vmem:[#allocation2 + $0x31a] sm:$0xff] }
 0x297   :  { %v16612_v44 = vpop.f32.mrf.mxu0 }
 0x298   :  { %21597 = vst [vmem:[#allocation52_spill] sm:$0xff] %v16608_v16  ;;  %21598 = vst [vmem:[#allocation53_spill] sm:$0xff] %v16612_v44  ;;  %13449 = vmatmul.mubr.f32.gmra.mxu0 %v4407_v38  ;;  %v4411_v16 = vld [vmem:[#allocation2 + $0x322] sm:$0xff]  ;;  %v16624_v44 = vpop.f32.mrf.mxu1 }
 0x299   :  { %v13146_v17 = vpop.f32.mrf.mxu0  ;;  %13451 = vmatprep.mubr.f32.mxu0 %v4408_v11 }
 0x29a   :  { %v16615_v21 = vadd.f32 %v13146_v17, %v16364_v29  ;;  %v4412_v29 = vld [vmem:[#allocation2 + $0x332] sm:$0xff] }
 0x29b   :  { %v16619_v22 = vpop.f32.mrf.mxu0 }
 0x29c   :  { %21599 = vst [vmem:[#allocation54_spill] sm:$0xff] %v16615_v21  ;;  %21600 = vst [vmem:[#allocation55_spill] sm:$0xff] %v16619_v22  ;;  %13452 = vmatmul.mubr.f32.gmra.mxu0 %v4409_v35  ;;  %v4413_v21 = vld [vmem:[#allocation2 + $0x33a] sm:$0xff]  ;;  %v16631_v22 = vpop.f32.mrf.mxu1 }
 0x29d   :  { %v13149_v40 = vpop.f32.mrf.mxu0  ;;  %13454 = vmatprep.mubr.f32.mxu0 %v4410_v30 }
 0x29e   :  { %v16622_v33 = vadd.f32 %v13149_v40, %v16372_v52  ;;  %v4414_v52 = vld [vmem:[#allocation2 + $0x34a] sm:$0xff] }
 0x29f   :  { %v16626_v38 = vpop.f32.mrf.mxu0 }
 0x2a0   :  { %21601 = vst [vmem:[#allocation56_spill] sm:$0xff] %v16622_v33  ;;  %21602 = vst [vmem:[#allocation57_spill] sm:$0xff] %v16626_v38  ;;  %13455 = vmatmul.mubr.f32.gmra.mxu0 %v4411_v16  ;;  %v4415_v33 = vld [vmem:[#allocation2 + $0x352] sm:$0xff]  ;;  %v16638_v38 = vpop.f32.mrf.mxu1 }
 0x2a1   :  { %v13152_v17 = vpop.f32.mrf.mxu0  ;;  %13457 = vmatprep.mubr.f32.mxu0 %v4412_v29  ;;  %v10757_v29 = vld [vmem:[%s21318_s4 + $0xf8] sm:$0xff] }
 0x2a2   :  { %v16629_v11 = vadd.f32 %v13152_v17, %v16380_v4  ;;  %13463 = vmatprep.subr.mxu1 %v10757_v29 }
 0x2a3   :  { %v16633_v35 = vpop.f32.mrf.mxu0  ;;  %13464 = vmatpush3.msra.mxu1 %v10757_v29 }
 0x2a4   :  { %21603 = vst [vmem:[#allocation58_spill] sm:$0xff] %v16629_v11  ;;  %13458 = vmatmul.mubr.f32.gmra.mxu0 %v4413_v21  ;;  %v16648_v21 = vpop.f32.mrf.mxu1 }
 0x2a5   :  { %v13155_v40 = vpop.f32.mrf.mxu0  ;;  %13460 = vmatprep.mubr.f32.mxu0 %v4414_v52 }
 0x2a6   :  { %v16636_v30 = vadd.f32 %v13155_v40, %v16388_v19 }
 0x2a7   :  { %v16640_v16 = vpop.f32.mrf.mxu0 }
 0x2a8   :  { %21604 = vst [vmem:[#allocation59_spill] sm:$0xff] %v16636_v30  ;;  %21605 = vst [vmem:[#allocation60_spill] sm:$0xff] %v16640_v16  ;;  %13461 = vmatmul.mubr.f32.gmra.mxu0 %v4415_v33  ;;  %v16655_v30 = vpop.f32.mrf.mxu1  ;;  %v10756_v16 = vld [vmem:[%s21318_s4 + $0xf0] sm:$0xff] }
 0x2a9   :  { %v13158_v4 = vpop.f32.mrf.mxu0  ;;  %13465 = vmatprep.subr.mxu1 %v10756_v16 }
 0x2aa   :  { %v16646_v17 = vadd.f32 %v13158_v4, %v16397_v34  ;;  %13466 = vmatpush3.msra.mxu1 %v10756_v16 }
 0x2ab   :  { %v16650_v19 = vpop.f32.mrf.mxu0 }
 0x2ac   :  { %21606 = vst [vmem:[#allocation61_spill] sm:$0xff] %v16646_v17  ;;  %21607 = vst [vmem:[#allocation62_spill] sm:$0xff] %v16650_v19  ;;  %v16665_v17 = vpop.f32.mrf.mxu1  ;;  %v10755_v19 = vld [vmem:[%s21318_s4 + $0xe8] sm:$0xff] }
 0x2ad   :  { %v13161_v52 = vpop.f32.mrf.mxu0  ;;  %13467 = vmatprep.subr.mxu1 %v10755_v19 }
 0x2ae   :  { %v16653_v40 = vadd.f32 %v13161_v52, %v16405_v8  ;;  %13468 = vmatpush3.msra.mxu1 %v10755_v19 }
 0x2af   :  { %v16657_v33 = vpop.f32.mrf.mxu0 }
 0x2b0   :  { %21608 = vst [vmem:[#allocation63_spill] sm:$0xff] %v16653_v40  ;;  %21609 = vst [vmem:[#allocation64_spill] sm:$0xff] %v16657_v33  ;;  %v16672_v40 = vpop.f32.mrf.mxu1 }
 0x2b1   :  { %v13164_v34 = vpop.f32.mrf.mxu0 }
 0x2b2   :  { %v16663_v4 = vadd.f32 %v13164_v34, %v16413_v28  ;;  %v16682_v16 = vpop.f32.mrf.mxu1 }
 0x2b3   :  { %v16667_v29 = vpop.f32.mrf.mxu0 }
 0x2b4   :  { %21610 = vst [vmem:[#allocation65_spill] sm:$0xff] %v16663_v4  ;;  %21611 = vst [vmem:[#allocation66_spill] sm:$0xff] %v16667_v29  ;;  %v10754_v4 = vld [vmem:[%s21318_s4 + $0xe0] sm:$0xff] }
 0x2b5   :  { %v13167_v8 = vpop.f32.mrf.mxu0  ;;  %13469 = vmatprep.subr.mxu1 %v10754_v4 }
 0x2b6   :  { %v16670_v52 = vadd.f32 %v13167_v8, %v16421_v51  ;;  %13470 = vmatpush3.msra.mxu1 %v10754_v4 }
 0x2b7   :  { %v16674_v33 = vpop.f32.mrf.mxu0 }
 0x2b8   :  { %21612 = vst [vmem:[#allocation67_spill] sm:$0xff] %v16670_v52  ;;  %21613 = vst [vmem:[#allocation68_spill] sm:$0xff] %v16674_v33  ;;  %v16689_v52 = vpop.f32.mrf.mxu1 }
 0x2b9   :  { %v13170_v11 = vpop.f32.mrf.mxu0 }
 0x2ba   :  { %v16680_v28 = vadd.f32 %v13170_v11, %v16429_v0  ;;  %v16699_v11 = vpop.f32.mrf.mxu1 }
 0x2bb   :  { %v16684_v34 = vpop.f32.mrf.mxu0 }
 0x2bc   :  { %21614 = vst [vmem:[#allocation69_spill] sm:$0xff] %v16680_v28  ;;  %21615 = vst [vmem:[#allocation70_spill] sm:$0xff] %v16684_v34  ;;  %v10753_v28 = vld [vmem:[%s21318_s4 + $0xd8] sm:$0xff] }
 0x2bd   :  { %v13173_v51 = vpop.f32.mrf.mxu0  ;;  %13471 = vmatprep.subr.mxu1 %v10753_v28 }
 0x2be   :  { %v16687_v8 = vadd.f32 %v13173_v51, %v16437_v43  ;;  %13472 = vmatpush3.msra.mxu1 %v10753_v28 }
 0x2bf   :  { %v16691_v33 = vpop.f32.mrf.mxu0 }
 0x2c0   :  { %21616 = vst [vmem:[#allocation71_spill] sm:$0xff] %v16687_v8  ;;  %21617 = vst [vmem:[#allocation72_spill] sm:$0xff] %v16691_v33  ;;  %v16706_v8 = vpop.f32.mrf.mxu1 }
 0x2c1   :  { %v13176_v29 = vpop.f32.mrf.mxu0 }
 0x2c2   :  { %v16697_v0 = vadd.f32 %v13176_v29, %v16445_v48  ;;  %v16716_v4 = vpop.f32.mrf.mxu1 }
 0x2c3   :  { %v16701_v19 = vpop.f32.mrf.mxu0 }
 0x2c4   :  { %21618 = vst [vmem:[#allocation73_spill] sm:$0xff] %v16697_v0  ;;  %21619 = vst [vmem:[#allocation74_spill] sm:$0xff] %v16701_v19  ;;  %v10752_v0 = vld [vmem:[%s21318_s4 + $0xd0] sm:$0xff] }
 0x2c5   :  { %v13179_v43 = vpop.f32.mrf.mxu0  ;;  %13473 = vmatprep.subr.mxu1 %v10752_v0 }
 0x2c6   :  { %v16704_v51 = vadd.f32 %v13179_v43, %v16453_v1  ;;  %13474 = vmatpush3.msra.mxu1 %v10752_v0 }
 0x2c7   :  { %v16708_v33 = vpop.f32.mrf.mxu0 }
 0x2c8   :  { %21620 = vst [vmem:[#allocation75_spill] sm:$0xff] %v16704_v51  ;;  %21621 = vst [vmem:[#allocation76_spill] sm:$0xff] %v16708_v33  ;;  %v16723_v51 = vpop.f32.mrf.mxu1 }
 0x2c9   :  { %v13182_v34 = vpop.f32.mrf.mxu0 }
 0x2ca   :  { %v16714_v48 = vadd.f32 %v13182_v34, %v16461_v47  ;;  %v16733_v28 = vpop.f32.mrf.mxu1 }
 0x2cb   :  { %v16718_v29 = vpop.f32.mrf.mxu0 }
 0x2cc   :  { %21622 = vst [vmem:[#allocation77_spill] sm:$0xff] %v16714_v48  ;;  %21623 = vst [vmem:[#allocation78_spill] sm:$0xff] %v16718_v29  ;;  %v10751_v48 = vld [vmem:[%s21318_s4 + $0xc8] sm:$0xff] }
 0x2cd   :  { %v13185_v1 = vpop.f32.mrf.mxu0  ;;  %13475 = vmatprep.subr.mxu1 %v10751_v48 }
 0x2ce   :  { %v16721_v43 = vadd.f32 %v13185_v1, %v16469_v9  ;;  %13476 = vmatpush3.msra.mxu1 %v10751_v48 }
 0x2cf   :  { %v16725_v33 = vpop.f32.mrf.mxu0 }
 0x2d0   :  { %21624 = vst [vmem:[#allocation79_spill] sm:$0xff] %v16721_v43  ;;  %21625 = vst [vmem:[#allocation80_spill] sm:$0xff] %v16725_v33  ;;  %v16740_v43 = vpop.f32.mrf.mxu1 }
 0x2d1   :  { %v13188_v19 = vpop.f32.mrf.mxu0 }
 0x2d2   :  { %v16731_v47 = vadd.f32 %v13188_v19, %v16477_v14  ;;  %v16750_v0 = vpop.f32.mrf.mxu1 }
 0x2d3   :  { %v16735_v34 = vpop.f32.mrf.mxu0 }
 0x2d4   :  { %21626 = vst [vmem:[#allocation81_spill] sm:$0xff] %v16731_v47  ;;  %21627 = vst [vmem:[#allocation82_spill] sm:$0xff] %v16735_v34  ;;  %v10750_v47 = vld [vmem:[%s21318_s4 + $0xc0] sm:$0xff] }
 0x2d5   :  { %v13191_v9 = vpop.f32.mrf.mxu0  ;;  %13477 = vmatprep.subr.mxu1 %v10750_v47 }
 0x2d6   :  { %v16738_v1 = vadd.f32 %v13191_v9, %v16485_v13  ;;  %13478 = vmatpush3.msra.mxu1 %v10750_v47 }
 0x2d7   :  { %v16742_v33 = vpop.f32.mrf.mxu0 }
 0x2d8   :  { %21628 = vst [vmem:[#allocation83_spill] sm:$0xff] %v16738_v1  ;;  %21629 = vst [vmem:[#allocation84_spill] sm:$0xff] %v16742_v33  ;;  %v16757_v1 = vpop.f32.mrf.mxu1 }
 0x2d9   :  { %v13194_v29 = vpop.f32.mrf.mxu0 }
 0x2da   :  { %v16748_v14 = vadd.f32 %v13194_v29, %v16493_v41  ;;  %v16767_v48 = vpop.f32.mrf.mxu1 }
 0x2db   :  { %v16752_v19 = vpop.f32.mrf.mxu0 }
 0x2dc   :  { %21630 = vst [vmem:[#allocation85_spill] sm:$0xff] %v16748_v14  ;;  %21631 = vst [vmem:[#allocation86_spill] sm:$0xff] %v16752_v19  ;;  %v10749_v14 = vld [vmem:[%s21318_s4 + $0xb8] sm:$0xff] }
 0x2dd   :  { %v13197_v13 = vpop.f32.mrf.mxu0  ;;  %13479 = vmatprep.subr.mxu1 %v10749_v14 }
 0x2de   :  { %v16755_v9 = vadd.f32 %v13197_v13, %v16501_v46  ;;  %13480 = vmatpush3.msra.mxu1 %v10749_v14  ;;  %v4291_v14 = vadd.f32 %v16540_v62, %v16538_v50  ;;  %v4293_v50 = vadd.f32 %v16556_v20, %v16546_v56 }
 0x2df   :  { %v16759_v33 = vpop.f32.mrf.mxu0 }
 0x2e0   :  { %21632 = vst [vmem:[#allocation87_spill] sm:$0xff] %v16755_v9  ;;  %21633 = vst [vmem:[#allocation88_spill] sm:$0xff] %v16759_v33  ;;  %v16774_v9 = vpop.f32.mrf.mxu1 }
 0x2e1   :  { %v13200_v34 = vpop.f32.mrf.mxu0  ;;  %21637 = vst [vmem:[#allocation92_spill] sm:$0xff] %v16774_v9 }
 0x2e2   :  { %v16765_v41 = vadd.f32 %v13200_v34, %v16509_v53  ;;  %v16784_v47 = vpop.f32.mrf.mxu1 }
 0x2e3   :  { %v16769_v29 = vpop.f32.mrf.mxu0 }
 0x2e4   :  { %21634 = vst [vmem:[#allocation89_spill] sm:$0xff] %v16765_v41  ;;  %21635 = vst [vmem:[#allocation90_spill] sm:$0xff] %v16769_v29 }
 0x2e5   :  { %v13203_v46 = vpop.f32.mrf.mxu0 }
 0x2e6   :  { %v16772_v13 = vadd.f32 %v13203_v46, %v16517_v57  ;;  %v4289_v46 = vadd.f32 %v16527_v55, %v16530_v12 }
 0x2e7   :  { %v16776_v33 = vpop.f32.mrf.mxu0 }
 0x2e8   :  { %21636 = vst [vmem:[#allocation91_spill] sm:$0xff] %v16772_v13  ;;  %21638 = vst [vmem:[#allocation93_spill] sm:$0xff] %v16776_v33  ;;  %v4288_v13 = vadd.f32 %v16532_v42, %v16535_v2  ;;  %v16792_v33 = vpop.f32.mrf.mxu1 }
 0x2e9   :  { %v13206_v19 = vpop.f32.mrf.mxu0 }
 0x2ea   :  { %v16782_v53 = vadd.f32 %v13206_v19, %v16525_v6  ;;  %v4290_v19 = vadd.f32 %v16548_v59, %v16543_v31  ;;  %v16804_v12 = vpop.f32.mrf.mxu1  ;;  %v4292_v31 = vadd.f32 %v16564_v39, %v16551_v25  ;;  %v4295_v25 = vadd.f32 %v16572_v24, %v16554_v45 }
 0x2eb   :  { %v16786_v34 = vpop.f32.mrf.mxu0 }
 0x2ec   :  { %21639 = vst [vmem:[#allocation94_spill] sm:$0xff] %v16782_v53  ;;  %21640 = vst [vmem:[#allocation95_spill] sm:$0xff] %v16786_v34  ;;  %v16821_v34 = vpop.f32.mrf.mxu1 }
 0x2ed   :  { %v13369_v57 = vpop.f32.mrf.mxu0 }
 0x2ee   :  { %v16794_v29 = vadd.f32 %v13369_v57, %v4289_v46 }
 0x2ef   :  { %v4499_v41 = vpop.f32.mrf.mxu0 }
 0x2f0   :  { %21641 = vst [vmem:[#allocation96_spill] sm:$0xff] %v16794_v29  ;;  %v16796_v9 = vadd.f32 %v4499_v41, %v4288_v13  ;;  %v4953_v2 = vmul.f32 %v16794_v29, %v16794_v29 }
 0x2f1   :  { %v13372_v6 = vpop.f32.mrf.mxu0 }
 0x2f2   :  { %v4952_v55 = vmul.f32 %v16796_v9, %v16796_v9  ;;  %v4882_v41 = vadd.f32 %v16794_v29, %v16796_v9  ;;  %v16810_v13 = vadd.f32 %v13372_v6, %v4291_v14 }
 0x2f3   :  { %v4509_v42 = vpop.f32.mrf.mxu0 }
 0x2f4   :  { %v16812_v57 = vadd.f32 %v4509_v42, %v4290_v19  ;;  %v5016_v59 = vadd.f32 %v4953_v2, %v4952_v55  ;;  %v4955_v14 = vmul.f32 %v16810_v13, %v16810_v13  ;;  %v4294_v55 = vadd.f32 %v16580_v3, %v16559_v54 }
 0x2f5   :  { %v13375_v62 = vpop.f32.mrf.mxu0  ;;  %v4297_v54 = vadd.f32 %v16588_v37, %v16562_v49 }
 0x2f6   :  { %v4883_v46 = vadd.f32 %v4882_v41, %v16812_v57  ;;  %v4954_v53 = vmul.f32 %v16812_v57, %v16812_v57  ;;  %v16823_v29 = vadd.f32 %v13375_v62, %v4293_v50  ;;  %v16837_v50 = vpop.f32.mrf.mxu1 }
 0x2f7   :  { %v4519_v6 = vpop.f32.mrf.mxu0 }
 0x2f8   :  { %v4884_v56 = vadd.f32 %v4883_v46, %v16810_v13  ;;  %v5017_v20 = vadd.f32 %v5016_v59, %v4954_v53  ;;  %v16828_v19 = vadd.f32 %v4519_v6, %v4292_v31  ;;  %v4957_v53 = vmul.f32 %v16823_v29, %v16823_v29 }
 0x2f9   :  { %v13378_v39 = vpop.f32.mrf.mxu0  ;;  %v4296_v46 = vadd.f32 %v16596_v61, %v16567_v7  ;;  %v4299_v7 = vadd.f32 %v16603_v63, %v16570_v58 }
 0x2fa   :  { %v5018_v42 = vadd.f32 %v5017_v20, %v4955_v14  ;;  %v4885_v2 = vadd.f32 %v4884_v56, %v16828_v19  ;;  %v4956_v41 = vmul.f32 %v16828_v19, %v16828_v19  ;;  %v16841_v59 = vadd.f32 %v13378_v39, %v4295_v25  ;;  %v16853_v20 = vpop.f32.mrf.mxu1 }
 0x2fb   :  { %v4529_v62 = vpop.f32.mrf.mxu0 }
 0x2fc   :  { %v5019_v31 = vadd.f32 %v5018_v42, %v4956_v41  ;;  %v16843_v45 = vadd.f32 %v4529_v62, %v4294_v55  ;;  %v4886_v24 = vadd.f32 %v4885_v2, %v16823_v29  ;;  %v4959_v55 = vmul.f32 %v16841_v59, %v16841_v59 }
 0x2fd   :  { %v13381_v3 = vpop.f32.mrf.mxu0  ;;  %v4298_v2 = vadd.f32 %v16610_v5, %v16575_v60  ;;  %v4301_v5 = vadd.f32 %v16617_v27, %v16578_v15 }
 0x2fe   :  { %v4887_v6 = vadd.f32 %v4886_v24, %v16843_v45  ;;  %v4958_v14 = vmul.f32 %v16843_v45, %v16843_v45  ;;  %v5020_v56 = vadd.f32 %v5019_v31, %v4957_v53  ;;  %v16855_v25 = vadd.f32 %v13381_v3, %v4297_v54  ;;  %v16869_v31 = vpop.f32.mrf.mxu1 }
 0x2ff   :  { %v4539_v39 = vpop.f32.mrf.mxu0 }
 0x300   :  { %v5021_v42 = vadd.f32 %v5020_v56, %v4958_v14  ;;  %v16859_v49 = vadd.f32 %v4539_v39, %v4296_v46  ;;  %v4888_v37 = vadd.f32 %v4887_v6, %v16841_v59  ;;  %v4961_v24 = vmul.f32 %v16855_v25, %v16855_v25 }
 0x301   :  { %v13384_v61 = vpop.f32.mrf.mxu0  ;;  %v4300_v6 = vadd.f32 %v16624_v44, %v16583_v18  ;;  %v4303_v44 = vadd.f32 %v16631_v22, %v16586_v32 }
 0x302   :  { %v4889_v41 = vadd.f32 %v4888_v37, %v16859_v49  ;;  %v4960_v53 = vmul.f32 %v16859_v49, %v16859_v49  ;;  %v5022_v62 = vadd.f32 %v5021_v42, %v4959_v55  ;;  %v16873_v46 = vadd.f32 %v13384_v61, %v4299_v7  ;;  %v16887_v42 = vpop.f32.mrf.mxu1 }
 0x303   :  { %v4549_v54 = vpop.f32.mrf.mxu0  ;;  %v3243_v55 = vadd.f32 %v16335_v10, %v16338_v26  ;;  %v4302_v10 = vadd.f32 %v16638_v38, %v16591_v23  ;;  %v21644_v38 = vld [vmem:[#allocation49_spill] sm:$0xff] }
 0x304   :  { %v5023_v3 = vadd.f32 %v5022_v62, %v4960_v53  ;;  %v16875_v58 = vadd.f32 %v4549_v54, %v4298_v2  ;;  %v4890_v63 = vadd.f32 %v4889_v41, %v16855_v25  ;;  %v4963_v15 = vmul.f32 %v16873_v46, %v16873_v46  ;;  %v21643_v54 = vld [vmem:[#allocation21_spill] sm:$0xff] }
 0x305   :  { %v13387_v60 = vpop.f32.mrf.mxu0  ;;  %v3774_v2 = vadd.f32 %v16598_v36, %v3243_v55 }
 0x306   :  { %v4891_v14 = vadd.f32 %v4890_v63, %v16875_v58  ;;  %v4962_v56 = vmul.f32 %v16875_v58, %v16875_v58  ;;  %v5024_v39 = vadd.f32 %v5023_v3, %v4961_v24  ;;  %v16889_v37 = vadd.f32 %v13387_v60, %v4301_v5  ;;  %v21642_v24 = vld [vmem:[#allocation22_spill] sm:$0xff]  ;;  %v16906_v63 = vpop.f32.mrf.mxu1 }
 0x307   :  { %v4559_v7 = vpop.f32.mrf.mxu0  ;;  %v3245_v3 = vadd.f32 %v21643_v54, %v21642_v24  ;;  %v21648_v24 = vld [vmem:[#allocation50_spill] sm:$0xff] }
 0x308   :  { %v5025_v27 = vadd.f32 %v5024_v39, %v4962_v56  ;;  %v16893_v61 = vadd.f32 %v4559_v7, %v4300_v6  ;;  %v4892_v18 = vadd.f32 %v4891_v14, %v16873_v46  ;;  %v4965_v32 = vmul.f32 %v16889_v37, %v16889_v37  ;;  %v21645_v39 = vld [vmem:[#allocation51_spill] sm:$0xff] }
 0x309   :  { %v13390_v41 = vpop.f32.mrf.mxu0  ;;  %v4305_v6 = vadd.f32 %v16648_v21, %v21644_v38  ;;  %v4304_v14 = vadd.f32 %v16655_v30, %v3774_v2  ;;  %v3776_v55 = vadd.f32 %v21645_v39, %v3245_v3  ;;  %v4307_v54 = vadd.f32 %v16665_v17, %v21648_v24  ;;  %v21649_v3 = vld [vmem:[#allocation53_spill] sm:$0xff]  ;;  %v21651_v39 = vld [vmem:[#allocation26_spill] sm:$0xff] }
 0x30a   :  { %v4893_v26 = vadd.f32 %v4892_v18, %v16893_v61  ;;  %v4964_v53 = vmul.f32 %v16893_v61, %v16893_v61  ;;  %v5026_v62 = vadd.f32 %v5025_v27, %v4963_v15  ;;  %v16910_v5 = vadd.f32 %v13390_v41, %v4303_v44  ;;  %v21646_v18 = vld [vmem:[#allocation23_spill] sm:$0xff]  ;;  %v21647_v44 = vld [vmem:[#allocation25_spill] sm:$0xff] }
 0x30b   :  { %v4569_v22 = vpop.f32.mrf.mxu0  ;;  %v3247_v41 = vadd.f32 %v21647_v44, %v21646_v18 }
 0x30c   :  { %v5027_v36 = vadd.f32 %v5026_v62, %v4964_v53  ;;  %v16912_v60 = vadd.f32 %v4569_v22, %v4302_v10  ;;  %v4894_v23 = vadd.f32 %v4893_v26, %v16889_v37  ;;  %v16924_v10 = vpop.f32.mrf.mxu1  ;;  %v4967_v30 = vmul.f32 %v16910_v5, %v16910_v5 }
 0x30d   :  { %v13393_v56 = vpop.f32.mrf.mxu0 }
 0x30e   :  { %v4895_v7 = vadd.f32 %v4894_v23, %v16912_v60  ;;  %v4966_v15 = vmul.f32 %v16912_v60, %v16912_v60  ;;  %v5028_v27 = vadd.f32 %v5027_v36, %v4965_v32  ;;  %v16926_v26 = vadd.f32 %v13393_v56, %v4305_v6  ;;  %v21650_v56 = vld [vmem:[#allocation24_spill] sm:$0xff] }
 0x30f   :  { %v4579_v53 = vpop.f32.mrf.mxu0  ;;  %v3778_v32 = vadd.f32 %v21649_v3, %v3247_v41  ;;  %v4306_v36 = vadd.f32 %v16672_v40, %v3776_v55  ;;  %v21652_v55 = vld [vmem:[#allocation52_spill] sm:$0xff] }
 0x310   :  { %v5029_v21 = vadd.f32 %v5028_v27, %v4966_v15  ;;  %v16930_v2 = vadd.f32 %v4579_v53, %v4304_v14  ;;  %v4896_v62 = vadd.f32 %v4895_v7, %v16910_v5  ;;  %v3249_v14 = vadd.f32 %v21651_v39, %v21650_v56  ;;  %v16942_v15 = vpop.f32.mrf.mxu1 }
 0x311   :  { %v13396_v22 = vpop.f32.mrf.mxu0  ;;  %v4969_v7 = vmul.f32 %v16926_v26, %v16926_v26  ;;  %v4309_v41 = vadd.f32 %v16682_v16, %v21652_v55  ;;  %v4308_v53 = vadd.f32 %v16689_v52, %v3778_v32 }
 0x312   :  { %v4897_v23 = vadd.f32 %v4896_v62, %v16930_v2  ;;  %v4968_v38 = vmul.f32 %v16930_v2, %v16930_v2  ;;  %v5030_v6 = vadd.f32 %v5029_v21, %v4967_v30  ;;  %v16946_v18 = vadd.f32 %v13396_v22, %v4307_v54  ;;  %v21653_v21 = vld [vmem:[#allocation55_spill] sm:$0xff]  ;;  %v21654_v54 = vld [vmem:[#allocation28_spill] sm:$0xff] }
 0x313   :  { %v4589_v17 = vpop.f32.mrf.mxu0  ;;  %v3780_v62 = vadd.f32 %v21653_v21, %v3249_v14  ;;  %v21655_v22 = vld [vmem:[#allocation27_spill] sm:$0xff]  ;;  %v21656_v14 = vld [vmem:[#allocation54_spill] sm:$0xff] }
 0x314   :  { %v5031_v27 = vadd.f32 %v5030_v6, %v4968_v38  ;;  %v16948_v44 = vadd.f32 %v4589_v17, %v4306_v36  ;;  %v4898_v40 = vadd.f32 %v4897_v23, %v16926_v26  ;;  %v3251_v36 = vadd.f32 %v21655_v22, %v21654_v54  ;;  %v16960_v6 = vpop.f32.mrf.mxu1  ;;  %v21658_v54 = vld [vmem:[#allocation30_spill] sm:$0xff] }
 0x315   :  { %v13399_v30 = vpop.f32.mrf.mxu0  ;;  %v4971_v52 = vmul.f32 %v16946_v18, %v16946_v18  ;;  %v4311_v17 = vadd.f32 %v16699_v11, %v21656_v14  ;;  %v4310_v55 = vadd.f32 %v16706_v8, %v3780_v62  ;;  %v21660_v62 = vld [vmem:[#allocation56_spill] sm:$0xff] }
 0x316   :  { %v4899_v24 = vadd.f32 %v4898_v40, %v16948_v44  ;;  %v4970_v3 = vmul.f32 %v16948_v44, %v16948_v44  ;;  %v5032_v38 = vadd.f32 %v5031_v27, %v4969_v7  ;;  %v16962_v23 = vadd.f32 %v13399_v30, %v4309_v41  ;;  %v21657_v7 = vld [vmem:[#allocation57_spill] sm:$0xff] }
 0x317   :  { %v4599_v56 = vpop.f32.mrf.mxu0  ;;  %v3782_v27 = vadd.f32 %v21657_v7, %v3251_v36 }
 0x318   :  { %v5033_v16 = vadd.f32 %v5032_v38, %v4970_v3  ;;  %v16966_v32 = vadd.f32 %v4599_v56, %v4308_v53  ;;  %v4900_v39 = vadd.f32 %v4899_v24, %v16946_v18  ;;  %v21659_v3 = vld [vmem:[#allocation29_spill] sm:$0xff]  ;;  %v16978_v38 = vpop.f32.mrf.mxu1  ;;  %v4973_v24 = vmul.f32 %v16962_v23, %v16962_v23 }
 0x319   :  { %v13402_v40 = vpop.f32.mrf.mxu0  ;;  %v3253_v53 = vadd.f32 %v21659_v3, %v21658_v54 }
 0x31a   :  { %v4901_v41 = vadd.f32 %v4900_v39, %v16966_v32  ;;  %v4972_v30 = vmul.f32 %v16966_v32, %v16966_v32  ;;  %v5034_v21 = vadd.f32 %v5033_v16, %v4971_v52  ;;  %v16982_v36 = vadd.f32 %v13402_v40, %v4311_v17  ;;  %v21661_v17 = vld [vmem:[#allocation32_spill] sm:$0xff]  ;;  %v21662_v40 = vld [vmem:[#allocation31_spill] sm:$0xff] }
 0x31b   :  { %v4609_v11 = vpop.f32.mrf.mxu0  ;;  %v4313_v39 = vadd.f32 %v16716_v4, %v21660_v62  ;;  %v4312_v52 = vadd.f32 %v16723_v51, %v3782_v27  ;;  %v3784_v14 = vadd.f32 %v16633_v35, %v3253_v53  ;;  %v21663_v53 = vld [vmem:[#allocation58_spill] sm:$0xff] }
 0x31c   :  { %v5035_v22 = vadd.f32 %v5034_v21, %v4972_v30  ;;  %v16984_v56 = vadd.f32 %v4609_v11, %v4310_v55  ;;  %v4902_v8 = vadd.f32 %v4901_v41, %v16962_v23  ;;  %v3255_v55 = vadd.f32 %v21662_v40, %v21661_v17  ;;  %v16996_v21 = vpop.f32.mrf.mxu1  ;;  %v21665_v40 = vld [vmem:[#allocation34_spill] sm:$0xff] }
 0x31d   :  { %v13405_v16 = vpop.f32.mrf.mxu0  ;;  %v4975_v51 = vmul.f32 %v16982_v36, %v16982_v36  ;;  %v4315_v11 = vadd.f32 %v16733_v28, %v21663_v53  ;;  %v4314_v62 = vadd.f32 %v16740_v43, %v3784_v14 }
 0x31e   :  { %v4903_v7 = vadd.f32 %v4902_v8, %v16984_v56  ;;  %v4974_v54 = vmul.f32 %v16984_v56, %v16984_v56  ;;  %v5036_v30 = vadd.f32 %v5035_v22, %v4973_v24  ;;  %v16998_v41 = vadd.f32 %v13405_v16, %v4313_v39  ;;  %v21664_v24 = vld [vmem:[#allocation60_spill] sm:$0xff] }
 0x31f   :  { %v4619_v3 = vpop.f32.mrf.mxu0  ;;  %v3786_v22 = vadd.f32 %v21664_v24, %v3255_v55  ;;  %v5504_v55 = vld [vmem:[%s21318_s4 + $0x78] sm:$0xff] }
 0x320   :  { %v5037_v4 = vadd.f32 %v5036_v30, %v4974_v54  ;;  %v17002_v27 = vadd.f32 %v4619_v3, %v4312_v52  ;;  %v4904_v35 = vadd.f32 %v4903_v7, %v16982_v36  ;;  %v21666_v54 = vld [vmem:[#allocation33_spill] sm:$0xff]  ;;  %v17014_v30 = vpop.f32.mrf.mxu1  ;;  %v4977_v7 = vmul.f32 %v16998_v41, %v16998_v41  ;;  %13591 = vmatprep.subr.mxu0 %v5504_v55 }
 0x321   :  { %v13408_v8 = vpop.f32.mrf.mxu0  ;;  %v3257_v52 = vadd.f32 %v21666_v54, %v21665_v40  ;;  %v4316_v53 = vadd.f32 %v16757_v1, %v3786_v22  ;;  %13592 = vmatpush3.msra.mxu0 %v5504_v55  ;;  %v5503_v40 = vld [vmem:[%s21318_s4 + $0x70] sm:$0xff]  ;;  %v21670_v54 = vld [vmem:[#allocation62_spill] sm:$0xff] }
 0x322   :  { %v4905_v39 = vadd.f32 %v4904_v35, %v17002_v27  ;;  %v4976_v16 = vmul.f32 %v17002_v27, %v17002_v27  ;;  %v5038_v17 = vadd.f32 %v5037_v4, %v4975_v51  ;;  %v17021_v14 = vadd.f32 %v13408_v8, %v4315_v11  ;;  %v21669_v4 = vld [vmem:[#allocation59_spill] sm:$0xff]  ;;  %13593 = vmatprep.subr.mxu0 %v5503_v40 }
 0x323   :  { %v4629_v28 = vpop.f32.mrf.mxu0  ;;  %v4317_v35 = vadd.f32 %v16750_v0, %v21669_v4  ;;  %13594 = vmatpush3.msra.mxu0 %v5503_v40  ;;  %v5501_v40 = vld [vmem:[%s21318_s4 + $0x60] sm:$0xff] }
 0x324   :  { %v5039_v43 = vadd.f32 %v5038_v17, %v4976_v16  ;;  %21667 = vst [vmem:[#allocation22_spill] sm:$0xff] %v17021_v14  ;;  %v17023_v3 = vadd.f32 %v4629_v28, %v4314_v62  ;;  %v4906_v51 = vadd.f32 %v4905_v39, %v16998_v41  ;;  %v3788_v16 = vadd.f32 %v21670_v54, %v3257_v52  ;;  %v21671_v39 = vld [vmem:[#allocation36_spill] sm:$0xff]  ;;  %v21672_v17 = vld [vmem:[#allocation35_spill] sm:$0xff]  ;;  %v17038_v28 = vpop.f32.mrf.mxu1 }
 0x325   :  { %v13411_v24 = vpop.f32.mrf.mxu0  ;;  %v3259_v0 = vadd.f32 %v21672_v17, %v21671_v39  ;;  %v5502_v52 = vld [vmem:[%s21318_s4 + $0x68] sm:$0xff]  ;;  %v4979_v55 = vmul.f32 %v17021_v14, %v17021_v14 }
 0x326   :  { %21668 = vst [vmem:[#allocation21_spill] sm:$0xff] %v17023_v3  ;;  %v4907_v11 = vadd.f32 %v4906_v51, %v17023_v3  ;;  %v4978_v8 = vmul.f32 %v17023_v3, %v17023_v3  ;;  %v5040_v62 = vadd.f32 %v5039_v43, %v4977_v7  ;;  %v17040_v1 = vadd.f32 %v13411_v24, %v4317_v35  ;;  %v21674_v43 = vld [vmem:[#allocation61_spill] sm:$0xff]  ;;  %v21675_v35 = vld [vmem:[#allocation64_spill] sm:$0xff] }
 0x327   :  { %v4639_v22 = vpop.f32.mrf.mxu0  ;;  %13595 = vmatprep.subr.mxu0 %v5502_v52  ;;  %v4319_v54 = vadd.f32 %v16767_v48, %v21674_v43  ;;  %v3790_v24 = vadd.f32 %v21675_v35, %v3259_v0  ;;  %v21676_v17 = vld [vmem:[#allocation92_spill] sm:$0xff]  ;;  %v17062_v43 = vpop.f32.mrf.mxu1 }
 0x328   :  { %v5041_v51 = vadd.f32 %v5040_v62, %v4978_v8  ;;  %v17047_v4 = vadd.f32 %v4639_v22, %v4316_v53  ;;  %v4908_v7 = vadd.f32 %v4907_v11, %v17021_v14  ;;  %13596 = vmatpush3.msra.mxu0 %v5502_v52  ;;  %v4318_v3 = vadd.f32 %v21676_v17, %v3788_v16  ;;  %v21677_v62 = vld [vmem:[#allocation38_spill] sm:$0xff]  ;;  %v21678_v22 = vld [vmem:[#allocation37_spill] sm:$0xff] }
 0x329   :  { %v13414_v39 = vpop.f32.mrf.mxu0  ;;  %13597 = vmatprep.subr.mxu0 %v5501_v40  ;;  %v3261_v48 = vadd.f32 %v21678_v22, %v21677_v62  ;;  %v4981_v0 = vmul.f32 %v17040_v1, %v17040_v1  ;;  %v5500_v16 = vld [vmem:[%s21318_s4 + $0x58] sm:$0xff]  ;;  %v4320_v22 = vadd.f32 %v16792_v33, %v3790_v24 }
 0x32a   :  { %21673 = vst [vmem:[#allocation49_spill] sm:$0xff] %v17047_v4  ;;  %v4909_v8 = vadd.f32 %v4908_v7, %v17047_v4  ;;  %v4980_v53 = vmul.f32 %v17047_v4, %v17047_v4  ;;  %v5042_v11 = vadd.f32 %v5041_v51, %v4979_v55  ;;  %13598 = vmatpush3.msra.mxu0 %v5501_v40  ;;  %v21681_v51 = vld [vmem:[#allocation63_spill] sm:$0xff]  ;;  %v5499_v40 = vld [vmem:[%s21318_s4 + $0x50] sm:$0xff]  ;;  %v21682_v14 = vld [vmem:[#allocation66_spill] sm:$0xff] }
 0x32b   :  { %v4649_v52 = vpop.f32.mrf.mxu0  ;;  %v17069_v35 = vadd.f32 %v13414_v39, %v4319_v54  ;;  %13599 = vmatprep.subr.mxu0 %v5500_v16  ;;  %v4321_v62 = vadd.f32 %v16784_v47, %v21681_v51 }
 0x32c   :  { %v5043_v7 = vadd.f32 %v5042_v11, %v4980_v53  ;;  %v17071_v17 = vadd.f32 %v4649_v52, %v4318_v3  ;;  %v4910_v55 = vadd.f32 %v4909_v8, %v17040_v1  ;;  %13600 = vmatpush3.msra.mxu0 %v5500_v16  ;;  %v3792_v53 = vadd.f32 %v21682_v14, %v3261_v48  ;;  %v21683_v8 = vld [vmem:[#allocation40_spill] sm:$0xff]  ;;  %v21684_v11 = vld [vmem:[#allocation39_spill] sm:$0xff]  ;;  %v17086_v52 = vpop.f32.mrf.mxu1 }
 0x32d   :  { %21679 = vst [vmem:[#allocation51_spill] sm:$0xff] %v17069_v35  ;;  %v13417_v4 = vpop.f32.mrf.mxu0  ;;  %13601 = vmatprep.subr.mxu0 %v5499_v40  ;;  %v3263_v47 = vadd.f32 %v21684_v11, %v21683_v8  ;;  %v5498_v14 = vld [vmem:[%s21318_s4 + $0x48] sm:$0xff]  ;;  %v4983_v48 = vmul.f32 %v17069_v35, %v17069_v35 }
 0x32e   :  { %21680 = vst [vmem:[#allocation23_spill] sm:$0xff] %v17071_v17  ;;  %v4911_v54 = vadd.f32 %v4910_v55, %v17071_v17  ;;  %v4982_v3 = vmul.f32 %v17071_v17, %v17071_v17  ;;  %v5044_v39 = vadd.f32 %v5043_v7, %v4981_v0  ;;  %v17088_v33 = vadd.f32 %v13417_v4, %v4321_v62  ;;  %v21687_v7 = vld [vmem:[#allocation65_spill] sm:$0xff]  ;;  %v21688_v4 = vld [vmem:[#allocation68_spill] sm:$0xff] }
 0x32f   :  { %v4659_v24 = vpop.f32.mrf.mxu0  ;;  %13602 = vmatpush3.msra.mxu0 %v5499_v40  ;;  %v4323_v51 = vadd.f32 %v16804_v12, %v21687_v7  ;;  %v3794_v62 = vadd.f32 %v21688_v4, %v3263_v47  ;;  %v5497_v40 = vld [vmem:[%s21318_s4 + $0x40] sm:$0xff]  ;;  %v4322_v11 = vadd.f32 %v16821_v34, %v3792_v53  ;;  %v17110_v7 = vpop.f32.mrf.mxu1  ;;  %v5496_v34 = vld [vmem:[%s21318_s4 + $0x38] sm:$0xff] }
 0x330   :  { %21685 = vst [vmem:[#allocation25_spill] sm:$0xff] %v17088_v33  ;;  %v5045_v16 = vadd.f32 %v5044_v39, %v4982_v3  ;;  %v17095_v55 = vadd.f32 %v4659_v24, %v4320_v22  ;;  %v4912_v0 = vadd.f32 %v4911_v54, %v17069_v35  ;;  %13603 = vmatprep.subr.mxu0 %v5498_v14  ;;  %v21689_v39 = vld [vmem:[#allocation42_spill] sm:$0xff]  ;;  %v21690_v24 = vld [vmem:[#allocation41_spill] sm:$0xff] }
 0x331   :  { %v13420_v8 = vpop.f32.mrf.mxu0  ;;  %13604 = vmatpush3.msra.mxu0 %v5498_v14  ;;  %v3265_v12 = vadd.f32 %v21690_v24, %v21689_v39  ;;  %v4985_v47 = vmul.f32 %v17088_v33, %v17088_v33  ;;  %v4324_v24 = vadd.f32 %v16853_v20, %v3794_v62  ;;  %v21695_v20 = vld [vmem:[#allocation44_spill] sm:$0xff]  ;;  %v21696_v62 = vld [vmem:[#allocation43_spill] sm:$0xff] }
 0x332   :  { %21686 = vst [vmem:[#allocation50_spill] sm:$0xff] %v17095_v55  ;;  %v4913_v3 = vadd.f32 %v4912_v0, %v17095_v55  ;;  %v4984_v22 = vmul.f32 %v17095_v55, %v17095_v55  ;;  %v5046_v54 = vadd.f32 %v5045_v16, %v4983_v48  ;;  %13605 = vmatprep.subr.mxu0 %v5497_v40  ;;  %v21693_v16 = vld [vmem:[#allocation67_spill] sm:$0xff] }
 0x333   :  { %v4669_v14 = vpop.f32.mrf.mxu0  ;;  %13606 = vmatpush3.msra.mxu0 %v5497_v40  ;;  %v17117_v0 = vadd.f32 %v13420_v8, %v4323_v51  ;;  %v4325_v39 = vadd.f32 %v16837_v50, %v21693_v16  ;;  %v10748_v40 = vld [vmem:[%s21318_s4 + $0xb0] sm:$0xff]  ;;  %v21694_v8 = vld [vmem:[#allocation70_spill] sm:$0xff] }
 0x334   :  { %v5047_v53 = vadd.f32 %v5046_v54, %v4984_v22  ;;  %v17119_v4 = vadd.f32 %v4669_v14, %v4322_v11  ;;  %v4914_v48 = vadd.f32 %v4913_v3, %v17088_v33  ;;  %13607 = vmatprep.subr.mxu0 %v5496_v34  ;;  %v5495_v51 = vld [vmem:[%s21318_s4 + $0x30] sm:$0xff]  ;;  %v3796_v11 = vadd.f32 %v21694_v8, %v3265_v12  ;;  %v17137_v14 = vpop.f32.mrf.mxu1  ;;  %v10747_v12 = vld [vmem:[%s21318_s4 + $0xa8] sm:$0xff] }
 0x335   :  { %21691 = vst [vmem:[#allocation53_spill] sm:$0xff] %v17117_v0  ;;  %v13423_v55 = vpop.f32.mrf.mxu0  ;;  %13608 = vmatpush3.msra.mxu0 %v5496_v34  ;;  %13481 = vmatprep.subr.mxu1 %v10748_v40  ;;  %v3267_v54 = vadd.f32 %v21696_v62, %v21695_v20  ;;  %v21700_v20 = vld [vmem:[#allocation72_spill] sm:$0xff] }
 0x336   :  { %21692 = vst [vmem:[#allocation24_spill] sm:$0xff] %v17119_v4  ;;  %v4915_v3 = vadd.f32 %v4914_v48, %v17119_v4  ;;  %v4986_v22 = vmul.f32 %v17119_v4, %v17119_v4  ;;  %v5048_v50 = vadd.f32 %v5047_v53, %v4985_v47  ;;  %v17139_v16 = vadd.f32 %v13423_v55, %v4325_v39  ;;  %v5494_v55 = vld [vmem:[%s21318_s4 + $0x28] sm:$0xff]  ;;  %v21699_v39 = vld [vmem:[#allocation69_spill] sm:$0xff] }
 0x337   :  { %v4679_v34 = vpop.f32.mrf.mxu0  ;;  %13482 = vmatpush3.msra.mxu1 %v10748_v40  ;;  %13609 = vmatprep.subr.mxu0 %v5495_v51  ;;  %v4987_v48 = vmul.f32 %v17117_v0, %v17117_v0  ;;  %v4327_v40 = vadd.f32 %v16869_v31, %v21699_v39  ;;  %v3798_v62 = vadd.f32 %v21700_v20, %v3267_v54  ;;  %v21702_v31 = vld [vmem:[#allocation45_spill] sm:$0xff]  ;;  %v17164_v54 = vpop.f32.mrf.mxu1 }
 0x338   :  { %21697 = vst [vmem:[#allocation26_spill] sm:$0xff] %v17139_v16  ;;  %v5049_v8 = vadd.f32 %v5048_v50, %v4986_v22  ;;  %v17146_v47 = vadd.f32 %v4679_v34, %v4324_v24  ;;  %v4916_v53 = vadd.f32 %v4915_v3, %v17117_v0  ;;  %13483 = vmatprep.subr.mxu1 %v10747_v12  ;;  %v10746_v22 = vld [vmem:[%s21318_s4 + $0xa0] sm:$0xff]  ;;  %v21701_v0 = vld [vmem:[#allocation46_spill] sm:$0xff] }
 0x339   :  { %v13426_v4 = vpop.f32.mrf.mxu0  ;;  %13484 = vmatpush3.msra.mxu1 %v10747_v12  ;;  %13610 = vmatpush3.msra.mxu0 %v5495_v51  ;;  %v4326_v24 = vadd.f32 %v16887_v42, %v3796_v11  ;;  %v3269_v39 = vadd.f32 %v21702_v31, %v21701_v0  ;;  %v4989_v12 = vmul.f32 %v17139_v16, %v17139_v16  ;;  %v10745_v42 = vld [vmem:[%s21318_s4 + $0x98] sm:$0xff]  ;;  %v5493_v0 = vld [vmem:[%s21318_s4 + $0x20] sm:$0xff] }
 0x33a   :  { %21698 = vst [vmem:[#allocation52_spill] sm:$0xff] %v17146_v47  ;;  %v4917_v3 = vadd.f32 %v4916_v53, %v17146_v47  ;;  %v4988_v50 = vmul.f32 %v17146_v47, %v17146_v47  ;;  %v5050_v34 = vadd.f32 %v5049_v8, %v4987_v48  ;;  %13485 = vmatprep.subr.mxu1 %v10746_v22  ;;  %v21705_v53 = vld [vmem:[#allocation71_spill] sm:$0xff] }
 0x33b   :  { %v4689_v20 = vpop.f32.mrf.mxu0  ;;  %13486 = vmatpush3.msra.mxu1 %v10746_v22  ;;  %13611 = vmatprep.subr.mxu0 %v5494_v55  ;;  %v17171_v11 = vadd.f32 %v13426_v4, %v4327_v40  ;;  %v4329_v22 = vadd.f32 %v16906_v63, %v21705_v53  ;;  %v4328_v31 = vadd.f32 %v16924_v10, %v3798_v62  ;;  %v10744_v4 = vld [vmem:[%s21318_s4 + $0x90] sm:$0xff]  ;;  %v21706_v40 = vld [vmem:[#allocation74_spill] sm:$0xff]  ;;  %v21708_v63 = vld [vmem:[#allocation4_spill] sm:$0xff]  ;;  %v17191_v10 = vpop.f32.mrf.mxu1 }
 0x33c   :  { %v5051_v51 = vadd.f32 %v5050_v34, %v4988_v50  ;;  %v17173_v48 = vadd.f32 %v4689_v20, %v4326_v24  ;;  %v4918_v8 = vadd.f32 %v4917_v3, %v17139_v16  ;;  %13487 = vmatprep.subr.mxu1 %v10745_v42  ;;  %13612 = vmatpush3.msra.mxu0 %v5494_v55  ;;  %v21707_v20 = vld [vmem:[#allocation5_spill] sm:$0xff]  ;;  %v10743_v55 = vld [vmem:[%s21318_s4 + $0x88] sm:$0xff] }
 0x33d   :  { %21703 = vst [vmem:[#allocation55_spill] sm:$0xff] %v17171_v11  ;;  %v13429_v47 = vpop.f32.mrf.mxu0  ;;  %13488 = vmatpush3.msra.mxu1 %v10745_v42  ;;  %v3800_v24 = vadd.f32 %v21706_v40, %v3269_v39  ;;  %v3271_v53 = vadd.f32 %v21708_v63, %v21707_v20  ;;  %13613 = vmatprep.subr.mxu0 %v5493_v0  ;;  %v5492_v39 = vld [vmem:[%s21318_s4 + $0x18] sm:$0xff]  ;;  %v21712_v40 = vld [vmem:[#allocation76_spill] sm:$0xff] }
 0x33e   :  { %21704 = vst [vmem:[#allocation28_spill] sm:$0xff] %v17173_v48  ;;  %v4919_v3 = vadd.f32 %v4918_v8, %v17173_v48  ;;  %v4990_v50 = vmul.f32 %v17173_v48, %v17173_v48  ;;  %v5052_v34 = vadd.f32 %v5051_v51, %v4989_v12  ;;  %13489 = vmatprep.subr.mxu1 %v10744_v4  ;;  %v10742_v48 = vld [vmem:[%s21318_s4 + $0x80] sm:$0xff] }
 0x33f   :  { %v17193_v62 = vadd.f32 %v13429_v47, %v4329_v22  ;;  %v4699_v42 = vpop.f32.mrf.mxu0  ;;  %13490 = vmatpush3.msra.mxu1 %v10744_v4  ;;  %v4991_v12 = vmul.f32 %v17171_v11, %v17171_v11  ;;  %v21711_v22 = vld [vmem:[#allocation73_spill] sm:$0xff]  ;;  %v3802_v20 = vadd.f32 %v21712_v40, %v3271_v53  ;;  %13614 = vmatpush3.msra.mxu0 %v5493_v0  ;;  %v21713_v53 = vld [vmem:[#allocation7_spill] sm:$0xff]  ;;  %v21714_v0 = vld [vmem:[#allocation6_spill] sm:$0xff] }
 0x340   :  { %v5053_v51 = vadd.f32 %v5052_v34, %v4990_v50  ;;  %v17203_v8 = vadd.f32 %v4699_v42, %v4328_v31  ;;  %v4920_v47 = vadd.f32 %v4919_v3, %v17171_v11  ;;  %13491 = vmatprep.subr.mxu1 %v10743_v55  ;;  %v4331_v4 = vadd.f32 %v16942_v15, %v21711_v22  ;;  %v5491_v15 = vld [vmem:[%s21318_s4 + $0x10] sm:$0xff]  ;;  %v5505_v34 = vld [vmem:[#allocation2 + $0x1] sm:$0xff] }
 0x341   :  { %21709 = vst [vmem:[#allocation27_spill] sm:$0xff] %v17193_v62  ;;  %v13432_v63 = vpop.f32.mrf.mxu0  ;;  %13492 = vmatpush3.msra.mxu1 %v10743_v55  ;;  %v4330_v16 = vadd.f32 %v16960_v6, %v3800_v24  ;;  %13615 = vmatprep.subr.mxu0 %v5492_v39  ;;  %v3273_v42 = vadd.f32 %v21714_v0, %v21713_v53  ;;  %v17221_v55 = vpop.f32.mrf.mxu1  ;;  %v5490_v40 = vld [vmem:[%s21318_s4 + $0x8] sm:$0xff]  ;;  %v5425_v53 = vld [vmem:[#allocation2] sm:$0xff] }
 0x342   :  { %21710 = vst [vmem:[#allocation54_spill] sm:$0xff] %v17203_v8  ;;  %v4921_v31 = vadd.f32 %v4920_v47, %v17203_v8  ;;  %v4992_v3 = vmul.f32 %v17203_v8, %v17203_v8  ;;  %v5054_v50 = vadd.f32 %v5053_v51, %v4991_v12  ;;  %v4993_v6 = vmul.f32 %v17193_v62, %v17193_v62  ;;  %v21717_v0 = vld [vmem:[#allocation75_spill] sm:$0xff] }
 0x343   :  { %v4709_v24 = vpop.f32.mrf.mxu0  ;;  %13493 = vmatprep.subr.mxu1 %v10742_v48  ;;  %13616 = vmatpush3.msra.mxu0 %v5492_v39  ;;  %v17225_v22 = vadd.f32 %v13432_v63, %v4331_v4  ;;  %v4333_v8 = vadd.f32 %v16978_v38, %v21717_v0  ;;  %v4332_v11 = vadd.f32 %v16996_v21, %v3802_v20  ;;  %v21718_v39 = vld [vmem:[#allocation78_spill] sm:$0xff]  ;;  %v21719_v38 = vld [vmem:[#allocation8_spill] sm:$0xff]  ;;  %v17245_v20 = vpop.f32.mrf.mxu1 }
 0x344   :  { %v5055_v47 = vadd.f32 %v5054_v50, %v4992_v3  ;;  %v17227_v12 = vadd.f32 %v4709_v24, %v4330_v16  ;;  %v4922_v51 = vadd.f32 %v4921_v31, %v17193_v62  ;;  %13494 = vmatpush3.msra.mxu1 %v10742_v48  ;;  %13617 = vmatprep.subr.mxu0 %v5491_v15  ;;  %v5489_v31 = vld [vmem:[%s21318_s4] sm:$0xff]  ;;  %v5506_v3 = vld [vmem:[#allocation2 + $0x9] sm:$0xff] }
 0x345   :  { %21715 = vst [vmem:[#allocation57_spill] sm:$0xff] %v17225_v22  ;;  %v13435_v33 = vpop.f32.mrf.mxu0  ;;  %13495 = vmatprep.mubr.f32.mxu1 %v5505_v34  ;;  %v3804_v4 = vadd.f32 %v21718_v39, %v3273_v42  ;;  %13618 = vmatpush3.msra.mxu0 %v5491_v15  ;;  %v21720_v50 = vld [vmem:[#allocation3_spill] sm:$0xff]  ;;  %v4995_v24 = vmul.f32 %v17225_v22, %v17225_v22  ;;  %v21724_v39 = vld [vmem:[#allocation80_spill] sm:$0xff] }
 0x346   :  { %21716 = vst [vmem:[#allocation30_spill] sm:$0xff] %v17227_v12  ;;  %v4923_v16 = vadd.f32 %v4922_v51, %v17227_v12  ;;  %v4994_v48 = vmul.f32 %v17227_v12, %v17227_v12  ;;  %v5056_v63 = vadd.f32 %v5055_v47, %v4993_v6  ;;  %v3275_v21 = vadd.f32 %v21720_v50, %v21719_v38  ;;  %v21723_v51 = vld [vmem:[#allocation77_spill] sm:$0xff]  ;;  %v21757_v62 = vld [vmem:[#allocation48_spill] sm:$0xff] }
 0x347   :  { %v17247_v34 = vadd.f32 %v13435_v33, %v4333_v8  ;;  %v4719_v42 = vpop.f32.mrf.mxu0  ;;  %13619 = vmatprep.subr.mxu0 %v5490_v40  ;;  %13623 = vmatprep.mubr.f32.mxu0 %v5425_v53  ;;  %v4335_v0 = vadd.f32 %v17014_v30, %v21723_v51  ;;  %v10773_v33 = vld [vmem:[%s21318_s4 + $0x178] sm:$0xff]  ;;  %v4334_v8 = vadd.f32 %v17038_v28, %v3804_v4  ;;  %v10772_v30 = vld [vmem:[%s21318_s4 + $0x170] sm:$0xff]  ;;  %v14621_v4 = vld [vmem:[#allocation2 + $0x8] sm:$0xff] }
 0x348   :  { %v5057_v6 = vadd.f32 %v5056_v63, %v4994_v48  ;;  %v17251_v15 = vadd.f32 %v4719_v42, %v4332_v11  ;;  %v4924_v47 = vadd.f32 %v4923_v16, %v17225_v22  ;;  %13620 = vmatpush3.msra.mxu0 %v5490_v40  ;;  %v3806_v38 = vadd.f32 %v21724_v39, %v3275_v21  ;;  %v21725_v16 = vld [vmem:[#allocation10_spill] sm:$0xff]  ;;  %v21726_v48 = vld [vmem:[#allocation9_spill] sm:$0xff] }
 0x349   :  { %21721 = vst [vmem:[#allocation29_spill] sm:$0xff] %v17247_v34  ;;  %v13438_v50 = vpop.f32.mrf.mxu0  ;;  %13621 = vmatprep.subr.mxu0 %v5489_v31  ;;  %13496 = vmatmul.mubr.f32.vlgmr.msra.gmra.mxu1 %v5506_v3  ;;  %v3277_v63 = vadd.f32 %v21726_v48, %v21725_v16  ;;  %v17269_v3 = vpop.f32.mrf.mxu1  ;;  %v4997_v21 = vmul.f32 %v17247_v34, %v17247_v34  ;;  %v21729_v48 = vld [vmem:[#allocation82_spill] sm:$0xff] }
 0x34a   :  { %21722 = vst [vmem:[#allocation56_spill] sm:$0xff] %v17251_v15  ;;  %v4925_v11 = vadd.f32 %v4924_v47, %v17251_v15  ;;  %v4996_v53 = vmul.f32 %v17251_v15, %v17251_v15  ;;  %v5058_v40 = vadd.f32 %v5057_v6, %v4995_v24  ;;  %13622 = vmatpush3.msra.mxu0 %v5489_v31  ;;  %v21728_v6 = vld [vmem:[#allocation79_spill] sm:$0xff] }
 0x34b   :  { %v4729_v28 = vpop.f32.mrf.mxu0  ;;  %13624 = vmatmul.mubr.f32.vlgmr.msra.gmra.mxu0 %v14621_v4  ;;  %13719 = vmatprep.subr.mxu1 %v10773_v33  ;;  %v17273_v47 = vadd.f32 %v13438_v50, %v4335_v0  ;;  %v4337_v51 = vadd.f32 %v17062_v43, %v21728_v6  ;;  %v4336_v39 = vadd.f32 %v17086_v52, %v3806_v38  ;;  %v10771_v52 = vld [vmem:[%s21318_s4 + $0x168] sm:$0xff] }
 0x34c   :  { %v5059_v42 = vadd.f32 %v5058_v40, %v4996_v53  ;;  %v17275_v31 = vadd.f32 %v4729_v28, %v4334_v8  ;;  %v4926_v24 = vadd.f32 %v4925_v11, %v17247_v34  ;;  %13720 = vmatpush3.msra.mxu1 %v10773_v33  ;;  %v3808_v15 = vadd.f32 %v21729_v48, %v3277_v63  ;;  %v21730_v8 = vld [vmem:[#allocation12_spill] sm:$0xff]  ;;  %v21731_v53 = vld [vmem:[#allocation11_spill] sm:$0xff]  ;;  %v4249_v33 = vpop.f32.mrf.mxu1 }
 0x34d   :  { %21727 = vst [vmem:[#allocation32_spill] sm:$0xff] %v17273_v47  ;;  %v13441_v16 = vpop.f32.mrf.mxu0  ;;  %13721 = vmatprep.subr.mxu1 %v10772_v30  ;;  %v3279_v11 = vadd.f32 %v21731_v53, %v21730_v8  ;;  %v4999_v38 = vmul.f32 %v17273_v47, %v17273_v47 }
 0x34e   :  { %v4927_v4 = vadd.f32 %v4926_v24, %v17275_v31  ;;  %v4998_v0 = vmul.f32 %v17275_v31, %v17275_v31  ;;  %v5060_v50 = vadd.f32 %v5059_v42, %v4997_v21  ;;  %13722 = vmatpush3.msra.mxu1 %v10772_v30  ;;  %v17287_v40 = vadd.f32 %v13441_v16, %v4337_v51  ;;  %v21732_v30 = vld [vmem:[#allocation81_spill] sm:$0xff]  ;;  %v21733_v24 = vld [vmem:[#allocation84_spill] sm:$0xff] }
 0x34f   :  { %v4739_v43 = vpop.f32.mrf.mxu0  ;;  %13723 = vmatprep.subr.mxu1 %v10771_v52  ;;  %v4339_v42 = vadd.f32 %v17110_v7, %v21732_v30  ;;  %v3810_v6 = vadd.f32 %v21733_v24, %v3279_v11  ;;  %v4338_v16 = vadd.f32 %v17137_v14, %v3808_v15  ;;  %v21737_v15 = vld [vmem:[#allocation83_spill] sm:$0xff]  ;;  %v21738_v24 = vld [vmem:[#allocation86_spill] sm:$0xff] }
 0x350   :  { %v5061_v63 = vadd.f32 %v5060_v50, %v4998_v0  ;;  %v17294_v28 = vadd.f32 %v4739_v43, %v4336_v39  ;;  %v4928_v21 = vadd.f32 %v4927_v4, %v17273_v47  ;;  %13724 = vmatpush3.msra.mxu1 %v10771_v52  ;;  %v21734_v39 = vld [vmem:[#allocation14_spill] sm:$0xff]  ;;  %v21735_v50 = vld [vmem:[#allocation13_spill] sm:$0xff]  ;;  %v13328_v4 = vpop.f32.mrf.mxu1  ;;  %v5001_v43 = vmul.f32 %v17287_v40, %v17287_v40 }
 0x351   :  { %v13444_v51 = vpop.f32.mrf.mxu0  ;;  %v3281_v53 = vadd.f32 %v21735_v50, %v21734_v39 }
 0x352   :  { %v4929_v48 = vadd.f32 %v4928_v21, %v17294_v28  ;;  %v5000_v8 = vmul.f32 %v17294_v28, %v17294_v28  ;;  %v5062_v0 = vadd.f32 %v5061_v63, %v4999_v38  ;;  %v17308_v11 = vadd.f32 %v13444_v51, %v4339_v42  ;;  %v21739_v42 = vld [vmem:[#allocation16_spill] sm:$0xff]  ;;  %v21740_v51 = vld [vmem:[#allocation15_spill] sm:$0xff] }
 0x353   :  { %v4749_v7 = vpop.f32.mrf.mxu0  ;;  %v4341_v21 = vadd.f32 %v17164_v54, %v21737_v15  ;;  %v4340_v38 = vadd.f32 %v17191_v10, %v3810_v6  ;;  %v3812_v39 = vadd.f32 %v21738_v24, %v3281_v53  ;;  %v10770_v54 = vld [vmem:[%s21318_s4 + $0x160] sm:$0xff]  ;;  %v21744_v15 = vld [vmem:[#allocation88_spill] sm:$0xff] }
 0x354   :  { %v5063_v30 = vadd.f32 %v5062_v0, %v5000_v8  ;;  %21736 = vst [vmem:[#allocation31_spill] sm:$0xff] %v17308_v11  ;;  %v17310_v52 = vadd.f32 %v4749_v7, %v4338_v16  ;;  %v4930_v14 = vadd.f32 %v4929_v48, %v17287_v40  ;;  %v3283_v16 = vadd.f32 %v21740_v51, %v21739_v42  ;;  %v4259_v0 = vpop.f32.mrf.mxu1 }
 0x355   :  { %v13447_v63 = vpop.f32.mrf.mxu0  ;;  %v5003_v10 = vmul.f32 %v17308_v11, %v17308_v11  ;;  %13725 = vmatprep.subr.mxu1 %v10770_v54  ;;  %v4342_v24 = vadd.f32 %v17245_v20, %v3812_v39  ;;  %v21749_v39 = vld [vmem:[#allocation87_spill] sm:$0xff] }
 0x356   :  { %v4931_v50 = vadd.f32 %v4930_v14, %v17310_v52  ;;  %v5002_v47 = vmul.f32 %v17310_v52, %v17310_v52  ;;  %v5064_v8 = vadd.f32 %v5063_v30, %v5001_v43  ;;  %v17322_v7 = vadd.f32 %v13447_v63, %v4341_v21  ;;  %v21743_v43 = vld [vmem:[#allocation85_spill] sm:$0xff]  ;;  %13726 = vmatpush3.msra.mxu1 %v10770_v54 }
 0x357   :  { %v4759_v48 = vpop.f32.mrf.mxu0  ;;  %v4343_v30 = vadd.f32 %v17221_v55, %v21743_v43  ;;  %v3814_v21 = vadd.f32 %v21744_v15, %v3283_v16 }
 0x358   :  { %21741 = vst [vmem:[#allocation58_spill] sm:$0xff] %v17322_v7  ;;  %v5065_v6 = vadd.f32 %v5064_v8, %v5002_v47  ;;  %v17329_v53 = vadd.f32 %v4759_v48, %v4340_v38  ;;  %v4932_v14 = vadd.f32 %v4931_v50, %v17308_v11  ;;  %v21745_v38 = vld [vmem:[#allocation18_spill] sm:$0xff]  ;;  %v21746_v8 = vld [vmem:[#allocation17_spill] sm:$0xff]  ;;  %v13331_v50 = vpop.f32.mrf.mxu1  ;;  %v5005_v34 = vmul.f32 %v17322_v7, %v17322_v7 }
 0x359   :  { %v13450_v63 = vpop.f32.mrf.mxu0  ;;  %v3285_v48 = vadd.f32 %v21746_v8, %v21745_v38  ;;  %v4344_v15 = vadd.f32 %v4249_v33, %v3814_v21 }
 0x35a   :  { %21742 = vst [vmem:[#allocation60_spill] sm:$0xff] %v17329_v53  ;;  %v4933_v42 = vadd.f32 %v4932_v14, %v17329_v53  ;;  %v5004_v51 = vmul.f32 %v17329_v53, %v17329_v53  ;;  %v5066_v47 = vadd.f32 %v5065_v6, %v5003_v10  ;;  %v17343_v16 = vadd.f32 %v13450_v63, %v4343_v30  ;;  %v21750_v6 = vld [vmem:[#allocation90_spill] sm:$0xff]  ;;  %v21752_v30 = vld [vmem:[#allocation19_spill] sm:$0xff] }
 0x35b   :  { %v4769_v55 = vpop.f32.mrf.mxu0  ;;  %v4345_v14 = vadd.f32 %v17269_v3, %v21749_v39  ;;  %v3816_v22 = vadd.f32 %v21750_v6, %v3285_v48  ;;  %v10769_v3 = vld [vmem:[%s21318_s4 + $0x158] sm:$0xff] }
 0x35c   :  { %v5067_v43 = vadd.f32 %v5066_v47, %v5004_v51  ;;  %21747 = vst [vmem:[#allocation34_spill] sm:$0xff] %v17343_v16  ;;  %v17345_v54 = vadd.f32 %v4769_v55, %v4342_v24  ;;  %v4934_v20 = vadd.f32 %v4933_v42, %v17322_v7  ;;  %v21751_v51 = vld [vmem:[#allocation20_spill] sm:$0xff]  ;;  %v4269_v24 = vpop.f32.mrf.mxu1  ;;  %v5007_v33 = vmul.f32 %v17343_v16, %v17343_v16 }
 0x35d   :  { %v13453_v10 = vpop.f32.mrf.mxu0  ;;  %v3287_v63 = vadd.f32 %v21752_v30, %v21751_v51  ;;  %13727 = vmatprep.subr.mxu1 %v10769_v3 }
 0x35e   :  { %21748 = vst [vmem:[#allocation33_spill] sm:$0xff] %v17345_v54  ;;  %v4935_v38 = vadd.f32 %v4934_v20, %v17345_v54  ;;  %v5006_v8 = vmul.f32 %v17345_v54, %v17345_v54  ;;  %v5068_v12 = vadd.f32 %v5067_v43, %v5005_v34  ;;  %v17356_v47 = vadd.f32 %v13453_v10, %v4345_v14  ;;  %v21755_v34 = vld [vmem:[#allocation89_spill] sm:$0xff] }
 0x35f   :  { %v4779_v42 = vpop.f32.mrf.mxu0  ;;  %v4347_v43 = vadd.f32 %v13328_v4, %v21755_v34  ;;  %v21756_v20 = vld [vmem:[#allocation93_spill] sm:$0xff]  ;;  %13728 = vmatpush3.msra.mxu1 %v10769_v3  ;;  %v4346_v10 = vadd.f32 %v4259_v0, %v3816_v22  ;;  %v21761_v0 = vld [vmem:[#allocation91_spill] sm:$0xff] }
 0x360   :  { %21753 = vst [vmem:[#allocation59_spill] sm:$0xff] %v17356_v47  ;;  %v5069_v21 = vadd.f32 %v5068_v12, %v5006_v8  ;;  %v17363_v48 = vadd.f32 %v4779_v42, %v4344_v15  ;;  %v4936_v55 = vadd.f32 %v4935_v38, %v17343_v16  ;;  %v3818_v39 = vadd.f32 %v21756_v20, %v3287_v63  ;;  %v21758_v12 = vld [vmem:[#allocation47_spill] sm:$0xff]  ;;  %v13334_v8 = vpop.f32.mrf.mxu1  ;;  %v21789_v16 = vld [vmem:[#allocation32_spill] sm:$0xff] }
 0x361   :  { %v13456_v14 = vpop.f32.mrf.mxu0  ;;  %v3289_v15 = vadd.f32 %v21758_v12, %v21757_v62  ;;  %v5009_v38 = vmul.f32 %v17356_v47, %v17356_v47  ;;  %v4349_v3 = vadd.f32 %v13331_v50, %v21761_v0 }
 0x362   :  { %21754 = vst [vmem:[#allocation62_spill] sm:$0xff] %v17363_v48  ;;  %v4937_v6 = vadd.f32 %v4936_v55, %v17363_v48  ;;  %v5008_v51 = vmul.f32 %v17363_v48, %v17363_v48  ;;  %v5070_v30 = vadd.f32 %v5069_v21, %v5007_v33  ;;  %v17375_v34 = vadd.f32 %v13456_v14, %v4347_v43  ;;  %v21762_v33 = vld [vmem:[#allocation95_spill] sm:$0xff]  ;;  %v4279_v17 = vpop.f32.mrf.mxu1  ;;  %v10768_v14 = vld [vmem:[%s21318_s4 + $0x150] sm:$0xff] }
 0x363   :  { %v4789_v42 = vpop.f32.mrf.mxu0  ;;  %v4348_v55 = vadd.f32 %v4269_v24, %v3818_v39  ;;  %v3820_v21 = vadd.f32 %v21762_v33, %v3289_v15  ;;  %13729 = vmatprep.subr.mxu1 %v10768_v14 }
 0x364   :  { %v5071_v4 = vadd.f32 %v5070_v30, %v5008_v51  ;;  %21759 = vst [vmem:[#allocation36_spill] sm:$0xff] %v17375_v34  ;;  %v17377_v63 = vadd.f32 %v4789_v42, %v4346_v10  ;;  %v4938_v22 = vadd.f32 %v4937_v6, %v17356_v47  ;;  %v5011_v50 = vmul.f32 %v17375_v34, %v17375_v34  ;;  %v21765_v6 = vld [vmem:[#allocation94_spill] sm:$0xff] }
 0x365   :  { %v13459_v20 = vpop.f32.mrf.mxu0  ;;  %v4351_v30 = vadd.f32 %v13334_v8, %v21765_v6  ;;  %13730 = vmatpush3.msra.mxu1 %v10768_v14 }
 0x366   :  { %21760 = vst [vmem:[#allocation35_spill] sm:$0xff] %v17377_v63  ;;  %v4939_v62 = vadd.f32 %v4938_v22, %v17377_v63  ;;  %v5010_v12 = vmul.f32 %v17377_v63, %v17377_v63  ;;  %v5072_v35 = vadd.f32 %v5071_v4, %v5009_v38  ;;  %v17385_v51 = vadd.f32 %v13459_v20, %v4349_v3 }
 0x367   :  { %v4799_v43 = vpop.f32.mrf.mxu0  ;;  %v4350_v38 = vadd.f32 %v4279_v17, %v3820_v21 }
 0x368   :  { %21763 = vst [vmem:[#allocation61_spill] sm:$0xff] %v17385_v51  ;;  %v5073_v24 = vadd.f32 %v5072_v35, %v5010_v12  ;;  %v17392_v39 = vadd.f32 %v4799_v43, %v4348_v55  ;;  %v4940_v10 = vadd.f32 %v4939_v62, %v17375_v34  ;;  %v5013_v0 = vmul.f32 %v17385_v51, %v17385_v51  ;;  %v10767_v62 = vld [vmem:[%s21318_s4 + $0x148] sm:$0xff] }
 0x369   :  { %v13462_v15 = vpop.f32.mrf.mxu0  ;;  %13731 = vmatprep.subr.mxu1 %v10767_v62 }
 0x36a   :  { %21764 = vst [vmem:[#allocation64_spill] sm:$0xff] %v17392_v39  ;;  %v4941_v42 = vadd.f32 %v4940_v10, %v17392_v39  ;;  %v5012_v4 = vmul.f32 %v17392_v39, %v17392_v39  ;;  %v5074_v22 = vadd.f32 %v5073_v24, %v5011_v50  ;;  %v17401_v55 = vadd.f32 %v13462_v15, %v4351_v30 }
 0x36b   :  { %v4809_v35 = vpop.f32.mrf.mxu0  ;;  %13732 = vmatpush3.msra.mxu1 %v10767_v62 }
 0x36c   :  { %v5075_v3 = vadd.f32 %v5074_v22, %v5012_v4  ;;  %21766 = vst [vmem:[#allocation92_spill] sm:$0xff] %v17401_v55  ;;  %v17403_v20 = vadd.f32 %v4809_v35, %v4350_v38  ;;  %v4942_v8 = vadd.f32 %v4941_v42, %v17385_v51  ;;  %v5015_v12 = vmul.f32 %v17401_v55, %v17401_v55  ;;  %v10766_v38 = vld [vmem:[%s21318_s4 + $0x140] sm:$0xff] }
 0x36d   :  { %13733 = vmatprep.subr.mxu1 %v10766_v38 }
 0x36e   :  { %v4943_v33 = vadd.f32 %v4942_v8, %v17403_v20  ;;  %v5014_v17 = vmul.f32 %v17403_v20, %v17403_v20  ;;  %v5076_v21 = vadd.f32 %v5075_v3, %v5013_v0  ;;  %13734 = vmatpush3.msra.mxu1 %v10766_v38 }
 0x370   :  { %v4944_v43 = vadd.f32 %v4943_v33, %v17401_v55  ;;  %v5077_v14 = vadd.f32 %v5076_v21, %v5014_v17  ;;  %v5157_v17 = vlaneseq  ;;  %v10765_v21 = vld [vmem:[%s21318_s4 + $0x138] sm:$0xff] }
 0x371   :  { %13735 = vmatprep.subr.mxu1 %v10765_v21 }
 0x372   :  { %v4945_v50 = vrot.slane %v4944_v43, 4  ;;  %v5078_v24 = vadd.f32 %v5077_v14, %v5015_v12  ;;  %13736 = vmatpush3.msra.mxu1 %v10765_v21 }
 0x374   :  { %v4946_v10 = vadd.f32 %v4945_v50, %v4944_v43  ;;  %v5079_v6 = vrot.slane %v5078_v24, 4  ;;  %v17427_v50 = vshrl.u32 %v5157_v17, 7  ;;  %v21776_v43 = vld [vmem:[#allocation24_spill] sm:$0xff] }
 0x376   :  { %v4947_v30 = vrot.slane %v4946_v10, 2  ;;  %v5080_v15 = vadd.f32 %v5079_v6, %v5078_v24  ;;  %21767 = vst [vmem:[#allocation38_spill] sm:$0xff] %v17427_v50  ;;  %v21775_v6 = vld [vmem:[#allocation25_spill] sm:$0xff] }
 0x378   :  { %v4948_v42 = vadd.f32 %v4947_v30, %v4946_v10  ;;  %v5081_v4 = vrot.slane %v5080_v15, 2  ;;  %v10764_v30 = vld [vmem:[%s21318_s4 + $0x130] sm:$0xff] }
 0x379   :  { %13737 = vmatprep.subr.mxu1 %v10764_v30  ;;  %v21777_v10 = vld [vmem:[#allocation53_spill] sm:$0xff] }
 0x37a   :  { %v4949_v22 = vrot.slane %v4948_v42, 1  ;;  %v5082_v0 = vadd.f32 %v5081_v4, %v5080_v15  ;;  %v21768_v15 = vld [vmem:[#allocation96_spill] sm:$0xff]  ;;  %13738 = vmatpush3.msra.mxu1 %v10764_v30  ;;  %v21772_v4 = vld [vmem:[#allocation23_spill] sm:$0xff] }
 0x37c   :  { %v4950_v35 = vadd.f32 %v4949_v22, %v4948_v42  ;;  %v5083_v3 = vrot.slane %v5082_v0, 1 }
 0x37e   :  { %v17418_v8 = vmul.f32 0.001953125, %v4950_v35  ;;  %v5084_v33 = vadd.f32 %v5083_v3, %v5082_v0  ;;  %v21770_v35 = vld [vmem:[#allocation22_spill] sm:$0xff] }
 0x380   :  { %v5085_v62 = vmul.f32 0.001953125, %v5084_v33  ;;  %v5086_v12 = vmul.f32 %v17418_v8, %v17418_v8  ;;  %v5114_v21 = vsub.f32 %v16984_v56, %v17418_v8  ;;  %v5117_v17 = vsub.f32 %v16998_v41, %v17418_v8  ;;  %v21769_v33 = vld [vmem:[#allocation21_spill] sm:$0xff]  ;;  %v21774_v41 = vld [vmem:[#allocation50_spill] sm:$0xff] }
 0x381   :  { %v5118_v3 = vsub.f32 %v21769_v33, %v17418_v8  ;;  %v5119_v0 = vsub.f32 %v21770_v35, %v17418_v8  ;;  %v21771_v56 = vld [vmem:[#allocation49_spill] sm:$0xff]  ;;  %v5122_v30 = vsub.f32 %v21772_v4, %v17418_v8  ;;  %v5124_v38 = vsub.f32 %v21774_v41, %v17418_v8  ;;  %v21779_v4 = vld [vmem:[#allocation26_spill] sm:$0xff] }
 0x382   :  { %v5087_v14 = vsub.f32 %v5085_v62, %v5086_v12  ;;  %v10763_v12 = vld [vmem:[%s21318_s4 + $0x128] sm:$0xff]  ;;  %v5088_v62 = vld [vmem:[%s21319_s2] sm:$0x1]  ;;  %v5120_v22 = vsub.f32 %v21771_v56, %v17418_v8  ;;  %v5125_v35 = vsub.f32 %v21775_v6, %v17418_v8  ;;  %v5126_v56 = vsub.f32 %v21776_v43, %v17418_v8  ;;  %v21783_v43 = vld [vmem:[#allocation54_spill] sm:$0xff] }
 0x383   :  { %13739 = vmatprep.subr.mxu1 %v10763_v12  ;;  %v5127_v55 = vsub.f32 %v21777_v10, %v17418_v8  ;;  %v5129_v39 = vsub.f32 %v21779_v4, %v17418_v8  ;;  %v21782_v6 = vsub.s32 0, %v17427_v50  ;;  %v5132_v63 = vsub.f32 %v21783_v43, %v17418_v8  ;;  %v21784_v10 = vld [vmem:[#allocation27_spill] sm:$0xff]  ;;  %v21788_v50 = vld [vmem:[#allocation29_spill] sm:$0xff] }
 0x384   :  { %v5089_v24 = vadd.f32 1e-05, %v5087_v14  ;;  %v5115_v14 = vsub.f32 %v16982_v36, %v17418_v8  ;;  %13740 = vmatpush3.msra.mxu1 %v10763_v12  ;;  %v21773_v12 = vld [vmem:[#allocation51_spill] sm:$0xff]  ;;  %v5133_v47 = vsub.f32 %v21784_v10, %v17418_v8  ;;  %v5137_v43 = vsub.f32 %v21788_v50, %v17418_v8 }
 0x385   :  { %v5123_v42 = vsub.f32 %v21773_v12, %v17418_v8  ;;  %v21780_v12 = vld [vmem:[#allocation28_spill] sm:$0xff]  ;;  %v17564_v4 = vld [vmem:[%s21320_s3] ss:$0 sm:$0xff]  ;;  %v21790_v54 = vsub.f32 %v17403_v20, %v17418_v8  ;;  %v21792_v50 = vsub.f32 %v21768_v15, %v17418_v8  ;;  %v21793_v53 = vsub.f32 %v16812_v57, %v17418_v8 }
 0x386   :  { %14616 = vrsqrt.f32 %v5089_v24  ;;  %v5116_v24 = vsub.f32 %v17002_v27, %v17418_v8  ;;  %v5121_v27 = vsub.f32 %v17040_v1, %v17418_v8  ;;  %v21778_v1 = vld [vmem:[#allocation52_spill] sm:$0xff]  ;;  %v5130_v34 = vsub.f32 %v21780_v12, %v17418_v8  ;;  %v21786_v12 = vld [vmem:[#allocation57_spill] sm:$0xff] }
 0x387   :  { %v5128_v51 = vsub.f32 %v21778_v1, %v17418_v8  ;;  %v21785_v1 = vld [vmem:[#allocation30_spill] sm:$0xff]  ;;  %v21795_v20 = vsub.f32 %v16828_v19, %v17418_v8  ;;  %v21798_v19 = vsub.f32 %v16841_v59, %v17418_v8 }
 0x388   :  { %v5134_v48 = vsub.f32 %v21785_v1, %v17418_v8  ;;  %v10762_v1 = vld [vmem:[%s21318_s4 + $0x120] sm:$0xff] }
 0x389   :  { %13741 = vmatprep.subr.mxu1 %v10762_v1 }
 0x38a   :  { %13742 = vmatpush3.msra.mxu1 %v10762_v1  ;;  %v21802_v1 = vsub.f32 %v16873_v46, %v17418_v8 }
 0x393   :  { %v14617_v36 = vpop.eup %14616 }
 0x394   :  { %v5091_v33 = vmul.f32 %v14617_v36, %v5088_v62  ;;  %v21781_v62 = vld [vmem:[#allocation55_spill] sm:$0xff] }
 0x395   :  { %v5131_v36 = vsub.f32 %v21781_v62, %v17418_v8  ;;  %v5135_v62 = vsub.f32 %v21786_v12, %v17418_v8  ;;  %v21791_v12 = vsub.f32 %v16796_v9, %v17418_v8 }
 0x396   :  { %v17553_v41 = vrot.slane %v5091_v33, %v21782_v6  ;;  %v21787_v33 = vld [vmem:[#allocation56_spill] sm:$0xff] }
 0x397   :  { %v5136_v6 = vsub.f32 %v21787_v33, %v17418_v8 }
 0x398   :  { %v5224_v7 = vmul.f32 %v17553_v41, %v21790_v54  ;;  %v17585_v33 = vmul.f32 %v17553_v41, %v21791_v12  ;;  %v17591_v10 = vmul.f32 %v17553_v41, %v21792_v50  ;;  %v17597_v11 = vmul.f32 %v17553_v41, %v21793_v53 }
 0x399   :  { %v21794_v54 = vsub.f32 %v16810_v13, %v17418_v8  ;;  %v17609_v15 = vmul.f32 %v17553_v41, %v21795_v20  ;;  %v21796_v12 = vsub.f32 %v16823_v29, %v17418_v8  ;;  %v21797_v53 = vsub.f32 %v16843_v45, %v17418_v8 }
 0x39a   :  { %v5295_v50 = vadd.f32 %v17564_v4, %v5224_v7  ;;  %v21799_v29 = vsub.f32 %v16859_v49, %v17418_v8  ;;  %v21800_v45 = vsub.f32 %v16855_v25, %v17418_v8  ;;  %v21801_v7 = vsub.f32 %v16875_v58, %v17418_v8 }
 0x39b   :  { %v17603_v9 = vmul.f32 %v17553_v41, %v21794_v54  ;;  %v17615_v57 = vmul.f32 %v17553_v41, %v21796_v12  ;;  %v17621_v13 = vmul.f32 %v17553_v41, %v21797_v53  ;;  %v17628_v54 = vmul.f32 %v17553_v41, %v21798_v19 }
 0x39c   :  { %v17634_v20 = vmul.f32 %v17553_v41, %v21799_v29  ;;  %v17640_v12 = vmul.f32 %v17553_v41, %v21800_v45  ;;  %v17646_v59 = vmul.f32 %v17553_v41, %v21801_v7  ;;  %v17652_v49 = vmul.f32 %v17553_v41, %v21802_v1 }
 0x39d   :  { %v21803_v53 = vsub.f32 %v16893_v61, %v17418_v8  ;;  %v21804_v19 = vsub.f32 %v16889_v37, %v17418_v8  ;;  %v5359_v29 = vmax.f32 %v5295_v50, 0.0  ;;  %v21805_v45 = vsub.f32 %v16912_v60, %v17418_v8 }
 0x39e   :  { %v21806_v7 = vsub.f32 %v16910_v5, %v17418_v8  ;;  %v21807_v1 = vsub.f32 %v16930_v2, %v17418_v8  ;;  %v21808_v50 = vsub.f32 %v16926_v26, %v17418_v8 }
 0x39f   :  { %v17658_v25 = vmul.f32 %v17553_v41, %v21803_v53  ;;  %v17664_v58 = vmul.f32 %v17553_v41, %v21804_v19  ;;  %v17670_v46 = vmul.f32 %v17553_v41, %v21805_v45  ;;  %v21809_v53 = vsub.f32 %v16948_v44, %v17418_v8  ;;  %5423 = vst [vmem:[#allocation2 + $0x331] sm:$0xff] %v5359_v29 }
 0x3a0   :  { %v17676_v61 = vmul.f32 %v17553_v41, %v21806_v7  ;;  %v17682_v37 = vmul.f32 %v17553_v41, %v21807_v1  ;;  %v17688_v60 = vmul.f32 %v17553_v41, %v21808_v50  ;;  %v21810_v19 = vsub.f32 %v16946_v18, %v17418_v8 }
 0x3a1   :  { %v17694_v5 = vmul.f32 %v17553_v41, %v21809_v53  ;;  %v21811_v45 = vsub.f32 %v16966_v32, %v17418_v8  ;;  %v21812_v7 = vsub.f32 %v16962_v23, %v17418_v8  ;;  %v17715_v1 = vmul.f32 %v17553_v41, %v5114_v21  ;;  %v10761_v21 = vld [vmem:[%s21318_s4 + $0x118] sm:$0xff] }
 0x3a2   :  { %v17700_v2 = vmul.f32 %v17553_v41, %v21810_v19  ;;  %v17718_v18 = vmul.f32 %v17553_v41, %v5115_v14  ;;  %v17721_v50 = vmul.f32 %v17553_v41, %v5116_v24  ;;  %v17724_v32 = vmul.f32 %v17553_v41, %v5117_v17  ;;  %v10789_v14 = vld [vmem:[%s21318_s4 + $0x1f8] sm:$0xff]  ;;  %13743 = vmatprep.subr.mxu1 %v10761_v21 }
 0x3a3   :  { %v17706_v26 = vmul.f32 %v17553_v41, %v21811_v45  ;;  %v17712_v44 = vmul.f32 %v17553_v41, %v21812_v7  ;;  %v17727_v29 = vmul.f32 %v17553_v41, %v5118_v3  ;;  %v17730_v23 = vmul.f32 %v17553_v41, %v5119_v0  ;;  %13847 = vmatprep.subr.mxu0 %v10789_v14 }
 0x3a4   :  { %v17733_v53 = vmul.f32 %v17553_v41, %v5120_v22  ;;  %v17742_v17 = vmul.f32 %v17553_v41, %v5121_v27  ;;  %v17745_v3 = vmul.f32 %v17553_v41, %v5122_v30  ;;  %v17748_v0 = vmul.f32 %v17553_v41, %v5123_v42  ;;  %v10788_v42 = vld [vmem:[%s21318_s4 + $0x1f0] sm:$0xff]  ;;  %13744 = vmatpush3.msra.mxu1 %v10761_v21 }
 0x3a5   :  { %v17751_v22 = vmul.f32 %v17553_v41, %v5124_v38  ;;  %v17754_v24 = vmul.f32 %v17553_v41, %v5125_v35  ;;  %v17757_v19 = vmul.f32 %v17553_v41, %v5126_v56  ;;  %v17760_v45 = vmul.f32 %v17553_v41, %v5127_v55  ;;  %13848 = vmatpush3.msra.mxu0 %v10789_v14 }
 0x3a6   :  { %v17763_v27 = vmul.f32 %v17553_v41, %v5128_v51  ;;  %v17769_v38 = vmul.f32 %v17553_v41, %v5129_v39  ;;  %v17772_v30 = vmul.f32 %v17553_v41, %v5130_v34  ;;  %v17775_v35 = vmul.f32 %v17553_v41, %v5131_v36  ;;  %v10787_v34 = vld [vmem:[%s21318_s4 + $0x1e8] sm:$0xff]  ;;  %13849 = vmatprep.subr.mxu0 %v10788_v42 }
 0x3a7   :  { %v17778_v55 = vmul.f32 %v17553_v41, %v5132_v63  ;;  %v17781_v51 = vmul.f32 %v17553_v41, %v5133_v47  ;;  %v17784_v56 = vmul.f32 %v17553_v41, %v5134_v48  ;;  %v17787_v7 = vmul.f32 %v17553_v41, %v5135_v62  ;;  %13850 = vmatpush3.msra.mxu0 %v10788_v42 }
 0x3a8   :  { %v17790_v39 = vmul.f32 %v17553_v41, %v5136_v6  ;;  %v17796_v63 = vmul.f32 %v17553_v41, %v5137_v43  ;;  %v21813_v47 = vsub.f32 %v17275_v31, %v17418_v8  ;;  %v21814_v36 = vsub.f32 %v21789_v16, %v17418_v8  ;;  %13851 = vmatprep.subr.mxu0 %v10787_v34 }
 0x3a9   :  { %v21815_v6 = vsub.f32 %v17294_v28, %v17418_v8  ;;  %v21817_v43 = vsub.f32 %v17287_v40, %v17418_v8  ;;  %v21819_v14 = vsub.f32 %v17310_v52, %v17418_v8  ;;  %v10786_v52 = vld [vmem:[%s21318_s4 + $0x1e0] sm:$0xff]  ;;  %13852 = vmatpush3.msra.mxu0 %v10787_v34  ;;  %v17912_v34 = vadd.f32 %v17564_v4, %v17591_v10 }
 0x3aa   :  { %v17802_v48 = vmul.f32 %v17553_v41, %v21813_v47  ;;  %v17808_v62 = vmul.f32 %v17553_v41, %v21814_v36  ;;  %v21821_v47 = vld [vmem:[#allocation31_spill] sm:$0xff]  ;;  %13853 = vmatprep.subr.mxu0 %v10786_v52  ;;  %v17931_v10 = vadd.f32 %v17564_v4, %v17615_v57  ;;  %v17951_v57 = vadd.f32 %v17564_v4, %v17646_v59 }
 0x3ab   :  { %v17814_v21 = vmul.f32 %v17553_v41, %v21815_v6  ;;  %v17820_v31 = vmul.f32 %v17553_v41, %v21817_v43  ;;  %v17826_v16 = vmul.f32 %v17553_v41, %v21819_v14  ;;  %v21822_v36 = vsub.f32 %v21821_v47, %v17418_v8  ;;  %v21824_v6 = vld [vmem:[#allocation60_spill] sm:$0xff]  ;;  %v21827_v43 = vld [vmem:[#allocation58_spill] sm:$0xff]  ;;  %v21830_v47 = vld [vmem:[#allocation33_spill] sm:$0xff]  ;;  %13854 = vmatpush3.msra.mxu0 %v10786_v52 }
 0x3ac   :  { %v21828_v14 = vsub.f32 %v21827_v43, %v17418_v8  ;;  %v17970_v59 = vadd.f32 %v17564_v4, %v17670_v46  ;;  %v17986_v52 = vadd.f32 %v17564_v4, %v17694_v5  ;;  %v17990_v46 = vadd.f32 %v17564_v4, %v17700_v2 }
 0x3ad   :  { %21816 = vst [vmem:[#allocation37_spill] sm:$0xff] %v17814_v21  ;;  %21818 = vst [vmem:[#allocation63_spill] sm:$0xff] %v17820_v31  ;;  %v17832_v28 = vmul.f32 %v17553_v41, %v21822_v36  ;;  %v21825_v21 = vsub.f32 %v21824_v6, %v17418_v8  ;;  %v21831_v36 = vsub.f32 %v21830_v47, %v17418_v8  ;;  %v21833_v6 = vld [vmem:[#allocation34_spill] sm:$0xff] }
 0x3ae   :  { %21820 = vst [vmem:[#allocation66_spill] sm:$0xff] %v17826_v16  ;;  %v17847_v16 = vmul.f32 %v17553_v41, %v21828_v14  ;;  %v21839_v14 = vld [vmem:[#allocation59_spill] sm:$0xff]  ;;  %v18005_v5 = vadd.f32 %v17564_v4, %v17715_v1  ;;  %v18009_v2 = vadd.f32 %v17564_v4, %v17718_v18  ;;  %v18025_v1 = vadd.f32 %v17564_v4, %v17730_v23 }
 0x3af   :  { %21823 = vst [vmem:[#allocation40_spill] sm:$0xff] %v17832_v28  ;;  %v17838_v40 = vmul.f32 %v17553_v41, %v21825_v21  ;;  %v17853_v28 = vmul.f32 %v17553_v41, %v21831_v36  ;;  %v21834_v21 = vsub.f32 %v21833_v6, %v17418_v8  ;;  %v21841_v36 = vld [vmem:[#allocation35_spill] sm:$0xff]  ;;  %v18029_v18 = vadd.f32 %v17564_v4, %v17733_v53 }
 0x3b0   :  { %21829 = vst [vmem:[#allocation65_spill] sm:$0xff] %v17847_v16  ;;  %v21840_v16 = vsub.f32 %v21839_v14, %v17418_v8  ;;  %v18044_v23 = vadd.f32 %v17564_v4, %v17748_v0  ;;  %v18048_v53 = vadd.f32 %v17564_v4, %v17751_v22  ;;  %v18064_v0 = vadd.f32 %v17564_v4, %v17763_v27 }
 0x3b1   :  { %21826 = vst [vmem:[#allocation39_spill] sm:$0xff] %v17838_v40  ;;  %21832 = vst [vmem:[#allocation68_spill] sm:$0xff] %v17853_v28  ;;  %v17859_v42 = vmul.f32 %v17553_v41, %v21834_v21  ;;  %v21836_v40 = vld [vmem:[#allocation62_spill] sm:$0xff]  ;;  %v21842_v28 = vsub.f32 %v21841_v36, %v17418_v8  ;;  %v21844_v21 = vld [vmem:[#allocation36_spill] sm:$0xff]  ;;  %v18068_v22 = vadd.f32 %v17564_v4, %v17769_v38 }
 0x3b2   :  { %v21837_v31 = vsub.f32 %v21836_v40, %v17418_v8  ;;  %v17871_v47 = vmul.f32 %v17553_v41, %v21840_v16  ;;  %v10760_v16 = vld [vmem:[%s21318_s4 + $0x110] sm:$0xff]  ;;  %v18083_v27 = vadd.f32 %v17564_v4, %v17778_v55  ;;  %v18087_v38 = vadd.f32 %v17564_v4, %v17781_v51 }
 0x3b3   :  { %21835 = vst [vmem:[#allocation42_spill] sm:$0xff] %v17859_v42  ;;  %v17877_v6 = vmul.f32 %v17553_v41, %v21842_v28  ;;  %v21845_v42 = vsub.f32 %v21844_v21, %v17418_v8  ;;  %v21849_v36 = vld [vmem:[#allocation61_spill] sm:$0xff]  ;;  %v21851_v21 = vld [vmem:[#allocation92_spill] sm:$0xff]  ;;  %13745 = vmatprep.subr.mxu1 %v10760_v16  ;;  %v18102_v55 = vadd.f32 %v17564_v4, %v17790_v39 }
 0x3b4   :  { %v17865_v43 = vmul.f32 %v17553_v41, %v21837_v31  ;;  %v21847_v31 = vld [vmem:[#allocation64_spill] sm:$0xff]  ;;  %v21850_v28 = vsub.f32 %v21849_v36, %v17418_v8  ;;  %v17919_v36 = vadd.f32 %v17564_v4, %v17597_v11  ;;  %v17939_v11 = vadd.f32 %v17564_v4, %v17628_v54  ;;  %13746 = vmatpush3.msra.mxu1 %v10760_v16 }
 0x3b5   :  { %21843 = vst [vmem:[#allocation67_spill] sm:$0xff] %v17877_v6  ;;  %v17883_v40 = vmul.f32 %v17553_v41, %v21845_v42  ;;  %v21852_v42 = vsub.f32 %v21851_v21, %v17418_v8  ;;  %v17959_v54 = vadd.f32 %v17564_v4, %v17658_v25  ;;  %v17978_v25 = vadd.f32 %v17564_v4, %v17682_v37  ;;  %v10781_v21 = vld [vmem:[%s21318_s4 + $0x1b8] sm:$0xff] }
 0x3b6   :  { %21838 = vst [vmem:[#allocation41_spill] sm:$0xff] %v17865_v43  ;;  %v21848_v43 = vsub.f32 %v21847_v31, %v17418_v8  ;;  %v17898_v6 = vmul.f32 %v17553_v41, %v21850_v28  ;;  %v10785_v31 = vld [vmem:[%s21318_s4 + $0x1d8] sm:$0xff]  ;;  %v17923_v8 = vadd.f32 %v17564_v4, %v17603_v9  ;;  %v17943_v9 = vadd.f32 %v17564_v4, %v17634_v20 }
 0x3b7   :  { %21846 = vst [vmem:[#allocation70_spill] sm:$0xff] %v17883_v40  ;;  %v17904_v40 = vmul.f32 %v17553_v41, %v21852_v42  ;;  %v17963_v20 = vadd.f32 %v17564_v4, %v17664_v58  ;;  %13855 = vmatprep.subr.mxu0 %v10785_v31  ;;  %v17982_v58 = vadd.f32 %v17564_v4, %v17688_v60  ;;  %v10783_v60 = vld [vmem:[%s21318_s4 + $0x1c8] sm:$0xff] }
 0x3b8   :  { %v17889_v14 = vmul.f32 %v17553_v41, %v21848_v43  ;;  %v17908_v43 = vadd.f32 %v17564_v4, %v17585_v33  ;;  %v17927_v41 = vadd.f32 %v17564_v4, %v17609_v15  ;;  %v17935_v33 = vadd.f32 %v17564_v4, %v17621_v13  ;;  %13856 = vmatpush3.msra.mxu0 %v10785_v31  ;;  %v21855_v31 = vld [vmem:[#allocation37_spill] sm:$0xff] }
 0x3b9   :  { %v17947_v15 = vadd.f32 %v17564_v4, %v17640_v12  ;;  %v17955_v13 = vadd.f32 %v17564_v4, %v17652_v49  ;;  %v10784_v12 = vld [vmem:[%s21318_s4 + $0x1d0] sm:$0xff]  ;;  %v17974_v49 = vadd.f32 %v17564_v4, %v17676_v61  ;;  %v17994_v61 = vadd.f32 %v17564_v4, %v17706_v26 }
 0x3ba   :  { %v17998_v37 = vadd.f32 %v17564_v4, %v17712_v44  ;;  %v18013_v26 = vadd.f32 %v17564_v4, %v17721_v50  ;;  %v18017_v44 = vadd.f32 %v17564_v4, %v17724_v32  ;;  %13857 = vmatprep.subr.mxu0 %v10784_v12  ;;  %v18021_v16 = vadd.f32 %v17564_v4, %v17727_v29  ;;  %v10782_v32 = vld [vmem:[%s21318_s4 + $0x1c0] sm:$0xff] }
 0x3bb   :  { %v18033_v50 = vadd.f32 %v17564_v4, %v17742_v17  ;;  %13858 = vmatpush3.msra.mxu0 %v10784_v12  ;;  %v18040_v29 = vadd.f32 %v17564_v4, %v17745_v3  ;;  %v18052_v17 = vadd.f32 %v17564_v4, %v17754_v24  ;;  %v18056_v28 = vadd.f32 %v17564_v4, %v17757_v19  ;;  %v10759_v24 = vld [vmem:[%s21318_s4 + $0x108] sm:$0xff]  ;;  %v21857_v12 = vld [vmem:[#allocation63_spill] sm:$0xff] }
 0x3bc   :  { %13859 = vmatprep.subr.mxu0 %v10783_v60  ;;  %v18060_v3 = vadd.f32 %v17564_v4, %v17760_v45  ;;  %v18075_v19 = vadd.f32 %v17564_v4, %v17772_v30  ;;  %v18079_v45 = vadd.f32 %v17564_v4, %v17775_v35  ;;  %v18094_v30 = vadd.f32 %v17564_v4, %v17784_v56 }
 0x3bd   :  { %13860 = vmatpush3.msra.mxu0 %v10783_v60  ;;  %v18098_v35 = vadd.f32 %v17564_v4, %v17787_v7  ;;  %v18106_v51 = vadd.f32 %v17564_v4, %v17796_v63  ;;  %v18110_v42 = vadd.f32 %v17564_v4, %v17802_v48  ;;  %v18114_v56 = vadd.f32 %v17564_v4, %v17808_v62  ;;  %v21859_v63 = vld [vmem:[#allocation66_spill] sm:$0xff] }
 0x3be   :  { %13861 = vmatprep.subr.mxu0 %v10782_v32  ;;  %v18118_v7 = vadd.f32 %v17564_v4, %v21855_v31  ;;  %v18122_v39 = vadd.f32 %v17564_v4, %v21857_v12  ;;  %13747 = vmatprep.subr.mxu1 %v10759_v24  ;;  %v18126_v60 = vadd.f32 %v17564_v4, %v21859_v63  ;;  %v10780_v12 = vld [vmem:[%s21318_s4 + $0x1b0] sm:$0xff] }
 0x3bf   :  { %13862 = vmatpush3.msra.mxu0 %v10782_v32  ;;  %21853 = vst [vmem:[#allocation44_spill] sm:$0xff] %v18110_v42  ;;  %21854 = vst [vmem:[#allocation43_spill] sm:$0xff] %v18114_v56  ;;  %v21861_v32 = vld [vmem:[#allocation40_spill] sm:$0xff]  ;;  %v21863_v42 = vld [vmem:[#allocation39_spill] sm:$0xff]  ;;  %13748 = vmatpush3.msra.mxu1 %v10759_v24 }
 0x3c0   :  { %21856 = vst [vmem:[#allocation69_spill] sm:$0xff] %v18118_v7  ;;  %21858 = vst [vmem:[#allocation72_spill] sm:$0xff] %v18122_v39  ;;  %v18130_v48 = vadd.f32 %v17564_v4, %v21861_v32  ;;  %v18134_v62 = vadd.f32 %v17564_v4, %v21863_v42  ;;  %v21865_v56 = vld [vmem:[#allocation65_spill] sm:$0xff]  ;;  %13863 = vmatprep.subr.mxu0 %v10781_v21  ;;  %v21867_v39 = vld [vmem:[#allocation68_spill] sm:$0xff] }
 0x3c1   :  { %21860 = vst [vmem:[#allocation46_spill] sm:$0xff] %v18126_v60  ;;  %v18138_v31 = vadd.f32 %v17564_v4, %v21865_v56  ;;  %v18145_v63 = vadd.f32 %v17564_v4, %v21867_v39  ;;  %v21868_v60 = vld [vmem:[#allocation42_spill] sm:$0xff]  ;;  %v18157_v56 = vadd.f32 %v17564_v4, %v17871_v47  ;;  %13864 = vmatpush3.msra.mxu0 %v10781_v21  ;;  %v10779_v47 = vld [vmem:[%s21318_s4 + $0x1a8] sm:$0xff]  ;;  %v10758_v24 = vld [vmem:[%s21318_s4 + $0x100] sm:$0xff]  ;;  %v21378_v21 = vmax.f32 %v17923_v8, 0.0 }
 0x3c2   :  { %21862 = vst [vmem:[#allocation45_spill] sm:$0xff] %v18130_v48  ;;  %21864 = vst [vmem:[#allocation71_spill] sm:$0xff] %v18134_v62  ;;  %v18149_v32 = vadd.f32 %v17564_v4, %v21868_v60  ;;  %v21869_v48 = vld [vmem:[#allocation41_spill] sm:$0xff]  ;;  %v21871_v7 = vld [vmem:[#allocation70_spill] sm:$0xff]  ;;  %v18169_v60 = vadd.f32 %v17564_v4, %v17889_v14  ;;  %v5297_v14 = vmax.f32 %v17908_v43, 0.0  ;;  %13865 = vmatprep.subr.mxu0 %v10780_v12  ;;  %13749 = vmatprep.subr.mxu1 %v10758_v24 }
 0x3c3   :  { %21866 = vst [vmem:[#allocation74_spill] sm:$0xff] %v18138_v31  ;;  %v18153_v42 = vadd.f32 %v17564_v4, %v21869_v48  ;;  %v21870_v31 = vld [vmem:[#allocation67_spill] sm:$0xff]  ;;  %v18165_v39 = vadd.f32 %v17564_v4, %v21871_v7  ;;  %v18173_v48 = vadd.f32 %v17564_v4, %v17898_v6  ;;  %v18183_v7 = vadd.f32 %v17564_v4, %v17904_v40 }
 0x3c4   :  { %v18161_v62 = vadd.f32 %v17564_v4, %v21870_v31  ;;  %21873 = vst [vmem:[#allocation4_spill] sm:$0xff] %v18169_v60  ;;  %v5298_v31 = vmax.f32 %v17912_v34, 0.0  ;;  %v5299_v6 = vmax.f32 %v17919_v36, 0.0  ;;  %13866 = vmatpush3.msra.mxu0 %v10780_v12  ;;  %v10778_v4 = vld [vmem:[%s21318_s4 + $0x1a0] sm:$0xff]  ;;  %13750 = vmatpush3.msra.mxu1 %v10758_v24  ;;  %v21382_v40 = vmax.f32 %v17939_v11, 0.0  ;;  %5361 = vst [vmem:[#allocation2 + $0x19] sm:$0xff] %v5297_v14 }
 0x3c5   :  { %21872 = vst [vmem:[#allocation5_spill] sm:$0xff] %v18165_v39  ;;  %21874 = vst [vmem:[#allocation73_spill] sm:$0xff] %v18173_v48  ;;  %v21379_v48 = vmax.f32 %v17927_v41, 0.0  ;;  %v21380_v43 = vmax.f32 %v17943_v9, 0.0  ;;  %v21381_v34 = vmax.f32 %v17947_v15, 0.0  ;;  %13498 = vmatprep.mubr.f32.mxu1 %v5297_v14  ;;  %13867 = vmatprep.subr.mxu0 %v10779_v47  ;;  %v21383_v12 = vmax.f32 %v17955_v13, 0.0 }
 0x3c6   :  { %5362 = vst [vmem:[#allocation2 + $0x21] sm:$0xff] %v5298_v31  ;;  %5363 = vst [vmem:[#allocation2 + $0x31] sm:$0xff] %v5299_v6  ;;  %v21875_v36 = vmax.f32 %v17931_v10, 0.0  ;;  %v21876_v14 = vmax.f32 %v17935_v33, 0.0  ;;  %13499 = vmatmul.mubr.f32.gmra.mxu1 %v5298_v31  ;;  %13868 = vmatpush3.msra.mxu0 %v10779_v47  ;;  %v10777_v60 = vld [vmem:[%s21318_s4 + $0x198] sm:$0xff]  ;;  %v21388_v24 = vmax.f32 %v17974_v49, 0.0 }
 0x3c7   :  { %5364 = vst [vmem:[#allocation2 + $0x39] sm:$0xff] %v21378_v21  ;;  %5365 = vst [vmem:[#allocation2 + $0x49] sm:$0xff] %v21379_v48  ;;  %v21385_v39 = vmax.f32 %v17978_v25, 0.0  ;;  %v21384_v21 = vmax.f32 %v17982_v58, 0.0  ;;  %v21877_v47 = vmax.f32 %v17951_v57, 0.0  ;;  %13501 = vmatprep.mubr.f32.mxu1 %v5299_v6  ;;  %13869 = vmatprep.subr.mxu0 %v10778_v4  ;;  %v21386_v31 = vmax.f32 %v17990_v46, 0.0 }
 0x3c8   :  { %5366 = vst [vmem:[#allocation2 + $0x51] sm:$0xff] %v21875_v36  ;;  %5367 = vst [vmem:[#allocation2 + $0x61] sm:$0xff] %v21876_v14  ;;  %v21387_v36 = vmax.f32 %v17994_v61, 0.0  ;;  %v21880_v6 = vmax.f32 %v17970_v59, 0.0  ;;  %13870 = vmatpush3.msra.mxu0 %v10778_v4  ;;  %v21392_v48 = vmax.f32 %v18013_v26, 0.0  ;;  %v21881_v4 = vmax.f32 %v17986_v52, 0.0 }
 0x3c9   :  { %5368 = vst [vmem:[#allocation2 + $0x69] sm:$0xff] %v21382_v40  ;;  %5369 = vst [vmem:[#allocation2 + $0x79] sm:$0xff] %v21380_v43  ;;  %v21878_v43 = vmax.f32 %v17959_v54, 0.0  ;;  %v21389_v40 = vmax.f32 %v18009_v2, 0.0  ;;  %13871 = vmatprep.subr.mxu0 %v10777_v60  ;;  %v5327_v14 = vmax.f32 %v18040_v29, 0.0  ;;  %v18270_v29 = vld [vmem:[%s21318_s4 + $0x188] sm:$0xff] }
 0x3ca   :  { %5370 = vst [vmem:[#allocation2 + $0x81] sm:$0xff] %v21381_v34  ;;  %5371 = vst [vmem:[#allocation2 + $0x91] sm:$0xff] %v21877_v47  ;;  %v21879_v34 = vmax.f32 %v17963_v20, 0.0  ;;  %v10776_v47 = vld [vmem:[%s21318_s4 + $0x190] sm:$0xff]  ;;  %13872 = vmatpush3.msra.mxu0 %v10777_v60  ;;  %v21396_v60 = vmax.f32 %v18060_v3, 0.0 }
 0x3cb   :  { %5372 = vst [vmem:[#allocation2 + $0x99] sm:$0xff] %v21383_v12  ;;  %5373 = vst [vmem:[#allocation2 + $0xa9] sm:$0xff] %v21878_v43  ;;  %v21390_v12 = vmax.f32 %v18017_v44, 0.0  ;;  %v21391_v43 = vmax.f32 %v18025_v1, 0.0  ;;  %13873 = vmatprep.subr.mxu0 %v10776_v47 }
 0x3cc   :  { %5374 = vst [vmem:[#allocation2 + $0xb1] sm:$0xff] %v21879_v34  ;;  %5375 = vst [vmem:[#allocation2 + $0xc1] sm:$0xff] %v21880_v6  ;;  %v21394_v34 = vmax.f32 %v18029_v18, 0.0  ;;  %v21393_v6 = vmax.f32 %v18033_v50, 0.0  ;;  %13874 = vmatpush3.msra.mxu0 %v10776_v47  ;;  %v21897_v47 = vld [vmem:[#allocation46_spill] sm:$0xff] }
 0x3cd   :  { %5376 = vst [vmem:[#allocation2 + $0xc9] sm:$0xff] %v21388_v24  ;;  %5377 = vst [vmem:[#allocation2 + $0xd9] sm:$0xff] %v21385_v39  ;;  %v21884_v39 = vmax.f32 %v17923_v8, 0.0  ;;  %v21398_v24 = vmax.f32 %v18064_v0, 0.0  ;;  %v21399_v8 = vmax.f32 %v18068_v22, 0.0  ;;  %13875 = vmatprep.subr.mxu0 %v18270_v29 }
 0x3ce   :  { %5378 = vst [vmem:[#allocation2 + $0xe1] sm:$0xff] %v21384_v21  ;;  %5379 = vst [vmem:[#allocation2 + $0xf1] sm:$0xff] %v21881_v4  ;;  %v21882_v21 = vmax.f32 %v17998_v37, 0.0  ;;  %v21883_v4 = vmax.f32 %v18005_v5, 0.0  ;;  %13876 = vmatpush3.msra.mxu0 %v18270_v29  ;;  %v18378_v29 = vld [vmem:[#allocation2 + $0x38] sm:$0xff] }
 0x3cf   :  { %5380 = vst [vmem:[#allocation2 + $0xf9] sm:$0xff] %v21386_v31  ;;  %5381 = vst [vmem:[#allocation2 + $0x109] sm:$0xff] %v21387_v36  ;;  %13502 = vmatmul.mubr.f32.gmra.mxu1 %v21884_v39  ;;  %v18275_v31 = vld [vmem:[%s21318_s4 + $0x278] sm:$0xff]  ;;  %v5328_v36 = vmax.f32 %v18044_v23, 0.0  ;;  %v21886_v39 = vmax.f32 %v18021_v16, 0.0  ;;  %v21887_v23 = vmax.f32 %v17927_v41, 0.0 }
 0x3d0   :  { %5382 = vst [vmem:[#allocation2 + $0x111] sm:$0xff] %v21882_v21  ;;  %5383 = vst [vmem:[#allocation2 + $0x121] sm:$0xff] %v21883_v4  ;;  %v21397_v21 = vmax.f32 %v18048_v53, 0.0  ;;  %v21395_v4 = vmax.f32 %v18052_v17, 0.0  ;;  %v18301_v41 = vld [vmem:[#allocation2 + $0x18] sm:$0xff]  ;;  %13975 = vmatprep.subr.mxu1 %v18275_v31 }
 0x3d1   :  { %21885 = vst [vmem:[#allocation76_spill] sm:$0xff] %v18275_v31  ;;  %5384 = vst [vmem:[#allocation2 + $0x129] sm:$0xff] %v21389_v40  ;;  %13504 = vmatprep.mubr.f32.mxu1 %v21887_v23  ;;  %v21400_v40 = vmax.f32 %v18075_v19, 0.0  ;;  %v21402_v23 = vmax.f32 %v18079_v45, 0.0  ;;  %13626 = vmatprep.mubr.f32.mxu0 %v18301_v41 }
 0x3d2   :  { %5385 = vst [vmem:[#allocation2 + $0x139] sm:$0xff] %v21392_v48  ;;  %5386 = vst [vmem:[#allocation2 + $0x141] sm:$0xff] %v21390_v12  ;;  %v21404_v12 = vmax.f32 %v18083_v27, 0.0  ;;  %v21914_v48 = vld [vmem:[#allocation73_spill] sm:$0xff] }
 0x3d3   :  { %5387 = vst [vmem:[#allocation2 + $0x151] sm:$0xff] %v21886_v39  ;;  %5388 = vst [vmem:[#allocation2 + $0x159] sm:$0xff] %v21391_v43  ;;  %v18303_v39 = vld [vmem:[#allocation2 + $0x20] sm:$0xff] }
 0x3d4   :  { %5389 = vst [vmem:[#allocation2 + $0x169] sm:$0xff] %v21394_v34  ;;  %5390 = vst [vmem:[#allocation2 + $0x171] sm:$0xff] %v21393_v6  ;;  %13627 = vmatmul.mubr.f32.gmra.mxu0 %v18303_v39  ;;  %v21896_v6 = vld [vmem:[#allocation72_spill] sm:$0xff]  ;;  %v21902_v43 = vld [vmem:[#allocation71_spill] sm:$0xff] }
 0x3d5   :  { %5391 = vst [vmem:[#allocation2 + $0x181] sm:$0xff] %v5327_v14  ;;  %21888 = vst [vmem:[#allocation7_spill] sm:$0xff] %v18301_v41  ;;  %v21890_v14 = vmax.f32 %v18056_v28, 0.0  ;;  %v21913_v41 = vld [vmem:[#allocation4_spill] sm:$0xff] }
 0x3d6   :  { %21889 = vst [vmem:[#allocation6_spill] sm:$0xff] %v18303_v39  ;;  %5392 = vst [vmem:[#allocation2 + $0x189] sm:$0xff] %v5328_v36  ;;  %v21891_v36 = vld [vmem:[#allocation44_spill] sm:$0xff]  ;;  %v21903_v39 = vld [vmem:[#allocation74_spill] sm:$0xff]  ;;  %v21407_v34 = vmax.f32 %v21913_v41, 0.0 }
 0x3d7   :  { %5393 = vst [vmem:[#allocation2 + $0x1c9] sm:$0xff] %v21397_v21  ;;  %5394 = vst [vmem:[#allocation2 + $0x1d1] sm:$0xff] %v21395_v4  ;;  %v21893_v4 = vmax.f32 %v17931_v10, 0.0  ;;  %v21894_v21 = vld [vmem:[#allocation43_spill] sm:$0xff]  ;;  %v21898_v10 = vmax.f32 %v18087_v38, 0.0 }
 0x3d8   :  { %5395 = vst [vmem:[#allocation2 + $0x1e1] sm:$0xff] %v21890_v14  ;;  %5396 = vst [vmem:[#allocation2 + $0x1e9] sm:$0xff] %v21396_v60  ;;  %v18331_v14 = vld [vmem:[#allocation2 + $0x30] sm:$0xff]  ;;  %v10774_v60 = vld [vmem:[%s21318_s4 + $0x180] sm:$0xff] }
 0x3d9   :  { %5397 = vst [vmem:[#allocation2 + $0x1f9] sm:$0xff] %v21398_v24  ;;  %5398 = vst [vmem:[#allocation2 + $0x201] sm:$0xff] %v21399_v8  ;;  %13505 = vmatmul.mubr.f32.gmra.mxu1 %v21893_v4  ;;  %v21895_v24 = vld [vmem:[#allocation69_spill] sm:$0xff]  ;;  %v21899_v4 = vmax.f32 %v18094_v30, 0.0  ;;  %13629 = vmatprep.mubr.f32.mxu0 %v18331_v14 }
 0x3da   :  { %5399 = vst [vmem:[#allocation2 + $0x211] sm:$0xff] %v21400_v40  ;;  %21892 = vst [vmem:[#allocation75_spill] sm:$0xff] %v18331_v14  ;;  %v21900_v40 = vmax.f32 %v17935_v33, 0.0  ;;  %v21901_v8 = vld [vmem:[#allocation45_spill] sm:$0xff]  ;;  %v21907_v33 = vmax.f32 %v21891_v36, 0.0  ;;  %13877 = vmatprep.subr.mxu0 %v10774_v60  ;;  %13630 = vmatmul.mubr.f32.gmra.mxu0 %v18378_v29  ;;  %v21919_v14 = vmax.f32 %v17939_v11, 0.0 }
 0x3db   :  { %5400 = vst [vmem:[#allocation2 + $0x219] sm:$0xff] %v21402_v23  ;;  %5401 = vst [vmem:[#allocation2 + $0x229] sm:$0xff] %v21404_v12  ;;  %v21904_v12 = vmax.f32 %v18098_v35, 0.0  ;;  %v21912_v23 = vld [vmem:[#allocation5_spill] sm:$0xff]  ;;  %v21915_v31 = vmax.f32 %v21901_v8, 0.0  ;;  %13878 = vmatpush3.msra.mxu0 %v10774_v60  ;;  %v21929_v60 = vmax.f32 %v17955_v13, 0.0 }
 0x3dc   :  { %5402 = vst [vmem:[#allocation2 + $0x231] sm:$0xff] %v21898_v10  ;;  %5403 = vst [vmem:[#allocation2 + $0x241] sm:$0xff] %v21899_v4  ;;  %13507 = vmatprep.mubr.f32.mxu1 %v21900_v40  ;;  %v21905_v10 = vmax.f32 %v18102_v55, 0.0  ;;  %v21906_v4 = vmax.f32 %v18106_v51, 0.0  ;;  %v18393_v40 = vld [vmem:[#allocation2 + $0x48] sm:$0xff]  ;;  %v21925_v11 = vmax.f32 %v21912_v23, 0.0 }
 0x3dd   :  { %5404 = vst [vmem:[#allocation2 + $0x249] sm:$0xff] %v21904_v12  ;;  %5407 = vst [vmem:[#allocation2 + $0x271] sm:$0xff] %v21907_v33  ;;  %v21908_v12 = vmax.f32 %v21894_v21, 0.0  ;;  %v21911_v33 = vmax.f32 %v21897_v47, 0.0  ;;  %13508 = vmatmul.mubr.f32.gmra.mxu1 %v21919_v14  ;;  %13632 = vmatprep.mubr.f32.mxu0 %v18393_v40  ;;  %v21926_v14 = vmax.f32 %v21914_v48, 0.0  ;;  %v18444_v13 = vld [vmem:[#allocation2 + $0x98] sm:$0xff] }
 0x3de   :  { %5405 = vst [vmem:[#allocation2 + $0x259] sm:$0xff] %v21905_v10  ;;  %5406 = vst [vmem:[#allocation2 + $0x261] sm:$0xff] %v21906_v4  ;;  %v21909_v10 = vmax.f32 %v21895_v24, 0.0  ;;  %v21910_v4 = vmax.f32 %v21896_v6, 0.0 }
 0x3df   :  { %5408 = vst [vmem:[#allocation2 + $0x279] sm:$0xff] %v21908_v12  ;;  %5411 = vst [vmem:[#allocation2 + $0x2a1] sm:$0xff] %v21911_v33  ;;  %v5360_v12 = vmax.f32 %v18183_v7, 0.0  ;;  %v21918_v33 = vmax.f32 %v18145_v63, 0.0  ;;  %v21920_v7 = vmax.f32 %v18149_v32, 0.0 }
 0x3e0   :  { %5409 = vst [vmem:[#allocation2 + $0x289] sm:$0xff] %v21909_v10  ;;  %5410 = vst [vmem:[#allocation2 + $0x291] sm:$0xff] %v21910_v4  ;;  %v21916_v10 = vmax.f32 %v21902_v43, 0.0  ;;  %v21917_v4 = vmax.f32 %v21903_v39, 0.0 }
 0x3e1   :  { %5412 = vst [vmem:[#allocation2 + $0x2a9] sm:$0xff] %v21915_v31  ;;  %5415 = vst [vmem:[#allocation2 + $0x2d1] sm:$0xff] %v21918_v33  ;;  %v21921_v31 = vmax.f32 %v18153_v42, 0.0  ;;  %v21924_v33 = vmax.f32 %v17943_v9, 0.0  ;;  %v21927_v9 = vmax.f32 %v17947_v15, 0.0  ;;  %v18434_v15 = vld [vmem:[#allocation2 + $0x80] sm:$0xff] }
 0x3e2   :  { %5413 = vst [vmem:[#allocation2 + $0x2b9] sm:$0xff] %v21916_v10  ;;  %5414 = vst [vmem:[#allocation2 + $0x2c1] sm:$0xff] %v21917_v4  ;;  %v21922_v10 = vmax.f32 %v18157_v56, 0.0  ;;  %v21923_v4 = vmax.f32 %v18161_v62, 0.0 }
 0x3e3   :  { %5416 = vst [vmem:[#allocation2 + $0x2d9] sm:$0xff] %v21920_v7  ;;  %5417 = vst [vmem:[#allocation2 + $0x2e9] sm:$0xff] %v21921_v31  ;;  %13510 = vmatprep.mubr.f32.mxu1 %v21924_v33  ;;  %v18414_v7 = vld [vmem:[#allocation2 + $0x50] sm:$0xff]  ;;  %v18417_v31 = vld [vmem:[#allocation2 + $0x60] sm:$0xff]  ;;  %v21930_v33 = vmax.f32 %v17959_v54, 0.0 }
 0x3e4   :  { %5418 = vst [vmem:[#allocation2 + $0x2f1] sm:$0xff] %v21922_v10  ;;  %5419 = vst [vmem:[#allocation2 + $0x301] sm:$0xff] %v21923_v4  ;;  %13633 = vmatmul.mubr.f32.gmra.mxu0 %v18414_v7  ;;  %13511 = vmatmul.mubr.f32.gmra.mxu1 %v21927_v9  ;;  %v21928_v10 = vmax.f32 %v17951_v57, 0.0  ;;  %v18424_v4 = vld [vmem:[#allocation2 + $0x68] sm:$0xff]  ;;  %v18437_v57 = vld [vmem:[#allocation2 + $0x90] sm:$0xff]  ;;  %v21933_v9 = vmax.f32 %v17974_v49, 0.0 }
 0x3e5   :  { %5420 = vst [vmem:[#allocation2 + $0x309] sm:$0xff] %v21925_v11  ;;  %5421 = vst [vmem:[#allocation2 + $0x319] sm:$0xff] %v21407_v34  ;;  %13635 = vmatprep.mubr.f32.mxu0 %v18417_v31  ;;  %v21931_v11 = vmax.f32 %v17963_v20, 0.0  ;;  %v18447_v54 = vld [vmem:[#allocation2 + $0xa8] sm:$0xff]  ;;  %v18454_v20 = vld [vmem:[#allocation2 + $0xb0] sm:$0xff]  ;;  %v21951_v34 = vmax.f32 %v18060_v3, 0.0 }
 0x3e6   :  { %5422 = vst [vmem:[#allocation2 + $0x321] sm:$0xff] %v21926_v14  ;;  %5424 = vst [vmem:[#allocation2 + $0x339] sm:$0xff] %v5360_v12  ;;  %13513 = vmatprep.mubr.f32.mxu1 %v21928_v10  ;;  %v18427_v12 = vld [vmem:[#allocation2 + $0x78] sm:$0xff]  ;;  %v21932_v14 = vmax.f32 %v17970_v59, 0.0  ;;  %v21934_v10 = vmax.f32 %v17978_v25, 0.0  ;;  %v18457_v59 = vld [vmem:[#allocation2 + $0xc0] sm:$0xff] }
 0x3e7   :  { %v18464_v49 = vld [vmem:[#allocation2 + $0xc8] sm:$0xff]  ;;  %v18467_v25 = vld [vmem:[#allocation2 + $0xd8] sm:$0xff] }
 0x3e8   :  { %13636 = vmatmul.mubr.f32.gmra.mxu0 %v18424_v4  ;;  %13514 = vmatmul.mubr.f32.gmra.mxu1 %v21929_v60  ;;  %v21935_v60 = vmax.f32 %v17982_v58, 0.0  ;;  %v18474_v58 = vld [vmem:[#allocation2 + $0xe0] sm:$0xff]  ;;  %v18554_v3 = vld [vmem:[#allocation2 + $0x1e8] sm:$0xff] }
 0x3e9   :  { %13638 = vmatprep.mubr.f32.mxu0 %v18427_v12  ;;  %13516 = vmatprep.mubr.f32.mxu1 %v21930_v33  ;;  %v21936_v33 = vmax.f32 %v17986_v52, 0.0  ;;  %v18477_v52 = vld [vmem:[#allocation2 + $0xf0] sm:$0xff] }
 0x3ec   :  { %13639 = vmatmul.mubr.f32.gmra.mxu0 %v18434_v15  ;;  %13517 = vmatmul.mubr.f32.gmra.mxu1 %v21931_v11  ;;  %v21937_v11 = vmax.f32 %v17990_v46, 0.0  ;;  %v18484_v46 = vld [vmem:[#allocation2 + $0xf8] sm:$0xff] }
 0x3ed   :  { %13641 = vmatprep.mubr.f32.mxu0 %v18437_v57  ;;  %13519 = vmatprep.mubr.f32.mxu1 %v21932_v14  ;;  %v21938_v14 = vmax.f32 %v17994_v61, 0.0  ;;  %v18487_v61 = vld [vmem:[#allocation2 + $0x108] sm:$0xff] }
 0x3f0   :  { %13642 = vmatmul.mubr.f32.gmra.mxu0 %v18444_v13  ;;  %13520 = vmatmul.mubr.f32.gmra.mxu1 %v21933_v9  ;;  %v21939_v9 = vmax.f32 %v17998_v37, 0.0  ;;  %v18494_v37 = vld [vmem:[#allocation2 + $0x110] sm:$0xff] }
 0x3f1   :  { %13644 = vmatprep.mubr.f32.mxu0 %v18447_v54  ;;  %13522 = vmatprep.mubr.f32.mxu1 %v21934_v10  ;;  %v21940_v10 = vmax.f32 %v18005_v5, 0.0  ;;  %v18497_v5 = vld [vmem:[#allocation2 + $0x120] sm:$0xff] }
 0x3f4   :  { %13645 = vmatmul.mubr.f32.gmra.mxu0 %v18454_v20  ;;  %13523 = vmatmul.mubr.f32.gmra.mxu1 %v21935_v60  ;;  %v21941_v60 = vmax.f32 %v18009_v2, 0.0  ;;  %v18504_v2 = vld [vmem:[#allocation2 + $0x128] sm:$0xff] }
 0x3f5   :  { %13647 = vmatprep.mubr.f32.mxu0 %v18457_v59  ;;  %13525 = vmatprep.mubr.f32.mxu1 %v21936_v33  ;;  %v21942_v33 = vmax.f32 %v18013_v26, 0.0  ;;  %v18507_v26 = vld [vmem:[#allocation2 + $0x138] sm:$0xff] }
 0x3f8   :  { %13648 = vmatmul.mubr.f32.gmra.mxu0 %v18464_v49  ;;  %13526 = vmatmul.mubr.f32.gmra.mxu1 %v21937_v11  ;;  %v21943_v11 = vmax.f32 %v18017_v44, 0.0  ;;  %v5537_v44 = vld [vmem:[#allocation2 + $0x1b1] sm:$0xff] }
 0x3f9   :  { %13650 = vmatprep.mubr.f32.mxu0 %v18467_v25  ;;  %13528 = vmatprep.mubr.f32.mxu1 %v21938_v14  ;;  %v21944_v14 = vmax.f32 %v18021_v16, 0.0  ;;  %v18517_v16 = vld [vmem:[#allocation2 + $0x150] sm:$0xff] }
 0x3fc   :  { %13651 = vmatmul.mubr.f32.gmra.mxu0 %v18474_v58  ;;  %13529 = vmatmul.mubr.f32.gmra.mxu1 %v21939_v9  ;;  %v21945_v9 = vmax.f32 %v18025_v1, 0.0  ;;  %v5538_v1 = vld [vmem:[#allocation2 + $0x1b9] sm:$0xff] }
 0x3fd   :  { %13653 = vmatprep.mubr.f32.mxu0 %v18477_v52  ;;  %13531 = vmatprep.mubr.f32.mxu1 %v21940_v10  ;;  %v21946_v10 = vmax.f32 %v18029_v18, 0.0  ;;  %v18525_v18 = vld [vmem:[#allocation2 + $0x168] sm:$0xff] }
 0x400   :  { %13654 = vmatmul.mubr.f32.gmra.mxu0 %v18484_v46  ;;  %13532 = vmatmul.mubr.f32.gmra.mxu1 %v21941_v60  ;;  %v18514_v60 = vld [vmem:[#allocation2 + $0x140] sm:$0xff] }
 0x401   :  { %13656 = vmatprep.mubr.f32.mxu0 %v18487_v61  ;;  %13534 = vmatprep.mubr.f32.mxu1 %v21942_v33  ;;  %v21947_v33 = vmax.f32 %v18033_v50, 0.0  ;;  %v21949_v50 = vmax.f32 %v18052_v17, 0.0  ;;  %v18547_v17 = vld [vmem:[#allocation2 + $0x1e0] sm:$0xff] }
 0x404   :  { %13657 = vmatmul.mubr.f32.gmra.mxu0 %v18494_v37  ;;  %13535 = vmatmul.mubr.f32.gmra.mxu1 %v21943_v11  ;;  %v18522_v11 = vld [vmem:[#allocation2 + $0x158] sm:$0xff] }
 0x405   :  { %13659 = vmatprep.mubr.f32.mxu0 %v18497_v5  ;;  %13537 = vmatprep.mubr.f32.mxu1 %v21944_v14  ;;  %v21948_v14 = vmax.f32 %v18048_v53, 0.0  ;;  %v21952_v53 = vmax.f32 %v18064_v0, 0.0  ;;  %v18557_v0 = vld [vmem:[#allocation2 + $0x1f8] sm:$0xff] }
 0x408   :  { %13660 = vmatmul.mubr.f32.gmra.mxu0 %v18504_v2  ;;  %13538 = vmatmul.mubr.f32.gmra.mxu1 %v21945_v9  ;;  %v5457_v9 = vld [vmem:[#allocation2 + $0x1b0] sm:$0xff] }
 0x409   :  { %13662 = vmatprep.mubr.f32.mxu0 %v18507_v26  ;;  %13540 = vmatprep.mubr.f32.mxu1 %v21946_v10  ;;  %v18530_v10 = vld [vmem:[#allocation2 + $0x170] sm:$0xff] }
 0x40c   :  { %13663 = vmatmul.mubr.f32.gmra.mxu0 %v18514_v60  ;;  %13541 = vmatmul.mubr.f32.gmra.mxu1 %v21947_v33  ;;  %v14622_v33 = vld [vmem:[#allocation2 + $0x8] sm:$0xff] }
 0x40d   :  { %13665 = vmatprep.mubr.f32.mxu0 %v18517_v16  ;;  %13543 = vmatprep.mubr.f32.mxu1 %v5537_v44  ;;  %v21950_v44 = vmax.f32 %v18056_v28, 0.0  ;;  %v21953_v28 = vmax.f32 %v18068_v22, 0.0  ;;  %v18564_v22 = vld [vmem:[#allocation2 + $0x200] sm:$0xff] }
 0x410   :  { %13666 = vmatmul.mubr.f32.gmra.mxu0 %v18522_v11  ;;  %13544 = vmatmul.mubr.f32.gmra.mxu1 %v5538_v1  ;;  %v18537_v1 = vld [vmem:[#allocation2 + $0x1c8] sm:$0xff] }
 0x411   :  { %13668 = vmatprep.mubr.f32.mxu0 %v18525_v18  ;;  %13546 = vmatprep.mubr.f32.mxu1 %v21948_v14  ;;  %v18544_v14 = vld [vmem:[#allocation2 + $0x1d0] sm:$0xff] }
 0x414   :  { %13669 = vmatmul.mubr.f32.gmra.mxu0 %v18530_v10  ;;  %13547 = vmatmul.mubr.f32.gmra.mxu1 %v21949_v50  ;;  %v21956_v50 = vmax.f32 %v18083_v27, 0.0  ;;  %v18576_v27 = vld [vmem:[#allocation2 + $0x218] sm:$0xff] }
 0x415   :  { %13671 = vmatprep.mubr.f32.mxu0 %v5457_v9  ;;  %13549 = vmatprep.mubr.f32.mxu1 %v21950_v44  ;;  %v21954_v9 = vmax.f32 %v18075_v19, 0.0  ;;  %v18567_v19 = vld [vmem:[#allocation2 + $0x210] sm:$0xff]  ;;  %v21957_v44 = vmax.f32 %v18087_v38, 0.0  ;;  %v21961_v38 = vmax.f32 %v18102_v55, 0.0  ;;  %v18599_v55 = vld [vmem:[#allocation2 + $0x258] sm:$0xff] }
 0x418   :  { %13672 = vmatmul.mubr.f32.gmra.mxu0 %v14622_v33  ;;  %13550 = vmatmul.mubr.f32.gmra.mxu1 %v21951_v34  ;;  %v21955_v34 = vmax.f32 %v18079_v45, 0.0  ;;  %v13497_v33 = vpop.f32.mrf.mxu1  ;;  %v21958_v45 = vmax.f32 %v18094_v30, 0.0  ;;  %v18589_v30 = vld [vmem:[#allocation2 + $0x240] sm:$0xff] }
 0x419   :  { %13674 = vmatprep.mubr.f32.mxu0 %v18537_v1  ;;  %13552 = vmatprep.mubr.f32.mxu1 %v21952_v53  ;;  %v13625_v53 = vpop.f32.mrf.mxu0 }
 0x41c   :  { %13675 = vmatmul.mubr.f32.gmra.mxu0 %v18544_v14  ;;  %13553 = vmatmul.mubr.f32.gmra.mxu1 %v21953_v28  ;;  %v18574_v28 = vadd.f32 %v13625_v53, %v13497_v33  ;;  %v21963_v33 = vmax.f32 %v21891_v36, 0.0  ;;  %v21964_v53 = vmax.f32 %v21894_v21, 0.0  ;;  %v18609_v36 = vld [vmem:[#allocation2 + $0x270] sm:$0xff]  ;;  %v18616_v21 = vld [vmem:[#allocation2 + $0x278] sm:$0xff] }
 0x41d   :  { %13677 = vmatprep.mubr.f32.mxu0 %v18547_v17  ;;  %13555 = vmatprep.mubr.f32.mxu1 %v21954_v9  ;;  %v18579_v9 = vld [vmem:[#allocation2 + $0x228] sm:$0xff] }
 0x41e   :  { %21959 = vst [vmem:[#allocation78_spill] sm:$0xff] %v18574_v28  ;;  %v10803_v28 = vld [vmem:[%s21318_s4 + $0x268] sm:$0xff] }
 0x420   :  { %13678 = vmatmul.mubr.f32.gmra.mxu0 %v18554_v3  ;;  %13556 = vmatmul.mubr.f32.gmra.mxu1 %v21955_v34  ;;  %v21960_v34 = vmax.f32 %v18098_v35, 0.0  ;;  %v18596_v35 = vld [vmem:[#allocation2 + $0x248] sm:$0xff] }
 0x421   :  { %13680 = vmatprep.mubr.f32.mxu0 %v18557_v0  ;;  %13558 = vmatprep.mubr.f32.mxu1 %v21956_v50  ;;  %v18586_v50 = vld [vmem:[#allocation2 + $0x230] sm:$0xff] }
 0x424   :  { %13681 = vmatmul.mubr.f32.gmra.mxu0 %v18564_v22  ;;  %13559 = vmatmul.mubr.f32.gmra.mxu1 %v21957_v44  ;;  %v21962_v44 = vmax.f32 %v18106_v51, 0.0  ;;  %v18606_v51 = vld [vmem:[#allocation2 + $0x260] sm:$0xff] }
 0x425   :  { %13683 = vmatprep.mubr.f32.mxu0 %v18567_v19  ;;  %13561 = vmatprep.mubr.f32.mxu1 %v21958_v45  ;;  %v21965_v45 = vmax.f32 %v21895_v24, 0.0  ;;  %v18619_v24 = vld [vmem:[#allocation2 + $0x288] sm:$0xff] }
 0x428   :  { %13684 = vmatmul.mubr.f32.gmra.mxu0 %v18576_v27  ;;  %13562 = vmatmul.mubr.f32.gmra.mxu1 %v21960_v34  ;;  %v21966_v34 = vmax.f32 %v21896_v6, 0.0  ;;  %v10821_v6 = vld [vmem:[%s21318_s4 + $0x2f8] sm:$0xff] }
 0x429   :  { %13686 = vmatprep.mubr.f32.mxu0 %v18579_v9  ;;  %13564 = vmatprep.mubr.f32.mxu1 %v21961_v38  ;;  %v21967_v38 = vmax.f32 %v21897_v47, 0.0  ;;  %v18629_v47 = vld [vmem:[#allocation2 + $0x290] sm:$0xff] }
 0x42a   :  { %14103 = vmatprep.subr.mxu0 %v10821_v6 }
 0x42c   :  { %13687 = vmatmul.mubr.f32.gmra.mxu0 %v18586_v50  ;;  %13565 = vmatmul.mubr.f32.gmra.mxu1 %v21962_v44  ;;  %v21968_v44 = vmax.f32 %v21901_v8, 0.0  ;;  %v21971_v8 = vmax.f32 %v18145_v63, 0.0  ;;  %v18652_v63 = vld [vmem:[#allocation2 + $0x2d0] sm:$0xff] }
 0x42d   :  { %13689 = vmatprep.mubr.f32.mxu0 %v18589_v30  ;;  %13567 = vmatprep.mubr.f32.mxu1 %v21963_v33  ;;  %v21969_v33 = vmax.f32 %v21902_v43, 0.0  ;;  %v18639_v43 = vld [vmem:[#allocation2 + $0x2a8] sm:$0xff] }
 0x430   :  { %13690 = vmatmul.mubr.f32.gmra.mxu0 %v18596_v35  ;;  %13568 = vmatmul.mubr.f32.gmra.mxu1 %v21964_v53  ;;  %v18632_v53 = vld [vmem:[#allocation2 + $0x2a0] sm:$0xff] }
 0x431   :  { %13692 = vmatprep.mubr.f32.mxu0 %v18599_v55  ;;  %13570 = vmatprep.mubr.f32.mxu1 %v21965_v45  ;;  %v21970_v45 = vmax.f32 %v21903_v39, 0.0  ;;  %v18649_v39 = vld [vmem:[#allocation2 + $0x2c0] sm:$0xff] }
 0x434   :  { %13693 = vmatmul.mubr.f32.gmra.mxu0 %v18606_v51  ;;  %13571 = vmatmul.mubr.f32.gmra.mxu1 %v21966_v34  ;;  %v18642_v34 = vld [vmem:[#allocation2 + $0x2b8] sm:$0xff] }
 0x435   :  { %13695 = vmatprep.mubr.f32.mxu0 %v18609_v36  ;;  %13573 = vmatprep.mubr.f32.mxu1 %v21967_v38  ;;  %v21972_v38 = vmax.f32 %v18149_v32, 0.0  ;;  %v18659_v32 = vld [vmem:[#allocation2 + $0x2d8] sm:$0xff] }
 0x438   :  { %13696 = vmatmul.mubr.f32.gmra.mxu0 %v18616_v21  ;;  %13574 = vmatmul.mubr.f32.gmra.mxu1 %v21968_v44  ;;  %v21973_v44 = vmax.f32 %v18153_v42, 0.0  ;;  %v18662_v42 = vld [vmem:[#allocation2 + $0x2e8] sm:$0xff] }
 0x439   :  { %13698 = vmatprep.mubr.f32.mxu0 %v18619_v24  ;;  %13576 = vmatprep.mubr.f32.mxu1 %v21969_v33  ;;  %v21974_v33 = vmax.f32 %v18157_v56, 0.0  ;;  %v6356_v56 = vld [vmem:[#allocation2 + $0x2] sm:$0xff] }
 0x43c   :  { %13699 = vmatmul.mubr.f32.gmra.mxu0 %v18629_v47  ;;  %13577 = vmatmul.mubr.f32.gmra.mxu1 %v21970_v45  ;;  %v21975_v45 = vmax.f32 %v18161_v62, 0.0  ;;  %v18672_v62 = vld [vmem:[#allocation2 + $0x300] sm:$0xff] }
 0x43d   :  { %13701 = vmatprep.mubr.f32.mxu0 %v18632_v53  ;;  %13579 = vmatprep.mubr.f32.mxu1 %v21971_v8  ;;  %v21976_v8 = vmax.f32 %v21912_v23, 0.0  ;;  %v6357_v23 = vld [vmem:[#allocation2 + $0xa] sm:$0xff] }
 0x440   :  { %13702 = vmatmul.mubr.f32.gmra.mxu0 %v18639_v43  ;;  %13580 = vmatmul.mubr.f32.gmra.mxu1 %v21972_v38  ;;  %v21977_v38 = vmax.f32 %v21913_v41, 0.0  ;;  %v18680_v41 = vld [vmem:[#allocation2 + $0x318] sm:$0xff] }
 0x441   :  { %13704 = vmatprep.mubr.f32.mxu0 %v18642_v34  ;;  %13582 = vmatprep.mubr.f32.mxu1 %v21973_v44  ;;  %v18669_v44 = vld [vmem:[#allocation2 + $0x2f0] sm:$0xff]  ;;  %21980 = vst [vmem:[#allocation3_spill] sm:$0xff] %v18680_v41 }
 0x444   :  { %13705 = vmatmul.mubr.f32.gmra.mxu0 %v18649_v39  ;;  %13583 = vmatmul.mubr.f32.gmra.mxu1 %v21974_v33  ;;  %v21978_v33 = vmax.f32 %v21914_v48, 0.0  ;;  %v21982_v48 = vld [vmem:[#allocation76_spill] sm:$0xff] }
 0x445   :  { %13707 = vmatprep.mubr.f32.mxu0 %v18652_v63  ;;  %13585 = vmatprep.mubr.f32.mxu1 %v21975_v45  ;;  %v18677_v45 = vld [vmem:[#allocation2 + $0x308] sm:$0xff] }
 0x446   :  { %21979 = vst [vmem:[#allocation8_spill] sm:$0xff] %v18677_v45 }
 0x448   :  { %13708 = vmatmul.mubr.f32.gmra.mxu0 %v18659_v32  ;;  %13586 = vmatmul.mubr.f32.gmra.mxu1 %v21976_v8  ;;  %v18682_v8 = vld [vmem:[#allocation2 + $0x1a] sm:$0xff] }
 0x449   :  { %13710 = vmatprep.mubr.f32.mxu0 %v18662_v42  ;;  %13588 = vmatprep.mubr.f32.mxu1 %v21977_v38  ;;  %21981 = vst [vmem:[#allocation77_spill] sm:$0xff] %v18682_v8  ;;  %v10804_v38 = vld [vmem:[%s21318_s4 + $0x270] sm:$0xff] }
 0x44c   :  { %13711 = vmatmul.mubr.f32.gmra.mxu0 %v18669_v44  ;;  %13589 = vmatmul.mubr.f32.gmra.mxu1 %v21978_v33  ;;  %v18692_v33 = vld [vmem:[#allocation2 + $0x22] sm:$0xff] }
 0x44d   :  { %13713 = vmatprep.mubr.f32.mxu0 %v18672_v62  ;;  %13751 = vmatprep.mubr.f32.mxu1 %v6356_v56  ;;  %v18690_v56 = vld [vmem:[#allocation2 + $0x320] sm:$0xff]  ;;  %21984 = vst [vmem:[#allocation10_spill] sm:$0xff] %v18692_v33 }
 0x44e   :  { %21983 = vst [vmem:[#allocation80_spill] sm:$0xff] %v18690_v56 }
 0x450   :  { %13714 = vmatmul.mubr.f32.gmra.mxu0 %v18677_v45  ;;  %13752 = vmatmul.mubr.f32.vlgmr.msra.gmra.mxu1 %v6357_v23  ;;  %v18696_v23 = vld [vmem:[#allocation2 + $0x32] sm:$0xff]  ;;  %v21988_v45 = vld [vmem:[#allocation75_spill] sm:$0xff] }
 0x451   :  { %13716 = vmatprep.mubr.f32.mxu0 %v18680_v41  ;;  %13754 = vmatprep.mubr.f32.mxu1 %v18682_v8  ;;  %v21985_v41 = vld [vmem:[#allocation7_spill] sm:$0xff]  ;;  %v21987_v8 = vld [vmem:[#allocation6_spill] sm:$0xff] }
 0x452   :  { %13976 = vmatpush3.msra.mxu1 %v21982_v48  ;;  %v18703_v48 = vld [vmem:[#allocation2 + $0x3a] sm:$0xff] }
 0x453   :  { %13977 = vmatprep.subr.mxu1 %v10804_v38  ;;  %21986 = vst [vmem:[#allocation9_spill] sm:$0xff] %v18703_v48 }
 0x454   :  { %13717 = vmatmul.mubr.f32.gmra.mxu0 %v18690_v56  ;;  %13755 = vmatmul.mubr.f32.gmra.mxu1 %v18692_v33  ;;  %v18707_v56 = vld [vmem:[#allocation2 + $0x4a] sm:$0xff]  ;;  %v10802_v33 = vld [vmem:[%s21318_s4 + $0x260] sm:$0xff] }
 0x455   :  { %13879 = vmatprep.mubr.f32.mxu0 %v21985_v41  ;;  %13757 = vmatprep.mubr.f32.mxu1 %v18696_v23  ;;  %v10820_v41 = vld [vmem:[%s21318_s4 + $0x2f0] sm:$0xff] }
 0x456   :  { %13978 = vmatpush3.msra.mxu1 %v10804_v38  ;;  %v18717_v38 = vld [vmem:[#allocation2 + $0x52] sm:$0xff] }
 0x457   :  { %13979 = vmatprep.subr.mxu1 %v10803_v28 }
 0x458   :  { %13880 = vmatmul.mubr.f32.vlgmr.msra.gmra.mxu0 %v21987_v8  ;;  %13758 = vmatmul.mubr.f32.gmra.mxu1 %v18703_v48  ;;  %v18721_v8 = vld [vmem:[#allocation2 + $0x62] sm:$0xff]  ;;  %v10801_v48 = vld [vmem:[%s21318_s4 + $0x258] sm:$0xff] }
 0x459   :  { %13882 = vmatprep.mubr.f32.mxu0 %v21988_v45  ;;  %13760 = vmatprep.mubr.f32.mxu1 %v18707_v56  ;;  %v10819_v45 = vld [vmem:[%s21318_s4 + $0x2e8] sm:$0xff] }
 0x45a   :  { %13980 = vmatpush3.msra.mxu1 %v10803_v28  ;;  %14104 = vmatpush3.msra.mxu0 %v10821_v6  ;;  %v18731_v28 = vld [vmem:[#allocation2 + $0x6a] sm:$0xff] }
 0x45b   :  { %13981 = vmatprep.subr.mxu1 %v10802_v33  ;;  %14105 = vmatprep.subr.mxu0 %v10820_v41  ;;  %v10800_v6 = vld [vmem:[%s21318_s4 + $0x250] sm:$0xff] }
 0x45c   :  { %13883 = vmatmul.mubr.f32.gmra.mxu0 %v18378_v29  ;;  %13761 = vmatmul.mubr.f32.gmra.mxu1 %v18717_v38  ;;  %v18735_v29 = vld [vmem:[#allocation2 + $0x7a] sm:$0xff] }
 0x45d   :  { %13885 = vmatprep.mubr.f32.mxu0 %v18393_v40  ;;  %13763 = vmatprep.mubr.f32.mxu1 %v18721_v8  ;;  %v10818_v40 = vld [vmem:[%s21318_s4 + $0x2e0] sm:$0xff] }
 0x45e   :  { %13982 = vmatpush3.msra.mxu1 %v10802_v33  ;;  %14106 = vmatpush3.msra.mxu0 %v10820_v41  ;;  %v18745_v33 = vld [vmem:[#allocation2 + $0x82] sm:$0xff] }
 0x45f   :  { %13983 = vmatprep.subr.mxu1 %v10801_v48  ;;  %14107 = vmatprep.subr.mxu0 %v10819_v45  ;;  %v10799_v41 = vld [vmem:[%s21318_s4 + $0x248] sm:$0xff] }
 0x460   :  { %13886 = vmatmul.mubr.f32.gmra.mxu0 %v18414_v7  ;;  %13764 = vmatmul.mubr.f32.gmra.mxu1 %v18731_v28  ;;  %v18749_v7 = vld [vmem:[#allocation2 + $0x92] sm:$0xff] }
 0x461   :  { %13888 = vmatprep.mubr.f32.mxu0 %v18417_v31  ;;  %13766 = vmatprep.mubr.f32.mxu1 %v18735_v29  ;;  %v10817_v31 = vld [vmem:[%s21318_s4 + $0x2d8] sm:$0xff] }
 0x462   :  { %13984 = vmatpush3.msra.mxu1 %v10801_v48  ;;  %14108 = vmatpush3.msra.mxu0 %v10819_v45  ;;  %v18759_v48 = vld [vmem:[#allocation2 + $0x9a] sm:$0xff] }
 0x463   :  { %13985 = vmatprep.subr.mxu1 %v10800_v6  ;;  %14109 = vmatprep.subr.mxu0 %v10818_v40  ;;  %v10798_v45 = vld [vmem:[%s21318_s4 + $0x240] sm:$0xff] }
 0x464   :  { %13889 = vmatmul.mubr.f32.gmra.mxu0 %v18424_v4  ;;  %13767 = vmatmul.mubr.f32.gmra.mxu1 %v18745_v33  ;;  %v18763_v4 = vld [vmem:[#allocation2 + $0xaa] sm:$0xff] }
 0x465   :  { %13891 = vmatprep.mubr.f32.mxu0 %v18427_v12  ;;  %13769 = vmatprep.mubr.f32.mxu1 %v18749_v7  ;;  %v10816_v12 = vld [vmem:[%s21318_s4 + $0x2d0] sm:$0xff] }
 0x466   :  { %13986 = vmatpush3.msra.mxu1 %v10800_v6  ;;  %14110 = vmatpush3.msra.mxu0 %v10818_v40  ;;  %v18773_v6 = vld [vmem:[#allocation2 + $0xb2] sm:$0xff] }
 0x467   :  { %13987 = vmatprep.subr.mxu1 %v10799_v41  ;;  %14111 = vmatprep.subr.mxu0 %v10817_v31  ;;  %v10797_v40 = vld [vmem:[%s21318_s4 + $0x238] sm:$0xff] }
 0x468   :  { %13892 = vmatmul.mubr.f32.gmra.mxu0 %v18434_v15  ;;  %13770 = vmatmul.mubr.f32.gmra.mxu1 %v18759_v48  ;;  %v18777_v15 = vld [vmem:[#allocation2 + $0xc2] sm:$0xff] }
 0x469   :  { %13894 = vmatprep.mubr.f32.mxu0 %v18437_v57  ;;  %13772 = vmatprep.mubr.f32.mxu1 %v18763_v4  ;;  %v10815_v57 = vld [vmem:[%s21318_s4 + $0x2c8] sm:$0xff] }
 0x46a   :  { %13988 = vmatpush3.msra.mxu1 %v10799_v41  ;;  %14112 = vmatpush3.msra.mxu0 %v10817_v31  ;;  %v18787_v41 = vld [vmem:[#allocation2 + $0xca] sm:$0xff] }
 0x46b   :  { %13989 = vmatprep.subr.mxu1 %v10798_v45  ;;  %14113 = vmatprep.subr.mxu0 %v10816_v12  ;;  %v10796_v31 = vld [vmem:[%s21318_s4 + $0x230] sm:$0xff] }
 0x46c   :  { %13895 = vmatmul.mubr.f32.gmra.mxu0 %v18444_v13  ;;  %13773 = vmatmul.mubr.f32.gmra.mxu1 %v18773_v6  ;;  %v18791_v13 = vld [vmem:[#allocation2 + $0xda] sm:$0xff] }
 0x46d   :  { %13897 = vmatprep.mubr.f32.mxu0 %v18447_v54  ;;  %13775 = vmatprep.mubr.f32.mxu1 %v18777_v15  ;;  %v10814_v54 = vld [vmem:[%s21318_s4 + $0x2c0] sm:$0xff] }
 0x46e   :  { %13990 = vmatpush3.msra.mxu1 %v10798_v45  ;;  %14114 = vmatpush3.msra.mxu0 %v10816_v12  ;;  %v18801_v45 = vld [vmem:[#allocation2 + $0xe2] sm:$0xff] }
 0x46f   :  { %13991 = vmatprep.subr.mxu1 %v10797_v40  ;;  %14115 = vmatprep.subr.mxu0 %v10815_v57  ;;  %v10795_v12 = vld [vmem:[%s21318_s4 + $0x228] sm:$0xff] }
 0x470   :  { %13898 = vmatmul.mubr.f32.gmra.mxu0 %v18454_v20  ;;  %13776 = vmatmul.mubr.f32.gmra.mxu1 %v18787_v41  ;;  %v18805_v20 = vld [vmem:[#allocation2 + $0xf2] sm:$0xff] }
 0x471   :  { %13900 = vmatprep.mubr.f32.mxu0 %v18457_v59  ;;  %13778 = vmatprep.mubr.f32.mxu1 %v18791_v13  ;;  %v10813_v59 = vld [vmem:[%s21318_s4 + $0x2b8] sm:$0xff] }
 0x472   :  { %13992 = vmatpush3.msra.mxu1 %v10797_v40  ;;  %14116 = vmatpush3.msra.mxu0 %v10815_v57  ;;  %v18815_v40 = vld [vmem:[#allocation2 + $0xfa] sm:$0xff] }
 0x473   :  { %13993 = vmatprep.subr.mxu1 %v10796_v31  ;;  %14117 = vmatprep.subr.mxu0 %v10814_v54  ;;  %v10794_v57 = vld [vmem:[%s21318_s4 + $0x220] sm:$0xff] }
 0x474   :  { %13901 = vmatmul.mubr.f32.gmra.mxu0 %v18464_v49  ;;  %13779 = vmatmul.mubr.f32.gmra.mxu1 %v18801_v45  ;;  %v18819_v49 = vld [vmem:[#allocation2 + $0x10a] sm:$0xff] }
 0x475   :  { %13903 = vmatprep.mubr.f32.mxu0 %v18467_v25  ;;  %13781 = vmatprep.mubr.f32.mxu1 %v18805_v20  ;;  %v10812_v25 = vld [vmem:[%s21318_s4 + $0x2b0] sm:$0xff] }
 0x476   :  { %13994 = vmatpush3.msra.mxu1 %v10796_v31  ;;  %14118 = vmatpush3.msra.mxu0 %v10814_v54  ;;  %v18829_v31 = vld [vmem:[#allocation2 + $0x112] sm:$0xff] }
 0x477   :  { %13995 = vmatprep.subr.mxu1 %v10795_v12  ;;  %14119 = vmatprep.subr.mxu0 %v10813_v59  ;;  %v10793_v54 = vld [vmem:[%s21318_s4 + $0x218] sm:$0xff] }
 0x478   :  { %13904 = vmatmul.mubr.f32.gmra.mxu0 %v18474_v58  ;;  %13782 = vmatmul.mubr.f32.gmra.mxu1 %v18815_v40  ;;  %v18833_v58 = vld [vmem:[#allocation2 + $0x122] sm:$0xff] }
 0x479   :  { %13906 = vmatprep.mubr.f32.mxu0 %v18477_v52  ;;  %13784 = vmatprep.mubr.f32.mxu1 %v18819_v49  ;;  %v10811_v52 = vld [vmem:[%s21318_s4 + $0x2a8] sm:$0xff] }
 0x47a   :  { %13996 = vmatpush3.msra.mxu1 %v10795_v12  ;;  %14120 = vmatpush3.msra.mxu0 %v10813_v59  ;;  %v18843_v12 = vld [vmem:[#allocation2 + $0x12a] sm:$0xff] }
 0x47b   :  { %13997 = vmatprep.subr.mxu1 %v10794_v57  ;;  %14121 = vmatprep.subr.mxu0 %v10812_v25  ;;  %21989 = vst [vmem:[#allocation79_spill] sm:$0xff] %v18843_v12  ;;  %v10792_v59 = vld [vmem:[%s21318_s4 + $0x210] sm:$0xff] }
 0x47c   :  { %13907 = vmatmul.mubr.f32.gmra.mxu0 %v18484_v46  ;;  %13785 = vmatmul.mubr.f32.gmra.mxu1 %v18829_v31  ;;  %v18847_v46 = vld [vmem:[#allocation2 + $0x13a] sm:$0xff] }
 0x47d   :  { %13909 = vmatprep.mubr.f32.mxu0 %v18487_v61  ;;  %13787 = vmatprep.mubr.f32.mxu1 %v18833_v58  ;;  %v10810_v61 = vld [vmem:[%s21318_s4 + $0x2a0] sm:$0xff] }
 0x47e   :  { %13998 = vmatpush3.msra.mxu1 %v10794_v57  ;;  %14122 = vmatpush3.msra.mxu0 %v10812_v25  ;;  %v6383_v57 = vld [vmem:[#allocation2 + $0x142] sm:$0xff] }
 0x47f   :  { %13999 = vmatprep.subr.mxu1 %v10793_v54  ;;  %14123 = vmatprep.subr.mxu0 %v10811_v52  ;;  %v10791_v25 = vld [vmem:[%s21318_s4 + $0x208] sm:$0xff] }
 0x480   :  { %13910 = vmatmul.mubr.f32.gmra.mxu0 %v18494_v37  ;;  %13788 = vmatmul.mubr.f32.gmra.mxu1 %v18843_v12  ;;  %v6384_v37 = vld [vmem:[#allocation2 + $0x152] sm:$0xff] }
 0x481   :  { %13912 = vmatprep.mubr.f32.mxu0 %v18497_v5  ;;  %13790 = vmatprep.mubr.f32.mxu1 %v18847_v46  ;;  %v10809_v12 = vld [vmem:[%s21318_s4 + $0x298] sm:$0xff] }
 0x482   :  { %14000 = vmatpush3.msra.mxu1 %v10793_v54  ;;  %14124 = vmatpush3.msra.mxu0 %v10811_v52  ;;  %v6385_v5 = vld [vmem:[#allocation2 + $0x15a] sm:$0xff]  ;;  %v10808_v52 = vld [vmem:[%s21318_s4 + $0x290] sm:$0xff] }
 0x483   :  { %14001 = vmatprep.subr.mxu1 %v10792_v59  ;;  %14125 = vmatprep.subr.mxu0 %v10810_v61  ;;  %v10790_v54 = vld [vmem:[%s21318_s4 + $0x200] sm:$0xff] }
 0x484   :  { %13913 = vmatmul.mubr.f32.gmra.mxu0 %v18504_v2  ;;  %13791 = vmatmul.mubr.f32.gmra.mxu1 %v6383_v57  ;;  %v6386_v2 = vld [vmem:[#allocation2 + $0x16a] sm:$0xff]  ;;  %v10806_v57 = vld [vmem:[%s21318_s4 + $0x280] sm:$0xff] }
 0x485   :  { %13915 = vmatprep.mubr.f32.mxu0 %v18507_v26  ;;  %13793 = vmatprep.mubr.f32.mxu1 %v6384_v37  ;;  %v6388_v26 = vld [vmem:[#allocation2 + $0x1b2] sm:$0xff]  ;;  %v18888_v37 = vpop.f32.mrf.mxu1 }
 0x486   :  { %14002 = vmatpush3.msra.mxu1 %v10792_v59  ;;  %14126 = vmatpush3.msra.mxu0 %v10810_v61  ;;  %v6387_v59 = vld [vmem:[#allocation2 + $0x172] sm:$0xff] }
 0x487   :  { %14003 = vmatprep.subr.mxu1 %v10791_v25  ;;  %14127 = vmatprep.subr.mxu0 %v10809_v12  ;;  %v18880_v61 = vld [vmem:[%s21318_s4 + $0x378] sm:$0xff] }
 0x488   :  { %13916 = vmatmul.mubr.f32.gmra.mxu0 %v18514_v60  ;;  %13794 = vmatmul.mubr.f32.gmra.mxu1 %v6385_v5  ;;  %v10807_v60 = vld [vmem:[%s21318_s4 + $0x288] sm:$0xff]  ;;  %v13500_v5 = vpop.f32.mrf.mxu1 }
 0x489   :  { %13918 = vmatprep.mubr.f32.mxu0 %v18517_v16  ;;  %13796 = vmatprep.mubr.f32.mxu1 %v6386_v2  ;;  %v6389_v16 = vld [vmem:[#allocation2 + $0x1ba] sm:$0xff]  ;;  %v6392_v2 = vld [vmem:[#allocation2 + $0x1e2] sm:$0xff] }
 0x48a   :  { %14004 = vmatpush3.msra.mxu1 %v10791_v25  ;;  %14128 = vmatpush3.msra.mxu0 %v10809_v12  ;;  %v6390_v12 = vld [vmem:[#allocation2 + $0x1ca] sm:$0xff]  ;;  %v6391_v25 = vld [vmem:[#allocation2 + $0x1d2] sm:$0xff] }
 0x48b   :  { %14005 = vmatprep.subr.mxu1 %v10790_v54  ;;  %14129 = vmatprep.subr.mxu0 %v10808_v52 }
 0x48c   :  { %13919 = vmatmul.mubr.f32.gmra.mxu0 %v18522_v11  ;;  %13797 = vmatmul.mubr.f32.gmra.mxu1 %v6387_v59  ;;  %v6916_v11 = vld [vmem:[#allocation2 + $0x180] sm:$0xff]  ;;  %v18893_v59 = vpop.f32.mrf.mxu0 }
 0x48d   :  { %13921 = vmatprep.mubr.f32.mxu0 %v18525_v18  ;;  %13799 = vmatprep.mubr.f32.mxu1 %v6388_v26  ;;  %v6917_v18 = vld [vmem:[#allocation2 + $0x188] sm:$0xff]  ;;  %v6394_v26 = vld [vmem:[#allocation2 + $0x1fa] sm:$0xff] }
 0x48e   :  { %14006 = vmatpush3.msra.mxu1 %v10790_v54  ;;  %14130 = vmatpush3.msra.mxu0 %v10808_v52  ;;  %v6393_v54 = vld [vmem:[#allocation2 + $0x1ea] sm:$0xff] }
 0x48f   :  { %14131 = vmatprep.subr.mxu0 %v10807_v60  ;;  %14231 = vmatprep.subr.mxu1 %v18880_v61 }
 0x490   :  { %13922 = vmatmul.mubr.f32.gmra.mxu0 %v18530_v10  ;;  %13800 = vmatmul.mubr.f32.gmra.mxu1 %v6389_v16  ;;  %v5662_v10 = vpop.f32.mrf.mxu1  ;;  %v6395_v16 = vld [vmem:[#allocation2 + $0x202] sm:$0xff] }
 0x491   :  { %13924 = vmatprep.mubr.f32.mxu0 %v6916_v11  ;;  %13802 = vmatprep.mubr.f32.mxu1 %v6390_v12  ;;  %v6396_v12 = vld [vmem:[#allocation2 + $0x212] sm:$0xff] }
 0x492   :  { %14132 = vmatpush3.msra.mxu0 %v10807_v60  ;;  %v13503_v52 = vpop.f32.mrf.mxu1 }
 0x493   :  { %14133 = vmatprep.subr.mxu0 %v10806_v57 }
 0x494   :  { %13925 = vmatmul.mubr.f32.gmra.mxu0 %v6917_v18  ;;  %13803 = vmatmul.mubr.f32.gmra.mxu1 %v6391_v25  ;;  %v5672_v60 = vpop.f32.mrf.mxu1  ;;  %v13628_v11 = vpop.f32.mrf.mxu0 }
 0x495   :  { %13927 = vmatprep.mubr.f32.mxu0 %v18537_v1  ;;  %13805 = vmatprep.mubr.f32.mxu1 %v6392_v2 }
 0x496   :  { %14134 = vmatpush3.msra.mxu0 %v10806_v57  ;;  %v18896_v57 = vadd.f32 %v13628_v11, %v13500_v5  ;;  %v6399_v11 = vld [vmem:[#allocation2 + $0x232] sm:$0xff] }
 0x498   :  { %13928 = vmatmul.mubr.f32.gmra.mxu0 %v18544_v14  ;;  %13806 = vmatmul.mubr.f32.gmra.mxu1 %v6393_v54  ;;  %v6047_v14 = vpop.f32.mrf.mxu0 }
 0x499   :  { %13930 = vmatprep.mubr.f32.mxu0 %v18547_v17  ;;  %13808 = vmatprep.mubr.f32.mxu1 %v6394_v26  ;;  %v13506_v1 = vpop.f32.mrf.mxu1  ;;  %v18899_v25 = vadd.f32 %v6047_v14, %v5662_v10  ;;  %v6397_v17 = vld [vmem:[#allocation2 + $0x21a] sm:$0xff]  ;;  %v6398_v26 = vld [vmem:[#allocation2 + $0x22a] sm:$0xff]  ;;  %v6400_v14 = vld [vmem:[#allocation2 + $0x242] sm:$0xff] }
 0x49a   :  { %v13631_v2 = vpop.f32.mrf.mxu0 }
 0x49b   :  { %v5682_v18 = vpop.f32.mrf.mxu1 }
 0x49c   :  { %13931 = vmatmul.mubr.f32.gmra.mxu0 %v18554_v3  ;;  %13809 = vmatmul.mubr.f32.gmra.mxu1 %v6395_v16  ;;  %v18902_v3 = vadd.f32 %v13631_v2, %v13503_v52  ;;  %v6057_v5 = vpop.f32.mrf.mxu0  ;;  %v6401_v2 = vld [vmem:[#allocation2 + $0x24a] sm:$0xff] }
 0x49d   :  { %13933 = vmatprep.mubr.f32.mxu0 %v18557_v0  ;;  %13811 = vmatprep.mubr.f32.mxu1 %v6396_v12  ;;  %v13509_v54 = vpop.f32.mrf.mxu1  ;;  %v18905_v0 = vadd.f32 %v6057_v5, %v5672_v60  ;;  %v6402_v5 = vld [vmem:[#allocation2 + $0x25a] sm:$0xff] }
 0x49f   :  { %v5692_v16 = vpop.f32.mrf.mxu1 }
 0x4a0   :  { %13934 = vmatmul.mubr.f32.gmra.mxu0 %v18564_v22  ;;  %13812 = vmatmul.mubr.f32.gmra.mxu1 %v6397_v17 }
 0x4a1   :  { %13936 = vmatprep.mubr.f32.mxu0 %v18567_v19  ;;  %13814 = vmatprep.mubr.f32.mxu1 %v6398_v26 }
 0x4a4   :  { %v13634_v12 = vpop.f32.mrf.mxu0  ;;  %13937 = vmatmul.mubr.f32.gmra.mxu0 %v18576_v27  ;;  %v13512_v10 = vpop.f32.mrf.mxu1  ;;  %13815 = vmatmul.mubr.f32.gmra.mxu1 %v6399_v11 }
 0x4a5   :  { %v18908_v22 = vadd.f32 %v13634_v12, %v13506_v1  ;;  %13939 = vmatprep.mubr.f32.mxu0 %v18579_v9  ;;  %13817 = vmatprep.mubr.f32.mxu1 %v6400_v14  ;;  %v6403_v12 = vld [vmem:[#allocation2 + $0x262] sm:$0xff] }
 0x4a6   :  { %v6067_v52 = vpop.f32.mrf.mxu0  ;;  %v5702_v17 = vpop.f32.mrf.mxu1 }
 0x4a7   :  { %v18911_v19 = vadd.f32 %v6067_v52, %v5682_v18  ;;  %v6404_v52 = vld [vmem:[#allocation2 + $0x272] sm:$0xff] }
 0x4a8   :  { %v13637_v26 = vpop.f32.mrf.mxu0  ;;  %13940 = vmatmul.mubr.f32.gmra.mxu0 %v18586_v50  ;;  %v13515_v60 = vpop.f32.mrf.mxu1  ;;  %13818 = vmatmul.mubr.f32.gmra.mxu1 %v6401_v2 }
 0x4a9   :  { %v18914_v27 = vadd.f32 %v13637_v26, %v13509_v54  ;;  %13942 = vmatprep.mubr.f32.mxu0 %v18589_v30  ;;  %13820 = vmatprep.mubr.f32.mxu1 %v6402_v5  ;;  %v6405_v26 = vld [vmem:[#allocation2 + $0x27a] sm:$0xff] }
 0x4aa   :  { %v6077_v1 = vpop.f32.mrf.mxu0  ;;  %v5712_v11 = vpop.f32.mrf.mxu1 }
 0x4ab   :  { %v18917_v9 = vadd.f32 %v6077_v1, %v5692_v16  ;;  %v6406_v1 = vld [vmem:[#allocation2 + $0x28a] sm:$0xff] }
 0x4ac   :  { %v13640_v14 = vpop.f32.mrf.mxu0  ;;  %13943 = vmatmul.mubr.f32.gmra.mxu0 %v18596_v35  ;;  %v13518_v18 = vpop.f32.mrf.mxu1  ;;  %13821 = vmatmul.mubr.f32.gmra.mxu1 %v6403_v12 }
 0x4ad   :  { %v18920_v50 = vadd.f32 %v13640_v14, %v13512_v10  ;;  %13945 = vmatprep.mubr.f32.mxu0 %v18599_v55  ;;  %13823 = vmatprep.mubr.f32.mxu1 %v6404_v52  ;;  %v6407_v14 = vld [vmem:[#allocation2 + $0x292] sm:$0xff] }
 0x4ae   :  { %v6087_v54 = vpop.f32.mrf.mxu0  ;;  %v5722_v2 = vpop.f32.mrf.mxu1 }
 0x4af   :  { %v18923_v30 = vadd.f32 %v6087_v54, %v5702_v17  ;;  %v6408_v54 = vld [vmem:[#allocation2 + $0x2a2] sm:$0xff] }
 0x4b0   :  { %v13643_v5 = vpop.f32.mrf.mxu0  ;;  %13946 = vmatmul.mubr.f32.gmra.mxu0 %v18606_v51  ;;  %v13521_v16 = vpop.f32.mrf.mxu1  ;;  %13824 = vmatmul.mubr.f32.gmra.mxu1 %v6405_v26 }
 0x4b1   :  { %v18926_v35 = vadd.f32 %v13643_v5, %v13515_v60  ;;  %13948 = vmatprep.mubr.f32.mxu0 %v18609_v36  ;;  %13826 = vmatprep.mubr.f32.mxu1 %v6406_v1  ;;  %v6409_v5 = vld [vmem:[#allocation2 + $0x2aa] sm:$0xff] }
 0x4b2   :  { %v6097_v10 = vpop.f32.mrf.mxu0  ;;  %v5732_v12 = vpop.f32.mrf.mxu1 }
 0x4b3   :  { %v18929_v55 = vadd.f32 %v6097_v10, %v5712_v11  ;;  %v6410_v10 = vld [vmem:[#allocation2 + $0x2ba] sm:$0xff] }
 0x4b4   :  { %v13646_v52 = vpop.f32.mrf.mxu0  ;;  %13949 = vmatmul.mubr.f32.gmra.mxu0 %v18616_v21  ;;  %v13524_v17 = vpop.f32.mrf.mxu1  ;;  %13827 = vmatmul.mubr.f32.gmra.mxu1 %v6407_v14 }
 0x4b5   :  { %v18932_v51 = vadd.f32 %v13646_v52, %v13518_v18  ;;  %13951 = vmatprep.mubr.f32.mxu0 %v18619_v24  ;;  %13829 = vmatprep.mubr.f32.mxu1 %v6408_v54  ;;  %v18944_v24 = vld [vmem:[%s21318_s4 + $0x3f8] sm:$0xff] }
 0x4b6   :  { %v6107_v60 = vpop.f32.mrf.mxu0  ;;  %v5742_v26 = vpop.f32.mrf.mxu1  ;;  %14359 = vmatprep.subr.mxu0 %v18944_v24  ;;  %v6412_v54 = vld [vmem:[#allocation2 + $0x2d2] sm:$0xff] }
 0x4b7   :  { %v18935_v36 = vadd.f32 %v6107_v60, %v5722_v2 }
 0x4b8   :  { %v13649_v1 = vpop.f32.mrf.mxu0  ;;  %13952 = vmatmul.mubr.f32.gmra.mxu0 %v18629_v47  ;;  %v13527_v11 = vpop.f32.mrf.mxu1  ;;  %13830 = vmatmul.mubr.f32.gmra.mxu1 %v6409_v5  ;;  %v6411_v47 = vld [vmem:[#allocation2 + $0x2c2] sm:$0xff] }
 0x4b9   :  { %v18938_v21 = vadd.f32 %v13649_v1, %v13521_v16  ;;  %13954 = vmatprep.mubr.f32.mxu0 %v18632_v53  ;;  %13832 = vmatprep.mubr.f32.mxu1 %v6410_v10  ;;  %v6413_v10 = vld [vmem:[#allocation2 + $0x2da] sm:$0xff] }
 0x4ba   :  { %v6117_v18 = vpop.f32.mrf.mxu0  ;;  %v5752_v2 = vpop.f32.mrf.mxu1 }
 0x4bb   :  { %21990 = vst [vmem:[#allocation82_spill] sm:$0xff] %v18938_v21  ;;  %v18947_v14 = vadd.f32 %v6117_v18, %v5732_v12  ;;  %v6414_v18 = vld [vmem:[#allocation2 + $0x2ea] sm:$0xff] }
 0x4bc   :  { %v13652_v52 = vpop.f32.mrf.mxu0  ;;  %13955 = vmatmul.mubr.f32.gmra.mxu0 %v18639_v43  ;;  %v13530_v16 = vpop.f32.mrf.mxu1  ;;  %13833 = vmatmul.mubr.f32.gmra.mxu1 %v6411_v47 }
 0x4bd   :  { %v18950_v53 = vadd.f32 %v13652_v52, %v13524_v17  ;;  %13957 = vmatprep.mubr.f32.mxu0 %v18642_v34  ;;  %13835 = vmatprep.mubr.f32.mxu1 %v6412_v54  ;;  %v6415_v52 = vld [vmem:[#allocation2 + $0x2f2] sm:$0xff] }
 0x4be   :  { %v6127_v60 = vpop.f32.mrf.mxu0  ;;  %v5762_v5 = vpop.f32.mrf.mxu1 }
 0x4bf   :  { %v18953_v1 = vadd.f32 %v6127_v60, %v5742_v26  ;;  %v6416_v60 = vld [vmem:[#allocation2 + $0x302] sm:$0xff] }
 0x4c0   :  { %v13655_v21 = vpop.f32.mrf.mxu0  ;;  %13958 = vmatmul.mubr.f32.gmra.mxu0 %v18649_v39  ;;  %v13533_v12 = vpop.f32.mrf.mxu1  ;;  %13836 = vmatmul.mubr.f32.gmra.mxu1 %v6413_v10  ;;  %v6417_v10 = vld [vmem:[#allocation2 + $0x30a] sm:$0xff] }
 0x4c1   :  { %v18956_v43 = vadd.f32 %v13655_v21, %v13527_v11  ;;  %13960 = vmatprep.mubr.f32.mxu0 %v18652_v63  ;;  %13838 = vmatprep.mubr.f32.mxu1 %v6414_v18 }
 0x4c2   :  { %v6137_v17 = vpop.f32.mrf.mxu0  ;;  %v5772_v47 = vpop.f32.mrf.mxu1 }
 0x4c3   :  { %v18959_v34 = vadd.f32 %v6137_v17, %v5752_v2  ;;  %v6418_v17 = vld [vmem:[#allocation2 + $0x31a] sm:$0xff] }
 0x4c4   :  { %v13658_v54 = vpop.f32.mrf.mxu0  ;;  %13961 = vmatmul.mubr.f32.gmra.mxu0 %v18659_v32  ;;  %v13536_v26 = vpop.f32.mrf.mxu1  ;;  %13839 = vmatmul.mubr.f32.gmra.mxu1 %v6415_v52 }
 0x4c5   :  { %v18962_v39 = vadd.f32 %v13658_v54, %v13530_v16  ;;  %13963 = vmatprep.mubr.f32.mxu0 %v18662_v42  ;;  %13841 = vmatprep.mubr.f32.mxu1 %v6416_v60  ;;  %v6419_v54 = vld [vmem:[#allocation2 + $0x322] sm:$0xff] }
 0x4c6   :  { %v6147_v11 = vpop.f32.mrf.mxu0  ;;  %v5782_v21 = vpop.f32.mrf.mxu1 }
 0x4c7   :  { %v18965_v63 = vadd.f32 %v6147_v11, %v5762_v5  ;;  %v21994_v5 = vld [vmem:[#allocation8_spill] sm:$0xff] }
 0x4c8   :  { %v13661_v18 = vpop.f32.mrf.mxu0  ;;  %13964 = vmatmul.mubr.f32.gmra.mxu0 %v18669_v44  ;;  %v13539_v2 = vpop.f32.mrf.mxu1  ;;  %13842 = vmatmul.mubr.f32.gmra.mxu1 %v6417_v10  ;;  %v21995_v10 = vld [vmem:[#allocation3_spill] sm:$0xff] }
 0x4c9   :  { %21991 = vst [vmem:[#allocation12_spill] sm:$0xff] %v18965_v63  ;;  %v18968_v32 = vadd.f32 %v13661_v18, %v13533_v12  ;;  %13966 = vmatprep.mubr.f32.mxu0 %v18672_v62  ;;  %13844 = vmatprep.mubr.f32.mxu1 %v6418_v17  ;;  %v7416_v63 = vld [vmem:[#allocation2 + $0x19] sm:$0xff]  ;;  %v7417_v17 = vld [vmem:[#allocation2 + $0x21] sm:$0xff] }
 0x4ca   :  { %v6157_v16 = vpop.f32.mrf.mxu0  ;;  %v5792_v52 = vpop.f32.mrf.mxu1 }
 0x4cb   :  { %21992 = vst [vmem:[#allocation11_spill] sm:$0xff] %v18968_v32  ;;  %v18971_v42 = vadd.f32 %v6157_v16, %v5772_v47  ;;  %v21997_v47 = vld [vmem:[#allocation80_spill] sm:$0xff]  ;;  %v6948_v16 = vld [vmem:[#allocation2 + $0x330] sm:$0xff] }
 0x4cc   :  { %v13664_v60 = vpop.f32.mrf.mxu0  ;;  %13967 = vmatmul.mubr.f32.gmra.mxu0 %v21994_v5  ;;  %v13542_v11 = vpop.f32.mrf.mxu1  ;;  %13845 = vmatmul.mubr.f32.gmra.mxu1 %v6419_v54  ;;  %v7418_v5 = vld [vmem:[#allocation2 + $0x31] sm:$0xff] }
 0x4cd   :  { %21993 = vst [vmem:[#allocation81_spill] sm:$0xff] %v18971_v42  ;;  %v18974_v44 = vadd.f32 %v13664_v60, %v13536_v26  ;;  %13969 = vmatprep.mubr.f32.mxu0 %v21995_v10  ;;  %14007 = vmatprep.mubr.f32.mxu1 %v7416_v63  ;;  %v10836_v26 = vld [vmem:[%s21318_s4 + $0x370] sm:$0xff]  ;;  %v6949_v10 = vld [vmem:[#allocation2 + $0x338] sm:$0xff] }
 0x4ce   :  { %v6167_v12 = vpop.f32.mrf.mxu0  ;;  %v5802_v18 = vpop.f32.mrf.mxu1 }
 0x4cf   :  { %v18977_v62 = vadd.f32 %v6167_v12, %v5782_v21  ;;  %v7419_v12 = vld [vmem:[#allocation2 + $0x39] sm:$0xff] }
 0x4d0   :  { %v13667_v32 = vpop.f32.mrf.mxu0  ;;  %13970 = vmatmul.mubr.f32.gmra.mxu0 %v21997_v47  ;;  %v13545_v42 = vpop.f32.mrf.mxu1  ;;  %14008 = vmatmul.mubr.f32.vlgmr.msra.gmra.mxu1 %v7417_v17 }
 0x4d1   :  { %21996 = vst [vmem:[#allocation84_spill] sm:$0xff] %v18977_v62  ;;  %v18983_v54 = vadd.f32 %v13667_v32, %v13539_v2  ;;  %13972 = vmatprep.mubr.f32.mxu0 %v6948_v16  ;;  %14010 = vmatprep.mubr.f32.mxu1 %v7418_v5  ;;  %v7420_v62 = vld [vmem:[#allocation2 + $0x49] sm:$0xff] }
 0x4d2   :  { %v6177_v63 = vpop.f32.mrf.mxu0  ;;  %14232 = vmatpush3.msra.mxu1 %v18880_v61  ;;  %v5812_v21 = vpop.f32.mrf.mxu1  ;;  %v10835_v2 = vld [vmem:[%s21318_s4 + $0x368] sm:$0xff]  ;;  %v22000_v16 = vld [vmem:[#allocation77_spill] sm:$0xff] }
 0x4d3   :  { %21998 = vst [vmem:[#allocation14_spill] sm:$0xff] %v18983_v54  ;;  %v18986_v60 = vadd.f32 %v6177_v63, %v5792_v52  ;;  %14233 = vmatprep.subr.mxu1 %v10836_v26  ;;  %v7421_v63 = vld [vmem:[#allocation2 + $0x51] sm:$0xff]  ;;  %v7422_v54 = vld [vmem:[#allocation2 + $0x61] sm:$0xff] }
 0x4d4   :  { %v13670_v47 = vpop.f32.mrf.mxu0  ;;  %13973 = vmatmul.mubr.f32.gmra.mxu0 %v6949_v10  ;;  %v13548_v17 = vpop.f32.mrf.mxu1  ;;  %14011 = vmatmul.mubr.f32.gmra.mxu1 %v7419_v12 }
 0x4d5   :  { %21999 = vst [vmem:[#allocation13_spill] sm:$0xff] %v18986_v60  ;;  %v18991_v32 = vadd.f32 %v13670_v47, %v13542_v11  ;;  %14135 = vmatprep.mubr.f32.mxu0 %v22000_v16  ;;  %14013 = vmatprep.mubr.f32.mxu1 %v7420_v62  ;;  %v22002_v60 = vld [vmem:[#allocation10_spill] sm:$0xff]  ;;  %v10834_v11 = vld [vmem:[%s21318_s4 + $0x360] sm:$0xff]  ;;  %v10852_v62 = vld [vmem:[%s21318_s4 + $0x3f0] sm:$0xff] }
 0x4d6   :  { %v6187_v61 = vpop.f32.mrf.mxu0  ;;  %v5822_v52 = vpop.f32.mrf.mxu1  ;;  %14234 = vmatpush3.msra.mxu1 %v10836_v26  ;;  %v7423_v16 = vld [vmem:[#allocation2 + $0x69] sm:$0xff] }
 0x4d7   :  { %v18994_v5 = vadd.f32 %v6187_v61, %v5802_v18  ;;  %14235 = vmatprep.subr.mxu1 %v10835_v2 }
 0x4d8   :  { %v13673_v10 = vpop.f32.mrf.mxu0  ;;  %14136 = vmatmul.mubr.f32.vlgmr.msra.gmra.mxu0 %v22002_v60  ;;  %v13551_v12 = vpop.f32.mrf.mxu1  ;;  %14014 = vmatmul.mubr.f32.gmra.mxu1 %v7421_v63  ;;  %v22004_v63 = vld [vmem:[#allocation9_spill] sm:$0xff] }
 0x4d9   :  { %22001 = vst [vmem:[#allocation83_spill] sm:$0xff] %v18994_v5  ;;  %v19003_v47 = vadd.f32 %v13673_v10, %v13545_v42  ;;  %14138 = vmatprep.mubr.f32.mxu0 %v18696_v23  ;;  %14016 = vmatprep.mubr.f32.mxu1 %v7422_v54  ;;  %v7424_v42 = vld [vmem:[#allocation2 + $0x79] sm:$0xff]  ;;  %v10851_v54 = vld [vmem:[%s21318_s4 + $0x3e8] sm:$0xff] }
 0x4da   :  { %v6197_v18 = vpop.f32.mrf.mxu0  ;;  %v5832_v26 = vpop.f32.mrf.mxu1  ;;  %14236 = vmatpush3.msra.mxu1 %v10835_v2  ;;  %14360 = vmatpush3.msra.mxu0 %v18944_v24  ;;  %v10833_v23 = vld [vmem:[%s21318_s4 + $0x358] sm:$0xff] }
 0x4db   :  { %v19007_v60 = vadd.f32 %v6197_v18, %v5812_v21  ;;  %14237 = vmatprep.subr.mxu1 %v10834_v11  ;;  %14361 = vmatprep.subr.mxu0 %v10852_v62  ;;  %v7425_v18 = vld [vmem:[#allocation2 + $0x81] sm:$0xff] }
 0x4dc   :  { %v13676_v61 = vpop.f32.mrf.mxu0  ;;  %14139 = vmatmul.mubr.f32.gmra.mxu0 %v22004_v63  ;;  %v13554_v5 = vpop.f32.mrf.mxu1  ;;  %14017 = vmatmul.mubr.f32.gmra.mxu1 %v7423_v16 }
 0x4dd   :  { %22003 = vst [vmem:[#allocation86_spill] sm:$0xff] %v19007_v60  ;;  %v19016_v24 = vadd.f32 %v13676_v61, %v13548_v17  ;;  %14141 = vmatprep.mubr.f32.mxu0 %v18707_v56  ;;  %14019 = vmatprep.mubr.f32.mxu1 %v7424_v42  ;;  %v7426_v60 = vld [vmem:[#allocation2 + $0x91] sm:$0xff]  ;;  %v10850_v17 = vld [vmem:[%s21318_s4 + $0x3e0] sm:$0xff] }
 0x4de   :  { %v6207_v21 = vpop.f32.mrf.mxu0  ;;  %v5842_v2 = vpop.f32.mrf.mxu1  ;;  %14238 = vmatpush3.msra.mxu1 %v10834_v11  ;;  %14362 = vmatpush3.msra.mxu0 %v10852_v62  ;;  %v10832_v56 = vld [vmem:[%s21318_s4 + $0x350] sm:$0xff]  ;;  %v7427_v61 = vld [vmem:[#allocation2 + $0x99] sm:$0xff] }
 0x4df   :  { %v19019_v10 = vadd.f32 %v6207_v21, %v5822_v52  ;;  %14239 = vmatprep.subr.mxu1 %v10833_v23  ;;  %14363 = vmatprep.subr.mxu0 %v10851_v54 }
 0x4e0   :  { %v13679_v16 = vpop.f32.mrf.mxu0  ;;  %14142 = vmatmul.mubr.f32.gmra.mxu0 %v18717_v38  ;;  %v13557_v63 = vpop.f32.mrf.mxu1  ;;  %14020 = vmatmul.mubr.f32.gmra.mxu1 %v7425_v18  ;;  %v7428_v18 = vld [vmem:[#allocation2 + $0xa9] sm:$0xff] }
 0x4e1   :  { %v19028_v11 = vadd.f32 %v13679_v16, %v13551_v12  ;;  %14144 = vmatprep.mubr.f32.mxu0 %v18721_v8  ;;  %14022 = vmatprep.mubr.f32.mxu1 %v7426_v60  ;;  %v10831_v8 = vld [vmem:[%s21318_s4 + $0x348] sm:$0xff]  ;;  %v10849_v12 = vld [vmem:[%s21318_s4 + $0x3d8] sm:$0xff] }
 0x4e2   :  { %v6217_v52 = vpop.f32.mrf.mxu0  ;;  %v5852_v62 = vpop.f32.mrf.mxu1  ;;  %14240 = vmatpush3.msra.mxu1 %v10833_v23  ;;  %14364 = vmatpush3.msra.mxu0 %v10851_v54  ;;  %v7429_v54 = vld [vmem:[#allocation2 + $0xb1] sm:$0xff] }
 0x4e3   :  { %v19031_v38 = vadd.f32 %v6217_v52, %v5832_v26  ;;  %14241 = vmatprep.subr.mxu1 %v10832_v56  ;;  %14365 = vmatprep.subr.mxu0 %v10850_v17 }
 0x4e4   :  { %v13682_v42 = vpop.f32.mrf.mxu0  ;;  %14145 = vmatmul.mubr.f32.gmra.mxu0 %v18731_v28  ;;  %v13560_v21 = vpop.f32.mrf.mxu1  ;;  %14023 = vmatmul.mubr.f32.gmra.mxu1 %v7427_v61  ;;  %v7430_v61 = vld [vmem:[#allocation2 + $0xc1] sm:$0xff] }
 0x4e5   :  { %v19040_v60 = vadd.f32 %v13682_v42, %v13554_v5  ;;  %14147 = vmatprep.mubr.f32.mxu0 %v18735_v29  ;;  %14025 = vmatprep.mubr.f32.mxu1 %v7428_v18  ;;  %v10830_v29 = vld [vmem:[%s21318_s4 + $0x340] sm:$0xff]  ;;  %v10848_v5 = vld [vmem:[%s21318_s4 + $0x3d0] sm:$0xff] }
 0x4e6   :  { %v6227_v26 = vpop.f32.mrf.mxu0  ;;  %v5862_v23 = vpop.f32.mrf.mxu1  ;;  %14242 = vmatpush3.msra.mxu1 %v10832_v56  ;;  %14366 = vmatpush3.msra.mxu0 %v10850_v17  ;;  %v7431_v42 = vld [vmem:[#allocation2 + $0xc9] sm:$0xff] }
 0x4e7   :  { %v19043_v28 = vadd.f32 %v6227_v26, %v5842_v2  ;;  %14243 = vmatprep.subr.mxu1 %v10831_v8  ;;  %14367 = vmatprep.subr.mxu0 %v10849_v12 }
 0x4e8   :  { %v13685_v16 = vpop.f32.mrf.mxu0  ;;  %14148 = vmatmul.mubr.f32.gmra.mxu0 %v18745_v33  ;;  %v13563_v52 = vpop.f32.mrf.mxu1  ;;  %14026 = vmatmul.mubr.f32.gmra.mxu1 %v7429_v54  ;;  %v7432_v54 = vld [vmem:[#allocation2 + $0xd9] sm:$0xff] }
 0x4e9   :  { %v19052_v56 = vadd.f32 %v13685_v16, %v13557_v63  ;;  %14150 = vmatprep.mubr.f32.mxu0 %v18749_v7  ;;  %14028 = vmatprep.mubr.f32.mxu1 %v7430_v61  ;;  %v10829_v7 = vld [vmem:[%s21318_s4 + $0x338] sm:$0xff]  ;;  %v10847_v63 = vld [vmem:[%s21318_s4 + $0x3c8] sm:$0xff] }
 0x4ea   :  { %v6237_v2 = vpop.f32.mrf.mxu0  ;;  %v5872_v17 = vpop.f32.mrf.mxu1  ;;  %14244 = vmatpush3.msra.mxu1 %v10831_v8  ;;  %14368 = vmatpush3.msra.mxu0 %v10849_v12  ;;  %v7433_v16 = vld [vmem:[#allocation2 + $0xe1] sm:$0xff] }
 0x4eb   :  { %v19055_v33 = vadd.f32 %v6237_v2, %v5852_v62  ;;  %14245 = vmatprep.subr.mxu1 %v10830_v29  ;;  %14369 = vmatprep.subr.mxu0 %v10848_v5 }
 0x4ec   :  { %v13688_v18 = vpop.f32.mrf.mxu0  ;;  %14151 = vmatmul.mubr.f32.gmra.mxu0 %v18759_v48  ;;  %v13566_v26 = vpop.f32.mrf.mxu1  ;;  %14029 = vmatmul.mubr.f32.gmra.mxu1 %v7431_v42  ;;  %v7434_v42 = vld [vmem:[#allocation2 + $0xf1] sm:$0xff] }
 0x4ed   :  { %v19064_v8 = vadd.f32 %v13688_v18, %v13560_v21  ;;  %14153 = vmatprep.mubr.f32.mxu0 %v18763_v4  ;;  %14031 = vmatprep.mubr.f32.mxu1 %v7432_v54  ;;  %v10828_v4 = vld [vmem:[%s21318_s4 + $0x330] sm:$0xff]  ;;  %v10846_v21 = vld [vmem:[%s21318_s4 + $0x3c0] sm:$0xff] }
 0x4ee   :  { %v6247_v62 = vpop.f32.mrf.mxu0  ;;  %v5882_v12 = vpop.f32.mrf.mxu1  ;;  %14246 = vmatpush3.msra.mxu1 %v10830_v29  ;;  %14370 = vmatpush3.msra.mxu0 %v10848_v5  ;;  %v7435_v18 = vld [vmem:[#allocation2 + $0xf9] sm:$0xff] }
 0x4ef   :  { %v19067_v48 = vadd.f32 %v6247_v62, %v5862_v23  ;;  %14247 = vmatprep.subr.mxu1 %v10829_v7  ;;  %14371 = vmatprep.subr.mxu0 %v10847_v63 }
 0x4f0   :  { %v13691_v61 = vpop.f32.mrf.mxu0  ;;  %14154 = vmatmul.mubr.f32.gmra.mxu0 %v18773_v6  ;;  %v13569_v2 = vpop.f32.mrf.mxu1  ;;  %14032 = vmatmul.mubr.f32.gmra.mxu1 %v7433_v16  ;;  %v7436_v16 = vld [vmem:[#allocation2 + $0x109] sm:$0xff] }
 0x4f1   :  { %v19076_v29 = vadd.f32 %v13691_v61, %v13563_v52  ;;  %14156 = vmatprep.mubr.f32.mxu0 %v18777_v15  ;;  %14034 = vmatprep.mubr.f32.mxu1 %v7434_v42  ;;  %v10827_v15 = vld [vmem:[%s21318_s4 + $0x328] sm:$0xff]  ;;  %v10845_v52 = vld [vmem:[%s21318_s4 + $0x3b8] sm:$0xff] }
 0x4f2   :  { %v6257_v23 = vpop.f32.mrf.mxu0  ;;  %v5892_v5 = vpop.f32.mrf.mxu1  ;;  %14248 = vmatpush3.msra.mxu1 %v10829_v7  ;;  %14372 = vmatpush3.msra.mxu0 %v10847_v63  ;;  %v7437_v61 = vld [vmem:[#allocation2 + $0x111] sm:$0xff] }
 0x4f3   :  { %v19079_v6 = vadd.f32 %v6257_v23, %v5872_v17  ;;  %14249 = vmatprep.subr.mxu1 %v10828_v4  ;;  %14373 = vmatprep.subr.mxu0 %v10846_v21 }
 0x4f4   :  { %v13694_v54 = vpop.f32.mrf.mxu0  ;;  %14157 = vmatmul.mubr.f32.gmra.mxu0 %v18787_v41  ;;  %v13572_v62 = vpop.f32.mrf.mxu1  ;;  %14035 = vmatmul.mubr.f32.gmra.mxu1 %v7435_v18  ;;  %v7438_v18 = vld [vmem:[#allocation2 + $0x121] sm:$0xff] }
 0x4f5   :  { %v19088_v7 = vadd.f32 %v13694_v54, %v13566_v26  ;;  %14159 = vmatprep.mubr.f32.mxu0 %v18791_v13  ;;  %14037 = vmatprep.mubr.f32.mxu1 %v7436_v16  ;;  %v10826_v13 = vld [vmem:[%s21318_s4 + $0x320] sm:$0xff]  ;;  %v10844_v26 = vld [vmem:[%s21318_s4 + $0x3b0] sm:$0xff] }
 0x4f6   :  { %v6267_v17 = vpop.f32.mrf.mxu0  ;;  %v5902_v63 = vpop.f32.mrf.mxu1  ;;  %14250 = vmatpush3.msra.mxu1 %v10828_v4  ;;  %14374 = vmatpush3.msra.mxu0 %v10846_v21  ;;  %v7439_v54 = vld [vmem:[#allocation2 + $0x129] sm:$0xff] }
 0x4f7   :  { %v19091_v41 = vadd.f32 %v6267_v17, %v5882_v12  ;;  %14251 = vmatprep.subr.mxu1 %v10827_v15  ;;  %14375 = vmatprep.subr.mxu0 %v10845_v52 }
 0x4f8   :  { %v13697_v42 = vpop.f32.mrf.mxu0  ;;  %14160 = vmatmul.mubr.f32.gmra.mxu0 %v18801_v45  ;;  %v13575_v23 = vpop.f32.mrf.mxu1  ;;  %14038 = vmatmul.mubr.f32.gmra.mxu1 %v7437_v61  ;;  %v7440_v61 = vld [vmem:[#allocation2 + $0x139] sm:$0xff] }
 0x4f9   :  { %v19100_v4 = vadd.f32 %v13697_v42, %v13569_v2  ;;  %14162 = vmatprep.mubr.f32.mxu0 %v18805_v20  ;;  %14040 = vmatprep.mubr.f32.mxu1 %v7438_v18  ;;  %v10825_v20 = vld [vmem:[%s21318_s4 + $0x318] sm:$0xff]  ;;  %v10843_v2 = vld [vmem:[%s21318_s4 + $0x3a8] sm:$0xff] }
 0x4fa   :  { %v6277_v12 = vpop.f32.mrf.mxu0  ;;  %v5912_v21 = vpop.f32.mrf.mxu1  ;;  %14252 = vmatpush3.msra.mxu1 %v10827_v15  ;;  %14376 = vmatpush3.msra.mxu0 %v10845_v52  ;;  %v7441_v42 = vld [vmem:[#allocation2 + $0x141] sm:$0xff] }
 0x4fb   :  { %v19103_v45 = vadd.f32 %v6277_v12, %v5892_v5  ;;  %14253 = vmatprep.subr.mxu1 %v10826_v13  ;;  %14377 = vmatprep.subr.mxu0 %v10844_v26 }
 0x4fc   :  { %v13700_v16 = vpop.f32.mrf.mxu0  ;;  %14163 = vmatmul.mubr.f32.gmra.mxu0 %v18815_v40  ;;  %v13578_v17 = vpop.f32.mrf.mxu1  ;;  %14041 = vmatmul.mubr.f32.gmra.mxu1 %v7439_v54  ;;  %v7442_v54 = vld [vmem:[#allocation2 + $0x151] sm:$0xff] }
 0x4fd   :  { %v19112_v15 = vadd.f32 %v13700_v16, %v13572_v62  ;;  %14165 = vmatprep.mubr.f32.mxu0 %v18819_v49  ;;  %14043 = vmatprep.mubr.f32.mxu1 %v7440_v61  ;;  %v10824_v49 = vld [vmem:[%s21318_s4 + $0x310] sm:$0xff]  ;;  %v10842_v62 = vld [vmem:[%s21318_s4 + $0x3a0] sm:$0xff] }
 0x4fe   :  { %v6287_v5 = vpop.f32.mrf.mxu0  ;;  %v5922_v52 = vpop.f32.mrf.mxu1  ;;  %14254 = vmatpush3.msra.mxu1 %v10826_v13  ;;  %14378 = vmatpush3.msra.mxu0 %v10844_v26  ;;  %v7443_v16 = vld [vmem:[#allocation2 + $0x159] sm:$0xff] }
 0x4ff   :  { %22005 = vst [vmem:[#allocation16_spill] sm:$0xff] %v19112_v15  ;;  %v19115_v40 = vadd.f32 %v6287_v5, %v5902_v63  ;;  %14255 = vmatprep.subr.mxu1 %v10825_v20  ;;  %14379 = vmatprep.subr.mxu0 %v10843_v2  ;;  %v22009_v5 = vld [vmem:[#allocation79_spill] sm:$0xff] }
 0x500   :  { %v13703_v18 = vpop.f32.mrf.mxu0  ;;  %14166 = vmatmul.mubr.f32.gmra.mxu0 %v18829_v31  ;;  %v13581_v12 = vpop.f32.mrf.mxu1  ;;  %14044 = vmatmul.mubr.f32.gmra.mxu1 %v7441_v42  ;;  %v7452_v15 = vld [vmem:[#allocation2 + $0x1f9] sm:$0xff] }
 0x501   :  { %22006 = vst [vmem:[#allocation15_spill] sm:$0xff] %v19115_v40  ;;  %v19124_v13 = vadd.f32 %v13703_v18, %v13575_v23  ;;  %14168 = vmatprep.mubr.f32.mxu0 %v18833_v58  ;;  %14046 = vmatprep.mubr.f32.mxu1 %v7442_v54  ;;  %v7444_v40 = vld [vmem:[#allocation2 + $0x169] sm:$0xff]  ;;  %v10841_v23 = vld [vmem:[%s21318_s4 + $0x398] sm:$0xff] }
 0x502   :  { %v6297_v63 = vpop.f32.mrf.mxu0  ;;  %v5932_v26 = vpop.f32.mrf.mxu1  ;;  %14256 = vmatpush3.msra.mxu1 %v10825_v20  ;;  %14380 = vmatpush3.msra.mxu0 %v10843_v2  ;;  %v10823_v58 = vld [vmem:[%s21318_s4 + $0x308] sm:$0xff] }
 0x503   :  { %22007 = vst [vmem:[#allocation85_spill] sm:$0xff] %v19124_v13  ;;  %v19127_v31 = vadd.f32 %v6297_v63, %v5912_v21  ;;  %14257 = vmatprep.subr.mxu1 %v10824_v49  ;;  %14381 = vmatprep.subr.mxu0 %v10842_v62  ;;  %v7971_v54 = vld [vmem:[#allocation2 + $0x142] sm:$0xff]  ;;  %v7972_v63 = vld [vmem:[#allocation2 + $0x152] sm:$0xff] }
 0x504   :  { %v13706_v61 = vpop.f32.mrf.mxu0  ;;  %14169 = vmatmul.mubr.f32.gmra.mxu0 %v22009_v5  ;;  %v13584_v42 = vpop.f32.mrf.mxu1  ;;  %14047 = vmatmul.mubr.f32.gmra.mxu1 %v7443_v16  ;;  %v7445_v16 = vld [vmem:[#allocation2 + $0x171] sm:$0xff]  ;;  %v7448_v13 = vld [vmem:[#allocation2 + $0x1c9] sm:$0xff] }
 0x505   :  { %22008 = vst [vmem:[#allocation88_spill] sm:$0xff] %v19127_v31  ;;  %v19136_v20 = vadd.f32 %v13706_v61, %v13578_v17  ;;  %14171 = vmatprep.mubr.f32.mxu0 %v18847_v46  ;;  %14049 = vmatprep.mubr.f32.mxu1 %v7444_v40  ;;  %v7446_v17 = vld [vmem:[#allocation2 + $0x181] sm:$0xff]  ;;  %v10840_v40 = vld [vmem:[%s21318_s4 + $0x390] sm:$0xff] }
 0x506   :  { %v6307_v21 = vpop.f32.mrf.mxu0  ;;  %v5942_v2 = vpop.f32.mrf.mxu1  ;;  %14258 = vmatpush3.msra.mxu1 %v10824_v49  ;;  %14382 = vmatpush3.msra.mxu0 %v10842_v62  ;;  %v10822_v46 = vld [vmem:[%s21318_s4 + $0x300] sm:$0xff] }
 0x507   :  { %22010 = vst [vmem:[#allocation18_spill] sm:$0xff] %v19136_v20  ;;  %v19139_v18 = vadd.f32 %v6307_v21, %v5922_v52  ;;  %14259 = vmatprep.subr.mxu1 %v10823_v58  ;;  %14383 = vmatprep.subr.mxu0 %v10841_v23  ;;  %v7973_v21 = vld [vmem:[#allocation2 + $0x15a] sm:$0xff] }
 0x508   :  { %v13709_v5 = vpop.f32.mrf.mxu0  ;;  %14172 = vmatmul.mubr.f32.gmra.mxu0 %v7971_v54  ;;  %v13587_v31 = vpop.f32.mrf.mxu1  ;;  %14050 = vmatmul.mubr.f32.gmra.mxu1 %v7445_v16  ;;  %v7974_v54 = vld [vmem:[#allocation2 + $0x16a] sm:$0xff] }
 0x509   :  { %22011 = vst [vmem:[#allocation17_spill] sm:$0xff] %v19139_v18  ;;  %v19147_v52 = vadd.f32 %v13709_v5, %v13581_v12  ;;  %14174 = vmatprep.mubr.f32.mxu0 %v7972_v63  ;;  %14052 = vmatprep.mubr.f32.mxu1 %v7446_v17  ;;  %v7447_v16 = vld [vmem:[#allocation2 + $0x189] sm:$0xff]  ;;  %v7975_v17 = vld [vmem:[#allocation2 + $0x172] sm:$0xff] }
 0x50a   :  { %v6317_v49 = vpop.f32.mrf.mxu0  ;;  %v5952_v62 = vpop.f32.mrf.mxu1  ;;  %14260 = vmatpush3.msra.mxu1 %v10823_v58  ;;  %14384 = vmatpush3.msra.mxu0 %v10841_v23  ;;  %v10839_v12 = vld [vmem:[%s21318_s4 + $0x388] sm:$0xff]  ;;  %v19157_v58 = vld [vmem:[%s21318_s4 + $0x478] sm:$0xff] }
 0x50b   :  { %22012 = vst [vmem:[#allocation87_spill] sm:$0xff] %v19147_v52  ;;  %v19149_v61 = vadd.f32 %v6317_v49, %v5932_v26  ;;  %14261 = vmatprep.subr.mxu1 %v10822_v46  ;;  %14385 = vmatprep.subr.mxu0 %v10840_v40  ;;  %v7449_v49 = vld [vmem:[#allocation2 + $0x1d1] sm:$0xff] }
 0x50c   :  { %v13712_v18 = vpop.f32.mrf.mxu0  ;;  %14175 = vmatmul.mubr.f32.gmra.mxu0 %v7973_v21  ;;  %v13590_v20 = vpop.f32.mrf.mxu1  ;;  %14053 = vmatmul.mubr.f32.gmra.mxu1 %v7447_v16  ;;  %v7976_v16 = vld [vmem:[#allocation2 + $0x182] sm:$0xff] }
 0x50d   :  { %22013 = vst [vmem:[#allocation90_spill] sm:$0xff] %v19149_v61  ;;  %v19159_v26 = vadd.f32 %v13712_v18, %v13584_v42  ;;  %14177 = vmatprep.mubr.f32.mxu0 %v7974_v54  ;;  %14055 = vmatprep.mubr.f32.mxu1 %v7448_v13  ;;  %v7450_v42 = vld [vmem:[#allocation2 + $0x1e1] sm:$0xff] }
 0x50e   :  { %v6327_v23 = vpop.f32.mrf.mxu0  ;;  %v5962_v63 = vpop.f32.mrf.mxu1  ;;  %14262 = vmatpush3.msra.mxu1 %v10822_v46  ;;  %14386 = vmatpush3.msra.mxu0 %v10840_v40  ;;  %v10838_v13 = vld [vmem:[%s21318_s4 + $0x380] sm:$0xff] }
 0x50f   :  { %22014 = vst [vmem:[#allocation20_spill] sm:$0xff] %v19159_v26  ;;  %v19161_v5 = vadd.f32 %v6327_v23, %v5942_v2  ;;  %14387 = vmatprep.subr.mxu0 %v10839_v12  ;;  %14487 = vmatprep.subr.mxu1 %v19157_v58  ;;  %v22016_v2 = vld [vmem:[#allocation78_spill] sm:$0xff]  ;;  %v7978_v26 = vld [vmem:[#allocation2 + $0x1ca] sm:$0xff] }
 0x510   :  { %v13715_v21 = vpop.f32.mrf.mxu0  ;;  %14178 = vmatmul.mubr.f32.gmra.mxu0 %v7975_v17  ;;  %v13753_v61 = vpop.f32.mrf.mxu1  ;;  %14056 = vmatmul.mubr.f32.gmra.mxu1 %v7449_v49  ;;  %v7977_v17 = vld [vmem:[#allocation2 + $0x18a] sm:$0xff] }
 0x511   :  { %22015 = vst [vmem:[#allocation19_spill] sm:$0xff] %v19161_v5  ;;  %v19167_v18 = vadd.f32 %v13715_v21, %v13587_v31  ;;  %14180 = vmatprep.mubr.f32.mxu0 %v7976_v16  ;;  %v6823_v46 = vadd.f32 %v13753_v61, %v22016_v2  ;;  %14058 = vmatprep.mubr.f32.mxu1 %v7450_v42  ;;  %v7451_v5 = vld [vmem:[#allocation2 + $0x1e9] sm:$0xff]  ;;  %v7979_v42 = vld [vmem:[#allocation2 + $0x1d2] sm:$0xff] }
 0x512   :  { %v6337_v40 = vpop.f32.mrf.mxu0  ;;  %v6503_v54 = vpop.f32.mrf.mxu1  ;;  %14388 = vmatpush3.msra.mxu0 %v10839_v12 }
 0x513   :  { %v19170_v23 = vadd.f32 %v6337_v40, %v5952_v62  ;;  %14389 = vmatprep.subr.mxu0 %v10838_v13  ;;  %v6038_v62 = vadd.f32 %v18893_v59, %v18888_v37  ;;  %v7453_v40 = vld [vmem:[#allocation2 + $0x201] sm:$0xff] }
 0x514   :  { %v13718_v49 = vpop.f32.mrf.mxu0  ;;  %14181 = vmatmul.mubr.f32.gmra.mxu0 %v7977_v17  ;;  %v13756_v52 = vpop.f32.mrf.mxu1  ;;  %14059 = vmatmul.mubr.f32.gmra.mxu1 %v7451_v5 }
 0x515   :  { %v19172_v31 = vadd.f32 %v13718_v49, %v13590_v20  ;;  %14183 = vmatprep.mubr.f32.mxu0 %v7978_v26  ;;  %v6825_v61 = vadd.f32 %v13756_v52, %v18896_v57  ;;  %14061 = vmatprep.mubr.f32.mxu1 %v7452_v15  ;;  %v7980_v20 = vld [vmem:[#allocation2 + $0x1e2] sm:$0xff]  ;;  %v7454_v26 = vld [vmem:[#allocation2 + $0x211] sm:$0xff]  ;;  %v6822_v15 = vadd.f32 %v6503_v54, %v6038_v62  ;;  %v7455_v49 = vld [vmem:[#allocation2 + $0x219] sm:$0xff] }
 0x516   :  { %v6347_v21 = vpop.f32.mrf.mxu0  ;;  %v6513_v16 = vpop.f32.mrf.mxu1  ;;  %14390 = vmatpush3.msra.mxu0 %v10838_v13  ;;  %v7981_v13 = vld [vmem:[#allocation2 + $0x1ea] sm:$0xff] }
 0x517   :  { %v19177_v12 = vadd.f32 %v6347_v21, %v5962_v63  ;;  %v6824_v2 = vadd.f32 %v6513_v16, %v18899_v25  ;;  %v7982_v16 = vld [vmem:[#allocation2 + $0x1fa] sm:$0xff] }
 0x518   :  { %v13881_v5 = vpop.f32.mrf.mxu0  ;;  %14184 = vmatmul.mubr.f32.gmra.mxu0 %v7979_v42  ;;  %v13759_v17 = vpop.f32.mrf.mxu1  ;;  %14062 = vmatmul.mubr.f32.gmra.mxu1 %v7453_v40 }
 0x519   :  { %v19180_v57 = vadd.f32 %v13881_v5, %v6823_v46  ;;  %14186 = vmatprep.mubr.f32.mxu0 %v7980_v20  ;;  %v6827_v52 = vadd.f32 %v13759_v17, %v18902_v3  ;;  %14064 = vmatprep.mubr.f32.mxu1 %v7454_v26  ;;  %v7456_v46 = vld [vmem:[#allocation2 + $0x229] sm:$0xff]  ;;  %v7457_v17 = vld [vmem:[#allocation2 + $0x231] sm:$0xff] }
 0x51a   :  { %v7033_v37 = vpop.f32.mrf.mxu0  ;;  %v6523_v59 = vpop.f32.mrf.mxu1  ;;  %v7983_v20 = vld [vmem:[#allocation2 + $0x202] sm:$0xff] }
 0x51b   :  { %v19183_v63 = vadd.f32 %v7033_v37, %v6822_v15  ;;  %v6826_v25 = vadd.f32 %v6523_v59, %v18905_v0  ;;  %v7984_v15 = vld [vmem:[#allocation2 + $0x212] sm:$0xff]  ;;  %v7458_v59 = vld [vmem:[#allocation2 + $0x241] sm:$0xff] }
 0x51c   :  { %v13884_v21 = vpop.f32.mrf.mxu0  ;;  %14187 = vmatmul.mubr.f32.gmra.mxu0 %v7981_v13  ;;  %v13762_v42 = vpop.f32.mrf.mxu1  ;;  %14065 = vmatmul.mubr.f32.gmra.mxu1 %v7455_v49 }
 0x51d   :  { %v19186_v40 = vadd.f32 %v13884_v21, %v6825_v61  ;;  %14189 = vmatprep.mubr.f32.mxu0 %v7982_v16  ;;  %v6829_v3 = vadd.f32 %v13762_v42, %v18908_v22  ;;  %14067 = vmatprep.mubr.f32.mxu1 %v7456_v46  ;;  %v7985_v21 = vld [vmem:[#allocation2 + $0x21a] sm:$0xff]  ;;  %v7459_v16 = vld [vmem:[#allocation2 + $0x249] sm:$0xff] }
 0x51e   :  { %v7043_v54 = vpop.f32.mrf.mxu0  ;;  %v6533_v62 = vpop.f32.mrf.mxu1  ;;  %v7986_v46 = vld [vmem:[#allocation2 + $0x22a] sm:$0xff] }
 0x51f   :  { %v19189_v5 = vadd.f32 %v7043_v54, %v6824_v2  ;;  %v6828_v0 = vadd.f32 %v6533_v62, %v18911_v19  ;;  %v7460_v62 = vld [vmem:[#allocation2 + $0x259] sm:$0xff] }
 0x520   :  { %v13887_v26 = vpop.f32.mrf.mxu0  ;;  %14190 = vmatmul.mubr.f32.gmra.mxu0 %v7983_v20  ;;  %v13765_v37 = vpop.f32.mrf.mxu1  ;;  %14068 = vmatmul.mubr.f32.gmra.mxu1 %v7457_v17 }
 0x521   :  { %v19192_v61 = vadd.f32 %v13887_v26, %v6827_v52  ;;  %14192 = vmatprep.mubr.f32.mxu0 %v7984_v15  ;;  %v6831_v22 = vadd.f32 %v13765_v37, %v18914_v27  ;;  %14070 = vmatprep.mubr.f32.mxu1 %v7458_v59  ;;  %v7987_v26 = vld [vmem:[#allocation2 + $0x232] sm:$0xff]  ;;  %v7461_v15 = vld [vmem:[#allocation2 + $0x261] sm:$0xff] }
 0x522   :  { %v7053_v13 = vpop.f32.mrf.mxu0  ;;  %v6543_v49 = vpop.f32.mrf.mxu1  ;;  %v7988_v59 = vld [vmem:[#allocation2 + $0x242] sm:$0xff] }
 0x523   :  { %v19195_v2 = vadd.f32 %v7053_v13, %v6826_v25  ;;  %v6830_v19 = vadd.f32 %v6543_v49, %v18917_v9  ;;  %v7462_v49 = vld [vmem:[#allocation2 + $0x271] sm:$0xff] }
 0x524   :  { %v13890_v42 = vpop.f32.mrf.mxu0  ;;  %14193 = vmatmul.mubr.f32.gmra.mxu0 %v7985_v21  ;;  %v13768_v54 = vpop.f32.mrf.mxu1  ;;  %14071 = vmatmul.mubr.f32.gmra.mxu1 %v7459_v16 }
 0x525   :  { %v19198_v52 = vadd.f32 %v13890_v42, %v6829_v3  ;;  %14195 = vmatprep.mubr.f32.mxu0 %v7986_v46  ;;  %v6833_v27 = vadd.f32 %v13768_v54, %v18920_v50  ;;  %14073 = vmatprep.mubr.f32.mxu1 %v7460_v62  ;;  %v7989_v42 = vld [vmem:[#allocation2 + $0x24a] sm:$0xff]  ;;  %v7463_v46 = vld [vmem:[#allocation2 + $0x279] sm:$0xff] }
 0x526   :  { %v7063_v20 = vpop.f32.mrf.mxu0  ;;  %v6553_v17 = vpop.f32.mrf.mxu1  ;;  %v7990_v62 = vld [vmem:[#allocation2 + $0x25a] sm:$0xff] }
 0x527   :  { %v19201_v25 = vadd.f32 %v7063_v20, %v6828_v0  ;;  %v6832_v9 = vadd.f32 %v6553_v17, %v18923_v30  ;;  %v7464_v17 = vld [vmem:[#allocation2 + $0x289] sm:$0xff] }
 0x528   :  { %v13893_v37 = vpop.f32.mrf.mxu0  ;;  %14196 = vmatmul.mubr.f32.gmra.mxu0 %v7987_v26  ;;  %v13771_v13 = vpop.f32.mrf.mxu1  ;;  %14074 = vmatmul.mubr.f32.gmra.mxu1 %v7461_v15 }
 0x529   :  { %v19204_v3 = vadd.f32 %v13893_v37, %v6831_v22  ;;  %14198 = vmatprep.mubr.f32.mxu0 %v7988_v59  ;;  %v6835_v50 = vadd.f32 %v13771_v13, %v18926_v35  ;;  %14076 = vmatprep.mubr.f32.mxu1 %v7462_v49  ;;  %v7991_v37 = vld [vmem:[#allocation2 + $0x262] sm:$0xff]  ;;  %v7465_v59 = vld [vmem:[#allocation2 + $0x291] sm:$0xff] }
 0x52a   :  { %v7073_v21 = vpop.f32.mrf.mxu0  ;;  %v6563_v16 = vpop.f32.mrf.mxu1  ;;  %v7992_v49 = vld [vmem:[#allocation2 + $0x272] sm:$0xff] }
 0x52b   :  { %v19207_v0 = vadd.f32 %v7073_v21, %v6830_v19  ;;  %v6834_v30 = vadd.f32 %v6563_v16, %v18929_v55  ;;  %v7466_v16 = vld [vmem:[#allocation2 + $0x2a1] sm:$0xff] }
 0x52c   :  { %v13896_v54 = vpop.f32.mrf.mxu0  ;;  %14199 = vmatmul.mubr.f32.gmra.mxu0 %v7989_v42  ;;  %v13774_v20 = vpop.f32.mrf.mxu1  ;;  %14077 = vmatmul.mubr.f32.gmra.mxu1 %v7463_v46  ;;  %v22017_v42 = vld [vmem:[#allocation82_spill] sm:$0xff] }
 0x52d   :  { %v19210_v22 = vadd.f32 %v13896_v54, %v6833_v27  ;;  %14201 = vmatprep.mubr.f32.mxu0 %v7990_v62  ;;  %v6837_v35 = vadd.f32 %v13774_v20, %v18932_v51  ;;  %14079 = vmatprep.mubr.f32.mxu1 %v7464_v17  ;;  %v7993_v62 = vld [vmem:[#allocation2 + $0x27a] sm:$0xff]  ;;  %v7467_v20 = vld [vmem:[#allocation2 + $0x2a9] sm:$0xff] }
 0x52e   :  { %v7083_v26 = vpop.f32.mrf.mxu0  ;;  %v6573_v15 = vpop.f32.mrf.mxu1 }
 0x52f   :  { %v19213_v19 = vadd.f32 %v7083_v26, %v6832_v9  ;;  %v6836_v55 = vadd.f32 %v6573_v15, %v18935_v36  ;;  %v7994_v26 = vld [vmem:[#allocation2 + $0x28a] sm:$0xff] }
 0x530   :  { %v13899_v13 = vpop.f32.mrf.mxu0  ;;  %14202 = vmatmul.mubr.f32.gmra.mxu0 %v7991_v37  ;;  %v13777_v21 = vpop.f32.mrf.mxu1  ;;  %14080 = vmatmul.mubr.f32.gmra.mxu1 %v7465_v59  ;;  %v7468_v37 = vld [vmem:[#allocation2 + $0x2b9] sm:$0xff] }
 0x531   :  { %v19216_v27 = vadd.f32 %v13899_v13, %v6835_v50  ;;  %14204 = vmatprep.mubr.f32.mxu0 %v7992_v49  ;;  %v6839_v51 = vadd.f32 %v13777_v21, %v22017_v42  ;;  %14082 = vmatprep.mubr.f32.mxu1 %v7466_v16  ;;  %v7995_v21 = vld [vmem:[#allocation2 + $0x292] sm:$0xff]  ;;  %v7469_v16 = vld [vmem:[#allocation2 + $0x2c1] sm:$0xff] }
 0x532   :  { %v7093_v46 = vpop.f32.mrf.mxu0  ;;  %v6583_v54 = vpop.f32.mrf.mxu1 }
 0x533   :  { %v19219_v9 = vadd.f32 %v7093_v46, %v6834_v30  ;;  %v6838_v36 = vadd.f32 %v6583_v54, %v18947_v14  ;;  %v7996_v46 = vld [vmem:[#allocation2 + $0x2a2] sm:$0xff] }
 0x534   :  { %v13902_v17 = vpop.f32.mrf.mxu0  ;;  %14205 = vmatmul.mubr.f32.gmra.mxu0 %v7993_v62  ;;  %v13780_v15 = vpop.f32.mrf.mxu1  ;;  %14083 = vmatmul.mubr.f32.gmra.mxu1 %v7467_v20  ;;  %v7470_v62 = vld [vmem:[#allocation2 + $0x2d1] sm:$0xff] }
 0x535   :  { %v19222_v50 = vadd.f32 %v13902_v17, %v6837_v35  ;;  %14207 = vmatprep.mubr.f32.mxu0 %v7994_v26  ;;  %v6841_v59 = vadd.f32 %v13780_v15, %v18950_v53  ;;  %14085 = vmatprep.mubr.f32.mxu1 %v7468_v37  ;;  %v7997_v26 = vld [vmem:[#allocation2 + $0x2aa] sm:$0xff]  ;;  %v7471_v15 = vld [vmem:[#allocation2 + $0x2d9] sm:$0xff] }
 0x536   :  { %v7103_v13 = vpop.f32.mrf.mxu0  ;;  %v6593_v49 = vpop.f32.mrf.mxu1 }
 0x537   :  { %v19225_v30 = vadd.f32 %v7103_v13, %v6836_v55  ;;  %v6840_v14 = vadd.f32 %v6593_v49, %v18953_v1  ;;  %v7998_v13 = vld [vmem:[#allocation2 + $0x2ba] sm:$0xff] }
 0x538   :  { %v13905_v42 = vpop.f32.mrf.mxu0  ;;  %14208 = vmatmul.mubr.f32.gmra.mxu0 %v7995_v21  ;;  %v13783_v54 = vpop.f32.mrf.mxu1  ;;  %14086 = vmatmul.mubr.f32.gmra.mxu1 %v7469_v16  ;;  %v7472_v21 = vld [vmem:[#allocation2 + $0x2e9] sm:$0xff] }
 0x539   :  { %v19228_v35 = vadd.f32 %v13905_v42, %v6839_v51  ;;  %14210 = vmatprep.mubr.f32.mxu0 %v7996_v46  ;;  %v6843_v53 = vadd.f32 %v13783_v54, %v18956_v43  ;;  %14088 = vmatprep.mubr.f32.mxu1 %v7470_v62  ;;  %v7999_v46 = vld [vmem:[#allocation2 + $0x2c2] sm:$0xff]  ;;  %v7473_v62 = vld [vmem:[#allocation2 + $0x2f1] sm:$0xff] }
 0x53a   :  { %v7113_v20 = vpop.f32.mrf.mxu0  ;;  %v6603_v17 = vpop.f32.mrf.mxu1  ;;  %v22020_v54 = vld [vmem:[#allocation12_spill] sm:$0xff] }
 0x53b   :  { %v19231_v55 = vadd.f32 %v7113_v20, %v6838_v36  ;;  %v6842_v1 = vadd.f32 %v6603_v17, %v18959_v34  ;;  %v8000_v17 = vld [vmem:[#allocation2 + $0x2d2] sm:$0xff] }
 0x53c   :  { %v13908_v37 = vpop.f32.mrf.mxu0  ;;  %14211 = vmatmul.mubr.f32.gmra.mxu0 %v7997_v26  ;;  %v13786_v49 = vpop.f32.mrf.mxu1  ;;  %14089 = vmatmul.mubr.f32.gmra.mxu1 %v7471_v15  ;;  %v7474_v15 = vld [vmem:[#allocation2 + $0x301] sm:$0xff] }
 0x53d   :  { %v19234_v51 = vadd.f32 %v13908_v37, %v6841_v59  ;;  %14213 = vmatprep.mubr.f32.mxu0 %v7998_v13  ;;  %v6845_v43 = vadd.f32 %v13786_v49, %v18962_v39  ;;  %14091 = vmatprep.mubr.f32.mxu1 %v7472_v21  ;;  %v22021_v37 = vld [vmem:[#allocation11_spill] sm:$0xff] }
 0x53e   :  { %v7123_v16 = vpop.f32.mrf.mxu0  ;;  %v6613_v42 = vpop.f32.mrf.mxu1  ;;  %v8001_v21 = vld [vmem:[#allocation2 + $0x2da] sm:$0xff] }
 0x53f   :  { %22018 = vst [vmem:[#allocation89_spill] sm:$0xff] %v19234_v51  ;;  %v19237_v36 = vadd.f32 %v7123_v16, %v6840_v14  ;;  %v6844_v34 = vadd.f32 %v6613_v42, %v22020_v54  ;;  %v22023_v16 = vld [vmem:[#allocation81_spill] sm:$0xff] }
 0x540   :  { %v13911_v20 = vpop.f32.mrf.mxu0  ;;  %14214 = vmatmul.mubr.f32.gmra.mxu0 %v7999_v46  ;;  %v13789_v26 = vpop.f32.mrf.mxu1  ;;  %14092 = vmatmul.mubr.f32.gmra.mxu1 %v7473_v62  ;;  %v7475_v54 = vld [vmem:[#allocation2 + $0x309] sm:$0xff]  ;;  %v7476_v62 = vld [vmem:[#allocation2 + $0x319] sm:$0xff] }
 0x541   :  { %22019 = vst [vmem:[#allocation93_spill] sm:$0xff] %v19237_v36  ;;  %v19240_v59 = vadd.f32 %v13911_v20, %v6843_v53  ;;  %14216 = vmatprep.mubr.f32.mxu0 %v8000_v17  ;;  %v6847_v39 = vadd.f32 %v13789_v26, %v22021_v37  ;;  %14094 = vmatprep.mubr.f32.mxu1 %v7474_v15  ;;  %v8002_v46 = vld [vmem:[#allocation2 + $0x2ea] sm:$0xff]  ;;  %v8003_v15 = vld [vmem:[#allocation2 + $0x2f2] sm:$0xff] }
 0x542   :  { %v7133_v13 = vpop.f32.mrf.mxu0  ;;  %v6623_v49 = vpop.f32.mrf.mxu1  ;;  %v22026_v37 = vld [vmem:[#allocation84_spill] sm:$0xff] }
 0x543   :  { %v19243_v14 = vadd.f32 %v7133_v13, %v6842_v1  ;;  %v6846_v42 = vadd.f32 %v6623_v49, %v22023_v16  ;;  %v7477_v49 = vld [vmem:[#allocation2 + $0x321] sm:$0xff] }
 0x544   :  { %v13914_v36 = vpop.f32.mrf.mxu0  ;;  %14217 = vmatmul.mubr.f32.gmra.mxu0 %v8001_v21  ;;  %v13792_v51 = vpop.f32.mrf.mxu1  ;;  %14095 = vmatmul.mubr.f32.gmra.mxu1 %v7475_v54  ;;  %v8004_v21 = vld [vmem:[#allocation2 + $0x302] sm:$0xff]  ;;  %v7478_v54 = vld [vmem:[#allocation2 + $0x331] sm:$0xff] }
 0x545   :  { %22022 = vst [vmem:[#allocation48_spill] sm:$0xff] %v19243_v14  ;;  %v19246_v53 = vadd.f32 %v13914_v36, %v6845_v43  ;;  %14219 = vmatprep.mubr.f32.mxu0 %v8002_v46  ;;  %v6849_v20 = vadd.f32 %v13792_v51, %v18974_v44  ;;  %14097 = vmatprep.mubr.f32.mxu1 %v7476_v62  ;;  %v22027_v36 = vld [vmem:[#allocation14_spill] sm:$0xff]  ;;  %v8005_v62 = vld [vmem:[#allocation2 + $0x30a] sm:$0xff] }
 0x546   :  { %v7143_v17 = vpop.f32.mrf.mxu0  ;;  %v6633_v26 = vpop.f32.mrf.mxu1 }
 0x547   :  { %22024 = vst [vmem:[#allocation47_spill] sm:$0xff] %v19246_v53  ;;  %v19249_v1 = vadd.f32 %v7143_v17, %v6844_v34  ;;  %v6848_v13 = vadd.f32 %v6633_v26, %v22026_v37  ;;  %v22029_v17 = vld [vmem:[#allocation13_spill] sm:$0xff]  ;;  %v7479_v37 = vld [vmem:[#allocation2 + $0x339] sm:$0xff] }
 0x548   :  { %v13917_v16 = vpop.f32.mrf.mxu0  ;;  %14220 = vmatmul.mubr.f32.gmra.mxu0 %v8003_v15  ;;  %v13795_v14 = vpop.f32.mrf.mxu1  ;;  %14098 = vmatmul.mubr.f32.gmra.mxu1 %v7477_v49  ;;  %v8006_v15 = vld [vmem:[#allocation2 + $0x31a] sm:$0xff]  ;;  %v8476_v49 = vld [vmem:[#allocation2 + $0x30] sm:$0xff] }
 0x549   :  { %22025 = vst [vmem:[#allocation91_spill] sm:$0xff] %v19249_v1  ;;  %v19252_v43 = vadd.f32 %v13917_v16, %v6847_v39  ;;  %14222 = vmatprep.mubr.f32.mxu0 %v8004_v21  ;;  %v6851_v44 = vadd.f32 %v13795_v14, %v22027_v36  ;;  %14100 = vmatprep.mubr.f32.mxu1 %v7478_v54  ;;  %v8007_v54 = vld [vmem:[#allocation2 + $0x322] sm:$0xff] }
 0x54a   :  { %v7153_v51 = vpop.f32.mrf.mxu0  ;;  %v6643_v46 = vpop.f32.mrf.mxu1  ;;  %v22030_v36 = vld [vmem:[#allocation83_spill] sm:$0xff] }
 0x54b   :  { %v19255_v34 = vadd.f32 %v7153_v51, %v6846_v42  ;;  %v6850_v26 = vadd.f32 %v6643_v46, %v22029_v17  ;;  %v8477_v46 = vld [vmem:[#allocation2 + $0x38] sm:$0xff] }
 0x54c   :  { %v13920_v1 = vpop.f32.mrf.mxu0  ;;  %14223 = vmatmul.mubr.f32.gmra.mxu0 %v8005_v62  ;;  %v13798_v53 = vpop.f32.mrf.mxu1  ;;  %14101 = vmatmul.mubr.f32.gmra.mxu1 %v7479_v37  ;;  %v8008_v62 = vld [vmem:[#allocation2 + $0x332] sm:$0xff]  ;;  %v8478_v37 = vld [vmem:[#allocation2 + $0x48] sm:$0xff] }
 0x54d   :  { %22028 = vst [vmem:[#allocation95_spill] sm:$0xff] %v19255_v34  ;;  %v19258_v39 = vadd.f32 %v13920_v1, %v6849_v20  ;;  %14225 = vmatprep.mubr.f32.mxu0 %v8006_v15  ;;  %v6853_v14 = vadd.f32 %v13798_v53, %v18991_v32  ;;  %14263 = vmatprep.mubr.f32.mxu1 %v8476_v49  ;;  %v10868_v20 = vld [vmem:[%s21318_s4 + $0x470] sm:$0xff]  ;;  %v8009_v49 = vld [vmem:[#allocation2 + $0x33a] sm:$0xff] }
 0x54e   :  { %v7163_v16 = vpop.f32.mrf.mxu0  ;;  %v6653_v21 = vpop.f32.mrf.mxu1 }
 0x54f   :  { %v19261_v42 = vadd.f32 %v7163_v16, %v6848_v13  ;;  %v6852_v51 = vadd.f32 %v6653_v21, %v22030_v36  ;;  %v22032_v16 = vld [vmem:[#allocation86_spill] sm:$0xff] }
 0x550   :  { %v13923_v17 = vpop.f32.mrf.mxu0  ;;  %14226 = vmatmul.mubr.f32.gmra.mxu0 %v8007_v54  ;;  %v13801_v34 = vpop.f32.mrf.mxu1  ;;  %14264 = vmatmul.mubr.f32.vlgmr.msra.gmra.mxu1 %v8477_v46  ;;  %v8479_v54 = vld [vmem:[#allocation2 + $0x50] sm:$0xff] }
 0x551   :  { %v19267_v32 = vadd.f32 %v13923_v17, %v6851_v44  ;;  %14228 = vmatprep.mubr.f32.mxu0 %v8008_v62  ;;  %v6855_v53 = vadd.f32 %v13801_v34, %v19003_v47  ;;  %14266 = vmatprep.mubr.f32.mxu1 %v8478_v37  ;;  %v9006_v46 = vld [vmem:[#allocation2 + $0x31] sm:$0xff]  ;;  %v8480_v17 = vld [vmem:[#allocation2 + $0x60] sm:$0xff]  ;;  %v10867_v47 = vld [vmem:[%s21318_s4 + $0x468] sm:$0xff] }
 0x552   :  { %v7173_v1 = vpop.f32.mrf.mxu0  ;;  %14488 = vmatpush3.msra.mxu1 %v19157_v58  ;;  %v6663_v13 = vpop.f32.mrf.mxu1 }
 0x553   :  { %v19271_v15 = vadd.f32 %v7173_v1, %v6850_v26  ;;  %v6854_v21 = vadd.f32 %v6663_v13, %v22032_v16  ;;  %14489 = vmatprep.subr.mxu1 %v10868_v20  ;;  %v9007_v1 = vld [vmem:[#allocation2 + $0x39] sm:$0xff] }
 0x554   :  { %v13926_v36 = vpop.f32.mrf.mxu0  ;;  %14229 = vmatmul.mubr.f32.gmra.mxu0 %v8009_v49  ;;  %v13804_v44 = vpop.f32.mrf.mxu1  ;;  %14267 = vmatmul.mubr.f32.gmra.mxu1 %v8479_v54  ;;  %v8481_v49 = vld [vmem:[#allocation2 + $0x68] sm:$0xff] }
 0x555   :  { %22031 = vst [vmem:[#allocation94_spill] sm:$0xff] %v19271_v15  ;;  %v19277_v34 = vadd.f32 %v13926_v36, %v6853_v14  ;;  %14391 = vmatprep.mubr.f32.mxu0 %v9006_v46  ;;  %v6857_v58 = vadd.f32 %v13804_v44, %v19016_v24  ;;  %14269 = vmatprep.mubr.f32.mxu1 %v8480_v17  ;;  %v9008_v54 = vld [vmem:[#allocation2 + $0x49] sm:$0xff]  ;;  %v8482_v14 = vld [vmem:[#allocation2 + $0x78] sm:$0xff]  ;;  %v10866_v24 = vld [vmem:[%s21318_s4 + $0x460] sm:$0xff] }
 0x556   :  { %v7183_v26 = vpop.f32.mrf.mxu0  ;;  %v6673_v62 = vpop.f32.mrf.mxu1  ;;  %14490 = vmatpush3.msra.mxu1 %v10868_v20  ;;  %v9009_v44 = vld [vmem:[#allocation2 + $0x51] sm:$0xff] }
 0x557   :  { %v19280_v37 = vadd.f32 %v7183_v26, %v6852_v51  ;;  %v6856_v13 = vadd.f32 %v6673_v62, %v19019_v10  ;;  %14491 = vmatprep.subr.mxu1 %v10867_v47  ;;  %v8483_v26 = vld [vmem:[#allocation2 + $0x80] sm:$0xff] }
 0x558   :  { %v13929_v16 = vpop.f32.mrf.mxu0  ;;  %14392 = vmatmul.mubr.f32.vlgmr.msra.gmra.mxu0 %v9007_v1  ;;  %v13807_v15 = vpop.f32.mrf.mxu1  ;;  %14270 = vmatmul.mubr.f32.gmra.mxu1 %v8481_v49  ;;  %v9010_v1 = vld [vmem:[#allocation2 + $0x61] sm:$0xff] }
 0x559   :  { %v19286_v36 = vadd.f32 %v13929_v16, %v6855_v53  ;;  %14394 = vmatprep.mubr.f32.mxu0 %v9008_v54  ;;  %v6859_v51 = vadd.f32 %v13807_v15, %v19028_v11  ;;  %14272 = vmatprep.mubr.f32.mxu1 %v8482_v14  ;;  %v8484_v53 = vld [vmem:[#allocation2 + $0x90] sm:$0xff]  ;;  %v10865_v11 = vld [vmem:[%s21318_s4 + $0x458] sm:$0xff] }
 0x55a   :  { %v7193_v20 = vpop.f32.mrf.mxu0  ;;  %v6683_v10 = vpop.f32.mrf.mxu1  ;;  %14492 = vmatpush3.msra.mxu1 %v10867_v47  ;;  %v9011_v54 = vld [vmem:[#allocation2 + $0x69] sm:$0xff] }
 0x55b   :  { %v19289_v46 = vadd.f32 %v7193_v20, %v6854_v21  ;;  %v6858_v17 = vadd.f32 %v6683_v10, %v19031_v38  ;;  %14493 = vmatprep.subr.mxu1 %v10866_v24  ;;  %v8485_v20 = vld [vmem:[#allocation2 + $0x98] sm:$0xff] }
 0x55c   :  { %v13932_v62 = vpop.f32.mrf.mxu0  ;;  %14395 = vmatmul.mubr.f32.gmra.mxu0 %v9009_v44  ;;  %v13810_v49 = vpop.f32.mrf.mxu1  ;;  %14273 = vmatmul.mubr.f32.gmra.mxu1 %v8483_v26  ;;  %v9012_v44 = vld [vmem:[#allocation2 + $0x79] sm:$0xff] }
 0x55d   :  { %v19295_v15 = vadd.f32 %v13932_v62, %v6857_v58  ;;  %14397 = vmatprep.mubr.f32.mxu0 %v9010_v1  ;;  %v6861_v21 = vadd.f32 %v13810_v49, %v19040_v60  ;;  %14275 = vmatprep.mubr.f32.mxu1 %v8484_v53  ;;  %v8486_v58 = vld [vmem:[#allocation2 + $0xa8] sm:$0xff]  ;;  %v10864_v60 = vld [vmem:[%s21318_s4 + $0x450] sm:$0xff] }
 0x55e   :  { %v7203_v47 = vpop.f32.mrf.mxu0  ;;  %v6693_v38 = vpop.f32.mrf.mxu1  ;;  %14494 = vmatpush3.msra.mxu1 %v10866_v24  ;;  %v9013_v49 = vld [vmem:[#allocation2 + $0x81] sm:$0xff] }
 0x55f   :  { %v19298_v16 = vadd.f32 %v7203_v47, %v6856_v13  ;;  %v6860_v14 = vadd.f32 %v6693_v38, %v19043_v28  ;;  %14495 = vmatprep.subr.mxu1 %v10865_v11  ;;  %v8487_v47 = vld [vmem:[#allocation2 + $0xb0] sm:$0xff] }
 0x560   :  { %v13935_v10 = vpop.f32.mrf.mxu0  ;;  %14398 = vmatmul.mubr.f32.gmra.mxu0 %v9011_v54  ;;  %v13813_v26 = vpop.f32.mrf.mxu1  ;;  %14276 = vmatmul.mubr.f32.gmra.mxu1 %v8485_v20  ;;  %v9014_v54 = vld [vmem:[#allocation2 + $0x91] sm:$0xff] }
 0x561   :  { %v19304_v62 = vadd.f32 %v13935_v10, %v6859_v51  ;;  %14400 = vmatprep.mubr.f32.mxu0 %v9012_v44  ;;  %v6863_v13 = vadd.f32 %v13813_v26, %v19052_v56  ;;  %14278 = vmatprep.mubr.f32.mxu1 %v8486_v58  ;;  %v8488_v51 = vld [vmem:[#allocation2 + $0xc0] sm:$0xff]  ;;  %v10863_v56 = vld [vmem:[%s21318_s4 + $0x448] sm:$0xff] }
 0x562   :  { %v7213_v24 = vpop.f32.mrf.mxu0  ;;  %v6703_v28 = vpop.f32.mrf.mxu1  ;;  %14496 = vmatpush3.msra.mxu1 %v10865_v11  ;;  %v9015_v26 = vld [vmem:[#allocation2 + $0x99] sm:$0xff] }
 0x563   :  { %v19307_v1 = vadd.f32 %v7213_v24, %v6858_v17  ;;  %v6862_v53 = vadd.f32 %v6703_v28, %v19055_v33  ;;  %14497 = vmatprep.subr.mxu1 %v10864_v60  ;;  %v8489_v24 = vld [vmem:[#allocation2 + $0xc8] sm:$0xff] }
 0x564   :  { %v13938_v38 = vpop.f32.mrf.mxu0  ;;  %14401 = vmatmul.mubr.f32.gmra.mxu0 %v9013_v49  ;;  %v13816_v20 = vpop.f32.mrf.mxu1  ;;  %14279 = vmatmul.mubr.f32.gmra.mxu1 %v8487_v47  ;;  %v9016_v49 = vld [vmem:[#allocation2 + $0xa9] sm:$0xff] }
 0x565   :  { %v19313_v10 = vadd.f32 %v13938_v38, %v6861_v21  ;;  %14403 = vmatprep.mubr.f32.mxu0 %v9014_v54  ;;  %v6865_v17 = vadd.f32 %v13816_v20, %v19064_v8  ;;  %14281 = vmatprep.mubr.f32.mxu1 %v8488_v51  ;;  %v8490_v21 = vld [vmem:[#allocation2 + $0xd8] sm:$0xff]  ;;  %v10862_v8 = vld [vmem:[%s21318_s4 + $0x440] sm:$0xff] }
 0x566   :  { %v7223_v11 = vpop.f32.mrf.mxu0  ;;  %v6713_v33 = vpop.f32.mrf.mxu1  ;;  %14498 = vmatpush3.msra.mxu1 %v10864_v60  ;;  %v9017_v20 = vld [vmem:[#allocation2 + $0xb1] sm:$0xff] }
 0x567   :  { %v19316_v44 = vadd.f32 %v7223_v11, %v6860_v14  ;;  %v6864_v58 = vadd.f32 %v6713_v33, %v19067_v48  ;;  %14499 = vmatprep.subr.mxu1 %v10863_v56  ;;  %v8491_v11 = vld [vmem:[#allocation2 + $0xe0] sm:$0xff] }
 0x568   :  { %v13941_v28 = vpop.f32.mrf.mxu0  ;;  %14404 = vmatmul.mubr.f32.gmra.mxu0 %v9015_v26  ;;  %v13819_v47 = vpop.f32.mrf.mxu1  ;;  %14282 = vmatmul.mubr.f32.gmra.mxu1 %v8489_v24  ;;  %v9018_v26 = vld [vmem:[#allocation2 + $0xc1] sm:$0xff] }
 0x569   :  { %v19322_v38 = vadd.f32 %v13941_v28, %v6863_v13  ;;  %14406 = vmatprep.mubr.f32.mxu0 %v9016_v49  ;;  %v6867_v14 = vadd.f32 %v13819_v47, %v19076_v29  ;;  %14284 = vmatprep.mubr.f32.mxu1 %v8490_v21  ;;  %v8492_v13 = vld [vmem:[#allocation2 + $0xf0] sm:$0xff]  ;;  %v10861_v29 = vld [vmem:[%s21318_s4 + $0x438] sm:$0xff] }
 0x56a   :  { %v7233_v60 = vpop.f32.mrf.mxu0  ;;  %v6723_v48 = vpop.f32.mrf.mxu1  ;;  %14500 = vmatpush3.msra.mxu1 %v10863_v56  ;;  %v9019_v47 = vld [vmem:[#allocation2 + $0xc9] sm:$0xff] }
 0x56b   :  { %v19325_v54 = vadd.f32 %v7233_v60, %v6862_v53  ;;  %v6866_v51 = vadd.f32 %v6723_v48, %v19079_v6  ;;  %14501 = vmatprep.subr.mxu1 %v10862_v8  ;;  %v8493_v60 = vld [vmem:[#allocation2 + $0xf8] sm:$0xff] }
 0x56c   :  { %v13944_v33 = vpop.f32.mrf.mxu0  ;;  %14407 = vmatmul.mubr.f32.gmra.mxu0 %v9017_v20  ;;  %v13822_v24 = vpop.f32.mrf.mxu1  ;;  %14285 = vmatmul.mubr.f32.gmra.mxu1 %v8491_v11  ;;  %v9020_v20 = vld [vmem:[#allocation2 + $0xd9] sm:$0xff] }
 0x56d   :  { %v19331_v28 = vadd.f32 %v13944_v33, %v6865_v17  ;;  %14409 = vmatprep.mubr.f32.mxu0 %v9018_v26  ;;  %v6869_v53 = vadd.f32 %v13822_v24, %v19088_v7  ;;  %14287 = vmatprep.mubr.f32.mxu1 %v8492_v13  ;;  %v8494_v17 = vld [vmem:[#allocation2 + $0x108] sm:$0xff]  ;;  %v10860_v7 = vld [vmem:[%s21318_s4 + $0x430] sm:$0xff] }
 0x56e   :  { %v7243_v56 = vpop.f32.mrf.mxu0  ;;  %v6733_v6 = vpop.f32.mrf.mxu1  ;;  %14502 = vmatpush3.msra.mxu1 %v10862_v8  ;;  %v9021_v24 = vld [vmem:[#allocation2 + $0xe1] sm:$0xff] }
 0x56f   :  { %v19334_v49 = vadd.f32 %v7243_v56, %v6864_v58  ;;  %v6868_v21 = vadd.f32 %v6733_v6, %v19091_v41  ;;  %14503 = vmatprep.subr.mxu1 %v10861_v29  ;;  %v8495_v56 = vld [vmem:[#allocation2 + $0x110] sm:$0xff] }
 0x570   :  { %v13947_v48 = vpop.f32.mrf.mxu0  ;;  %14410 = vmatmul.mubr.f32.gmra.mxu0 %v9019_v47  ;;  %v13825_v11 = vpop.f32.mrf.mxu1  ;;  %14288 = vmatmul.mubr.f32.gmra.mxu1 %v8493_v60  ;;  %v9022_v47 = vld [vmem:[#allocation2 + $0xf1] sm:$0xff] }
 0x571   :  { %v19340_v33 = vadd.f32 %v13947_v48, %v6867_v14  ;;  %14412 = vmatprep.mubr.f32.mxu0 %v9020_v20  ;;  %v6871_v58 = vadd.f32 %v13825_v11, %v19100_v4  ;;  %14290 = vmatprep.mubr.f32.mxu1 %v8494_v17  ;;  %v8496_v14 = vld [vmem:[#allocation2 + $0x120] sm:$0xff]  ;;  %v10859_v4 = vld [vmem:[%s21318_s4 + $0x428] sm:$0xff] }
 0x572   :  { %v7253_v8 = vpop.f32.mrf.mxu0  ;;  %v6743_v41 = vpop.f32.mrf.mxu1  ;;  %14504 = vmatpush3.msra.mxu1 %v10861_v29  ;;  %v9023_v17 = vld [vmem:[#allocation2 + $0xf9] sm:$0xff] }
 0x573   :  { %22033 = vst [vmem:[#allocation96_spill] sm:$0xff] %v19340_v33  ;;  %v19343_v26 = vadd.f32 %v7253_v8, %v6866_v51  ;;  %v6870_v13 = vadd.f32 %v6743_v41, %v19103_v45  ;;  %14505 = vmatprep.subr.mxu1 %v10860_v7  ;;  %v22036_v51 = vld [vmem:[#allocation16_spill] sm:$0xff]  ;;  %v22038_v8 = vld [vmem:[#allocation15_spill] sm:$0xff] }
 0x574   :  { %v13950_v6 = vpop.f32.mrf.mxu0  ;;  %14413 = vmatmul.mubr.f32.gmra.mxu0 %v9021_v24  ;;  %v13828_v60 = vpop.f32.mrf.mxu1  ;;  %14291 = vmatmul.mubr.f32.gmra.mxu1 %v8495_v56  ;;  %v8497_v24 = vld [vmem:[#allocation2 + $0x128] sm:$0xff] }
 0x575   :  { %22034 = vst [vmem:[#allocation21_spill] sm:$0xff] %v19343_v26  ;;  %v19349_v48 = vadd.f32 %v13950_v6, %v6869_v53  ;;  %14415 = vmatprep.mubr.f32.mxu0 %v9022_v47  ;;  %v6873_v29 = vadd.f32 %v13828_v60, %v22036_v51  ;;  %14293 = vmatprep.mubr.f32.mxu1 %v8496_v14  ;;  %v9024_v26 = vld [vmem:[#allocation2 + $0x109] sm:$0xff]  ;;  %v8498_v53 = vld [vmem:[#allocation2 + $0x138] sm:$0xff]  ;;  %v10858_v6 = vld [vmem:[%s21318_s4 + $0x420] sm:$0xff] }
 0x576   :  { %v7263_v20 = vpop.f32.mrf.mxu0  ;;  %v6753_v45 = vpop.f32.mrf.mxu1  ;;  %14506 = vmatpush3.msra.mxu1 %v10860_v7 }
 0x577   :  { %22035 = vst [vmem:[#allocation22_spill] sm:$0xff] %v19349_v48  ;;  %v19352_v11 = vadd.f32 %v7263_v20, %v6868_v21  ;;  %v6872_v41 = vadd.f32 %v6753_v45, %v22038_v8  ;;  %14507 = vmatprep.subr.mxu1 %v10859_v4  ;;  %v22040_v21 = vld [vmem:[#allocation85_spill] sm:$0xff]  ;;  %v22042_v45 = vld [vmem:[#allocation88_spill] sm:$0xff]  ;;  %v8499_v8 = vld [vmem:[#allocation2 + $0x140] sm:$0xff] }
 0x578   :  { %v13953_v56 = vpop.f32.mrf.mxu0  ;;  %14416 = vmatmul.mubr.f32.gmra.mxu0 %v9023_v17  ;;  %v13831_v33 = vpop.f32.mrf.mxu1  ;;  %14294 = vmatmul.mubr.f32.gmra.mxu1 %v8497_v24  ;;  %v9025_v20 = vld [vmem:[#allocation2 + $0x111] sm:$0xff] }
 0x579   :  { %22037 = vst [vmem:[#allocation49_spill] sm:$0xff] %v19352_v11  ;;  %v19358_v47 = vadd.f32 %v13953_v56, %v6871_v58  ;;  %14418 = vmatprep.mubr.f32.mxu0 %v9024_v26  ;;  %v6875_v7 = vadd.f32 %v13831_v33, %v22040_v21  ;;  %14296 = vmatprep.mubr.f32.mxu1 %v8498_v53  ;;  %v9026_v11 = vld [vmem:[#allocation2 + $0x121] sm:$0xff]  ;;  %v8500_v58 = vld [vmem:[#allocation2 + $0x150] sm:$0xff]  ;;  %v10857_v33 = vld [vmem:[%s21318_s4 + $0x418] sm:$0xff] }
 0x57a   :  { %v7273_v60 = vpop.f32.mrf.mxu0  ;;  %v6763_v14 = vpop.f32.mrf.mxu1  ;;  %14508 = vmatpush3.msra.mxu1 %v10859_v4 }
 0x57b   :  { %22039 = vst [vmem:[#allocation23_spill] sm:$0xff] %v19358_v47  ;;  %v19361_v51 = vadd.f32 %v7273_v60, %v6870_v13  ;;  %v6874_v17 = vadd.f32 %v6763_v14, %v22042_v45  ;;  %14509 = vmatprep.subr.mxu1 %v10858_v6  ;;  %v22044_v13 = vld [vmem:[#allocation18_spill] sm:$0xff]  ;;  %v9027_v60 = vld [vmem:[#allocation2 + $0x129] sm:$0xff] }
 0x57c   :  { %v13956_v24 = vpop.f32.mrf.mxu0  ;;  %14419 = vmatmul.mubr.f32.gmra.mxu0 %v9025_v20  ;;  %v13834_v48 = vpop.f32.mrf.mxu1  ;;  %14297 = vmatmul.mubr.f32.gmra.mxu1 %v8499_v8  ;;  %v22046_v14 = vld [vmem:[#allocation17_spill] sm:$0xff]  ;;  %v8501_v45 = vld [vmem:[#allocation2 + $0x158] sm:$0xff] }
 0x57d   :  { %22041 = vst [vmem:[#allocation51_spill] sm:$0xff] %v19361_v51  ;;  %v19367_v26 = vadd.f32 %v13956_v24, %v6873_v29  ;;  %14421 = vmatprep.mubr.f32.mxu0 %v9026_v11  ;;  %v6877_v4 = vadd.f32 %v13834_v48, %v22044_v13  ;;  %14299 = vmatprep.mubr.f32.mxu1 %v8500_v58  ;;  %v9028_v51 = vld [vmem:[#allocation2 + $0x139] sm:$0xff]  ;;  %v8502_v29 = vld [vmem:[#allocation2 + $0x168] sm:$0xff]  ;;  %v10856_v48 = vld [vmem:[%s21318_s4 + $0x410] sm:$0xff] }
 0x57e   :  { %v7283_v56 = vpop.f32.mrf.mxu0  ;;  %v6773_v53 = vpop.f32.mrf.mxu1  ;;  %14510 = vmatpush3.msra.mxu1 %v10858_v6 }
 0x57f   :  { %22043 = vst [vmem:[#allocation50_spill] sm:$0xff] %v19367_v26  ;;  %v19370_v21 = vadd.f32 %v7283_v56, %v6872_v41  ;;  %v6876_v20 = vadd.f32 %v6773_v53, %v22046_v14  ;;  %14511 = vmatprep.subr.mxu1 %v10857_v33  ;;  %v22048_v41 = vld [vmem:[#allocation87_spill] sm:$0xff]  ;;  %v22050_v53 = vld [vmem:[#allocation90_spill] sm:$0xff]  ;;  %v8503_v14 = vld [vmem:[#allocation2 + $0x170] sm:$0xff] }
 0x580   :  { %v13959_v8 = vpop.f32.mrf.mxu0  ;;  %14422 = vmatmul.mubr.f32.gmra.mxu0 %v9027_v60  ;;  %v13837_v47 = vpop.f32.mrf.mxu1  ;;  %14300 = vmatmul.mubr.f32.gmra.mxu1 %v8501_v45  ;;  %v9029_v56 = vld [vmem:[#allocation2 + $0x141] sm:$0xff] }
 0x581   :  { %22045 = vst [vmem:[#allocation25_spill] sm:$0xff] %v19370_v21  ;;  %v19376_v11 = vadd.f32 %v13959_v8, %v6875_v7  ;;  %14424 = vmatprep.mubr.f32.mxu0 %v9028_v51  ;;  %v6879_v6 = vadd.f32 %v13837_v47, %v22048_v41  ;;  %14302 = vmatprep.mubr.f32.mxu1 %v8502_v29  ;;  %v9030_v21 = vld [vmem:[#allocation2 + $0x151] sm:$0xff]  ;;  %v8504_v7 = vld [vmem:[#allocation2 + $0x180] sm:$0xff]  ;;  %v10855_v47 = vld [vmem:[%s21318_s4 + $0x408] sm:$0xff] }
 0x582   :  { %v7293_v24 = vpop.f32.mrf.mxu0  ;;  %v6783_v58 = vpop.f32.mrf.mxu1  ;;  %14512 = vmatpush3.msra.mxu1 %v10857_v33  ;;  %v8506_v41 = vld [vmem:[#allocation2 + $0x198] sm:$0xff] }
 0x583   :  { %22047 = vst [vmem:[#allocation24_spill] sm:$0xff] %v19376_v11  ;;  %v19379_v13 = vadd.f32 %v7293_v24, %v6874_v17  ;;  %v6878_v60 = vadd.f32 %v6783_v58, %v22050_v53  ;;  %14513 = vmatprep.subr.mxu1 %v10856_v48  ;;  %v22051_v17 = vld [vmem:[#allocation20_spill] sm:$0xff]  ;;  %v9031_v58 = vld [vmem:[#allocation2 + $0x159] sm:$0xff] }
 0x584   :  { %v13962_v45 = vpop.f32.mrf.mxu0  ;;  %14425 = vmatmul.mubr.f32.gmra.mxu0 %v9029_v56  ;;  %v13840_v26 = vpop.f32.mrf.mxu1  ;;  %14303 = vmatmul.mubr.f32.gmra.mxu1 %v8503_v14  ;;  %v22052_v56 = vld [vmem:[#allocation19_spill] sm:$0xff]  ;;  %v8505_v14 = vld [vmem:[#allocation2 + $0x188] sm:$0xff] }
 0x585   :  { %22049 = vst [vmem:[#allocation53_spill] sm:$0xff] %v19379_v13  ;;  %v19385_v51 = vadd.f32 %v13962_v45, %v6877_v4  ;;  %14427 = vmatprep.mubr.f32.mxu0 %v9030_v21  ;;  %v6881_v33 = vadd.f32 %v13840_v26, %v22051_v17  ;;  %14305 = vmatprep.mubr.f32.mxu1 %v8504_v7  ;;  %v9032_v11 = vld [vmem:[#allocation2 + $0x169] sm:$0xff]  ;;  %v10854_v26 = vld [vmem:[%s21318_s4 + $0x400] sm:$0xff]  ;;  %v9033_v17 = vld [vmem:[#allocation2 + $0x171] sm:$0xff] }
 0x586   :  { %v7303_v8 = vpop.f32.mrf.mxu0  ;;  %v6793_v29 = vpop.f32.mrf.mxu1  ;;  %14514 = vmatpush3.msra.mxu1 %v10856_v48 }
 0x587   :  { %v19388_v24 = vadd.f32 %v7303_v8, %v6876_v20  ;;  %v6880_v53 = vadd.f32 %v6793_v29, %v22052_v56  ;;  %14515 = vmatprep.subr.mxu1 %v10855_v47 }
 0x588   :  { %v13965_v13 = vpop.f32.mrf.mxu0  ;;  %14428 = vmatmul.mubr.f32.gmra.mxu0 %v9031_v58  ;;  %v13843_v4 = vpop.f32.mrf.mxu1  ;;  %14306 = vmatmul.mubr.f32.gmra.mxu1 %v8505_v14  ;;  %v9034_v58 = vld [vmem:[#allocation2 + $0x181] sm:$0xff] }
 0x589   :  { %v19394_v21 = vadd.f32 %v13965_v13, %v6879_v6  ;;  %14430 = vmatprep.mubr.f32.mxu0 %v9032_v11  ;;  %v6883_v20 = vadd.f32 %v13843_v4, %v19167_v18  ;;  %14308 = vmatprep.mubr.f32.mxu1 %v8506_v41  ;;  %v19400_v14 = vld [vmem:[#allocation2 + $0x8] sm:$0xff]  ;;  %v8508_v11 = vld [vmem:[#allocation2 + $0x1e0] sm:$0xff] }
 0x58a   :  { %v7313_v48 = vpop.f32.mrf.mxu0  ;;  %v6803_v45 = vpop.f32.mrf.mxu1  ;;  %14516 = vmatpush3.msra.mxu1 %v10855_v47  ;;  %v9035_v41 = vld [vmem:[#allocation2 + $0x189] sm:$0xff] }
 0x58b   :  { %v19397_v7 = vadd.f32 %v7313_v48, %v6878_v60  ;;  %v6882_v8 = vadd.f32 %v6803_v45, %v19170_v23  ;;  %14517 = vmatprep.subr.mxu1 %v10854_v26  ;;  %v9036_v60 = vld [vmem:[#allocation2 + $0x199] sm:$0xff]  ;;  %v8509_v48 = vld [vmem:[#allocation2 + $0x1e8] sm:$0xff] }
 0x58c   :  { %v13968_v29 = vpop.f32.mrf.mxu0  ;;  %14431 = vmatmul.mubr.f32.gmra.mxu0 %v9033_v17  ;;  %v13846_v56 = vpop.f32.mrf.mxu1  ;;  %14309 = vmatmul.mubr.f32.gmra.mxu1 %v19400_v14 }
 0x58d   :  { %v19403_v18 = vadd.f32 %v13968_v29, %v6881_v33  ;;  %14433 = vmatprep.mubr.f32.mxu0 %v9034_v58  ;;  %v6885_v6 = vadd.f32 %v13846_v56, %v19172_v31  ;;  %14311 = vmatprep.mubr.f32.mxu1 %v8508_v11  ;;  %v8510_v33 = vld [vmem:[#allocation2 + $0x1f8] sm:$0xff]  ;;  %v9037_v31 = vld [vmem:[#allocation2 + $0x1a1] sm:$0xff] }
 0x58e   :  { %v7323_v13 = vpop.f32.mrf.mxu0  ;;  %v6813_v47 = vpop.f32.mrf.mxu1  ;;  %14518 = vmatpush3.msra.mxu1 %v10854_v26 }
 0x58f   :  { %v19406_v23 = vadd.f32 %v7323_v13, %v6880_v53  ;;  %v6884_v4 = vadd.f32 %v6813_v47, %v19177_v12  ;;  %v8511_v12 = vld [vmem:[#allocation2 + $0x200] sm:$0xff] }
 0x590   :  { %v13971_v45 = vpop.f32.mrf.mxu0  ;;  %14434 = vmatmul.mubr.f32.gmra.mxu0 %v9035_v41  ;;  %v14009_v17 = vpop.f32.mrf.mxu1  ;;  %14312 = vmatmul.mubr.f32.gmra.mxu1 %v8509_v48  ;;  %v9038_v47 = vld [vmem:[#allocation2 + $0x1e1] sm:$0xff]  ;;  %v8512_v48 = vld [vmem:[#allocation2 + $0x210] sm:$0xff] }
 0x591   :  { %v19409_v29 = vadd.f32 %v13971_v45, %v6883_v20  ;;  %14436 = vmatprep.mubr.f32.mxu0 %v9036_v60  ;;  %v7883_v58 = vadd.f32 %v14009_v17, %v19180_v57  ;;  %14314 = vmatprep.mubr.f32.mxu1 %v8510_v33  ;;  %v8513_v33 = vld [vmem:[#allocation2 + $0x218] sm:$0xff] }
 0x592   :  { %v7333_v56 = vpop.f32.mrf.mxu0  ;;  %v7563_v26 = vpop.f32.mrf.mxu1 }
 0x593   :  { %v19412_v53 = vadd.f32 %v7333_v56, %v6882_v8  ;;  %v7882_v11 = vadd.f32 %v7563_v26, %v19183_v63  ;;  %v9039_v8 = vld [vmem:[#allocation2 + $0x1e9] sm:$0xff] }
 0x594   :  { %v13974_v13 = vpop.f32.mrf.mxu0  ;;  %14437 = vmatmul.mubr.f32.gmra.mxu0 %v9037_v31  ;;  %v14012_v41 = vpop.f32.mrf.mxu1  ;;  %14315 = vmatmul.mubr.f32.gmra.mxu1 %v8511_v12  ;;  %v9040_v31 = vld [vmem:[#allocation2 + $0x1f9] sm:$0xff]  ;;  %v8514_v12 = vld [vmem:[#allocation2 + $0x228] sm:$0xff] }
 0x595   :  { %v19415_v20 = vadd.f32 %v13974_v13, %v6885_v6  ;;  %14439 = vmatprep.mubr.f32.mxu0 %v9038_v47  ;;  %v7885_v60 = vadd.f32 %v14012_v41, %v19186_v40  ;;  %14317 = vmatprep.mubr.f32.mxu1 %v8512_v48  ;;  %v9041_v41 = vld [vmem:[#allocation2 + $0x201] sm:$0xff]  ;;  %v8515_v48 = vld [vmem:[#allocation2 + $0x230] sm:$0xff] }
 0x596   :  { %v7343_v57 = vpop.f32.mrf.mxu0  ;;  %v7573_v45 = vpop.f32.mrf.mxu1 }
 0x597   :  { %v19418_v17 = vadd.f32 %v7343_v57, %v6884_v4  ;;  %v7884_v63 = vadd.f32 %v7573_v45, %v19189_v5  ;;  %v9042_v45 = vld [vmem:[#allocation2 + $0x211] sm:$0xff] }
 0x598   :  { %v14137_v56 = vpop.f32.mrf.mxu0  ;;  %14440 = vmatmul.mubr.f32.gmra.mxu0 %v9039_v8  ;;  %v14015_v26 = vpop.f32.mrf.mxu1  ;;  %14318 = vmatmul.mubr.f32.gmra.mxu1 %v8513_v33  ;;  %v8516_v33 = vld [vmem:[#allocation2 + $0x240] sm:$0xff] }
 0x599   :  { %v19421_v6 = vadd.f32 %v14137_v56, %v7883_v58  ;;  %14442 = vmatprep.mubr.f32.mxu0 %v9040_v31  ;;  %v7887_v40 = vadd.f32 %v14015_v26, %v19192_v61  ;;  %14320 = vmatprep.mubr.f32.mxu1 %v8514_v12  ;;  %v9043_v26 = vld [vmem:[#allocation2 + $0x219] sm:$0xff]  ;;  %v8517_v12 = vld [vmem:[#allocation2 + $0x248] sm:$0xff] }
 0x59a   :  { %v8093_v13 = vpop.f32.mrf.mxu0  ;;  %v7583_v47 = vpop.f32.mrf.mxu1 }
 0x59b   :  { %v19424_v4 = vadd.f32 %v8093_v13, %v7882_v11  ;;  %v7886_v5 = vadd.f32 %v7583_v47, %v19195_v2  ;;  %v9044_v47 = vld [vmem:[#allocation2 + $0x229] sm:$0xff] }
 0x59c   :  { %v14140_v57 = vpop.f32.mrf.mxu0  ;;  %14443 = vmatmul.mubr.f32.gmra.mxu0 %v9041_v41  ;;  %v14018_v8 = vpop.f32.mrf.mxu1  ;;  %14321 = vmatmul.mubr.f32.gmra.mxu1 %v8515_v48  ;;  %v8518_v48 = vld [vmem:[#allocation2 + $0x258] sm:$0xff] }
 0x59d   :  { %v19427_v58 = vadd.f32 %v14140_v57, %v7885_v60  ;;  %14445 = vmatprep.mubr.f32.mxu0 %v9042_v45  ;;  %v7889_v61 = vadd.f32 %v14018_v8, %v19198_v52  ;;  %14323 = vmatprep.mubr.f32.mxu1 %v8516_v33  ;;  %v9045_v8 = vld [vmem:[#allocation2 + $0x231] sm:$0xff]  ;;  %v8519_v33 = vld [vmem:[#allocation2 + $0x260] sm:$0xff] }
 0x59e   :  { %v8103_v56 = vpop.f32.mrf.mxu0  ;;  %v7593_v31 = vpop.f32.mrf.mxu1 }
 0x59f   :  { %v19430_v11 = vadd.f32 %v8103_v56, %v7884_v63  ;;  %v7888_v2 = vadd.f32 %v7593_v31, %v19201_v25  ;;  %v9046_v31 = vld [vmem:[#allocation2 + $0x241] sm:$0xff] }
 0x5a0   :  { %v14143_v13 = vpop.f32.mrf.mxu0  ;;  %14446 = vmatmul.mubr.f32.gmra.mxu0 %v9043_v26  ;;  %v14021_v41 = vpop.f32.mrf.mxu1  ;;  %14324 = vmatmul.mubr.f32.gmra.mxu1 %v8517_v12  ;;  %v8520_v12 = vld [vmem:[#allocation2 + $0x270] sm:$0xff] }
 0x5a1   :  { %v19433_v60 = vadd.f32 %v14143_v13, %v7887_v40  ;;  %14448 = vmatprep.mubr.f32.mxu0 %v9044_v47  ;;  %v7891_v52 = vadd.f32 %v14021_v41, %v19204_v3  ;;  %14326 = vmatprep.mubr.f32.mxu1 %v8518_v48  ;;  %v9047_v41 = vld [vmem:[#allocation2 + $0x249] sm:$0xff]  ;;  %v8521_v48 = vld [vmem:[#allocation2 + $0x278] sm:$0xff] }
 0x5a2   :  { %v8113_v57 = vpop.f32.mrf.mxu0  ;;  %v7603_v45 = vpop.f32.mrf.mxu1 }
 0x5a3   :  { %v19436_v63 = vadd.f32 %v8113_v57, %v7886_v5  ;;  %v7890_v25 = vadd.f32 %v7603_v45, %v19207_v0  ;;  %v9048_v45 = vld [vmem:[#allocation2 + $0x259] sm:$0xff] }
 0x5a4   :  { %v14146_v56 = vpop.f32.mrf.mxu0  ;;  %14449 = vmatmul.mubr.f32.gmra.mxu0 %v9045_v8  ;;  %v14024_v26 = vpop.f32.mrf.mxu1  ;;  %14327 = vmatmul.mubr.f32.gmra.mxu1 %v8519_v33  ;;  %v8522_v33 = vld [vmem:[#allocation2 + $0x288] sm:$0xff] }
 0x5a5   :  { %v19439_v40 = vadd.f32 %v14146_v56, %v7889_v61  ;;  %14451 = vmatprep.mubr.f32.mxu0 %v9046_v31  ;;  %v7893_v3 = vadd.f32 %v14024_v26, %v19210_v22  ;;  %14329 = vmatprep.mubr.f32.mxu1 %v8520_v12  ;;  %v9049_v26 = vld [vmem:[#allocation2 + $0x261] sm:$0xff]  ;;  %v8523_v12 = vld [vmem:[#allocation2 + $0x290] sm:$0xff] }
 0x5a6   :  { %v8123_v13 = vpop.f32.mrf.mxu0  ;;  %v7613_v47 = vpop.f32.mrf.mxu1 }
 0x5a7   :  { %v19442_v5 = vadd.f32 %v8123_v13, %v7888_v2  ;;  %v7892_v0 = vadd.f32 %v7613_v47, %v19213_v19  ;;  %v9050_v47 = vld [vmem:[#allocation2 + $0x271] sm:$0xff] }
 0x5a8   :  { %v14149_v57 = vpop.f32.mrf.mxu0  ;;  %14452 = vmatmul.mubr.f32.gmra.mxu0 %v9047_v41  ;;  %v14027_v8 = vpop.f32.mrf.mxu1  ;;  %14330 = vmatmul.mubr.f32.gmra.mxu1 %v8521_v48  ;;  %v8524_v48 = vld [vmem:[#allocation2 + $0x2a0] sm:$0xff] }
 0x5a9   :  { %v19445_v61 = vadd.f32 %v14149_v57, %v7891_v52  ;;  %14454 = vmatprep.mubr.f32.mxu0 %v9048_v45  ;;  %v7895_v22 = vadd.f32 %v14027_v8, %v19216_v27  ;;  %14332 = vmatprep.mubr.f32.mxu1 %v8522_v33  ;;  %v9051_v8 = vld [vmem:[#allocation2 + $0x279] sm:$0xff]  ;;  %v8525_v33 = vld [vmem:[#allocation2 + $0x2a8] sm:$0xff] }
 0x5aa   :  { %v8133_v56 = vpop.f32.mrf.mxu0  ;;  %v7623_v31 = vpop.f32.mrf.mxu1 }
 0x5ab   :  { %v19448_v2 = vadd.f32 %v8133_v56, %v7890_v25  ;;  %v7894_v19 = vadd.f32 %v7623_v31, %v19219_v9  ;;  %v9052_v31 = vld [vmem:[#allocation2 + $0x289] sm:$0xff] }
 0x5ac   :  { %v14152_v13 = vpop.f32.mrf.mxu0  ;;  %14455 = vmatmul.mubr.f32.gmra.mxu0 %v9049_v26  ;;  %v14030_v41 = vpop.f32.mrf.mxu1  ;;  %14333 = vmatmul.mubr.f32.gmra.mxu1 %v8523_v12  ;;  %v8526_v12 = vld [vmem:[#allocation2 + $0x2b8] sm:$0xff] }
 0x5ad   :  { %v19451_v52 = vadd.f32 %v14152_v13, %v7893_v3  ;;  %14457 = vmatprep.mubr.f32.mxu0 %v9050_v47  ;;  %v7897_v27 = vadd.f32 %v14030_v41, %v19222_v50  ;;  %14335 = vmatprep.mubr.f32.mxu1 %v8524_v48  ;;  %v9053_v41 = vld [vmem:[#allocation2 + $0x291] sm:$0xff]  ;;  %v8527_v48 = vld [vmem:[#allocation2 + $0x2c0] sm:$0xff] }
 0x5ae   :  { %v8143_v57 = vpop.f32.mrf.mxu0  ;;  %v7633_v45 = vpop.f32.mrf.mxu1 }
 0x5af   :  { %v19454_v25 = vadd.f32 %v8143_v57, %v7892_v0  ;;  %v7896_v9 = vadd.f32 %v7633_v45, %v19225_v30  ;;  %v9054_v45 = vld [vmem:[#allocation2 + $0x2a1] sm:$0xff] }
 0x5b0   :  { %v14155_v56 = vpop.f32.mrf.mxu0  ;;  %14458 = vmatmul.mubr.f32.gmra.mxu0 %v9051_v8  ;;  %v14033_v26 = vpop.f32.mrf.mxu1  ;;  %14336 = vmatmul.mubr.f32.gmra.mxu1 %v8525_v33  ;;  %v8528_v33 = vld [vmem:[#allocation2 + $0x2d0] sm:$0xff] }
 0x5b1   :  { %v19457_v3 = vadd.f32 %v14155_v56, %v7895_v22  ;;  %14460 = vmatprep.mubr.f32.mxu0 %v9052_v31  ;;  %v7899_v50 = vadd.f32 %v14033_v26, %v19228_v35  ;;  %14338 = vmatprep.mubr.f32.mxu1 %v8526_v12  ;;  %v22055_v56 = vld [vmem:[#allocation89_spill] sm:$0xff] }
 0x5b2   :  { %v8153_v13 = vpop.f32.mrf.mxu0  ;;  %v7643_v47 = vpop.f32.mrf.mxu1  ;;  %v9055_v12 = vld [vmem:[#allocation2 + $0x2a9] sm:$0xff] }
 0x5b3   :  { %22053 = vst [vmem:[#allocation52_spill] sm:$0xff] %v19457_v3  ;;  %v19460_v0 = vadd.f32 %v8153_v13, %v7894_v19  ;;  %v7898_v30 = vadd.f32 %v7643_v47, %v19231_v55  ;;  %v22057_v13 = vld [vmem:[#allocation93_spill] sm:$0xff]  ;;  %v8529_v47 = vld [vmem:[#allocation2 + $0x2d8] sm:$0xff] }
 0x5b4   :  { %v14158_v57 = vpop.f32.mrf.mxu0  ;;  %14461 = vmatmul.mubr.f32.gmra.mxu0 %v9053_v41  ;;  %v14036_v8 = vpop.f32.mrf.mxu1  ;;  %14339 = vmatmul.mubr.f32.gmra.mxu1 %v8527_v48  ;;  %v9056_v41 = vld [vmem:[#allocation2 + $0x2b9] sm:$0xff]  ;;  %v8530_v48 = vld [vmem:[#allocation2 + $0x2e8] sm:$0xff] }
 0x5b5   :  { %22054 = vst [vmem:[#allocation26_spill] sm:$0xff] %v19460_v0  ;;  %v19463_v22 = vadd.f32 %v14158_v57, %v7897_v27  ;;  %14463 = vmatprep.mubr.f32.mxu0 %v9054_v45  ;;  %v7901_v35 = vadd.f32 %v14036_v8, %v22055_v56  ;;  %14341 = vmatprep.mubr.f32.mxu1 %v8528_v33  ;;  %v9057_v33 = vld [vmem:[#allocation2 + $0x2c1] sm:$0xff] }
 0x5b6   :  { %v8163_v31 = vpop.f32.mrf.mxu0  ;;  %v7653_v26 = vpop.f32.mrf.mxu1  ;;  %v22060_v56 = vld [vmem:[#allocation48_spill] sm:$0xff] }
 0x5b7   :  { %v19466_v19 = vadd.f32 %v8163_v31, %v7896_v9  ;;  %v7900_v55 = vadd.f32 %v7653_v26, %v22057_v13  ;;  %v8531_v26 = vld [vmem:[#allocation2 + $0x2f0] sm:$0xff] }
 0x5b8   :  { %v14161_v0 = vpop.f32.mrf.mxu0  ;;  %14464 = vmatmul.mubr.f32.gmra.mxu0 %v9055_v12  ;;  %v14039_v3 = vpop.f32.mrf.mxu1  ;;  %14342 = vmatmul.mubr.f32.gmra.mxu1 %v8529_v47  ;;  %v9058_v12 = vld [vmem:[#allocation2 + $0x2d1] sm:$0xff]  ;;  %v8532_v47 = vld [vmem:[#allocation2 + $0x300] sm:$0xff] }
 0x5b9   :  { %22056 = vst [vmem:[#allocation28_spill] sm:$0xff] %v19466_v19  ;;  %v19469_v27 = vadd.f32 %v14161_v0, %v7899_v50  ;;  %14466 = vmatprep.mubr.f32.mxu0 %v9056_v41  ;;  %v7903_v57 = vadd.f32 %v14039_v3, %v19240_v59  ;;  %14344 = vmatprep.mubr.f32.mxu1 %v8530_v48  ;;  %v22061_v0 = vld [vmem:[#allocation47_spill] sm:$0xff] }
 0x5ba   :  { %v8173_v45 = vpop.f32.mrf.mxu0  ;;  %v7663_v8 = vpop.f32.mrf.mxu1  ;;  %v9059_v48 = vld [vmem:[#allocation2 + $0x2d9] sm:$0xff] }
 0x5bb   :  { %22058 = vst [vmem:[#allocation55_spill] sm:$0xff] %v19469_v27  ;;  %v19472_v9 = vadd.f32 %v8173_v45, %v7898_v30  ;;  %v7902_v31 = vadd.f32 %v7663_v8, %v22060_v56  ;;  %v22063_v45 = vld [vmem:[#allocation91_spill] sm:$0xff]  ;;  %v8533_v56 = vld [vmem:[#allocation2 + $0x308] sm:$0xff] }
 0x5bc   :  { %v14164_v13 = vpop.f32.mrf.mxu0  ;;  %14467 = vmatmul.mubr.f32.gmra.mxu0 %v9057_v33  ;;  %v14042_v19 = vpop.f32.mrf.mxu1  ;;  %14345 = vmatmul.mubr.f32.gmra.mxu1 %v8531_v26  ;;  %v9060_v33 = vld [vmem:[#allocation2 + $0x2e9] sm:$0xff]  ;;  %v8534_v26 = vld [vmem:[#allocation2 + $0x318] sm:$0xff] }
 0x5bd   :  { %22059 = vst [vmem:[#allocation54_spill] sm:$0xff] %v19472_v9  ;;  %v19475_v50 = vadd.f32 %v14164_v13, %v7901_v35  ;;  %14469 = vmatprep.mubr.f32.mxu0 %v9058_v12  ;;  %v7905_v59 = vadd.f32 %v14042_v19, %v22061_v0  ;;  %14347 = vmatprep.mubr.f32.mxu1 %v8532_v47  ;;  %v9061_v47 = vld [vmem:[#allocation2 + $0x2f1] sm:$0xff]  ;;  %v22064_v0 = vld [vmem:[#allocation95_spill] sm:$0xff] }
 0x5be   :  { %v8183_v3 = vpop.f32.mrf.mxu0  ;;  %v7673_v41 = vpop.f32.mrf.mxu1 }
 0x5bf   :  { %v19478_v30 = vadd.f32 %v8183_v3, %v7900_v55  ;;  %v7904_v8 = vadd.f32 %v7673_v41, %v22063_v45  ;;  %v8535_v41 = vld [vmem:[#allocation2 + $0x320] sm:$0xff] }
 0x5c0   :  { %v14167_v9 = vpop.f32.mrf.mxu0  ;;  %14470 = vmatmul.mubr.f32.gmra.mxu0 %v9059_v48  ;;  %v14045_v27 = vpop.f32.mrf.mxu1  ;;  %14348 = vmatmul.mubr.f32.gmra.mxu1 %v8533_v56  ;;  %v9062_v48 = vld [vmem:[#allocation2 + $0x301] sm:$0xff]  ;;  %v8536_v56 = vld [vmem:[#allocation2 + $0x330] sm:$0xff] }
 0x5c1   :  { %22062 = vst [vmem:[#allocation27_spill] sm:$0xff] %v19478_v30  ;;  %v19481_v35 = vadd.f32 %v14167_v9, %v7903_v57  ;;  %14472 = vmatprep.mubr.f32.mxu0 %v9060_v33  ;;  %v7907_v19 = vadd.f32 %v14045_v27, %v19252_v43  ;;  %14350 = vmatprep.mubr.f32.mxu1 %v8534_v26  ;;  %v9063_v26 = vld [vmem:[#allocation2 + $0x309] sm:$0xff] }
 0x5c2   :  { %v8193_v13 = vpop.f32.mrf.mxu0  ;;  %v7683_v12 = vpop.f32.mrf.mxu1 }
 0x5c3   :  { %v19484_v55 = vadd.f32 %v8193_v13, %v7902_v31  ;;  %v7906_v3 = vadd.f32 %v7683_v12, %v22064_v0  ;;  %v8538_v31 = vld [vmem:[#allocation2 + $0x348] sm:$0xff]  ;;  %v8537_v12 = vld [vmem:[#allocation2 + $0x338] sm:$0xff] }
 0x5c4   :  { %v14170_v45 = vpop.f32.mrf.mxu0  ;;  %14473 = vmatmul.mubr.f32.gmra.mxu0 %v9061_v47  ;;  %v14048_v30 = vpop.f32.mrf.mxu1  ;;  %14351 = vmatmul.mubr.f32.gmra.mxu1 %v8535_v41  ;;  %v9064_v0 = vld [vmem:[#allocation2 + $0x319] sm:$0xff] }
 0x5c5   :  { %v19487_v57 = vadd.f32 %v14170_v45, %v7905_v59  ;;  %14475 = vmatprep.mubr.f32.mxu0 %v9062_v48  ;;  %v7909_v43 = vadd.f32 %v14048_v30, %v19258_v39  ;;  %14353 = vmatprep.mubr.f32.mxu1 %v8536_v56  ;;  %v22065_v56 = vld [vmem:[#allocation94_spill] sm:$0xff] }
 0x5c6   :  { %v8203_v27 = vpop.f32.mrf.mxu0  ;;  %v7693_v9 = vpop.f32.mrf.mxu1 }
 0x5c7   :  { %v19490_v33 = vadd.f32 %v8203_v27, %v7904_v8  ;;  %v7908_v13 = vadd.f32 %v7693_v9, %v19261_v42  ;;  %v9065_v8 = vld [vmem:[#allocation2 + $0x321] sm:$0xff]  ;;  %v9066_v9 = vld [vmem:[#allocation2 + $0x331] sm:$0xff] }
 0x5c8   :  { %v14173_v47 = vpop.f32.mrf.mxu0  ;;  %14476 = vmatmul.mubr.f32.gmra.mxu0 %v9063_v26  ;;  %v14051_v41 = vpop.f32.mrf.mxu1  ;;  %14354 = vmatmul.mubr.f32.gmra.mxu1 %v8537_v12  ;;  %v9536_v12 = vld [vmem:[#allocation2 + $0x32] sm:$0xff] }
 0x5c9   :  { %v19493_v59 = vadd.f32 %v14173_v47, %v7907_v19  ;;  %14478 = vmatprep.mubr.f32.mxu0 %v9064_v0  ;;  %v7911_v39 = vadd.f32 %v14051_v41, %v19267_v32  ;;  %14356 = vmatprep.mubr.f32.mxu1 %v8538_v31  ;;  %v9068_v47 = vld [vmem:[#allocation2 + $0x349] sm:$0xff]  ;;  %v9067_v41 = vld [vmem:[#allocation2 + $0x339] sm:$0xff] }
 0x5ca   :  { %v8213_v30 = vpop.f32.mrf.mxu0  ;;  %v7703_v45 = vpop.f32.mrf.mxu1 }
 0x5cb   :  { %v19496_v48 = vadd.f32 %v8213_v30, %v7906_v3  ;;  %v7910_v27 = vadd.f32 %v7703_v45, %v22065_v56  ;;  %v9537_v45 = vld [vmem:[#allocation2 + $0x3a] sm:$0xff] }
 0x5cc   :  { %v14176_v42 = vpop.f32.mrf.mxu0  ;;  %14479 = vmatmul.mubr.f32.gmra.mxu0 %v9065_v8  ;;  %v14054_v26 = vpop.f32.mrf.mxu1  ;;  %14357 = vmatmul.mubr.f32.gmra.mxu1 %v19400_v14  ;;  %v9538_v14 = vld [vmem:[#allocation2 + $0x4a] sm:$0xff] }
 0x5cd   :  { %v19500_v19 = vadd.f32 %v14176_v42, %v7909_v43  ;;  %14481 = vmatprep.mubr.f32.mxu0 %v9066_v9  ;;  %v7913_v32 = vadd.f32 %v14054_v26, %v19277_v34  ;;  %14519 = vmatprep.mubr.f32.mxu1 %v9536_v12  ;;  %v9069_v42 = vld [vmem:[#allocation2 + $0x351] sm:$0xff] }
 0x5ce   :  { %v8223_v31 = vpop.f32.mrf.mxu0  ;;  %v7713_v3 = vpop.f32.mrf.mxu1 }
 0x5cf   :  { %v19503_v0 = vadd.f32 %v8223_v31, %v7908_v13  ;;  %v7912_v30 = vadd.f32 %v7713_v3, %v19280_v37  ;;  %v9539_v37 = vld [vmem:[#allocation2 + $0x52] sm:$0xff] }
 0x5d0   :  { %v14179_v8 = vpop.f32.mrf.mxu0  ;;  %14482 = vmatmul.mubr.f32.gmra.mxu0 %v9067_v41  ;;  %v14057_v56 = vpop.f32.mrf.mxu1  ;;  %14520 = vmatmul.mubr.f32.vlgmr.msra.gmra.mxu1 %v9537_v45  ;;  %v9540_v41 = vld [vmem:[#allocation2 + $0x62] sm:$0xff] }
 0x5d1   :  { %v19506_v43 = vadd.f32 %v14179_v8, %v7911_v39  ;;  %14484 = vmatprep.mubr.f32.mxu0 %v9068_v47  ;;  %v7915_v34 = vadd.f32 %v14057_v56, %v19286_v36  ;;  %14522 = vmatprep.mubr.f32.mxu1 %v9538_v14  ;;  %v9541_v56 = vld [vmem:[#allocation2 + $0x6a] sm:$0xff] }
 0x5d2   :  { %v8233_v9 = vpop.f32.mrf.mxu0  ;;  %v7723_v26 = vpop.f32.mrf.mxu1 }
 0x5d3   :  { %v19509_v13 = vadd.f32 %v8233_v9, %v7910_v27  ;;  %v7914_v12 = vadd.f32 %v7723_v26, %v19289_v46  ;;  %v9542_v9 = vld [vmem:[#allocation2 + $0x7a] sm:$0xff] }
 0x5d4   :  { %v14182_v31 = vpop.f32.mrf.mxu0  ;;  %14485 = vmatmul.mubr.f32.gmra.mxu0 %v9069_v42  ;;  %v14060_v3 = vpop.f32.mrf.mxu1  ;;  %14523 = vmatmul.mubr.f32.gmra.mxu1 %v9539_v37 }
 0x5d5   :  { %v19512_v45 = vadd.f32 %v14182_v31, %v7913_v32  ;;  %v7917_v39 = vadd.f32 %v14060_v3, %v19295_v15  ;;  %14525 = vmatprep.mubr.f32.mxu1 %v9540_v41 }
 0x5d6   :  { %v8243_v47 = vpop.f32.mrf.mxu0  ;;  %v7733_v36 = vpop.f32.mrf.mxu1 }
 0x5d7   :  { %v19515_v8 = vadd.f32 %v8243_v47, %v7912_v30  ;;  %v7916_v27 = vadd.f32 %v7733_v36, %v19298_v16  ;;  %v9543_v30 = vld [vmem:[#allocation2 + $0x82] sm:$0xff]  ;;  %v9544_v16 = vld [vmem:[#allocation2 + $0x92] sm:$0xff] }
 0x5d8   :  { %v14185_v14 = vpop.f32.mrf.mxu0  ;;  %v14063_v46 = vpop.f32.mrf.mxu1  ;;  %14526 = vmatmul.mubr.f32.gmra.mxu1 %v9541_v56 }
 0x5d9   :  { %v19518_v42 = vadd.f32 %v14185_v14, %v7915_v34  ;;  %v7919_v26 = vadd.f32 %v14063_v46, %v19304_v62  ;;  %14528 = vmatprep.mubr.f32.mxu1 %v9542_v9 }
 0x5da   :  { %v8253_v32 = vpop.f32.mrf.mxu0  ;;  %v7743_v37 = vpop.f32.mrf.mxu1 }
 0x5db   :  { %v19521_v15 = vadd.f32 %v8253_v32, %v7914_v12  ;;  %v7918_v31 = vadd.f32 %v7743_v37, %v19307_v1  ;;  %v9545_v12 = vld [vmem:[#allocation2 + $0x9a] sm:$0xff]  ;;  %v9546_v1 = vld [vmem:[#allocation2 + $0xaa] sm:$0xff] }
 0x5dc   :  { %v14188_v3 = vpop.f32.mrf.mxu0  ;;  %v14066_v41 = vpop.f32.mrf.mxu1  ;;  %14529 = vmatmul.mubr.f32.gmra.mxu1 %v9543_v30 }
 0x5dd   :  { %v19524_v47 = vadd.f32 %v14188_v3, %v7917_v39  ;;  %v7921_v36 = vadd.f32 %v14066_v41, %v19313_v10  ;;  %14531 = vmatprep.mubr.f32.mxu1 %v9544_v16 }
 0x5de   :  { %v8263_v34 = vpop.f32.mrf.mxu0  ;;  %v7753_v56 = vpop.f32.mrf.mxu1 }
 0x5df   :  { %v19527_v62 = vadd.f32 %v8263_v34, %v7916_v27  ;;  %v7920_v14 = vadd.f32 %v7753_v56, %v19316_v44  ;;  %v9547_v27 = vld [vmem:[#allocation2 + $0xb2] sm:$0xff]  ;;  %v9548_v44 = vld [vmem:[#allocation2 + $0xc2] sm:$0xff] }
 0x5e0   :  { %v14191_v46 = vpop.f32.mrf.mxu0  ;;  %v14069_v9 = vpop.f32.mrf.mxu1  ;;  %14532 = vmatmul.mubr.f32.gmra.mxu1 %v9545_v12 }
 0x5e1   :  { %v19530_v32 = vadd.f32 %v14191_v46, %v7919_v26  ;;  %v7923_v37 = vadd.f32 %v14069_v9, %v19322_v38  ;;  %14534 = vmatprep.mubr.f32.mxu1 %v9546_v1 }
 0x5e2   :  { %v8273_v39 = vpop.f32.mrf.mxu0  ;;  %v7763_v30 = vpop.f32.mrf.mxu1 }
 0x5e3   :  { %v19533_v10 = vadd.f32 %v8273_v39, %v7918_v31  ;;  %v7922_v3 = vadd.f32 %v7763_v30, %v19325_v54  ;;  %v9549_v31 = vld [vmem:[#allocation2 + $0xca] sm:$0xff]  ;;  %v9550_v54 = vld [vmem:[#allocation2 + $0xda] sm:$0xff] }
 0x5e4   :  { %v14194_v41 = vpop.f32.mrf.mxu0  ;;  %v14072_v16 = vpop.f32.mrf.mxu1  ;;  %14535 = vmatmul.mubr.f32.gmra.mxu1 %v9547_v27  ;;  %v22069_v30 = vld [vmem:[#allocation96_spill] sm:$0xff] }
 0x5e5   :  { %v19536_v34 = vadd.f32 %v14194_v41, %v7921_v36  ;;  %v7925_v56 = vadd.f32 %v14072_v16, %v19331_v28  ;;  %14537 = vmatprep.mubr.f32.mxu1 %v9548_v44  ;;  %v22071_v16 = vld [vmem:[#allocation21_spill] sm:$0xff] }
 0x5e6   :  { %v8283_v26 = vpop.f32.mrf.mxu0  ;;  %v7773_v12 = vpop.f32.mrf.mxu1 }
 0x5e7   :  { %22066 = vst [vmem:[#allocation30_spill] sm:$0xff] %v19536_v34  ;;  %v19539_v38 = vadd.f32 %v8283_v26, %v7920_v14  ;;  %v7924_v46 = vadd.f32 %v7773_v12, %v19334_v49  ;;  %v9551_v14 = vld [vmem:[#allocation2 + $0xe2] sm:$0xff]  ;;  %v9552_v49 = vld [vmem:[#allocation2 + $0xf2] sm:$0xff] }
 0x5e8   :  { %v14197_v9 = vpop.f32.mrf.mxu0  ;;  %v14075_v1 = vpop.f32.mrf.mxu1  ;;  %14538 = vmatmul.mubr.f32.gmra.mxu1 %v9549_v31  ;;  %v22073_v31 = vld [vmem:[#allocation22_spill] sm:$0xff] }
 0x5e9   :  { %22067 = vst [vmem:[#allocation57_spill] sm:$0xff] %v19539_v38  ;;  %v19542_v39 = vadd.f32 %v14197_v9, %v7923_v37  ;;  %v7927_v27 = vadd.f32 %v14075_v1, %v22069_v30  ;;  %14540 = vmatprep.mubr.f32.mxu1 %v9550_v54  ;;  %v22075_v54 = vld [vmem:[#allocation49_spill] sm:$0xff] }
 0x5ea   :  { %v8293_v36 = vpop.f32.mrf.mxu0  ;;  %v7783_v41 = vpop.f32.mrf.mxu1 }
 0x5eb   :  { %22068 = vst [vmem:[#allocation56_spill] sm:$0xff] %v19542_v39  ;;  %v19545_v28 = vadd.f32 %v8293_v36, %v7922_v3  ;;  %v7926_v44 = vadd.f32 %v7783_v41, %v22071_v16  ;;  %v9553_v3 = vld [vmem:[#allocation2 + $0xfa] sm:$0xff]  ;;  %v9554_v41 = vld [vmem:[#allocation2 + $0x10a] sm:$0xff] }
 0x5ec   :  { %v14200_v26 = vpop.f32.mrf.mxu0  ;;  %v14078_v38 = vpop.f32.mrf.mxu1  ;;  %14541 = vmatmul.mubr.f32.gmra.mxu1 %v9551_v14  ;;  %v22077_v14 = vld [vmem:[#allocation23_spill] sm:$0xff] }
 0x5ed   :  { %22070 = vst [vmem:[#allocation29_spill] sm:$0xff] %v19545_v28  ;;  %v19548_v12 = vadd.f32 %v14200_v26, %v7925_v56  ;;  %v7929_v34 = vadd.f32 %v14078_v38, %v22073_v31  ;;  %14543 = vmatprep.mubr.f32.mxu1 %v9552_v49  ;;  %v22079_v49 = vld [vmem:[#allocation51_spill] sm:$0xff] }
 0x5ee   :  { %v8303_v37 = vpop.f32.mrf.mxu0  ;;  %v7793_v9 = vpop.f32.mrf.mxu1 }
 0x5ef   :  { %22072 = vst [vmem:[#allocation32_spill] sm:$0xff] %v19548_v12  ;;  %v19551_v1 = vadd.f32 %v8303_v37, %v7924_v46  ;;  %v7928_v30 = vadd.f32 %v7793_v9, %v22075_v54  ;;  %v9555_v46 = vld [vmem:[#allocation2 + $0x112] sm:$0xff]  ;;  %v9556_v9 = vld [vmem:[#allocation2 + $0x122] sm:$0xff] }
 0x5f0   :  { %v14203_v36 = vpop.f32.mrf.mxu0  ;;  %v14081_v28 = vpop.f32.mrf.mxu1  ;;  %14544 = vmatmul.mubr.f32.gmra.mxu1 %v9553_v3  ;;  %v22080_v3 = vld [vmem:[#allocation50_spill] sm:$0xff] }
 0x5f1   :  { %22074 = vst [vmem:[#allocation31_spill] sm:$0xff] %v19551_v1  ;;  %v19554_v16 = vadd.f32 %v14203_v36, %v7927_v27  ;;  %v7931_v39 = vadd.f32 %v14081_v28, %v22077_v14  ;;  %14546 = vmatprep.mubr.f32.mxu1 %v9554_v41  ;;  %v22082_v41 = vld [vmem:[#allocation25_spill] sm:$0xff] }
 0x5f2   :  { %v8313_v56 = vpop.f32.mrf.mxu0  ;;  %v7803_v26 = vpop.f32.mrf.mxu1 }
 0x5f3   :  { %22076 = vst [vmem:[#allocation60_spill] sm:$0xff] %v19554_v16  ;;  %v19557_v38 = vadd.f32 %v8313_v56, %v7926_v44  ;;  %v7930_v31 = vadd.f32 %v7803_v26, %v22079_v49  ;;  %v9557_v44 = vld [vmem:[#allocation2 + $0x12a] sm:$0xff]  ;;  %v9558_v26 = vld [vmem:[#allocation2 + $0x13a] sm:$0xff] }
 0x5f4   :  { %v14206_v37 = vpop.f32.mrf.mxu0  ;;  %v14084_v1 = vpop.f32.mrf.mxu1  ;;  %14547 = vmatmul.mubr.f32.gmra.mxu1 %v9555_v46  ;;  %v22083_v46 = vld [vmem:[#allocation24_spill] sm:$0xff] }
 0x5f5   :  { %22078 = vst [vmem:[#allocation58_spill] sm:$0xff] %v19557_v38  ;;  %v19560_v54 = vadd.f32 %v14206_v37, %v7929_v34  ;;  %v7933_v12 = vadd.f32 %v14084_v1, %v22080_v3  ;;  %14549 = vmatprep.mubr.f32.mxu1 %v9556_v9  ;;  %v22084_v9 = vld [vmem:[#allocation53_spill] sm:$0xff] }
 0x5f6   :  { %v8323_v27 = vpop.f32.mrf.mxu0  ;;  %v7813_v36 = vpop.f32.mrf.mxu1 }
 0x5f7   :  { %v19563_v28 = vadd.f32 %v8323_v27, %v7928_v30  ;;  %v7932_v14 = vadd.f32 %v7813_v36, %v22082_v41  ;;  %v9559_v30 = vld [vmem:[#allocation2 + $0x142] sm:$0xff]  ;;  %v9560_v36 = vld [vmem:[#allocation2 + $0x152] sm:$0xff] }
 0x5f8   :  { %v14209_v56 = vpop.f32.mrf.mxu0  ;;  %v14087_v38 = vpop.f32.mrf.mxu1  ;;  %14550 = vmatmul.mubr.f32.gmra.mxu1 %v9557_v44 }
 0x5f9   :  { %22081 = vst [vmem:[#allocation33_spill] sm:$0xff] %v19563_v28  ;;  %v19566_v49 = vadd.f32 %v14209_v56, %v7931_v39  ;;  %v7935_v16 = vadd.f32 %v14087_v38, %v22083_v46  ;;  %14552 = vmatprep.mubr.f32.mxu1 %v9558_v26 }
 0x5fa   :  { %v8333_v34 = vpop.f32.mrf.mxu0  ;;  %v7823_v37 = vpop.f32.mrf.mxu1 }
 0x5fb   :  { %v19569_v1 = vadd.f32 %v8333_v34, %v7930_v31  ;;  %v7934_v3 = vadd.f32 %v7823_v37, %v22084_v9  ;;  %v9561_v31 = vld [vmem:[#allocation2 + $0x15a] sm:$0xff]  ;;  %v9562_v37 = vld [vmem:[#allocation2 + $0x16a] sm:$0xff] }
 0x5fc   :  { %v14212_v27 = vpop.f32.mrf.mxu0  ;;  %v14090_v28 = vpop.f32.mrf.mxu1  ;;  %14553 = vmatmul.mubr.f32.gmra.mxu1 %v9559_v30 }
 0x5fd   :  { %v19572_v41 = vadd.f32 %v14212_v27, %v7933_v12  ;;  %v7937_v44 = vadd.f32 %v14090_v28, %v19385_v51  ;;  %14555 = vmatprep.mubr.f32.mxu1 %v9560_v36 }
 0x5fe   :  { %v8343_v39 = vpop.f32.mrf.mxu0  ;;  %v7833_v56 = vpop.f32.mrf.mxu1 }
 0x5ff   :  { %v19575_v38 = vadd.f32 %v8343_v39, %v7932_v14  ;;  %v7936_v26 = vadd.f32 %v7833_v56, %v19388_v24  ;;  %v9563_v14 = vld [vmem:[#allocation2 + $0x172] sm:$0xff]  ;;  %v9564_v24 = vld [vmem:[#allocation2 + $0x182] sm:$0xff] }
 0x600   :  { %v14215_v46 = vpop.f32.mrf.mxu0  ;;  %v14093_v34 = vpop.f32.mrf.mxu1  ;;  %14556 = vmatmul.mubr.f32.gmra.mxu1 %v9561_v31 }
 0x601   :  { %v19578_v9 = vadd.f32 %v14215_v46, %v7935_v16  ;;  %v7939_v30 = vadd.f32 %v14093_v34, %v19394_v21  ;;  %14558 = vmatprep.mubr.f32.mxu1 %v9562_v37  ;;  %v9566_v21 = vld [vmem:[#allocation2 + $0x19a] sm:$0xff]  ;;  %v9565_v37 = vld [vmem:[#allocation2 + $0x18a] sm:$0xff] }
 0x602   :  { %v8353_v12 = vpop.f32.mrf.mxu0  ;;  %v7843_v27 = vpop.f32.mrf.mxu1 }
 0x603   :  { %v19581_v51 = vadd.f32 %v8353_v12, %v7934_v3  ;;  %v7938_v28 = vadd.f32 %v7843_v27, %v19397_v7 }
 0x604   :  { %v14218_v36 = vpop.f32.mrf.mxu0  ;;  %v14096_v39 = vpop.f32.mrf.mxu1  ;;  %14559 = vmatmul.mubr.f32.gmra.mxu1 %v9563_v14 }
 0x605   :  { %v19584_v56 = vadd.f32 %v14218_v36, %v7937_v44  ;;  %v7941_v31 = vadd.f32 %v14096_v39, %v19403_v18  ;;  %14561 = vmatprep.mubr.f32.mxu1 %v9564_v24  ;;  %v9567_v44 = vld [vmem:[#allocation2 + $0x1a2] sm:$0xff] }
 0x606   :  { %v8363_v16 = vpop.f32.mrf.mxu0  ;;  %v7853_v46 = vpop.f32.mrf.mxu1 }
 0x607   :  { %v19587_v34 = vadd.f32 %v8363_v16, %v7936_v26  ;;  %v7940_v3 = vadd.f32 %v7853_v46, %v19406_v23  ;;  %v9568_v23 = vld [vmem:[#allocation2 + $0x1e2] sm:$0xff] }
 0x608   :  { %v14221_v12 = vpop.f32.mrf.mxu0  ;;  %v14099_v7 = vpop.f32.mrf.mxu1  ;;  %14562 = vmatmul.mubr.f32.gmra.mxu1 %v9565_v37 }
 0x609   :  { %v19590_v27 = vadd.f32 %v14221_v12, %v7939_v30  ;;  %v7943_v14 = vadd.f32 %v14099_v7, %v19409_v29  ;;  %14564 = vmatprep.mubr.f32.mxu1 %v9566_v21  ;;  %v9569_v7 = vld [vmem:[#allocation2 + $0x1ea] sm:$0xff] }
 0x60a   :  { %v8373_v36 = vpop.f32.mrf.mxu0  ;;  %v7863_v18 = vpop.f32.mrf.mxu1 }
 0x60b   :  { %v19593_v39 = vadd.f32 %v8373_v36, %v7938_v28  ;;  %v7942_v24 = vadd.f32 %v7863_v18, %v19412_v53  ;;  %v9570_v53 = vld [vmem:[#allocation2 + $0x1fa] sm:$0xff] }
 0x60c   :  { %v14224_v26 = vpop.f32.mrf.mxu0  ;;  %v14102_v16 = vpop.f32.mrf.mxu1  ;;  %14565 = vmatmul.mubr.f32.gmra.mxu1 %v9567_v44 }
 0x60d   :  { %v19596_v46 = vadd.f32 %v14224_v26, %v7941_v31  ;;  %v7945_v37 = vadd.f32 %v14102_v16, %v19415_v20  ;;  %14567 = vmatprep.mubr.f32.mxu1 %v9568_v23  ;;  %v9571_v16 = vld [vmem:[#allocation2 + $0x202] sm:$0xff] }
 0x60e   :  { %v8383_v30 = vpop.f32.mrf.mxu0  ;;  %v7873_v12 = vpop.f32.mrf.mxu1 }
 0x60f   :  { %v19599_v29 = vadd.f32 %v8383_v30, %v7940_v3  ;;  %v7944_v21 = vadd.f32 %v7873_v12, %v19418_v17  ;;  %v9572_v30 = vld [vmem:[#allocation2 + $0x212] sm:$0xff] }
 0x610   :  { %v14227_v28 = vpop.f32.mrf.mxu0  ;;  %v14265_v36 = vpop.f32.mrf.mxu1  ;;  %14568 = vmatmul.mubr.f32.gmra.mxu1 %v9569_v7 }
 0x611   :  { %v19602_v18 = vadd.f32 %v14227_v28, %v7943_v14  ;;  %v19605_v44 = vadd.f32 %v14265_v36, %v19421_v6  ;;  %14570 = vmatprep.mubr.f32.mxu1 %v9570_v53 }
 0x612   :  { %v8393_v31 = vpop.f32.mrf.mxu0  ;;  %v8623_v20 = vpop.f32.mrf.mxu1 }
 0x613   :  { %v19607_v26 = vadd.f32 %v8393_v31, %v7942_v24  ;;  %v19610_v3 = vadd.f32 %v8623_v20, %v19424_v4  ;;  %v9573_v4 = vld [vmem:[#allocation2 + $0x21a] sm:$0xff]  ;;  %v9574_v31 = vld [vmem:[#allocation2 + $0x22a] sm:$0xff] }
 0x614   :  { %v14230_v17 = vpop.f32.mrf.mxu0  ;;  %v14268_v23 = vpop.f32.mrf.mxu1  ;;  %14571 = vmatmul.mubr.f32.gmra.mxu1 %v9571_v16 }
 0x615   :  { %v19612_v12 = vadd.f32 %v14230_v17, %v7945_v37  ;;  %v19615_v14 = vadd.f32 %v14268_v23, %v19427_v58  ;;  %14573 = vmatprep.mubr.f32.mxu1 %v9572_v30  ;;  %v9576_v23 = vld [vmem:[#allocation2 + $0x242] sm:$0xff] }
 0x616   :  { %v8403_v6 = vpop.f32.mrf.mxu0  ;;  %v8633_v7 = vpop.f32.mrf.mxu1 }
 0x617   :  { %v19617_v28 = vadd.f32 %v8403_v6, %v7944_v21  ;;  %v19620_v24 = vadd.f32 %v8633_v7, %v19430_v11  ;;  %v9575_v21 = vld [vmem:[#allocation2 + $0x232] sm:$0xff] }
 0x618   :  { %v19622_v36 = vpop.f32.mrf.mxu0  ;;  %v14271_v53 = vpop.f32.mrf.mxu1  ;;  %14574 = vmatmul.mubr.f32.gmra.mxu1 %v9573_v4  ;;  %v9577_v4 = vld [vmem:[#allocation2 + $0x24a] sm:$0xff] }
 0x619   :  { %v19625_v37 = vadd.f32 %v14271_v53, %v19433_v60  ;;  %14576 = vmatprep.mubr.f32.mxu1 %v9574_v31  ;;  %v9578_v31 = vld [vmem:[#allocation2 + $0x25a] sm:$0xff] }
 0x61a   :  { %v19627_v58 = vpop.f32.mrf.mxu0  ;;  %v8643_v20 = vpop.f32.mrf.mxu1 }
 0x61b   :  { %v19630_v16 = vadd.f32 %v8643_v20, %v19436_v63 }
 0x61c   :  { %v19632_v17 = vpop.f32.mrf.mxu0  ;;  %v14274_v11 = vpop.f32.mrf.mxu1  ;;  %14577 = vmatmul.mubr.f32.gmra.mxu1 %v9575_v21 }
 0x61d   :  { %v19635_v30 = vadd.f32 %v14274_v11, %v19439_v40  ;;  %14579 = vmatprep.mubr.f32.mxu1 %v9576_v23  ;;  %v9579_v23 = vld [vmem:[#allocation2 + $0x262] sm:$0xff] }
 0x61e   :  { %v19637_v6 = vpop.f32.mrf.mxu0  ;;  %v8653_v60 = vpop.f32.mrf.mxu1 }
 0x61f   :  { %22085 = vst [vmem:[#allocation34_spill] sm:$0xff] %v19635_v30  ;;  %v19640_v7 = vadd.f32 %v8653_v60, %v19442_v5  ;;  %v9580_v5 = vld [vmem:[#allocation2 + $0x272] sm:$0xff] }
 0x620   :  { %v19642_v53 = vpop.f32.mrf.mxu0  ;;  %v14277_v63 = vpop.f32.mrf.mxu1  ;;  %14580 = vmatmul.mubr.f32.gmra.mxu1 %v9577_v4 }
 0x621   :  { %22086 = vst [vmem:[#allocation62_spill] sm:$0xff] %v19640_v7  ;;  %v19645_v20 = vadd.f32 %v14277_v63, %v19445_v61  ;;  %14582 = vmatprep.mubr.f32.mxu1 %v9578_v31  ;;  %v9581_v63 = vld [vmem:[#allocation2 + $0x27a] sm:$0xff] }
 0x622   :  { %v19647_v21 = vpop.f32.mrf.mxu0  ;;  %v8663_v40 = vpop.f32.mrf.mxu1 }
 0x623   :  { %22087 = vst [vmem:[#allocation59_spill] sm:$0xff] %v19645_v20  ;;  %v19650_v11 = vadd.f32 %v8663_v40, %v19448_v2  ;;  %v9582_v20 = vld [vmem:[#allocation2 + $0x28a] sm:$0xff] }
 0x624   :  { %v14280_v30 = vpop.f32.mrf.mxu1  ;;  %14583 = vmatmul.mubr.f32.gmra.mxu1 %v9579_v23  ;;  %v19655_v4 = vpop.f32.mrf.mxu0  ;;  %v22092_v2 = vld [vmem:[#allocation52_spill] sm:$0xff] }
 0x625   :  { %22088 = vst [vmem:[#allocation35_spill] sm:$0xff] %v19650_v11  ;;  %v19653_v60 = vadd.f32 %v14280_v30, %v19451_v52  ;;  %14585 = vmatprep.mubr.f32.mxu1 %v9580_v5  ;;  %22090 = vst [vmem:[#allocation64_spill] sm:$0xff] %v19655_v4  ;;  %v22094_v52 = vld [vmem:[#allocation26_spill] sm:$0xff]  ;;  %v9584_v4 = vld [vmem:[#allocation2 + $0x2a2] sm:$0xff] }
 0x626   :  { %v8673_v7 = vpop.f32.mrf.mxu1  ;;  %v19663_v23 = vpop.f32.mrf.mxu0  ;;  %v9583_v5 = vld [vmem:[#allocation2 + $0x292] sm:$0xff] }
 0x627   :  { %22089 = vst [vmem:[#allocation36_spill] sm:$0xff] %v19653_v60  ;;  %v19658_v61 = vadd.f32 %v8673_v7, %v19454_v25 }
 0x628   :  { %v14283_v31 = vpop.f32.mrf.mxu1  ;;  %14586 = vmatmul.mubr.f32.gmra.mxu1 %v9581_v63  ;;  %v19671_v7 = vpop.f32.mrf.mxu0 }
 0x629   :  { %22091 = vst [vmem:[#allocation61_spill] sm:$0xff] %v19658_v61  ;;  %v19661_v40 = vadd.f32 %v14283_v31, %v22092_v2  ;;  %14588 = vmatprep.mubr.f32.mxu1 %v9582_v20  ;;  %22097 = vst [vmem:[#allocation66_spill] sm:$0xff] %v19671_v7  ;;  %v22098_v31 = vld [vmem:[#allocation28_spill] sm:$0xff]  ;;  %v9586_v61 = vld [vmem:[#allocation2 + $0x2ba] sm:$0xff] }
 0x62a   :  { %v8683_v11 = vpop.f32.mrf.mxu1  ;;  %v9585_v20 = vld [vmem:[#allocation2 + $0x2aa] sm:$0xff]  ;;  %v9588_v7 = vld [vmem:[#allocation2 + $0x2d2] sm:$0xff] }
 0x62b   :  { %22093 = vst [vmem:[#allocation92_spill] sm:$0xff] %v19661_v40  ;;  %v19666_v30 = vadd.f32 %v8683_v11, %v22094_v52  ;;  %v22100_v11 = vld [vmem:[#allocation55_spill] sm:$0xff] }
 0x62c   :  { %v14286_v60 = vpop.f32.mrf.mxu1  ;;  %14589 = vmatmul.mubr.f32.gmra.mxu1 %v9583_v5  ;;  %v19679_v5 = vpop.f32.mrf.mxu0 }
 0x62d   :  { %22095 = vst [vmem:[#allocation37_spill] sm:$0xff] %v19666_v30  ;;  %v19669_v25 = vadd.f32 %v14286_v60, %v19463_v22  ;;  %14591 = vmatprep.mubr.f32.mxu1 %v9584_v4  ;;  %v22102_v22 = vld [vmem:[#allocation54_spill] sm:$0xff]  ;;  %v9587_v4 = vld [vmem:[#allocation2 + $0x2c2] sm:$0xff] }
 0x62e   :  { %v8693_v63 = vpop.f32.mrf.mxu1 }
 0x62f   :  { %22096 = vst [vmem:[#allocation63_spill] sm:$0xff] %v19669_v25  ;;  %v19674_v2 = vadd.f32 %v8693_v63, %v22098_v31  ;;  %v19687_v31 = vpop.f32.mrf.mxu0 }
 0x630   :  { %v14289_v40 = vpop.f32.mrf.mxu1  ;;  %14592 = vmatmul.mubr.f32.gmra.mxu1 %v9585_v20 }
 0x631   :  { %22099 = vst [vmem:[#allocation40_spill] sm:$0xff] %v19674_v2  ;;  %v19677_v52 = vadd.f32 %v14289_v40, %v22100_v11  ;;  %14594 = vmatprep.mubr.f32.mxu1 %v9586_v61  ;;  %v22104_v40 = vld [vmem:[#allocation27_spill] sm:$0xff]  ;;  %v9590_v2 = vld [vmem:[#allocation2 + $0x2ea] sm:$0xff] }
 0x632   :  { %v8703_v30 = vpop.f32.mrf.mxu1  ;;  %v9589_v61 = vld [vmem:[#allocation2 + $0x2da] sm:$0xff] }
 0x633   :  { %22101 = vst [vmem:[#allocation39_spill] sm:$0xff] %v19677_v52  ;;  %v19682_v60 = vadd.f32 %v8703_v30, %v22102_v22  ;;  %v19695_v22 = vpop.f32.mrf.mxu0 }
 0x634   :  { %v14292_v25 = vpop.f32.mrf.mxu1  ;;  %14595 = vmatmul.mubr.f32.gmra.mxu1 %v9587_v4 }
 0x635   :  { %v19685_v63 = vadd.f32 %v14292_v25, %v19475_v50  ;;  %14597 = vmatprep.mubr.f32.mxu1 %v9588_v7  ;;  %v9591_v25 = vld [vmem:[#allocation2 + $0x2f2] sm:$0xff] }
 0x636   :  { %v8713_v20 = vpop.f32.mrf.mxu1 }
 0x637   :  { %22103 = vst [vmem:[#allocation65_spill] sm:$0xff] %v19685_v63  ;;  %v19690_v11 = vadd.f32 %v8713_v20, %v22104_v40  ;;  %v9592_v63 = vld [vmem:[#allocation2 + $0x302] sm:$0xff]  ;;  %v19703_v40 = vpop.f32.mrf.mxu0 }
 0x638   :  { %v14295_v52 = vpop.f32.mrf.mxu1  ;;  %14598 = vmatmul.mubr.f32.gmra.mxu1 %v9589_v61 }
 0x639   :  { %v19693_v30 = vadd.f32 %v14295_v52, %v19481_v35  ;;  %14600 = vmatprep.mubr.f32.mxu1 %v9590_v2  ;;  %v9593_v2 = vld [vmem:[#allocation2 + $0x30a] sm:$0xff] }
 0x63a   :  { %v8723_v4 = vpop.f32.mrf.mxu1 }
 0x63b   :  { %22105 = vst [vmem:[#allocation68_spill] sm:$0xff] %v19693_v30  ;;  %v19698_v50 = vadd.f32 %v8723_v4, %v19484_v55  ;;  %v9594_v30 = vld [vmem:[#allocation2 + $0x31a] sm:$0xff]  ;;  %v19711_v4 = vpop.f32.mrf.mxu0 }
 0x63c   :  { %v14298_v7 = vpop.f32.mrf.mxu1  ;;  %14601 = vmatmul.mubr.f32.gmra.mxu1 %v9591_v25 }
 0x63d   :  { %v19701_v20 = vadd.f32 %v14298_v7, %v19487_v57  ;;  %14603 = vmatprep.mubr.f32.mxu1 %v9592_v63  ;;  %v9595_v63 = vld [vmem:[#allocation2 + $0x322] sm:$0xff] }
 0x63e   :  { %v8733_v61 = vpop.f32.mrf.mxu1 }
 0x63f   :  { %22106 = vst [vmem:[#allocation42_spill] sm:$0xff] %v19701_v20  ;;  %v19706_v35 = vadd.f32 %v8733_v61, %v19490_v33  ;;  %v9596_v20 = vld [vmem:[#allocation2 + $0x332] sm:$0xff]  ;;  %v19719_v61 = vpop.f32.mrf.mxu0 }
 0x640   :  { %v14301_v52 = vpop.f32.mrf.mxu1  ;;  %14604 = vmatmul.mubr.f32.gmra.mxu1 %v9593_v2 }
 0x641   :  { %v19709_v55 = vadd.f32 %v14301_v52, %v19493_v59  ;;  %14606 = vmatprep.mubr.f32.mxu1 %v9594_v30  ;;  %v9598_v59 = vld [vmem:[#allocation2 + $0x34a] sm:$0xff]  ;;  %v9597_v52 = vld [vmem:[#allocation2 + $0x33a] sm:$0xff] }
 0x642   :  { %v8743_v25 = vpop.f32.mrf.mxu1 }
 0x643   :  { %22107 = vst [vmem:[#allocation41_spill] sm:$0xff] %v19709_v55  ;;  %v19714_v57 = vadd.f32 %v8743_v25, %v19496_v48  ;;  %v9599_v25 = vld [vmem:[#allocation2 + $0x352] sm:$0xff] }
 0x644   :  { %v14304_v7 = vpop.f32.mrf.mxu1  ;;  %14607 = vmatmul.mubr.f32.gmra.mxu1 %v9595_v63  ;;  %v19727_v63 = vpop.f32.mrf.mxu0 }
 0x645   :  { %v19717_v33 = vadd.f32 %v14304_v7, %v19500_v19  ;;  %14609 = vmatprep.mubr.f32.mxu1 %v9596_v20 }
 0x646   :  { %v8753_v2 = vpop.f32.mrf.mxu1 }
 0x647   :  { %22108 = vst [vmem:[#allocation67_spill] sm:$0xff] %v19717_v33  ;;  %v19722_v30 = vadd.f32 %v8753_v2, %v19503_v0  ;;  %v19735_v0 = vpop.f32.mrf.mxu0 }
 0x648   :  { %v14307_v55 = vpop.f32.mrf.mxu1  ;;  %14610 = vmatmul.mubr.f32.gmra.mxu1 %v9597_v52 }
 0x649   :  { %22109 = vst [vmem:[#allocation70_spill] sm:$0xff] %v19722_v30  ;;  %v19725_v48 = vadd.f32 %v14307_v55, %v19506_v43  ;;  %14612 = vmatprep.mubr.f32.mxu1 %v9598_v59  ;;  %v19743_v59 = vpop.f32.mrf.mxu0  ;;  %v22133_v30 = vld [vmem:[#allocation58_spill] sm:$0xff] }
 0x64a   :  { %v8763_v19 = vpop.f32.mrf.mxu1 }
 0x64b   :  { %22110 = vst [vmem:[#allocation44_spill] sm:$0xff] %v19725_v48  ;;  %v19730_v20 = vadd.f32 %v8763_v19, %v19509_v13  ;;  %v19751_v19 = vpop.f32.mrf.mxu0 }
 0x64c   :  { %v14310_v7 = vpop.f32.mrf.mxu1  ;;  %14613 = vmatmul.mubr.f32.gmra.mxu1 %v9599_v25 }
 0x64d   :  { %22111 = vst [vmem:[#allocation43_spill] sm:$0xff] %v19730_v20  ;;  %v19733_v33 = vadd.f32 %v14310_v7, %v19512_v45  ;;  %v22130_v20 = vld [vmem:[#allocation31_spill] sm:$0xff] }
 0x64e   :  { %v8773_v2 = vpop.f32.mrf.mxu1 }
 0x64f   :  { %22112 = vst [vmem:[#allocation69_spill] sm:$0xff] %v19733_v33  ;;  %v19738_v52 = vadd.f32 %v8773_v2, %v19515_v8  ;;  %v22126_v33 = vld [vmem:[#allocation29_spill] sm:$0xff] }
 0x650   :  { %v14313_v43 = vpop.f32.mrf.mxu1 }
 0x651   :  { %22113 = vst [vmem:[#allocation72_spill] sm:$0xff] %v19738_v52  ;;  %v19741_v55 = vadd.f32 %v14313_v43, %v19518_v42  ;;  %v19759_v43 = vpop.f32.mrf.mxu0  ;;  %v22122_v52 = vld [vmem:[#allocation57_spill] sm:$0xff] }
 0x652   :  { %v8783_v48 = vpop.f32.mrf.mxu1 }
 0x653   :  { %22114 = vst [vmem:[#allocation46_spill] sm:$0xff] %v19741_v55  ;;  %v19746_v13 = vadd.f32 %v8783_v48, %v19521_v15 }
 0x654   :  { %v14316_v25 = vpop.f32.mrf.mxu1 }
 0x655   :  { %22115 = vst [vmem:[#allocation45_spill] sm:$0xff] %v19746_v13  ;;  %v19749_v45 = vadd.f32 %v14316_v25, %v19524_v47  ;;  %v22120_v13 = vld [vmem:[#allocation30_spill] sm:$0xff]  ;;  %v19767_v25 = vpop.f32.mrf.mxu0 }
 0x656   :  { %v8793_v7 = vpop.f32.mrf.mxu1 }
 0x657   :  { %22116 = vst [vmem:[#allocation71_spill] sm:$0xff] %v19749_v45  ;;  %v19754_v8 = vadd.f32 %v8793_v7, %v19527_v62 }
 0x658   :  { %v14319_v2 = vpop.f32.mrf.mxu1 }
 0x659   :  { %22117 = vst [vmem:[#allocation74_spill] sm:$0xff] %v19754_v8  ;;  %v19757_v42 = vadd.f32 %v14319_v2, %v19530_v32  ;;  %v22124_v8 = vld [vmem:[#allocation56_spill] sm:$0xff]  ;;  %v19775_v2 = vpop.f32.mrf.mxu0 }
 0x65a   :  { %v8803_v55 = vpop.f32.mrf.mxu1 }
 0x65b   :  { %22118 = vst [vmem:[#allocation5_spill] sm:$0xff] %v19757_v42  ;;  %v19762_v15 = vadd.f32 %v8803_v55, %v19533_v10 }
 0x65c   :  { %v14322_v48 = vpop.f32.mrf.mxu1 }
 0x65d   :  { %22119 = vst [vmem:[#allocation4_spill] sm:$0xff] %v19762_v15  ;;  %v19765_v47 = vadd.f32 %v14322_v48, %v22120_v13  ;;  %v22128_v15 = vld [vmem:[#allocation32_spill] sm:$0xff]  ;;  %v19783_v48 = vpop.f32.mrf.mxu0 }
 0x65e   :  { %v8813_v45 = vpop.f32.mrf.mxu1 }
 0x65f   :  { %22121 = vst [vmem:[#allocation73_spill] sm:$0xff] %v19765_v47  ;;  %v19770_v62 = vadd.f32 %v8813_v45, %v22122_v52 }
 0x660   :  { %v14325_v7 = vpop.f32.mrf.mxu1 }
 0x661   :  { %22123 = vst [vmem:[#allocation76_spill] sm:$0xff] %v19770_v62  ;;  %v19773_v32 = vadd.f32 %v14325_v7, %v22124_v8  ;;  %v22131_v62 = vld [vmem:[#allocation60_spill] sm:$0xff]  ;;  %v19791_v7 = vpop.f32.mrf.mxu0 }
 0x662   :  { %v8823_v42 = vpop.f32.mrf.mxu1 }
 0x663   :  { %22125 = vst [vmem:[#allocation7_spill] sm:$0xff] %v19773_v32  ;;  %v19778_v10 = vadd.f32 %v8823_v42, %v22126_v33 }
 0x664   :  { %v14328_v55 = vpop.f32.mrf.mxu1 }
 0x665   :  { %22127 = vst [vmem:[#allocation6_spill] sm:$0xff] %v19778_v10  ;;  %v19781_v13 = vadd.f32 %v14328_v55, %v22128_v15  ;;  %v19799_v55 = vpop.f32.mrf.mxu0  ;;  %v22135_v10 = vld [vmem:[#allocation33_spill] sm:$0xff] }
 0x666   :  { %v8833_v47 = vpop.f32.mrf.mxu1 }
 0x667   :  { %22129 = vst [vmem:[#allocation75_spill] sm:$0xff] %v19781_v13  ;;  %v19786_v52 = vadd.f32 %v8833_v47, %v22130_v20 }
 0x668   :  { %v14331_v45 = vpop.f32.mrf.mxu1 }
 0x669   :  { %v19789_v8 = vadd.f32 %v14331_v45, %v22131_v62  ;;  %v19807_v45 = vpop.f32.mrf.mxu0 }
 0x66a   :  { %v8843_v32 = vpop.f32.mrf.mxu1 }
 0x66b   :  { %22132 = vst [vmem:[#allocation8_spill] sm:$0xff] %v19789_v8  ;;  %v19794_v33 = vadd.f32 %v8843_v32, %v22133_v30 }
 0x66c   :  { %v14334_v42 = vpop.f32.mrf.mxu1 }
 0x66d   :  { %v19797_v15 = vadd.f32 %v14334_v42, %v19560_v54  ;;  %v19815_v42 = vpop.f32.mrf.mxu0 }
 0x66e   :  { %v8853_v13 = vpop.f32.mrf.mxu1 }
 0x66f   :  { %22134 = vst [vmem:[#allocation3_spill] sm:$0xff] %v19797_v15  ;;  %v19802_v20 = vadd.f32 %v8853_v13, %v22135_v10 }
 0x670   :  { %v14337_v47 = vpop.f32.mrf.mxu1 }
 0x671   :  { %v19805_v62 = vadd.f32 %v14337_v47, %v19566_v49  ;;  %v19823_v47 = vpop.f32.mrf.mxu0 }
 0x672   :  { %v8863_v8 = vpop.f32.mrf.mxu1 }
 0x673   :  { %22136 = vst [vmem:[#allocation80_spill] sm:$0xff] %v19805_v62  ;;  %v19810_v30 = vadd.f32 %v8863_v8, %v19569_v1 }
 0x674   :  { %v14340_v32 = vpop.f32.mrf.mxu1 }
 0x675   :  { %v19813_v54 = vadd.f32 %v14340_v32, %v19572_v41  ;;  %v19831_v32 = vpop.f32.mrf.mxu0 }
 0x676   :  { %v8873_v15 = vpop.f32.mrf.mxu1 }
 0x677   :  { %22137 = vst [vmem:[#allocation77_spill] sm:$0xff] %v19813_v54  ;;  %v19818_v10 = vadd.f32 %v8873_v15, %v19575_v38 }
 0x678   :  { %v14343_v13 = vpop.f32.mrf.mxu1 }
 0x679   :  { %v19821_v49 = vadd.f32 %v14343_v13, %v19578_v9  ;;  %v19839_v13 = vpop.f32.mrf.mxu0 }
 0x67a   :  { %v8883_v62 = vpop.f32.mrf.mxu1 }
 0x67b   :  { %22138 = vst [vmem:[#allocation10_spill] sm:$0xff] %v19821_v49  ;;  %v19826_v1 = vadd.f32 %v8883_v62, %v19581_v51 }
 0x67c   :  { %v14346_v8 = vpop.f32.mrf.mxu1 }
 0x67d   :  { %v19829_v41 = vadd.f32 %v14346_v8, %v19584_v56  ;;  %v19847_v8 = vpop.f32.mrf.mxu0 }
 0x67e   :  { %v8893_v54 = vpop.f32.mrf.mxu1 }
 0x67f   :  { %22139 = vst [vmem:[#allocation9_spill] sm:$0xff] %v19829_v41  ;;  %v19834_v38 = vadd.f32 %v8893_v54, %v19587_v34 }
 0x680   :  { %v14349_v15 = vpop.f32.mrf.mxu1 }
 0x681   :  { %v19837_v9 = vadd.f32 %v14349_v15, %v19590_v27  ;;  %v19855_v15 = vpop.f32.mrf.mxu0 }
 0x682   :  { %v8903_v49 = vpop.f32.mrf.mxu1 }
 0x683   :  { %22140 = vst [vmem:[#allocation79_spill] sm:$0xff] %v19837_v9  ;;  %v19842_v51 = vadd.f32 %v8903_v49, %v19593_v39 }
 0x684   :  { %v14352_v62 = vpop.f32.mrf.mxu1 }
 0x685   :  { %v19845_v56 = vadd.f32 %v14352_v62, %v19596_v46  ;;  %v19863_v62 = vpop.f32.mrf.mxu0 }
 0x686   :  { %v8913_v41 = vpop.f32.mrf.mxu1 }
 0x687   :  { %22141 = vst [vmem:[#allocation78_spill] sm:$0xff] %v19845_v56  ;;  %v19850_v34 = vadd.f32 %v8913_v41, %v19599_v29 }
 0x688   :  { %v14355_v54 = vpop.f32.mrf.mxu1 }
 0x689   :  { %v19853_v27 = vadd.f32 %v14355_v54, %v19602_v18  ;;  %v9473_v18 = vadd.f32 %v19622_v36, %v19605_v44  ;;  %v9472_v54 = vadd.f32 %v19627_v58, %v19610_v3 }
 0x68a   :  { %v8923_v9 = vpop.f32.mrf.mxu1 }
 0x68b   :  { %22142 = vst [vmem:[#allocation82_spill] sm:$0xff] %v19853_v27  ;;  %v19858_v39 = vadd.f32 %v8923_v9, %v19607_v26  ;;  %v19872_v27 = vpop.f32.mrf.mxu0 }
 0x68c   :  { %v14358_v49 = vpop.f32.mrf.mxu1 }
 0x68d   :  { %22143 = vst [vmem:[#allocation12_spill] sm:$0xff] %v19858_v39  ;;  %v19861_v46 = vadd.f32 %v14358_v49, %v19612_v12  ;;  %v19884_v36 = vpop.f32.mrf.mxu0 }
 0x68e   :  { %v8933_v56 = vpop.f32.mrf.mxu1 }
 0x68f   :  { %22144 = vst [vmem:[#allocation11_spill] sm:$0xff] %v19861_v46  ;;  %v19866_v29 = vadd.f32 %v8933_v56, %v19617_v28  ;;  %v9475_v46 = vadd.f32 %v19632_v17, %v19615_v14  ;;  %v9474_v28 = vadd.f32 %v19637_v6, %v19620_v24  ;;  %v9477_v14 = vadd.f32 %v19642_v53, %v19625_v37 }
 0x690   :  { %v14521_v41 = vpop.f32.mrf.mxu1  ;;  %v9476_v17 = vadd.f32 %v19647_v21, %v19630_v16  ;;  %v22151_v16 = vld [vmem:[#allocation34_spill] sm:$0xff]  ;;  %v22152_v21 = vld [vmem:[#allocation64_spill] sm:$0xff] }
 0x691   :  { %22145 = vst [vmem:[#allocation81_spill] sm:$0xff] %v19866_v29  ;;  %v19874_v9 = vadd.f32 %v14521_v41, %v9473_v18  ;;  %v19901_v29 = vpop.f32.mrf.mxu0 }
 0x692   :  { %v9683_v26 = vpop.f32.mrf.mxu1 }
 0x693   :  { %22146 = vst [vmem:[#allocation84_spill] sm:$0xff] %v19874_v9  ;;  %v19876_v12 = vadd.f32 %v9683_v26, %v9472_v54  ;;  %v10137_v58 = vmul.f32 %v19874_v9, %v19874_v9 }
 0x694   :  { %v14524_v49 = vpop.f32.mrf.mxu1 }
 0x695   :  { %22147 = vst [vmem:[#allocation14_spill] sm:$0xff] %v19876_v12  ;;  %v10136_v44 = vmul.f32 %v19876_v12, %v19876_v12  ;;  %v10066_v56 = vadd.f32 %v19874_v9, %v19876_v12  ;;  %v19890_v41 = vadd.f32 %v14524_v49, %v9475_v46  ;;  %v19917_v12 = vpop.f32.mrf.mxu0 }
 0x696   :  { %v9693_v3 = vpop.f32.mrf.mxu1 }
 0x697   :  { %22148 = vst [vmem:[#allocation13_spill] sm:$0xff] %v19890_v41  ;;  %v19892_v18 = vadd.f32 %v9693_v3, %v9474_v28  ;;  %v10200_v6 = vadd.f32 %v10137_v58, %v10136_v44  ;;  %v10139_v49 = vmul.f32 %v19890_v41, %v19890_v41  ;;  %v9479_v44 = vadd.f32 %v22152_v21, %v22151_v16  ;;  %v22153_v58 = vld [vmem:[#allocation62_spill] sm:$0xff]  ;;  %v22157_v21 = vld [vmem:[#allocation35_spill] sm:$0xff] }
 0x698   :  { %v14527_v24 = vpop.f32.mrf.mxu1 }
 0x699   :  { %22149 = vst [vmem:[#allocation83_spill] sm:$0xff] %v19892_v18  ;;  %v10067_v54 = vadd.f32 %v10066_v56, %v19892_v18  ;;  %v10138_v26 = vmul.f32 %v19892_v18, %v19892_v18  ;;  %v19903_v9 = vadd.f32 %v14527_v24, %v9477_v14  ;;  %v9478_v56 = vadd.f32 %v19663_v23, %v22153_v58  ;;  %v22155_v23 = vld [vmem:[#allocation59_spill] sm:$0xff] }
 0x69a   :  { %v9703_v46 = vpop.f32.mrf.mxu1  ;;  %v9480_v58 = vadd.f32 %v19679_v5, %v22157_v21  ;;  %v22159_v5 = vld [vmem:[#allocation36_spill] sm:$0xff] }
 0x69b   :  { %v10068_v37 = vadd.f32 %v10067_v54, %v19890_v41  ;;  %v10201_v53 = vadd.f32 %v10200_v6, %v10138_v26  ;;  %v19908_v28 = vadd.f32 %v9703_v46, %v9476_v17  ;;  %v10141_v6 = vmul.f32 %v19903_v9, %v19903_v9 }
 0x69c   :  { %v14530_v3 = vpop.f32.mrf.mxu1 }
 0x69d   :  { %22150 = vst [vmem:[#allocation86_spill] sm:$0xff] %v19908_v28  ;;  %v10202_v18 = vadd.f32 %v10201_v53, %v10139_v49  ;;  %v10069_v14 = vadd.f32 %v10068_v37, %v19908_v28  ;;  %v10140_v24 = vmul.f32 %v19908_v28, %v19908_v28  ;;  %v19921_v26 = vadd.f32 %v14530_v3, %v9479_v44  ;;  %v22156_v49 = vld [vmem:[#allocation66_spill] sm:$0xff] }
 0x69e   :  { %v9713_v17 = vpop.f32.mrf.mxu1  ;;  %v9481_v53 = vadd.f32 %v22156_v49, %v22155_v23  ;;  %v22160_v49 = vld [vmem:[#allocation61_spill] sm:$0xff] }
 0x69f   :  { %v10203_v54 = vadd.f32 %v10202_v18, %v10140_v24  ;;  %22154 = vst [vmem:[#allocation16_spill] sm:$0xff] %v19921_v26  ;;  %v19923_v46 = vadd.f32 %v9713_v17, %v9478_v56  ;;  %v10070_v16 = vadd.f32 %v10069_v14, %v19903_v9  ;;  %v19933_v18 = vpop.f32.mrf.mxu0  ;;  %v10143_v56 = vmul.f32 %v19921_v26, %v19921_v26 }
 0x6a0   :  { %v14533_v37 = vpop.f32.mrf.mxu1 }
 0x6a1   :  { %v10071_v28 = vadd.f32 %v10070_v16, %v19923_v46  ;;  %v10142_v41 = vmul.f32 %v19923_v46, %v19923_v46  ;;  %v10204_v39 = vadd.f32 %v10203_v54, %v10141_v6  ;;  %v19935_v44 = vadd.f32 %v14533_v37, %v9481_v53  ;;  %v19949_v21 = vpop.f32.mrf.mxu0 }
 0x6a2   :  { %v9723_v3 = vpop.f32.mrf.mxu1  ;;  %v9483_v16 = vadd.f32 %v19687_v31, %v22159_v5  ;;  %v9482_v6 = vadd.f32 %v19695_v22, %v22160_v49  ;;  %v22161_v22 = vld [vmem:[#allocation92_spill] sm:$0xff]  ;;  %v22162_v49 = vld [vmem:[#allocation37_spill] sm:$0xff] }
 0x6a3   :  { %v10205_v14 = vadd.f32 %v10204_v39, %v10142_v41  ;;  %v19939_v24 = vadd.f32 %v9723_v3, %v9480_v58  ;;  %v10072_v17 = vadd.f32 %v10071_v28, %v19921_v26  ;;  %v10145_v39 = vmul.f32 %v19935_v44, %v19935_v44 }
 0x6a4   :  { %v14536_v23 = vpop.f32.mrf.mxu1 }
 0x6a5   :  { %22158 = vst [vmem:[#allocation15_spill] sm:$0xff] %v19939_v24  ;;  %v10073_v54 = vadd.f32 %v10072_v17, %v19939_v24  ;;  %v10144_v53 = vmul.f32 %v19939_v24, %v19939_v24  ;;  %v10206_v37 = vadd.f32 %v10205_v14, %v10143_v56  ;;  %v19953_v58 = vadd.f32 %v14536_v23, %v9483_v16 }
 0x6a6   :  { %v9733_v41 = vpop.f32.mrf.mxu1  ;;  %v9485_v17 = vadd.f32 %v19703_v40, %v22161_v22  ;;  %v9484_v56 = vadd.f32 %v19711_v4, %v22162_v49  ;;  %v22164_v4 = vld [vmem:[#allocation63_spill] sm:$0xff]  ;;  %v22165_v22 = vld [vmem:[#allocation40_spill] sm:$0xff] }
 0x6a7   :  { %v10207_v28 = vadd.f32 %v10206_v37, %v10144_v53  ;;  %v19955_v31 = vadd.f32 %v9733_v41, %v9482_v6  ;;  %v10074_v3 = vadd.f32 %v10073_v54, %v19935_v44  ;;  %v19965_v53 = vpop.f32.mrf.mxu0  ;;  %v10147_v6 = vmul.f32 %v19953_v58, %v19953_v58 }
 0x6a8   :  { %v14539_v5 = vpop.f32.mrf.mxu1  ;;  %v9487_v41 = vadd.f32 %v19719_v61, %v22164_v4 }
 0x6a9   :  { %v10075_v14 = vadd.f32 %v10074_v3, %v19955_v31  ;;  %v10146_v24 = vmul.f32 %v19955_v31, %v19955_v31  ;;  %v10208_v26 = vadd.f32 %v10207_v28, %v10145_v39  ;;  %v19967_v16 = vadd.f32 %v14539_v5, %v9485_v17  ;;  %v19981_v49 = vpop.f32.mrf.mxu0 }
 0x6aa   :  { %v9743_v23 = vpop.f32.mrf.mxu1  ;;  %v9486_v39 = vadd.f32 %v19727_v63, %v22165_v22  ;;  %v22166_v63 = vld [vmem:[#allocation39_spill] sm:$0xff] }
 0x6ab   :  { %v10209_v54 = vadd.f32 %v10208_v26, %v10146_v24  ;;  %v19971_v40 = vadd.f32 %v9743_v23, %v9484_v56  ;;  %v10076_v37 = vadd.f32 %v10075_v14, %v19953_v58  ;;  %v10149_v26 = vmul.f32 %v19967_v16, %v19967_v16 }
 0x6ac   :  { %v14542_v3 = vpop.f32.mrf.mxu1 }
 0x6ad   :  { %22163 = vst [vmem:[#allocation85_spill] sm:$0xff] %v19971_v40  ;;  %v10077_v28 = vadd.f32 %v10076_v37, %v19971_v40  ;;  %v10148_v17 = vmul.f32 %v19971_v40, %v19971_v40  ;;  %v10210_v5 = vadd.f32 %v10209_v54, %v10147_v6  ;;  %v19985_v14 = vadd.f32 %v14542_v3, %v9487_v41 }
 0x6ae   :  { %v9753_v24 = vpop.f32.mrf.mxu1  ;;  %v9489_v37 = vadd.f32 %v19735_v0, %v22166_v63  ;;  %v9488_v6 = vadd.f32 %v19743_v59, %v19682_v60  ;;  %v22167_v60 = vld [vmem:[#allocation65_spill] sm:$0xff] }
 0x6af   :  { %v10211_v56 = vadd.f32 %v10210_v5, %v10148_v17  ;;  %v19987_v61 = vadd.f32 %v9753_v24, %v9486_v39  ;;  %v10078_v23 = vadd.f32 %v10077_v28, %v19967_v16  ;;  %v19997_v17 = vpop.f32.mrf.mxu0  ;;  %v10151_v39 = vmul.f32 %v19985_v14, %v19985_v14 }
 0x6b0   :  { %v14545_v4 = vpop.f32.mrf.mxu1  ;;  %v9491_v59 = vadd.f32 %v19751_v19, %v22167_v60 }
 0x6b1   :  { %v10079_v54 = vadd.f32 %v10078_v23, %v19987_v61  ;;  %v10150_v22 = vmul.f32 %v19987_v61, %v19987_v61  ;;  %v10212_v40 = vadd.f32 %v10211_v56, %v10149_v26  ;;  %v19999_v41 = vadd.f32 %v14545_v4, %v9489_v37  ;;  %v20013_v37 = vpop.f32.mrf.mxu0 }
 0x6b2   :  { %v9763_v3 = vpop.f32.mrf.mxu1  ;;  %v9490_v26 = vadd.f32 %v19759_v43, %v19690_v11  ;;  %v22168_v11 = vld [vmem:[#allocation68_spill] sm:$0xff] }
 0x6b3   :  { %v10213_v28 = vadd.f32 %v10212_v40, %v10150_v22  ;;  %v20003_v0 = vadd.f32 %v9763_v3, %v9488_v6  ;;  %v10080_v5 = vadd.f32 %v10079_v54, %v19985_v14  ;;  %v10153_v40 = vmul.f32 %v19999_v41, %v19999_v41 }
 0x6b4   :  { %v14548_v24 = vpop.f32.mrf.mxu1  ;;  %v9493_v43 = vadd.f32 %v19767_v25, %v22168_v11 }
 0x6b5   :  { %v10081_v56 = vadd.f32 %v10080_v5, %v20003_v0  ;;  %v10152_v23 = vmul.f32 %v20003_v0, %v20003_v0  ;;  %v10214_v63 = vadd.f32 %v10213_v28, %v10151_v39  ;;  %v20017_v54 = vadd.f32 %v14548_v24, %v9491_v59 }
 0x6b6   :  { %v9773_v4 = vpop.f32.mrf.mxu1  ;;  %v9492_v39 = vadd.f32 %v19775_v2, %v19698_v50  ;;  %v22169_v50 = vld [vmem:[#allocation42_spill] sm:$0xff] }
 0x6b7   :  { %v10215_v6 = vadd.f32 %v10214_v63, %v10152_v23  ;;  %v20019_v19 = vadd.f32 %v9773_v4, %v9490_v26  ;;  %v10082_v22 = vadd.f32 %v10081_v56, %v19999_v41  ;;  %v20029_v23 = vpop.f32.mrf.mxu0  ;;  %v10155_v26 = vmul.f32 %v20017_v54, %v20017_v54 }
 0x6b8   :  { %v14551_v3 = vpop.f32.mrf.mxu1  ;;  %v9495_v2 = vadd.f32 %v19783_v48, %v22169_v50 }
 0x6b9   :  { %v10083_v28 = vadd.f32 %v10082_v22, %v20019_v19  ;;  %v10154_v5 = vmul.f32 %v20019_v19, %v20019_v19  ;;  %v10216_v60 = vadd.f32 %v10215_v6, %v10153_v40  ;;  %v20031_v59 = vadd.f32 %v14551_v3, %v9493_v43  ;;  %v20045_v43 = vpop.f32.mrf.mxu0 }
 0x6ba   :  { %v9783_v24 = vpop.f32.mrf.mxu1  ;;  %v9494_v40 = vadd.f32 %v19791_v7, %v19706_v35  ;;  %v22171_v35 = vld [vmem:[#allocation41_spill] sm:$0xff] }
 0x6bb   :  { %v10217_v56 = vadd.f32 %v10216_v60, %v10154_v5  ;;  %v20035_v25 = vadd.f32 %v9783_v24, %v9492_v39  ;;  %v10084_v63 = vadd.f32 %v10083_v28, %v20017_v54  ;;  %v10157_v3 = vmul.f32 %v20031_v59, %v20031_v59 }
 0x6bc   :  { %v14554_v4 = vpop.f32.mrf.mxu1  ;;  %v9497_v7 = vadd.f32 %v19799_v55, %v22171_v35 }
 0x6bd   :  { %v10085_v6 = vadd.f32 %v10084_v63, %v20035_v25  ;;  %v10156_v22 = vmul.f32 %v20035_v25, %v20035_v25  ;;  %v10218_v11 = vadd.f32 %v10217_v56, %v10155_v26  ;;  %v20049_v5 = vadd.f32 %v14554_v4, %v9495_v2 }
 0x6be   :  { %v9793_v39 = vpop.f32.mrf.mxu1  ;;  %v9496_v26 = vadd.f32 %v19807_v45, %v19714_v57  ;;  %v22173_v57 = vld [vmem:[#allocation67_spill] sm:$0xff] }
 0x6bf   :  { %v10219_v28 = vadd.f32 %v10218_v11, %v10156_v22  ;;  %22170 = vst [vmem:[#allocation88_spill] sm:$0xff] %v20049_v5  ;;  %v20051_v48 = vadd.f32 %v9793_v39, %v9494_v40  ;;  %v10086_v60 = vadd.f32 %v10085_v6, %v20031_v59  ;;  %v20061_v22 = vpop.f32.mrf.mxu0  ;;  %v10159_v40 = vmul.f32 %v20049_v5, %v20049_v5 }
 0x6c0   :  { %v14557_v24 = vpop.f32.mrf.mxu1  ;;  %v9499_v45 = vadd.f32 %v19815_v42, %v22173_v57 }
 0x6c1   :  { %v10087_v56 = vadd.f32 %v10086_v60, %v20051_v48  ;;  %v10158_v63 = vmul.f32 %v20051_v48, %v20051_v48  ;;  %v10220_v50 = vadd.f32 %v10219_v28, %v10157_v3  ;;  %v20063_v2 = vadd.f32 %v14557_v24, %v9497_v7  ;;  %v22174_v60 = vld [vmem:[#allocation70_spill] sm:$0xff]  ;;  %v20077_v24 = vpop.f32.mrf.mxu0 }
 0x6c2   :  { %v9803_v4 = vpop.f32.mrf.mxu1  ;;  %v9498_v3 = vadd.f32 %v19823_v47, %v22174_v60  ;;  %v22176_v47 = vld [vmem:[#allocation44_spill] sm:$0xff]  ;;  %v22177_v60 = vld [vmem:[#allocation43_spill] sm:$0xff] }
 0x6c3   :  { %v10221_v6 = vadd.f32 %v10220_v50, %v10158_v63  ;;  %v20067_v55 = vadd.f32 %v9803_v4, %v9496_v26  ;;  %v10088_v11 = vadd.f32 %v10087_v56, %v20049_v5  ;;  %v10161_v26 = vmul.f32 %v20063_v2, %v20063_v2 }
 0x6c4   :  { %v14560_v39 = vpop.f32.mrf.mxu1 }
 0x6c5   :  { %22172 = vst [vmem:[#allocation18_spill] sm:$0xff] %v20067_v55  ;;  %v10089_v28 = vadd.f32 %v10088_v11, %v20067_v55  ;;  %v10160_v35 = vmul.f32 %v20067_v55, %v20067_v55  ;;  %v10222_v7 = vadd.f32 %v10221_v6, %v10159_v40  ;;  %v20081_v50 = vadd.f32 %v14560_v39, %v9499_v45 }
 0x6c6   :  { %v9813_v63 = vpop.f32.mrf.mxu1  ;;  %v9501_v11 = vadd.f32 %v19831_v32, %v22176_v47  ;;  %v9500_v40 = vadd.f32 %v19839_v13, %v22177_v60  ;;  %v22179_v13 = vld [vmem:[#allocation69_spill] sm:$0xff]  ;;  %v22180_v47 = vld [vmem:[#allocation72_spill] sm:$0xff] }
 0x6c7   :  { %v10223_v56 = vadd.f32 %v10222_v7, %v10160_v35  ;;  %22175 = vst [vmem:[#allocation17_spill] sm:$0xff] %v20081_v50  ;;  %v20083_v42 = vadd.f32 %v9813_v63, %v9498_v3  ;;  %v10090_v4 = vadd.f32 %v10089_v28, %v20063_v2  ;;  %v20093_v35 = vpop.f32.mrf.mxu0  ;;  %v10163_v3 = vmul.f32 %v20081_v50, %v20081_v50 }
 0x6c8   :  { %v14563_v57 = vpop.f32.mrf.mxu1  ;;  %v9503_v63 = vadd.f32 %v19847_v8, %v22179_v13 }
 0x6c9   :  { %v10091_v6 = vadd.f32 %v10090_v4, %v20083_v42  ;;  %v10162_v55 = vmul.f32 %v20083_v42, %v20083_v42  ;;  %v10224_v5 = vadd.f32 %v10223_v56, %v10161_v26  ;;  %v20095_v45 = vadd.f32 %v14563_v57, %v9501_v11  ;;  %v20109_v60 = vpop.f32.mrf.mxu0 }
 0x6ca   :  { %v9823_v39 = vpop.f32.mrf.mxu1  ;;  %v9502_v26 = vadd.f32 %v19855_v15, %v22180_v47  ;;  %v22182_v15 = vld [vmem:[#allocation46_spill] sm:$0xff]  ;;  %v22183_v47 = vld [vmem:[#allocation45_spill] sm:$0xff] }
 0x6cb   :  { %v10225_v28 = vadd.f32 %v10224_v5, %v10162_v55  ;;  %v20099_v32 = vadd.f32 %v9823_v39, %v9500_v40  ;;  %v10092_v7 = vadd.f32 %v10091_v6, %v20081_v50  ;;  %v10165_v5 = vmul.f32 %v20095_v45, %v20095_v45 }
 0x6cc   :  { %v14566_v4 = vpop.f32.mrf.mxu1 }
 0x6cd   :  { %22178 = vst [vmem:[#allocation87_spill] sm:$0xff] %v20099_v32  ;;  %v10093_v56 = vadd.f32 %v10092_v7, %v20099_v32  ;;  %v10164_v11 = vmul.f32 %v20099_v32, %v20099_v32  ;;  %v10226_v57 = vadd.f32 %v10225_v28, %v10163_v3  ;;  %v20113_v6 = vadd.f32 %v14566_v4, %v9503_v63 }
 0x6ce   :  { %v9833_v55 = vpop.f32.mrf.mxu1  ;;  %v9505_v7 = vadd.f32 %v19863_v62, %v22182_v15  ;;  %v9504_v3 = vadd.f32 %v19872_v27, %v22183_v47  ;;  %v22185_v27 = vld [vmem:[#allocation71_spill] sm:$0xff]  ;;  %v22186_v15 = vld [vmem:[#allocation74_spill] sm:$0xff] }
 0x6cf   :  { %v10227_v40 = vadd.f32 %v10226_v57, %v10164_v11  ;;  %22181 = vst [vmem:[#allocation90_spill] sm:$0xff] %v20113_v6  ;;  %v20115_v8 = vadd.f32 %v9833_v55, %v9502_v26  ;;  %v10094_v39 = vadd.f32 %v10093_v56, %v20095_v45  ;;  %v20125_v11 = vpop.f32.mrf.mxu0  ;;  %v10167_v26 = vmul.f32 %v20113_v6, %v20113_v6 }
 0x6d0   :  { %v14569_v13 = vpop.f32.mrf.mxu1  ;;  %v9507_v55 = vadd.f32 %v19884_v36, %v22185_v27 }
 0x6d1   :  { %v10095_v28 = vadd.f32 %v10094_v39, %v20115_v8  ;;  %v10166_v32 = vmul.f32 %v20115_v8, %v20115_v8  ;;  %v10228_v50 = vadd.f32 %v10227_v40, %v10165_v5  ;;  %v20127_v63 = vadd.f32 %v14569_v13, %v9505_v7  ;;  %v20141_v47 = vpop.f32.mrf.mxu0 }
 0x6d2   :  { %v9843_v4 = vpop.f32.mrf.mxu1  ;;  %v9506_v5 = vadd.f32 %v19901_v29, %v22186_v15  ;;  %v22188_v29 = vld [vmem:[#allocation5_spill] sm:$0xff]  ;;  %v22189_v15 = vld [vmem:[#allocation4_spill] sm:$0xff] }
 0x6d3   :  { %v10229_v56 = vadd.f32 %v10228_v50, %v10166_v32  ;;  %v20131_v62 = vadd.f32 %v9843_v4, %v9504_v3  ;;  %v10096_v57 = vadd.f32 %v10095_v28, %v20113_v6  ;;  %v10169_v50 = vmul.f32 %v20127_v63, %v20127_v63 }
 0x6d4   :  { %v14572_v39 = vpop.f32.mrf.mxu1 }
 0x6d5   :  { %22184 = vst [vmem:[#allocation20_spill] sm:$0xff] %v20131_v62  ;;  %v10097_v40 = vadd.f32 %v10096_v57, %v20131_v62  ;;  %v10168_v7 = vmul.f32 %v20131_v62, %v20131_v62  ;;  %v10230_v13 = vadd.f32 %v10229_v56, %v10167_v26  ;;  %v20145_v28 = vadd.f32 %v14572_v39, %v9507_v55 }
 0x6d6   :  { %v9853_v32 = vpop.f32.mrf.mxu1  ;;  %v9509_v57 = vadd.f32 %v19917_v12, %v22188_v29  ;;  %v9508_v26 = vadd.f32 %v19933_v18, %v22189_v15  ;;  %v22191_v18 = vld [vmem:[#allocation73_spill] sm:$0xff]  ;;  %v22192_v29 = vld [vmem:[#allocation76_spill] sm:$0xff] }
 0x6d7   :  { %v10231_v3 = vadd.f32 %v10230_v13, %v10168_v7  ;;  %22187 = vst [vmem:[#allocation19_spill] sm:$0xff] %v20145_v28  ;;  %v20147_v36 = vadd.f32 %v9853_v32, %v9506_v5  ;;  %v10098_v4 = vadd.f32 %v10097_v40, %v20127_v63  ;;  %v20157_v7 = vpop.f32.mrf.mxu0  ;;  %v10171_v5 = vmul.f32 %v20145_v28, %v20145_v28 }
 0x6d8   :  { %v14575_v27 = vpop.f32.mrf.mxu1  ;;  %v9511_v32 = vadd.f32 %v19949_v21, %v22191_v18 }
 0x6d9   :  { %v10099_v56 = vadd.f32 %v10098_v4, %v20147_v36  ;;  %v10170_v62 = vmul.f32 %v20147_v36, %v20147_v36  ;;  %v10232_v6 = vadd.f32 %v10231_v3, %v10169_v50  ;;  %v20159_v55 = vadd.f32 %v14575_v27, %v9509_v57  ;;  %v20173_v15 = vpop.f32.mrf.mxu0 }
 0x6da   :  { %v9863_v39 = vpop.f32.mrf.mxu1  ;;  %v9510_v50 = vadd.f32 %v19965_v53, %v22192_v29  ;;  %v22193_v53 = vld [vmem:[#allocation7_spill] sm:$0xff]  ;;  %v22194_v29 = vld [vmem:[#allocation6_spill] sm:$0xff] }
 0x6db   :  { %v10233_v40 = vadd.f32 %v10232_v6, %v10170_v62  ;;  %v20163_v12 = vadd.f32 %v9863_v39, %v9508_v26  ;;  %v10100_v13 = vadd.f32 %v10099_v56, %v20145_v28  ;;  %v10173_v6 = vmul.f32 %v20159_v55, %v20159_v55 }
 0x6dc   :  { %v14578_v4 = vpop.f32.mrf.mxu1 }
 0x6dd   :  { %22190 = vst [vmem:[#allocation89_spill] sm:$0xff] %v20163_v12  ;;  %v10101_v3 = vadd.f32 %v10100_v13, %v20163_v12  ;;  %v10172_v57 = vmul.f32 %v20163_v12, %v20163_v12  ;;  %v10234_v27 = vadd.f32 %v10233_v40, %v10171_v5  ;;  %v20177_v56 = vadd.f32 %v14578_v4, %v9511_v32 }
 0x6de   :  { %v9873_v62 = vpop.f32.mrf.mxu1  ;;  %v9513_v13 = vadd.f32 %v19981_v49, %v22193_v53  ;;  %v9512_v5 = vadd.f32 %v19997_v17, %v22194_v29  ;;  %v22195_v17 = vld [vmem:[#allocation75_spill] sm:$0xff] }
 0x6df   :  { %v10235_v26 = vadd.f32 %v10234_v27, %v10172_v57  ;;  %v20179_v21 = vadd.f32 %v9873_v62, %v9510_v50  ;;  %v10102_v39 = vadd.f32 %v10101_v3, %v20159_v55  ;;  %v20189_v57 = vpop.f32.mrf.mxu0  ;;  %v10175_v50 = vmul.f32 %v20177_v56, %v20177_v56 }
 0x6e0   :  { %v14581_v18 = vpop.f32.mrf.mxu1  ;;  %v9515_v62 = vadd.f32 %v20013_v37, %v22195_v17 }
 0x6e1   :  { %v10103_v40 = vadd.f32 %v10102_v39, %v20179_v21  ;;  %v10174_v12 = vmul.f32 %v20179_v21, %v20179_v21  ;;  %v10236_v28 = vadd.f32 %v10235_v26, %v10173_v6  ;;  %v20191_v32 = vadd.f32 %v14581_v18, %v9513_v13  ;;  %v20205_v18 = vpop.f32.mrf.mxu0 }
 0x6e2   :  { %v9883_v4 = vpop.f32.mrf.mxu1  ;;  %v9514_v6 = vadd.f32 %v20029_v23, %v19786_v52  ;;  %v22198_v52 = vld [vmem:[#allocation8_spill] sm:$0xff] }
 0x6e3   :  { %v10237_v3 = vadd.f32 %v10236_v28, %v10174_v12  ;;  %v20195_v49 = vadd.f32 %v9883_v4, %v9512_v5  ;;  %v10104_v27 = vadd.f32 %v10103_v40, %v20177_v56  ;;  %v10177_v28 = vmul.f32 %v20191_v32, %v20191_v32 }
 0x6e4   :  { %v14584_v39 = vpop.f32.mrf.mxu1  ;;  %v9517_v23 = vadd.f32 %v20045_v43, %v22198_v52 }
 0x6e5   :  { %v10105_v26 = vadd.f32 %v10104_v27, %v20195_v49  ;;  %v10176_v53 = vmul.f32 %v20195_v49, %v20195_v49  ;;  %v10238_v13 = vadd.f32 %v10237_v3, %v10175_v50  ;;  %v20209_v5 = vadd.f32 %v14584_v39, %v9515_v62 }
 0x6e6   :  { %v9893_v12 = vpop.f32.mrf.mxu1  ;;  %v9516_v50 = vadd.f32 %v20061_v22, %v19794_v33 }
 0x6e7   :  { %v10239_v29 = vadd.f32 %v10238_v13, %v10176_v53  ;;  %22196 = vst [vmem:[#allocation93_spill] sm:$0xff] %v20209_v5  ;;  %v20211_v37 = vadd.f32 %v9893_v12, %v9514_v6  ;;  %v10106_v40 = vadd.f32 %v10105_v26, %v20191_v32  ;;  %v9423_v53 = vpop.f32.mrf.mxu0  ;;  %v10179_v6 = vmul.f32 %v20209_v5, %v20209_v5  ;;  %v22201_v12 = vld [vmem:[#allocation3_spill] sm:$0xff] }
 0x6e8   :  { %v14587_v4 = vpop.f32.mrf.mxu1  ;;  %v9519_v33 = vadd.f32 %v20077_v24, %v22201_v12 }
 0x6e9   :  { %22197 = vst [vmem:[#allocation48_spill] sm:$0xff] %v20211_v37  ;;  %v10107_v3 = vadd.f32 %v10106_v40, %v20211_v37  ;;  %v10178_v27 = vmul.f32 %v20211_v37, %v20211_v37  ;;  %v10240_v17 = vadd.f32 %v10239_v29, %v10177_v28  ;;  %v20221_v62 = vadd.f32 %v14587_v4, %v9517_v23  ;;  %v14477_v23 = vpop.f32.mrf.mxu0 }
 0x6ea   :  { %v9903_v39 = vpop.f32.mrf.mxu1  ;;  %v9518_v40 = vadd.f32 %v20093_v35, %v19802_v20 }
 0x6eb   :  { %22199 = vst [vmem:[#allocation47_spill] sm:$0xff] %v20221_v62  ;;  %v10241_v26 = vadd.f32 %v10240_v17, %v10178_v27  ;;  %v20225_v13 = vadd.f32 %v9903_v39, %v9516_v50  ;;  %v10108_v43 = vadd.f32 %v10107_v3, %v20209_v5  ;;  %v10181_v4 = vmul.f32 %v20221_v62, %v20221_v62  ;;  %v22203_v39 = vld [vmem:[#allocation80_spill] sm:$0xff] }
 0x6ec   :  { %v14590_v22 = vpop.f32.mrf.mxu1  ;;  %v9521_v20 = vadd.f32 %v20109_v60, %v22203_v39 }
 0x6ed   :  { %22200 = vst [vmem:[#allocation91_spill] sm:$0xff] %v20225_v13  ;;  %v10109_v28 = vadd.f32 %v10108_v43, %v20225_v13  ;;  %v10180_v29 = vmul.f32 %v20225_v13, %v20225_v13  ;;  %v10242_v52 = vadd.f32 %v10241_v26, %v10179_v6  ;;  %v20237_v3 = vadd.f32 %v14590_v22, %v9519_v33 }
 0x6ee   :  { %v9913_v50 = vpop.f32.mrf.mxu1  ;;  %v9520_v43 = vadd.f32 %v20125_v11, %v19810_v30 }
 0x6ef   :  { %v10243_v27 = vadd.f32 %v10242_v52, %v10180_v29  ;;  %22202 = vst [vmem:[#allocation95_spill] sm:$0xff] %v20237_v3  ;;  %v20239_v17 = vadd.f32 %v9913_v50, %v9518_v40  ;;  %v10110_v24 = vadd.f32 %v10109_v28, %v20221_v62  ;;  %v9433_v29 = vpop.f32.mrf.mxu0  ;;  %v10183_v40 = vmul.f32 %v20237_v3, %v20237_v3  ;;  %v22204_v50 = vld [vmem:[#allocation77_spill] sm:$0xff] }
 0x6f0   :  { %v14593_v35 = vpop.f32.mrf.mxu1  ;;  %v9523_v30 = vadd.f32 %v20141_v47, %v22204_v50 }
 0x6f1   :  { %v10111_v6 = vadd.f32 %v10110_v24, %v20239_v17  ;;  %v10182_v26 = vmul.f32 %v20239_v17, %v20239_v17  ;;  %v10244_v12 = vadd.f32 %v10243_v27, %v10181_v4  ;;  %v20249_v33 = vadd.f32 %v14593_v35, %v9521_v20  ;;  %v14480_v20 = vpop.f32.mrf.mxu0 }
 0x6f2   :  { %v9923_v22 = vpop.f32.mrf.mxu1  ;;  %v9522_v24 = vadd.f32 %v20157_v7, %v19818_v10 }
 0x6f3   :  { %v10245_v28 = vadd.f32 %v10244_v12, %v10182_v26  ;;  %v20253_v52 = vadd.f32 %v9923_v22, %v9520_v43  ;;  %v10112_v60 = vadd.f32 %v10111_v6, %v20237_v3  ;;  %v10185_v35 = vmul.f32 %v20249_v33, %v20249_v33  ;;  %v22205_v22 = vld [vmem:[#allocation10_spill] sm:$0xff] }
 0x6f4   :  { %v14596_v11 = vpop.f32.mrf.mxu1  ;;  %v9525_v10 = vadd.f32 %v20173_v15, %v22205_v22 }
 0x6f5   :  { %v10113_v4 = vadd.f32 %v10112_v60, %v20253_v52  ;;  %v10184_v27 = vmul.f32 %v20253_v52, %v20253_v52  ;;  %v10246_v39 = vadd.f32 %v10245_v28, %v10183_v40  ;;  %v20265_v6 = vadd.f32 %v14596_v11, %v9523_v30 }
 0x6f6   :  { %v9933_v43 = vpop.f32.mrf.mxu1  ;;  %v9524_v60 = vadd.f32 %v20189_v57, %v19826_v1 }
 0x6f7   :  { %v10247_v26 = vadd.f32 %v10246_v39, %v10184_v27  ;;  %v20267_v12 = vadd.f32 %v9933_v43, %v9522_v24  ;;  %v10114_v47 = vadd.f32 %v10113_v4, %v20249_v33  ;;  %v9443_v27 = vpop.f32.mrf.mxu0  ;;  %v10187_v24 = vmul.f32 %v20265_v6, %v20265_v6  ;;  %v22207_v43 = vld [vmem:[#allocation9_spill] sm:$0xff] }
 0x6f8   :  { %v14599_v7 = vpop.f32.mrf.mxu1  ;;  %v9527_v1 = vadd.f32 %v20205_v18, %v22207_v43 }
 0x6f9   :  { %v10115_v40 = vadd.f32 %v10114_v47, %v20267_v12  ;;  %v10186_v28 = vmul.f32 %v20267_v12, %v20267_v12  ;;  %v10248_v50 = vadd.f32 %v10247_v26, %v10185_v35  ;;  %v20277_v30 = vadd.f32 %v14599_v7, %v9525_v10  ;;  %v14483_v10 = vpop.f32.mrf.mxu0 }
 0x6fa   :  { %v9943_v11 = vpop.f32.mrf.mxu1  ;;  %v9526_v47 = vadd.f32 %v9423_v53, %v19834_v38 }
 0x6fb   :  { %22206 = vst [vmem:[#allocation94_spill] sm:$0xff] %v20277_v30  ;;  %v10249_v4 = vadd.f32 %v10248_v50, %v10186_v28  ;;  %v20281_v39 = vadd.f32 %v9943_v11, %v9524_v60  ;;  %v10116_v15 = vadd.f32 %v10115_v40, %v20265_v6  ;;  %v10189_v7 = vmul.f32 %v20277_v30, %v20277_v30  ;;  %v22210_v11 = vld [vmem:[#allocation79_spill] sm:$0xff]  ;;  %v9453_v3 = vpop.f32.mrf.mxu0 }
 0x6fc   :  { %v14602_v57 = vpop.f32.mrf.mxu1  ;;  %v9529_v38 = vadd.f32 %v14477_v23, %v22210_v11 }
 0x6fd   :  { %v10117_v35 = vadd.f32 %v10116_v15, %v20281_v39  ;;  %v10188_v26 = vmul.f32 %v20281_v39, %v20281_v39  ;;  %v10250_v22 = vadd.f32 %v10249_v4, %v10187_v24  ;;  %v20292_v50 = vadd.f32 %v14602_v57, %v9527_v1 }
 0x6fe   :  { %v9953_v60 = vpop.f32.mrf.mxu1  ;;  %v9528_v15 = vadd.f32 %v9433_v29, %v19842_v51 }
 0x6ff   :  { %v10251_v28 = vadd.f32 %v10250_v22, %v10188_v26  ;;  %22208 = vst [vmem:[#allocation96_spill] sm:$0xff] %v20292_v50  ;;  %v20294_v40 = vadd.f32 %v9953_v60, %v9526_v47  ;;  %v10118_v18 = vadd.f32 %v10117_v35, %v20277_v30  ;;  %v10191_v57 = vmul.f32 %v20292_v50, %v20292_v50  ;;  %v22213_v26 = vld [vmem:[#allocation78_spill] sm:$0xff] }
 0x700   :  { %v14605_v53 = vpop.f32.mrf.mxu1  ;;  %v9531_v51 = vadd.f32 %v14480_v20, %v22213_v26  ;;  %v9530_v22 = vadd.f32 %v9443_v27, %v19850_v34 }
 0x701   :  { %22209 = vst [vmem:[#allocation21_spill] sm:$0xff] %v20294_v40  ;;  %v10119_v43 = vadd.f32 %v10118_v18, %v20294_v40  ;;  %v10190_v24 = vmul.f32 %v20294_v40, %v20294_v40  ;;  %v10252_v4 = vadd.f32 %v10251_v28, %v10189_v7  ;;  %v20302_v62 = vadd.f32 %v14605_v53, %v9529_v38  ;;  %v14486_v18 = vpop.f32.mrf.mxu0 }
 0x702   :  { %v9963_v1 = vpop.f32.mrf.mxu1 }
 0x703   :  { %22211 = vst [vmem:[#allocation22_spill] sm:$0xff] %v20302_v62  ;;  %v10253_v47 = vadd.f32 %v10252_v4, %v10190_v24  ;;  %v20306_v35 = vadd.f32 %v9963_v1, %v9528_v15  ;;  %v10120_v23 = vadd.f32 %v10119_v43, %v20292_v50  ;;  %v10193_v11 = vmul.f32 %v20302_v62, %v20302_v62  ;;  %v22216_v24 = vld [vmem:[#allocation82_spill] sm:$0xff]  ;;  %v22217_v4 = vld [vmem:[#allocation12_spill] sm:$0xff]  ;;  %v9463_v26 = vpop.f32.mrf.mxu0 }
 0x704   :  { %v14608_v29 = vpop.f32.mrf.mxu1  ;;  %v9533_v34 = vadd.f32 %v14483_v10, %v22216_v24  ;;  %v9532_v1 = vadd.f32 %v9453_v3, %v22217_v4 }
 0x705   :  { %22212 = vst [vmem:[#allocation49_spill] sm:$0xff] %v20306_v35  ;;  %v10121_v60 = vadd.f32 %v10120_v23, %v20306_v35  ;;  %v10192_v7 = vmul.f32 %v20306_v35, %v20306_v35  ;;  %v10254_v28 = vadd.f32 %v10253_v47, %v10191_v57  ;;  %v20316_v15 = vadd.f32 %v14608_v29, %v9531_v51 }
 0x706   :  { %v9973_v38 = vpop.f32.mrf.mxu1 }
 0x707   :  { %v10255_v53 = vadd.f32 %v10254_v28, %v10192_v7  ;;  %22214 = vst [vmem:[#allocation23_spill] sm:$0xff] %v20316_v15  ;;  %v20318_v43 = vadd.f32 %v9973_v38, %v9530_v22  ;;  %v10122_v20 = vadd.f32 %v10121_v60, %v20302_v62  ;;  %v10195_v29 = vmul.f32 %v20316_v15, %v20316_v15  ;;  %v22220_v7 = vld [vmem:[#allocation11_spill] sm:$0xff]  ;;  %v22221_v38 = vld [vmem:[#allocation81_spill] sm:$0xff] }
 0x708   :  { %v14611_v27 = vpop.f32.mrf.mxu1  ;;  %v9535_v3 = vadd.f32 %v14486_v18, %v22220_v7 }
 0x709   :  { %22215 = vst [vmem:[#allocation51_spill] sm:$0xff] %v20318_v43  ;;  %v10123_v23 = vadd.f32 %v10122_v20, %v20318_v43  ;;  %v10194_v57 = vmul.f32 %v20318_v43, %v20318_v43  ;;  %v10256_v47 = vadd.f32 %v10255_v53, %v10193_v11  ;;  %v20326_v13 = vadd.f32 %v14611_v27, %v9533_v34 }
 0x70a   :  { %v9983_v51 = vpop.f32.mrf.mxu1  ;;  %v9534_v20 = vadd.f32 %v9463_v26, %v22221_v38 }
 0x70b   :  { %22218 = vst [vmem:[#allocation50_spill] sm:$0xff] %v20326_v13  ;;  %v10257_v22 = vadd.f32 %v10256_v47, %v10194_v57  ;;  %v20330_v60 = vadd.f32 %v9983_v51, %v9532_v1  ;;  %v10124_v10 = vadd.f32 %v10123_v23, %v20316_v15  ;;  %v10197_v34 = vmul.f32 %v20326_v13, %v20326_v13 }
 0x70c   :  { %v14614_v28 = vpop.f32.mrf.mxu1 }
 0x70d   :  { %22219 = vst [vmem:[#allocation25_spill] sm:$0xff] %v20330_v60  ;;  %v10125_v24 = vadd.f32 %v10124_v10, %v20330_v60  ;;  %v10196_v11 = vmul.f32 %v20330_v60, %v20330_v60  ;;  %v10258_v53 = vadd.f32 %v10257_v22, %v10195_v29  ;;  %v20340_v1 = vadd.f32 %v14614_v28, %v9535_v3  ;;  %v22238_v60 = vld [vmem:[#allocation19_spill] sm:$0xff] }
 0x70e   :  { %v9993_v27 = vpop.f32.mrf.mxu1 }
 0x70f   :  { %v10259_v4 = vadd.f32 %v10258_v53, %v10196_v11  ;;  %22222 = vst [vmem:[#allocation24_spill] sm:$0xff] %v20340_v1  ;;  %v20342_v57 = vadd.f32 %v9993_v27, %v9534_v20  ;;  %v10126_v18 = vadd.f32 %v10125_v24, %v20326_v13  ;;  %v10199_v51 = vmul.f32 %v20340_v1, %v20340_v1 }
 0x711   :  { %22223 = vst [vmem:[#allocation53_spill] sm:$0xff] %v20342_v57  ;;  %v10127_v23 = vadd.f32 %v10126_v18, %v20342_v57  ;;  %v10198_v47 = vmul.f32 %v20342_v57, %v20342_v57  ;;  %v10260_v26 = vadd.f32 %v10259_v4, %v10197_v34 }
 0x713   :  { %v10128_v29 = vadd.f32 %v10127_v23, %v20340_v1  ;;  %v10261_v22 = vadd.f32 %v10260_v26, %v10198_v47 }
 0x715   :  { %v10129_v10 = vrot.slane %v10128_v29, 4  ;;  %v10262_v7 = vadd.f32 %v10261_v22, %v10199_v51  ;;  %v22224_v51 = vld [vmem:[#allocation14_spill] sm:$0xff]  ;;  %v22225_v22 = vld [vmem:[#allocation84_spill] sm:$0xff] }
 0x717   :  { %v10130_v3 = vadd.f32 %v10129_v10, %v10128_v29  ;;  %v10263_v28 = vrot.slane %v10262_v7, 4 }
 0x719   :  { %v10131_v38 = vrot.slane %v10130_v3, 2  ;;  %v10264_v20 = vadd.f32 %v10263_v28, %v10262_v7  ;;  %v22226_v7 = vld [vmem:[#allocation83_spill] sm:$0xff]  ;;  %v22227_v28 = vld [vmem:[#allocation13_spill] sm:$0xff] }
 0x71b   :  { %v10132_v11 = vadd.f32 %v10131_v38, %v10130_v3  ;;  %v10265_v24 = vrot.slane %v10264_v20, 2  ;;  %v22234_v3 = vld [vmem:[#allocation17_spill] sm:$0xff] }
 0x71d   :  { %v10133_v53 = vrot.slane %v10132_v11, 1  ;;  %v10266_v27 = vadd.f32 %v10265_v24, %v10264_v20  ;;  %v22233_v24 = vld [vmem:[#allocation18_spill] sm:$0xff] }
 0x71f   :  { %v10134_v18 = vadd.f32 %v10133_v53, %v10132_v11  ;;  %v10267_v5 = vrot.slane %v10266_v27, 1  ;;  %v22229_v53 = vld [vmem:[#allocation16_spill] sm:$0xff] }
 0x720   :  { %v22232_v11 = vld [vmem:[#allocation88_spill] sm:$0xff] }
 0x721   :  { %v20351_v37 = vmul.f32 0.001953125, %v10134_v18  ;;  %v10268_v34 = vadd.f32 %v10267_v5, %v10266_v27  ;;  %v22228_v5 = vld [vmem:[#allocation86_spill] sm:$0xff]  ;;  %v22230_v18 = vld [vmem:[#allocation15_spill] sm:$0xff] }
 0x722   :  { %v22236_v27 = vld [vmem:[#allocation90_spill] sm:$0xff] }
 0x723   :  { %v10269_v4 = vmul.f32 0.001953125, %v10268_v34  ;;  %v10270_v23 = vmul.f32 %v20351_v37, %v20351_v37  ;;  %v10299_v20 = vsub.f32 %v22232_v11, %v20351_v37  ;;  %v10300_v38 = vsub.f32 %v22233_v24, %v20351_v37 }
 0x724   :  { %v10301_v34 = vsub.f32 %v20063_v2, %v20351_v37  ;;  %v10303_v10 = vsub.f32 %v22234_v3, %v20351_v37  ;;  %v10305_v11 = vsub.f32 %v20095_v45, %v20351_v37  ;;  %v10306_v24 = vsub.f32 %v20115_v8, %v20351_v37  ;;  %v22237_v2 = vld [vmem:[#allocation20_spill] sm:$0xff]  ;;  %v22239_v45 = vld [vmem:[#allocation89_spill] sm:$0xff] }
 0x725   :  { %v10271_v47 = vsub.f32 %v10269_v4, %v10270_v23  ;;  %v10272_v23 = vld [vmem:[%s21321_s5] sm:$0x1]  ;;  %v10302_v4 = vsub.f32 %v20083_v42, %v20351_v37  ;;  %v10307_v1 = vsub.f32 %v22236_v27, %v20351_v37  ;;  %v10308_v13 = vsub.f32 %v22237_v2, %v20351_v37  ;;  %v22241_v2 = vld [vmem:[#allocation38_spill] sm:$0xff] }
 0x726   :  { %v10309_v3 = vsub.f32 %v20127_v63, %v20351_v37  ;;  %v10311_v15 = vsub.f32 %v22238_v60, %v20351_v37  ;;  %v10312_v43 = vsub.f32 %v22239_v45, %v20351_v37  ;;  %v10313_v8 = vsub.f32 %v20159_v55, %v20351_v37  ;;  %v22240_v60 = vld [vmem:[#allocation48_spill] sm:$0xff]  ;;  %v22243_v55 = vld [vmem:[#allocation93_spill] sm:$0xff] }
 0x727   :  { %v10273_v26 = vadd.f32 1e-05, %v10271_v47  ;;  %v10298_v47 = vsub.f32 %v20051_v48, %v20351_v37  ;;  %v22235_v48 = vld [vmem:[#allocation87_spill] sm:$0xff]  ;;  %v10314_v27 = vsub.f32 %v20179_v21, %v20351_v37  ;;  %v10316_v63 = vsub.f32 %v20195_v49, %v20351_v37 }
 0x728   :  { %v10304_v29 = vsub.f32 %v22235_v48, %v20351_v37  ;;  %v10310_v48 = vsub.f32 %v20147_v36, %v20351_v37  ;;  %v10317_v36 = vsub.f32 %v20191_v32, %v20351_v37  ;;  %v22242_v45 = vsub.s32 0, %v22241_v2  ;;  %v22244_v21 = vld [vmem:[#allocation91_spill] sm:$0xff] }
 0x729   :  { %14618 = vrsqrt.f32 %v10273_v26  ;;  %v22231_v26 = vld [vmem:[#allocation85_spill] sm:$0xff]  ;;  %v10319_v35 = vsub.f32 %v22243_v55, %v20351_v37  ;;  %v10320_v50 = vsub.f32 %v22244_v21, %v20351_v37  ;;  %v22246_v49 = vld [vmem:[#allocation95_spill] sm:$0xff]  ;;  %v22247_v32 = vsub.f32 %v22224_v51, %v20351_v37 }
 0x72a   :  { %v10323_v30 = vsub.f32 %v22246_v49, %v20351_v37  ;;  %v22250_v21 = vsub.f32 %v22227_v28, %v20351_v37  ;;  %v22252_v49 = vsub.f32 %v19903_v9, %v20351_v37 }
 0x736   :  { %v14619_v57 = vpop.eup %14618 }
 0x737   :  { %v10275_v42 = vmul.f32 %v14619_v57, %v10272_v23  ;;  %v10315_v57 = vsub.f32 %v20177_v56, %v20351_v37  ;;  %v10318_v23 = vsub.f32 %v22240_v60, %v20351_v37  ;;  %v22245_v56 = vld [vmem:[#allocation47_spill] sm:$0xff] }
 0x738   :  { %v10321_v40 = vsub.f32 %v22245_v56, %v20351_v37  ;;  %v22251_v56 = vsub.f32 %v22228_v5, %v20351_v37 }
 0x739   :  { %v20480_v62 = vrot.slane %v10275_v42, %v22242_v45  ;;  %v22248_v42 = vsub.f32 %v22225_v22, %v20351_v37  ;;  %v22249_v45 = vsub.f32 %v22226_v7, %v20351_v37 }
 0x73b   :  { %v20494_v60 = vmul.f32 %v20480_v62, %v22247_v32  ;;  %v20500_v2 = vmul.f32 %v20480_v62, %v22248_v42  ;;  %v20506_v55 = vmul.f32 %v20480_v62, %v22249_v45  ;;  %v20512_v51 = vmul.f32 %v20480_v62, %v22250_v21 }
 0x73c   :  { %v20518_v22 = vmul.f32 %v20480_v62, %v22251_v56  ;;  %v20524_v7 = vmul.f32 %v20480_v62, %v22252_v49  ;;  %v22253_v32 = vsub.f32 %v19923_v46, %v20351_v37  ;;  %v22254_v42 = vsub.f32 %v22229_v53, %v20351_v37 }
 0x73d   :  { %v22255_v45 = vsub.f32 %v22230_v18, %v20351_v37  ;;  %v22256_v21 = vsub.f32 %v19935_v44, %v20351_v37  ;;  %v22257_v56 = vsub.f32 %v19955_v31, %v20351_v37  ;;  %v22258_v49 = vsub.f32 %v19953_v58, %v20351_v37 }
 0x73e   :  { %v20530_v28 = vmul.f32 %v20480_v62, %v22253_v32  ;;  %v20536_v5 = vmul.f32 %v20480_v62, %v22254_v42  ;;  %v22259_v32 = vsub.f32 %v22231_v26, %v20351_v37  ;;  %v22260_v42 = vsub.f32 %v19967_v16, %v20351_v37 }
 0x73f   :  { %v20542_v9 = vmul.f32 %v20480_v62, %v22255_v45  ;;  %v20548_v46 = vmul.f32 %v20480_v62, %v22256_v21  ;;  %v20554_v53 = vmul.f32 %v20480_v62, %v22257_v56  ;;  %v20560_v18 = vmul.f32 %v20480_v62, %v22258_v49 }
 0x740   :  { %v20566_v44 = vmul.f32 %v20480_v62, %v22259_v32  ;;  %v20572_v31 = vmul.f32 %v20480_v62, %v22260_v42  ;;  %v22261_v45 = vsub.f32 %v19987_v61, %v20351_v37  ;;  %v22262_v21 = vsub.f32 %v19985_v14, %v20351_v37 }
 0x741   :  { %v22263_v56 = vsub.f32 %v20003_v0, %v20351_v37  ;;  %v22264_v49 = vsub.f32 %v19999_v41, %v20351_v37  ;;  %v22265_v32 = vsub.f32 %v20019_v19, %v20351_v37  ;;  %v22266_v42 = vsub.f32 %v20017_v54, %v20351_v37 }
 0x742   :  { %v20578_v58 = vmul.f32 %v20480_v62, %v22261_v45  ;;  %v20584_v26 = vmul.f32 %v20480_v62, %v22262_v21  ;;  %v22267_v45 = vsub.f32 %v20035_v25, %v20351_v37  ;;  %v22268_v21 = vsub.f32 %v20031_v59, %v20351_v37 }
 0x743   :  { %v20590_v16 = vmul.f32 %v20480_v62, %v22263_v56  ;;  %v20596_v61 = vmul.f32 %v20480_v62, %v22264_v49  ;;  %v20602_v14 = vmul.f32 %v20480_v62, %v22265_v32  ;;  %v20608_v0 = vmul.f32 %v20480_v62, %v22266_v42 }
 0x744   :  { %v20614_v41 = vmul.f32 %v20480_v62, %v22267_v45  ;;  %v20620_v19 = vmul.f32 %v20480_v62, %v22268_v21  ;;  %v20623_v56 = vmul.f32 %v20480_v62, %v10298_v47  ;;  %v20626_v54 = vmul.f32 %v20480_v62, %v10299_v20 }
 0x745   :  { %v20629_v49 = vmul.f32 %v20480_v62, %v10300_v38  ;;  %v20632_v25 = vmul.f32 %v20480_v62, %v10301_v34  ;;  %v20635_v32 = vmul.f32 %v20480_v62, %v10302_v4  ;;  %v20638_v59 = vmul.f32 %v20480_v62, %v10303_v10 }
 0x746   :  { %v20641_v42 = vmul.f32 %v20480_v62, %v10304_v29  ;;  %v20644_v47 = vmul.f32 %v20480_v62, %v10305_v11  ;;  %v20647_v20 = vmul.f32 %v20480_v62, %v10306_v24  ;;  %v20650_v38 = vmul.f32 %v20480_v62, %v10307_v1 }
 0x747   :  { %v20653_v34 = vmul.f32 %v20480_v62, %v10308_v13  ;;  %v20656_v4 = vmul.f32 %v20480_v62, %v10309_v3  ;;  %v20659_v10 = vmul.f32 %v20480_v62, %v10310_v48  ;;  %v20662_v29 = vmul.f32 %v20480_v62, %v10311_v15 }
 0x748   :  { %v20665_v11 = vmul.f32 %v20480_v62, %v10312_v43  ;;  %v20668_v24 = vmul.f32 %v20480_v62, %v10313_v8  ;;  %v20671_v1 = vmul.f32 %v20480_v62, %v10314_v27  ;;  %v20674_v13 = vmul.f32 %v20480_v62, %v10315_v57 }
 0x749   :  { %v20677_v3 = vmul.f32 %v20480_v62, %v10316_v63  ;;  %v20680_v48 = vmul.f32 %v20480_v62, %v10317_v36  ;;  %v20683_v15 = vmul.f32 %v20480_v62, %v10318_v23  ;;  %v20686_v43 = vmul.f32 %v20480_v62, %v10319_v35 }
 0x74a   :  { %v20689_v8 = vmul.f32 %v20480_v62, %v10320_v50  ;;  %v20692_v27 = vmul.f32 %v20480_v62, %v10321_v40  ;;  %v22269_v57 = vsub.f32 %v20239_v17, %v20351_v37  ;;  %v20701_v36 = vmul.f32 %v20480_v62, %v10323_v30 }
 0x74b   :  { %v22270_v23 = vsub.f32 %v20253_v52, %v20351_v37  ;;  %v22271_v50 = vsub.f32 %v20249_v33, %v20351_v37  ;;  %v22272_v17 = vsub.f32 %v20267_v12, %v20351_v37  ;;  %v22274_v30 = vsub.f32 %v20265_v6, %v20351_v37 }
 0x74c   :  { %v20698_v63 = vmul.f32 %v20480_v62, %v22269_v57  ;;  %v22276_v21 = vsub.f32 %v20281_v39, %v20351_v37  ;;  %v22278_v57 = vld [vmem:[#allocation94_spill] sm:$0xff] }
 0x74d   :  { %v20707_v35 = vmul.f32 %v20480_v62, %v22270_v23  ;;  %v20713_v40 = vmul.f32 %v20480_v62, %v22271_v50  ;;  %v20719_v45 = vmul.f32 %v20480_v62, %v22272_v17  ;;  %v20725_v52 = vmul.f32 %v20480_v62, %v22274_v30  ;;  %v22281_v50 = vld [vmem:[#allocation21_spill] sm:$0xff]  ;;  %v22284_v30 = vld [vmem:[#allocation96_spill] sm:$0xff] }
 0x74e   :  { %v20731_v33 = vmul.f32 %v20480_v62, %v22276_v21  ;;  %v22279_v23 = vsub.f32 %v22278_v57, %v20351_v37  ;;  %v22282_v17 = vsub.f32 %v22281_v50, %v20351_v37  ;;  %v20754_v21 = vld [vmem:[%s21322_s6] ss:$0 sm:$0xff]  ;;  %v22287_v57 = vld [vmem:[#allocation49_spill] sm:$0xff]  ;;  %v22290_v50 = vld [vmem:[#allocation22_spill] sm:$0xff] }
 0x74f   :  { %22273 = vst [vmem:[#allocation52_spill] sm:$0xff] %v20719_v45  ;;  %22275 = vst [vmem:[#allocation26_spill] sm:$0xff] %v20725_v52  ;;  %v22285_v52 = vsub.f32 %v22284_v30, %v20351_v37  ;;  %v22293_v30 = vld [vmem:[#allocation51_spill] sm:$0xff] }
 0x750   :  { %22277 = vst [vmem:[#allocation28_spill] sm:$0xff] %v20731_v33  ;;  %v20737_v12 = vmul.f32 %v20480_v62, %v22279_v23  ;;  %v20743_v6 = vmul.f32 %v20480_v62, %v22282_v17  ;;  %v22288_v23 = vsub.f32 %v22287_v57, %v20351_v37  ;;  %v22291_v17 = vsub.f32 %v22290_v50, %v20351_v37  ;;  %v22296_v33 = vld [vmem:[#allocation23_spill] sm:$0xff] }
 0x751   :  { %v20749_v39 = vmul.f32 %v20480_v62, %v22285_v52  ;;  %v22294_v52 = vsub.f32 %v22293_v30, %v20351_v37  ;;  %v22297_v45 = vsub.f32 %v22296_v33, %v20351_v37 }
 0x752   :  { %22280 = vst [vmem:[#allocation55_spill] sm:$0xff] %v20737_v12  ;;  %22283 = vst [vmem:[#allocation54_spill] sm:$0xff] %v20743_v6  ;;  %v20760_v12 = vmul.f32 %v20480_v62, %v22288_v23  ;;  %v20766_v6 = vmul.f32 %v20480_v62, %v22291_v17  ;;  %v22299_v23 = vld [vmem:[#allocation25_spill] sm:$0xff]  ;;  %v22301_v17 = vld [vmem:[#allocation50_spill] sm:$0xff] }
 0x753   :  { %22286 = vst [vmem:[#allocation27_spill] sm:$0xff] %v20749_v39  ;;  %v20772_v39 = vmul.f32 %v20480_v62, %v22294_v52  ;;  %v20778_v57 = vmul.f32 %v20480_v62, %v22297_v45  ;;  %v22303_v52 = vld [vmem:[#allocation53_spill] sm:$0xff]  ;;  %v22305_v45 = vld [vmem:[#allocation24_spill] sm:$0xff] }
 0x754   :  { %22289 = vst [vmem:[#allocation30_spill] sm:$0xff] %v20760_v12  ;;  %22292 = vst [vmem:[#allocation57_spill] sm:$0xff] %v20766_v6  ;;  %v22300_v12 = vsub.f32 %v22299_v23, %v20351_v37  ;;  %v22302_v6 = vsub.f32 %v22301_v17, %v20351_v37  ;;  %v20814_v17 = vadd.f32 %v20754_v21, %v20506_v55 }
 0x755   :  { %22295 = vst [vmem:[#allocation56_spill] sm:$0xff] %v20772_v39  ;;  %22298 = vst [vmem:[#allocation29_spill] sm:$0xff] %v20778_v57  ;;  %v22304_v39 = vsub.f32 %v22303_v52, %v20351_v37  ;;  %v22306_v57 = vsub.f32 %v22305_v45, %v20351_v37  ;;  %v20822_v37 = vadd.f32 %v20754_v21, %v20518_v22 }
 0x756   :  { %v20784_v50 = vmul.f32 %v20480_v62, %v22300_v12  ;;  %v20790_v30 = vmul.f32 %v20480_v62, %v22302_v6  ;;  %v20806_v12 = vadd.f32 %v20754_v21, %v20494_v60  ;;  %v20810_v6 = vadd.f32 %v20754_v21, %v20500_v2 }
 0x757   :  { %v20796_v33 = vmul.f32 %v20480_v62, %v22304_v39  ;;  %v20802_v23 = vmul.f32 %v20480_v62, %v22306_v57  ;;  %v20818_v39 = vadd.f32 %v20754_v21, %v20512_v51  ;;  %v20826_v62 = vadd.f32 %v20754_v21, %v20524_v7  ;;  %v22311_v57 = vld [vmem:[#allocation26_spill] sm:$0xff]  ;;  %v22313_v52 = vld [vmem:[#allocation28_spill] sm:$0xff] }
 0x758   :  { %v20830_v60 = vadd.f32 %v20754_v21, %v20530_v28  ;;  %v20834_v2 = vadd.f32 %v20754_v21, %v20536_v5  ;;  %v20838_v55 = vadd.f32 %v20754_v21, %v20542_v9  ;;  %v20842_v51 = vadd.f32 %v20754_v21, %v20548_v46 }
 0x759   :  { %v20846_v22 = vadd.f32 %v20754_v21, %v20554_v53  ;;  %v20850_v7 = vadd.f32 %v20754_v21, %v20560_v18  ;;  %v20854_v28 = vadd.f32 %v20754_v21, %v20566_v44  ;;  %v20858_v5 = vadd.f32 %v20754_v21, %v20572_v31  ;;  %v22315_v45 = vld [vmem:[#allocation55_spill] sm:$0xff] }
 0x75a   :  { %v20862_v9 = vadd.f32 %v20754_v21, %v20578_v58  ;;  %v20866_v46 = vadd.f32 %v20754_v21, %v20584_v26  ;;  %v20870_v53 = vadd.f32 %v20754_v21, %v20590_v16  ;;  %v20874_v18 = vadd.f32 %v20754_v21, %v20596_v61 }
 0x75b   :  { %v20878_v44 = vadd.f32 %v20754_v21, %v20602_v14  ;;  %v20882_v31 = vadd.f32 %v20754_v21, %v20608_v0  ;;  %v20886_v58 = vadd.f32 %v20754_v21, %v20614_v41  ;;  %v20890_v26 = vadd.f32 %v20754_v21, %v20620_v19 }
 0x75c   :  { %v20894_v16 = vadd.f32 %v20754_v21, %v20623_v56  ;;  %v20898_v61 = vadd.f32 %v20754_v21, %v20626_v54  ;;  %v20902_v14 = vadd.f32 %v20754_v21, %v20629_v49  ;;  %v20906_v0 = vadd.f32 %v20754_v21, %v20632_v25 }
 0x75d   :  { %v20910_v41 = vadd.f32 %v20754_v21, %v20635_v32  ;;  %v20914_v19 = vadd.f32 %v20754_v21, %v20638_v59  ;;  %v20918_v56 = vadd.f32 %v20754_v21, %v20641_v42  ;;  %v20922_v54 = vadd.f32 %v20754_v21, %v20644_v47 }
 0x75e   :  { %v20926_v49 = vadd.f32 %v20754_v21, %v20647_v20  ;;  %v20930_v25 = vadd.f32 %v20754_v21, %v20650_v38  ;;  %v20934_v32 = vadd.f32 %v20754_v21, %v20653_v34  ;;  %v20938_v59 = vadd.f32 %v20754_v21, %v20656_v4 }
 0x75f   :  { %v20942_v42 = vadd.f32 %v20754_v21, %v20659_v10  ;;  %v20946_v47 = vadd.f32 %v20754_v21, %v20662_v29  ;;  %v20950_v20 = vadd.f32 %v20754_v21, %v20665_v11  ;;  %v20954_v38 = vadd.f32 %v20754_v21, %v20668_v24 }
 0x760   :  { %v20958_v34 = vadd.f32 %v20754_v21, %v20671_v1  ;;  %v20962_v4 = vadd.f32 %v20754_v21, %v20674_v13  ;;  %v20966_v10 = vadd.f32 %v20754_v21, %v20677_v3  ;;  %v20970_v29 = vadd.f32 %v20754_v21, %v20680_v48 }
 0x761   :  { %v20974_v11 = vadd.f32 %v20754_v21, %v20683_v15  ;;  %v20978_v24 = vadd.f32 %v20754_v21, %v20686_v43  ;;  %v20982_v1 = vadd.f32 %v20754_v21, %v20689_v8  ;;  %v20986_v13 = vadd.f32 %v20754_v21, %v20692_v27  ;;  %v22309_v8 = vld [vmem:[#allocation52_spill] sm:$0xff] }
 0x762   :  { %v20990_v3 = vadd.f32 %v20754_v21, %v20698_v63  ;;  %v20994_v48 = vadd.f32 %v20754_v21, %v20701_v36  ;;  %v20998_v15 = vadd.f32 %v20754_v21, %v20707_v35  ;;  %v21002_v43 = vadd.f32 %v20754_v21, %v20713_v40 }
 0x763   :  { %v21006_v27 = vadd.f32 %v20754_v21, %v22309_v8  ;;  %v21010_v63 = vadd.f32 %v20754_v21, %v22311_v57  ;;  %v21014_v36 = vadd.f32 %v20754_v21, %v22313_v52  ;;  %v21018_v35 = vadd.f32 %v20754_v21, %v22315_v45 }
 0x764   :  { %22307 = vst [vmem:[#allocation32_spill] sm:$0xff] %v20998_v15  ;;  %22308 = vst [vmem:[#allocation31_spill] sm:$0xff] %v21002_v43  ;;  %v22317_v15 = vld [vmem:[#allocation54_spill] sm:$0xff]  ;;  %v22318_v43 = vld [vmem:[#allocation27_spill] sm:$0xff] }
 0x765   :  { %22310 = vst [vmem:[#allocation60_spill] sm:$0xff] %v21006_v27  ;;  %22312 = vst [vmem:[#allocation58_spill] sm:$0xff] %v21010_v63  ;;  %v21022_v40 = vadd.f32 %v20754_v21, %v22317_v15  ;;  %v21026_v8 = vadd.f32 %v20754_v21, %v22318_v43  ;;  %v22319_v27 = vld [vmem:[#allocation30_spill] sm:$0xff]  ;;  %v22320_v63 = vld [vmem:[#allocation57_spill] sm:$0xff]  ;;  %v21046_v43 = vadd.f32 %v20754_v21, %v20784_v50  ;;  %v10484_v50 = vmax.f32 %v20818_v39, 0.0 }
 0x766   :  { %22314 = vst [vmem:[#allocation33_spill] sm:$0xff] %v21014_v36  ;;  %22316 = vst [vmem:[#allocation34_spill] sm:$0xff] %v21018_v35  ;;  %v21030_v57 = vadd.f32 %v20754_v21, %v22319_v27  ;;  %v21034_v52 = vadd.f32 %v20754_v21, %v22320_v63  ;;  %v22321_v36 = vld [vmem:[#allocation56_spill] sm:$0xff]  ;;  %v22323_v35 = vld [vmem:[#allocation29_spill] sm:$0xff]  ;;  %v21050_v27 = vadd.f32 %v20754_v21, %v20790_v30  ;;  %v10486_v30 = vmax.f32 %v20826_v62, 0.0 }
 0x767   :  { %v21038_v45 = vadd.f32 %v20754_v21, %v22321_v36  ;;  %v21042_v15 = vadd.f32 %v20754_v21, %v22323_v35  ;;  %22325 = vst [vmem:[#allocation59_spill] sm:$0xff] %v21046_v43  ;;  %v21054_v63 = vadd.f32 %v20754_v21, %v20796_v33  ;;  %v21058_v36 = vadd.f32 %v20754_v21, %v20802_v23 }
 0x768   :  { %22326 = vst [vmem:[#allocation66_spill] sm:$0xff] %v21050_v27  ;;  %v10482_v35 = vmax.f32 %v20810_v6, 0.0  ;;  %v10485_v43 = vmax.f32 %v20822_v37, 0.0  ;;  %v10487_v27 = vmax.f32 %v20830_v60, 0.0  ;;  %v10488_v33 = vmax.f32 %v20834_v2, 0.0  ;;  %10548 = vst [vmem:[%s21323_s7 + $0x18] sm:$0xff] %v10484_v50 }
 0x769   :  { %22322 = vst [vmem:[#allocation64_spill] sm:$0xff] %v21038_v45  ;;  %22324 = vst [vmem:[#allocation62_spill] sm:$0xff] %v21042_v15  ;;  %v10481_v45 = vmax.f32 %v20806_v12, 0.0  ;;  %v10483_v15 = vmax.f32 %v20814_v17, 0.0  ;;  %v10490_v21 = vmax.f32 %v20842_v51, 0.0  ;;  %v10491_v23 = vmax.f32 %v20846_v22, 0.0 }
 0x76a   :  { %22327 = vst [vmem:[#allocation35_spill] sm:$0xff] %v21054_v63  ;;  %v10489_v63 = vmax.f32 %v20838_v55, 0.0  ;;  %v10492_v12 = vmax.f32 %v20850_v7, 0.0  ;;  %10546 = vst [vmem:[%s21323_s7 + $0x8] sm:$0xff] %v10482_v35  ;;  %v10493_v6 = vmax.f32 %v20854_v28, 0.0  ;;  %v10494_v17 = vmax.f32 %v20858_v5, 0.0 }
 0x76b   :  { %10545 = vst [vmem:[%s21323_s7] sm:$0xff] %v10481_v45  ;;  %10547 = vst [vmem:[%s21323_s7 + $0x10] sm:$0xff] %v10483_v15  ;;  %v10495_v39 = vmax.f32 %v20862_v9, 0.0  ;;  %v10496_v37 = vmax.f32 %v20866_v46, 0.0  ;;  %v10497_v62 = vmax.f32 %v20870_v53, 0.0  ;;  %v10498_v60 = vmax.f32 %v20874_v18, 0.0 }
 0x76c   :  { %10549 = vst [vmem:[%s21323_s7 + $0x20] sm:$0xff] %v10485_v43  ;;  %10550 = vst [vmem:[%s21323_s7 + $0x28] sm:$0xff] %v10486_v30  ;;  %v10499_v2 = vmax.f32 %v20878_v44, 0.0  ;;  %v10500_v55 = vmax.f32 %v20882_v31, 0.0  ;;  %v10501_v51 = vmax.f32 %v20886_v58, 0.0  ;;  %v10502_v22 = vmax.f32 %v20890_v26, 0.0 }
 0x76d   :  { %10551 = vst [vmem:[%s21323_s7 + $0x30] sm:$0xff] %v10487_v27  ;;  %10552 = vst [vmem:[%s21323_s7 + $0x38] sm:$0xff] %v10488_v33  ;;  %v10503_v7 = vmax.f32 %v20894_v16, 0.0  ;;  %v10504_v28 = vmax.f32 %v20898_v61, 0.0  ;;  %v10505_v5 = vmax.f32 %v20902_v14, 0.0  ;;  %v10506_v9 = vmax.f32 %v20906_v0, 0.0 }
 0x76e   :  { %10553 = vst [vmem:[%s21323_s7 + $0x40] sm:$0xff] %v10489_v63  ;;  %10554 = vst [vmem:[%s21323_s7 + $0x48] sm:$0xff] %v10490_v21  ;;  %v10507_v46 = vmax.f32 %v20910_v41, 0.0  ;;  %v10508_v53 = vmax.f32 %v20914_v19, 0.0  ;;  %v10509_v18 = vmax.f32 %v20918_v56, 0.0  ;;  %v10510_v44 = vmax.f32 %v20922_v54, 0.0 }
 0x76f   :  { %10555 = vst [vmem:[%s21323_s7 + $0x50] sm:$0xff] %v10491_v23  ;;  %10556 = vst [vmem:[%s21323_s7 + $0x58] sm:$0xff] %v10492_v12  ;;  %v10511_v31 = vmax.f32 %v20926_v49, 0.0  ;;  %v10512_v58 = vmax.f32 %v20930_v25, 0.0  ;;  %v10513_v26 = vmax.f32 %v20934_v32, 0.0  ;;  %v10514_v16 = vmax.f32 %v20938_v59, 0.0 }
 0x770   :  { %10557 = vst [vmem:[%s21323_s7 + $0x60] sm:$0xff] %v10493_v6  ;;  %10558 = vst [vmem:[%s21323_s7 + $0x68] sm:$0xff] %v10494_v17  ;;  %v10515_v61 = vmax.f32 %v20942_v42, 0.0  ;;  %v10516_v14 = vmax.f32 %v20946_v47, 0.0  ;;  %v10517_v0 = vmax.f32 %v20950_v20, 0.0  ;;  %v10518_v41 = vmax.f32 %v20954_v38, 0.0 }
 0x771   :  { %10559 = vst [vmem:[%s21323_s7 + $0x70] sm:$0xff] %v10495_v39  ;;  %10560 = vst [vmem:[%s21323_s7 + $0x78] sm:$0xff] %v10496_v37  ;;  %v10519_v19 = vmax.f32 %v20958_v34, 0.0  ;;  %v10520_v56 = vmax.f32 %v20962_v4, 0.0  ;;  %v10521_v54 = vmax.f32 %v20966_v10, 0.0  ;;  %v10522_v49 = vmax.f32 %v20970_v29, 0.0 }
 0x772   :  { %10561 = vst [vmem:[%s21323_s7 + $0x80] sm:$0xff] %v10497_v62  ;;  %10562 = vst [vmem:[%s21323_s7 + $0x88] sm:$0xff] %v10498_v60  ;;  %v10523_v25 = vmax.f32 %v20974_v11, 0.0  ;;  %v10524_v32 = vmax.f32 %v20978_v24, 0.0  ;;  %v10525_v59 = vmax.f32 %v20982_v1, 0.0  ;;  %v10526_v42 = vmax.f32 %v20986_v13, 0.0 }
 0x773   :  { %10563 = vst [vmem:[%s21323_s7 + $0x90] sm:$0xff] %v10499_v2  ;;  %10564 = vst [vmem:[%s21323_s7 + $0x98] sm:$0xff] %v10500_v55  ;;  %v10527_v47 = vmax.f32 %v20990_v3, 0.0  ;;  %v10528_v20 = vmax.f32 %v20994_v48, 0.0  ;;  %v22328_v38 = vld [vmem:[#allocation32_spill] sm:$0xff]  ;;  %v22329_v4 = vld [vmem:[#allocation31_spill] sm:$0xff] }
 0x774   :  { %10565 = vst [vmem:[%s21323_s7 + $0xa0] sm:$0xff] %v10501_v51  ;;  %10566 = vst [vmem:[%s21323_s7 + $0xa8] sm:$0xff] %v10502_v22  ;;  %v10529_v34 = vmax.f32 %v22328_v38, 0.0  ;;  %v10530_v10 = vmax.f32 %v22329_v4, 0.0  ;;  %v22330_v29 = vld [vmem:[#allocation60_spill] sm:$0xff]  ;;  %v22331_v24 = vld [vmem:[#allocation58_spill] sm:$0xff] }
 0x775   :  { %10567 = vst [vmem:[%s21323_s7 + $0xb0] sm:$0xff] %v10503_v7  ;;  %10568 = vst [vmem:[%s21323_s7 + $0xb8] sm:$0xff] %v10504_v28  ;;  %v10531_v11 = vmax.f32 %v22330_v29, 0.0  ;;  %v10532_v1 = vmax.f32 %v22331_v24, 0.0  ;;  %v22332_v13 = vld [vmem:[#allocation33_spill] sm:$0xff]  ;;  %v22333_v48 = vld [vmem:[#allocation34_spill] sm:$0xff] }
 0x776   :  { %10569 = vst [vmem:[%s21323_s7 + $0xc0] sm:$0xff] %v10505_v5  ;;  %10570 = vst [vmem:[%s21323_s7 + $0xc8] sm:$0xff] %v10506_v9  ;;  %v10533_v3 = vmax.f32 %v22332_v13, 0.0  ;;  %v10534_v45 = vmax.f32 %v22333_v48, 0.0  ;;  %v10535_v15 = vmax.f32 %v21022_v40, 0.0  ;;  %v10536_v43 = vmax.f32 %v21026_v8, 0.0 }
 0x777   :  { %10571 = vst [vmem:[%s21323_s7 + $0xd0] sm:$0xff] %v10507_v46  ;;  %10572 = vst [vmem:[%s21323_s7 + $0xd8] sm:$0xff] %v10508_v53  ;;  %v10537_v40 = vmax.f32 %v21030_v57, 0.0  ;;  %v10538_v8 = vmax.f32 %v21034_v52, 0.0  ;;  %v22334_v27 = vld [vmem:[#allocation64_spill] sm:$0xff]  ;;  %v22335_v35 = vld [vmem:[#allocation62_spill] sm:$0xff] }
 0x778   :  { %10573 = vst [vmem:[%s21323_s7 + $0xe0] sm:$0xff] %v10509_v18  ;;  %10574 = vst [vmem:[%s21323_s7 + $0xe8] sm:$0xff] %v10510_v44  ;;  %v10539_v63 = vmax.f32 %v22334_v27, 0.0  ;;  %v10540_v50 = vmax.f32 %v22335_v35, 0.0  ;;  %v22336_v57 = vld [vmem:[#allocation59_spill] sm:$0xff]  ;;  %v22337_v30 = vld [vmem:[#allocation66_spill] sm:$0xff] }
 0x779   :  { %10575 = vst [vmem:[%s21323_s7 + $0xf0] sm:$0xff] %v10511_v31  ;;  %10576 = vst [vmem:[%s21323_s7 + $0xf8] sm:$0xff] %v10512_v58  ;;  %v10541_v52 = vmax.f32 %v22336_v57, 0.0  ;;  %v10542_v33 = vmax.f32 %v22337_v30, 0.0  ;;  %v22338_v21 = vld [vmem:[#allocation35_spill] sm:$0xff]  ;;  %v10544_v12 = vmax.f32 %v21058_v36, 0.0 }
 0x77a   :  { %10577 = vst [vmem:[%s21323_s7 + $0x100] sm:$0xff] %v10513_v26  ;;  %10578 = vst [vmem:[%s21323_s7 + $0x108] sm:$0xff] %v10514_v16  ;;  %v10543_v23 = vmax.f32 %v22338_v21, 0.0 }
 0x77b   :  { %10579 = vst [vmem:[%s21323_s7 + $0x110] sm:$0xff] %v10515_v61  ;;  %10580 = vst [vmem:[%s21323_s7 + $0x118] sm:$0xff] %v10516_v14 }
 0x77c   :  { %10581 = vst [vmem:[%s21323_s7 + $0x120] sm:$0xff] %v10517_v0  ;;  %10582 = vst [vmem:[%s21323_s7 + $0x128] sm:$0xff] %v10518_v41 }
 0x77d   :  { %10583 = vst [vmem:[%s21323_s7 + $0x130] sm:$0xff] %v10519_v19  ;;  %10584 = vst [vmem:[%s21323_s7 + $0x138] sm:$0xff] %v10520_v56 }
 0x77e   :  { %10585 = vst [vmem:[%s21323_s7 + $0x140] sm:$0xff] %v10521_v54  ;;  %10586 = vst [vmem:[%s21323_s7 + $0x148] sm:$0xff] %v10522_v49 }
 0x77f   :  { %10587 = vst [vmem:[%s21323_s7 + $0x150] sm:$0xff] %v10523_v25  ;;  %10588 = vst [vmem:[%s21323_s7 + $0x158] sm:$0xff] %v10524_v32 }
 0x780   :  { %10589 = vst [vmem:[%s21323_s7 + $0x160] sm:$0xff] %v10525_v59  ;;  %10590 = vst [vmem:[%s21323_s7 + $0x168] sm:$0xff] %v10526_v42 }
 0x781   :  { %10591 = vst [vmem:[%s21323_s7 + $0x170] sm:$0xff] %v10527_v47  ;;  %10592 = vst [vmem:[%s21323_s7 + $0x178] sm:$0xff] %v10528_v20 }
 0x782   :  { %10593 = vst [vmem:[%s21323_s7 + $0x180] sm:$0xff] %v10529_v34  ;;  %10594 = vst [vmem:[%s21323_s7 + $0x188] sm:$0xff] %v10530_v10 }
 0x783   :  { %10595 = vst [vmem:[%s21323_s7 + $0x190] sm:$0xff] %v10531_v11  ;;  %10596 = vst [vmem:[%s21323_s7 + $0x198] sm:$0xff] %v10532_v1 }
 0x784   :  { %10597 = vst [vmem:[%s21323_s7 + $0x1a0] sm:$0xff] %v10533_v3  ;;  %10598 = vst [vmem:[%s21323_s7 + $0x1a8] sm:$0xff] %v10534_v45 }
 0x785   :  { %10599 = vst [vmem:[%s21323_s7 + $0x1b0] sm:$0xff] %v10535_v15  ;;  %10600 = vst [vmem:[%s21323_s7 + $0x1b8] sm:$0xff] %v10536_v43 }
 0x786   :  { %10601 = vst [vmem:[%s21323_s7 + $0x1c0] sm:$0xff] %v10537_v40  ;;  %10602 = vst [vmem:[%s21323_s7 + $0x1c8] sm:$0xff] %v10538_v8 }
 0x787   :  { %10603 = vst [vmem:[%s21323_s7 + $0x1d0] sm:$0xff] %v10539_v63  ;;  %10604 = vst [vmem:[%s21323_s7 + $0x1d8] sm:$0xff] %v10540_v50 }
 0x788   :  { %10605 = vst [vmem:[%s21323_s7 + $0x1e0] sm:$0xff] %v10541_v52  ;;  %10606 = vst [vmem:[%s21323_s7 + $0x1e8] sm:$0xff] %v10542_v33 }
 0x789   :  { %10607 = vst [vmem:[%s21323_s7 + $0x1f0] sm:$0xff] %v10543_v23  ;;  %10608 = vst [vmem:[%s21323_s7 + $0x1f8] sm:$0xff] %v10544_v12 }

</bundles_post_ra>
